<compile_context>
chip_gen: v5e
topology: v5e:2x2
jax: 0.10.0
libtpu: 0.0.40
codegen_flags: <defaults>
</compile_context>

<pallas_src>
import functools

import jax
import jax.numpy as jnp
from jax.experimental import pallas as pl
from jax.experimental.pallas import tpu as pltpu


def _soft_trine(x):
    # torch.where(x >= 0, |x - 2*floor((x+1)/2)|, x / (1 + |x|))
    pos = jnp.abs(x - 2.0 * jnp.floor((x + 1.0) * 0.5))
    neg = x / (1.0 + jnp.abs(x))          # exact divide (EUP/VPU, not the bottleneck)
    return jnp.where(x >= 0.0, pos, neg)


def _resnet_st_kernel(x_ref, w1_ref, w_ref, b_ref, wout_ref, out_ref,
                      *, dim, m, chunk):
    """One grid step: (dim, tile_n) inputs -> (1, tile_n) outputs.

    x_ref    : (dim, tile_n)   feature-major batch tile (lane-dense)
    w1_ref   : (m, dim)        fc1 weight
    w_ref    : (5, m, m)       fc2..fc6 weights
    b_ref    : (6, m, chunk)   biases pre-broadcast to the lane-chunk width
    wout_ref : (m, 1)          outlayer weight (no bias)
    out_ref  : (1, tile_n)     lane-dense output slab
    """
    f32 = jnp.float32
    tile_n = out_ref.shape[-1]
    n_chunks = tile_n // chunk

    # Small hoisted loads (persist across the unrolled chunk loop: ~8 vregs).
    w1 = w1_ref[...]            # (m, dim)
    wout = wout_ref[...]        # (m, 1)

    # Fully-unrolled inner loop over independent 256-lane chunks: static
    # offsets (zero-cost ref views), full scheduler visibility, bounded vregs.
    for c in range(n_chunks):
        sl = slice(c * chunk, (c + 1) * chunk)
        xc = x_ref[:, sl]                                   # (dim, chunk)

        # fc1 (K = dim = 2) as VPU broadcast-FMAs.  The sublane-broadcast x
        # rows are reused to rebuild the zero-padded residual (x @ Ix).T
        # in-register (no padded slab ever touches HBM).
        row = jax.lax.broadcasted_iota(jnp.int32, (m, chunk), 0)
        y = b_ref[0]                                        # (m, chunk)
        xp = jnp.zeros((m, chunk), f32)
        for d in range(dim):
            xd = jnp.broadcast_to(xc[d:d + 1, :], (m, chunk))
            y = y + w1[:, d:d + 1] * xd
            xp = xp + jnp.where(row == d, xd, 0.0)
        y = _soft_trine(y)

        # block 1 tail: fc2 + residual (residual s == xp)
        y = _soft_trine(jnp.dot(w_ref[0], y, preferred_element_type=f32) + b_ref[1])
        y = y + xp
        s = y

        # block 2: fc3, fc4 + residual
        y = _soft_trine(jnp.dot(w_ref[1], y, preferred_element_type=f32) + b_ref[2])
        y = _soft_trine(jnp.dot(w_ref[2], y, preferred_element_type=f32) + b_ref[3])
        y = y + s
        s = y

        # block 3: fc5, fc6 + residual
        y = _soft_trine(jnp.dot(w_ref[3], y, preferred_element_type=f32) + b_ref[4])
        y = _soft_trine(jnp.dot(w_ref[4], y, preferred_element_type=f32) + b_ref[5])
        y = y + s

        # outlayer (m -> 1, no bias): VPU multiply + sublane reduce.
        # Lane-dense, 128-aligned, unmasked store.
        out_ref[:, sl] = jnp.sum(y * wout, axis=0, keepdims=True)


def pack_params(params, *, chunk=256):
    """One-time packing of the torch-layout params into stable kernel operands."""
    m = params["w2"].shape[0]
    w_stack = jnp.stack([params["w2"], params["w3"], params["w4"],
                         params["w5"], params["w6"]], axis=0)          # (5, m, m)
    b_stack = jnp.stack([params["b1"], params["b2"], params["b3"],
                         params["b4"], params["b5"], params["b6"]], axis=0)  # (6, m)
    # Pre-broadcast biases to the lane-chunk width (removes per-use
    # broadcast_in_dim emission inside the kernel; read from HBM once/call).
    b_bc = jnp.broadcast_to(b_stack[:, :, None], (6, m, chunk)).astype(jnp.float32)
    return {
        "w1": params["w1"].astype(jnp.float32),           # (m, dim)
        "w_stack": w_stack.astype(jnp.float32),           # (5, m, m)
        "b_bc": b_bc,                                     # (6, m, chunk)
        "wout": params["wout"].reshape(m, 1).astype(jnp.float32),  # (m, 1)
    }


@functools.partial(jax.jit, static_argnames=("tile_n", "chunk"))
def resnet_st_forward(x, packed, *, tile_n=1024, chunk=256):
    """Pallas forward pass of ResNet_ST (boundary_control_type='none')."""
    n, dim = x.shape
    m = packed["w_stack"].shape[1]
    assert tile_n % chunk == 0 and chunk % 128 == 0
    assert packed["b_bc"].shape[-1] == chunk

    # Tile selection: biggest tile that still leaves >= 1 grid step per chunk
    # multiple; at the demo size (n=2048, tile=1024) the grid has 2 "parallel"
    # steps so both v7x TensorCores are used.
    n_blk = pl.cdiv(n, chunk) * chunk
    tile = min(tile_n, n_blk)
    n_pad = pl.cdiv(n_blk, tile) * tile

    # Only x.T goes to the kernel (dim rows, not m): ~16x less input traffic
    # than the old zero-padded (m, n_pad) slab.
    xt = jnp.zeros((dim, n_pad), jnp.float32).at[:, :n].set(x.T)

    grid = (n_pad // tile,)
    out = pl.pallas_call(
        functools.partial(_resnet_st_kernel, dim=dim, m=m, chunk=chunk),
        out_shape=jax.ShapeDtypeStruct((1, n_pad), jnp.float32),
        grid_spec=pltpu.PrefetchScalarGridSpec(
            num_scalar_prefetch=0,
            grid=grid,
            in_specs=[
                pl.BlockSpec((dim, tile), lambda i: (0, i)),       # x.T tile
                pl.BlockSpec((m, dim), lambda i: (0, 0)),          # fc1 weight
                pl.BlockSpec((5, m, m), lambda i: (0, 0, 0)),      # fc2..fc6 weights
                pl.BlockSpec((6, m, chunk), lambda i: (0, 0, 0)),  # biases (pre-bcast)
                pl.BlockSpec((m, 1), lambda i: (0, 0)),            # outlayer weight
            ],
            out_specs=pl.BlockSpec((1, tile), lambda i: (0, i)),
        ),
        compiler_params=pltpu.CompilerParams(
            dimension_semantics=("parallel",)),
    )(xt, packed["w1"], packed["w_stack"], packed["b_bc"], packed["wout"])
    return out[0, :n]  # y.squeeze(1)


def init_params(key, dim, m):
    """Deterministic init mirroring torch.nn.Linear defaults (U(-1/sqrt(fan_in), +))."""
    keys = jax.random.split(key, 13)

    def linear(kw, kb, fan_in, fan_out):
        bound = 1.0 / float(fan_in) ** 0.5
        w = jax.random.uniform(kw, (fan_out, fan_in), jnp.float32, -bound, bound)
        b = jax.random.uniform(kb, (fan_out,), jnp.float32, -bound, bound)
        return w, b

    p = {}
    p["w1"], p["b1"] = linear(keys[0], keys[1], dim, m)
    p["w2"], p["b2"] = linear(keys[2], keys[3], m, m)
    p["w3"], p["b3"] = linear(keys[4], keys[5], m, m)
    p["w4"], p["b4"] = linear(keys[6], keys[7], m, m)
    p["w5"], p["b5"] = linear(keys[8], keys[9], m, m)
    p["w6"], p["b6"] = linear(keys[10], keys[11], m, m)
    bound = 1.0 / float(m) ** 0.5
    p["wout"] = jax.random.uniform(keys[12], (1, m), jnp.float32, -bound, bound)
    return p


def _soft_trine_ref(x):
    return jnp.where(
        x >= 0.0,
        jnp.abs(x - 2.0 * jnp.floor((x + 1.0) / 2.0)),
        x / (1.0 + jnp.abs(x)),
    )


def _reference_forward(x, params, m):
    """Pure-JAX reference of the torch module ('none' branch), batch-major."""
    n, dim = x.shape
    ix = jnp.zeros((dim, m), jnp.float32).at[
        jnp.arange(dim), jnp.arange(dim)].set(1.0)

    def lin(v, w, b):
        return v @ w.T + b

    s = x @ ix
    y = _soft_trine_ref(lin(x, params["w1"], params["b1"]))
    y = _soft_trine_ref(lin(y, params["w2"], params["b2"]))
    y = y + s
    s = y
    y = _soft_trine_ref(lin(y, params["w3"], params["b3"]))
    y = _soft_trine_ref(lin(y, params["w4"], params["b4"]))
    y = y + s
    s = y
    y = _soft_trine_ref(lin(y, params["w5"], params["b5"]))
    y = _soft_trine_ref(lin(y, params["w6"], params["b6"]))
    y = y + s
    return (y @ params["wout"].T)[:, 0]


if __name__ == "__main__":
    dim = 2        # input dimension of ResNet_ST
    m = 32         # hidden width
    n = 2048       # batch of sample points (2 grid steps of 1024 -> both v7x TCs)
    tile_n = 1024  # lane-dense batch tile
    chunk = 256    # inner lane-chunk (bounds vreg pressure per unrolled step)

    key = jax.random.PRNGKey(0)
    k_params, k_x = jax.random.split(key)
    params = init_params(k_params, dim, m)
    x = jax.random.uniform(k_x, (n, dim), jnp.float32, -1.0, 1.0)

    packed = pack_params(params, chunk=chunk)       # one-time packing (hoisted)
    y = resnet_st_forward(x, packed, tile_n=tile_n, chunk=chunk)
    y = jax.block_until_ready(y)

    y_ref = _reference_forward(x, params, m)
    assert y.shape == (n,)
    # Remaining discrepancy vs. the XLA reference is matmul-precision related
    # (default-precision f32 dots on the reference path), not the nonlinearity.
    assert jnp.allclose(y, y_ref, atol=2e-3, rtol=2e-3), (
        f"mismatch vs JAX reference, max abs err {jnp.max(jnp.abs(y - y_ref))}")

    print("KERNEL_OK")
</pallas_src>

<mosaic_0001>
module attributes {stable_mosaic.version = 11 : i64} {
  func.func @_resnet_st_kernel(%arg0: i32, %arg1: memref<2x1024xf32, #tpu.memory_space<vmem>>, %arg2: memref<32x2xf32, #tpu.memory_space<vmem>>, %arg3: memref<5x32x32xf32, #tpu.memory_space<vmem>>, %arg4: memref<6x32x256xf32, #tpu.memory_space<vmem>>, %arg5: memref<32x1xf32, #tpu.memory_space<vmem>>, %arg6: memref<1x1024xf32, #tpu.memory_space<vmem>>) attributes {dimension_semantics = [#tpu.dimension_semantics<parallel>], iteration_bounds = array<i64: 2>, scalar_prefetch = 0 : i64, scratch_operands = 0 : i64, tpu.core_type = #tpu.core_type<tc>, window_params = [{transform_indices = @transform_0, window_bounds = array<i64: 2, 1024>}, {pipeline_mode = #tpu.pipeline_mode<synchronous>, transform_indices = @transform_1, window_bounds = array<i64: 32, 2>}, {pipeline_mode = #tpu.pipeline_mode<synchronous>, transform_indices = @transform_2, window_bounds = array<i64: 5, 32, 32>}, {pipeline_mode = #tpu.pipeline_mode<synchronous>, transform_indices = @transform_3, window_bounds = array<i64: 6, 32, 256>}, {pipeline_mode = #tpu.pipeline_mode<synchronous>, transform_indices = @transform_4, window_bounds = array<i64: 32, 1>}, {transform_indices = @transform_5, window_bounds = array<i64: 1, 1024>}]} {
    %c0 = arith.constant 0 : index
    %c0_0 = arith.constant 0 : index
    %0 = vector.load %arg2[%c0, %c0_0] : memref<32x2xf32, #tpu.memory_space<vmem>>, vector<32x2xf32>
    %c0_1 = arith.constant 0 : index
    %c0_2 = arith.constant 0 : index
    %1 = vector.load %arg5[%c0_1, %c0_2] : memref<32x1xf32, #tpu.memory_space<vmem>>, vector<32x1xf32>
    %c0_3 = arith.constant 0 : index
    %c0_4 = arith.constant 0 : index
    %2 = vector.load %arg1[%c0_3, %c0_4] : memref<2x1024xf32, #tpu.memory_space<vmem>>, vector<2x256xf32>
    %3 = tpu.iota {dimensions = array<i32: 0>} : vector<32x256xi32>
    %c0_5 = arith.constant 0 : index
    %c0_6 = arith.constant 0 : index
    %c0_7 = arith.constant 0 : index
    %4 = vector.load %arg4[%c0_5, %c0_6, %c0_7] : memref<6x32x256xf32, #tpu.memory_space<vmem>>, vector<1x32x256xf32>
    %5 = vector.shape_cast %4 : vector<1x32x256xf32> to vector<32x256xf32>
    %cst = arith.constant 0.000000e+00 : f32
    %6 = vector.broadcast %cst : f32 to vector<32x256xf32>
    %7 = vector.extract_strided_slice %2 {offsets = [0, 0], sizes = [1, 256], strides = [1, 1]} : vector<2x256xf32> to vector<1x256xf32>
    %8 = vector.shape_cast %7 : vector<1x256xf32> to vector<1x256xf32>
    %9 = vector.broadcast %8 : vector<1x256xf32> to vector<32x256xf32>
    %10 = vector.extract_strided_slice %0 {offsets = [0, 0], sizes = [32, 1], strides = [1, 1]} : vector<32x2xf32> to vector<32x1xf32>
    %11 = vector.broadcast %10 : vector<32x1xf32> to vector<32x256xf32>
    %12 = arith.mulf %11, %9 : vector<32x256xf32>
    %13 = arith.addf %5, %12 : vector<32x256xf32>
    %c0_i32 = arith.constant 0 : i32
    %14 = vector.broadcast %c0_i32 : i32 to vector<32x256xi32>
    %15 = arith.cmpi eq, %3, %14 : vector<32x256xi32>
    %cst_8 = arith.constant 0.000000e+00 : f32
    %16 = vector.broadcast %cst_8 : f32 to vector<32x256xf32>
    %17 = arith.select %15, %9, %16 : vector<32x256xi1>, vector<32x256xf32>
    %18 = arith.addf %6, %17 : vector<32x256xf32>
    %19 = vector.extract_strided_slice %2 {offsets = [1, 0], sizes = [1, 256], strides = [1, 1]} : vector<2x256xf32> to vector<1x256xf32>
    %20 = vector.shape_cast %19 : vector<1x256xf32> to vector<1x256xf32>
    %21 = vector.broadcast %20 : vector<1x256xf32> to vector<32x256xf32>
    %22 = vector.extract_strided_slice %0 {offsets = [0, 1], sizes = [32, 1], strides = [1, 1]} : vector<32x2xf32> to vector<32x1xf32>
    %23 = vector.broadcast %22 : vector<32x1xf32> to vector<32x256xf32>
    %24 = arith.mulf %23, %21 : vector<32x256xf32>
    %25 = arith.addf %13, %24 : vector<32x256xf32>
    %c1_i32 = arith.constant 1 : i32
    %26 = vector.broadcast %c1_i32 : i32 to vector<32x256xi32>
    %27 = arith.cmpi eq, %3, %26 : vector<32x256xi32>
    %cst_9 = arith.constant 0.000000e+00 : f32
    %28 = vector.broadcast %cst_9 : f32 to vector<32x256xf32>
    %29 = arith.select %27, %21, %28 : vector<32x256xi1>, vector<32x256xf32>
    %30 = arith.addf %18, %29 : vector<32x256xf32>
    %cst_10 = arith.constant 1.000000e+00 : f32
    %31 = vector.broadcast %cst_10 : f32 to vector<32x256xf32>
    %32 = arith.addf %25, %31 : vector<32x256xf32>
    %cst_11 = arith.constant 5.000000e-01 : f32
    %33 = vector.broadcast %cst_11 : f32 to vector<32x256xf32>
    %34 = arith.mulf %32, %33 : vector<32x256xf32>
    %35 = math.floor %34 : vector<32x256xf32>
    %cst_12 = arith.constant 2.000000e+00 : f32
    %36 = vector.broadcast %cst_12 : f32 to vector<32x256xf32>
    %37 = arith.mulf %36, %35 : vector<32x256xf32>
    %38 = arith.subf %25, %37 : vector<32x256xf32>
    %39 = math.absf %38 : vector<32x256xf32>
    %40 = math.absf %25 : vector<32x256xf32>
    %cst_13 = arith.constant 1.000000e+00 : f32
    %41 = vector.broadcast %cst_13 : f32 to vector<32x256xf32>
    %42 = arith.addf %41, %40 : vector<32x256xf32>
    %43 = arith.divf %25, %42 : vector<32x256xf32>
    %cst_14 = arith.constant 0.000000e+00 : f32
    %44 = vector.broadcast %cst_14 : f32 to vector<32x256xf32>
    %45 = arith.cmpf oge, %25, %44 : vector<32x256xf32>
    %46 = arith.select %45, %39, %43 : vector<32x256xi1>, vector<32x256xf32>
    %c0_15 = arith.constant 0 : index
    %c0_16 = arith.constant 0 : index
    %c0_17 = arith.constant 0 : index
    %47 = vector.load %arg3[%c0_15, %c0_16, %c0_17] : memref<5x32x32xf32, #tpu.memory_space<vmem>>, vector<1x32x32xf32>
    %48 = vector.shape_cast %47 : vector<1x32x32xf32> to vector<32x32xf32>
    %cst_18 = arith.constant dense<0.000000e+00> : vector<32x256xf32>
    %49 = tpu.matmul %48, %46, %cst_18 {dimension_numbers = #tpu.dot_dimension_numbers<[1], [0], [0], [1], [0, 0, 1, 1], [], []>} : vector<32x32xf32>, vector<32x256xf32>, vector<32x256xf32> -> vector<32x256xf32>
    %c1 = arith.constant 1 : index
    %c0_19 = arith.constant 0 : index
    %c0_20 = arith.constant 0 : index
    %50 = vector.load %arg4[%c1, %c0_19, %c0_20] : memref<6x32x256xf32, #tpu.memory_space<vmem>>, vector<1x32x256xf32>
    %51 = vector.shape_cast %50 : vector<1x32x256xf32> to vector<32x256xf32>
    %52 = arith.addf %49, %51 : vector<32x256xf32>
    %cst_21 = arith.constant 1.000000e+00 : f32
    %53 = vector.broadcast %cst_21 : f32 to vector<32x256xf32>
    %54 = arith.addf %52, %53 : vector<32x256xf32>
    %cst_22 = arith.constant 5.000000e-01 : f32
    %55 = vector.broadcast %cst_22 : f32 to vector<32x256xf32>
    %56 = arith.mulf %54, %55 : vector<32x256xf32>
    %57 = math.floor %56 : vector<32x256xf32>
    %cst_23 = arith.constant 2.000000e+00 : f32
    %58 = vector.broadcast %cst_23 : f32 to vector<32x256xf32>
    %59 = arith.mulf %58, %57 : vector<32x256xf32>
    %60 = arith.subf %52, %59 : vector<32x256xf32>
    %61 = math.absf %60 : vector<32x256xf32>
    %62 = math.absf %52 : vector<32x256xf32>
    %cst_24 = arith.constant 1.000000e+00 : f32
    %63 = vector.broadcast %cst_24 : f32 to vector<32x256xf32>
    %64 = arith.addf %63, %62 : vector<32x256xf32>
    %65 = arith.divf %52, %64 : vector<32x256xf32>
    %cst_25 = arith.constant 0.000000e+00 : f32
    %66 = vector.broadcast %cst_25 : f32 to vector<32x256xf32>
    %67 = arith.cmpf oge, %52, %66 : vector<32x256xf32>
    %68 = arith.select %67, %61, %65 : vector<32x256xi1>, vector<32x256xf32>
    %69 = arith.addf %68, %30 : vector<32x256xf32>
    %c1_26 = arith.constant 1 : index
    %c0_27 = arith.constant 0 : index
    %c0_28 = arith.constant 0 : index
    %70 = vector.load %arg3[%c1_26, %c0_27, %c0_28] : memref<5x32x32xf32, #tpu.memory_space<vmem>>, vector<1x32x32xf32>
    %71 = vector.shape_cast %70 : vector<1x32x32xf32> to vector<32x32xf32>
    %cst_29 = arith.constant dense<0.000000e+00> : vector<32x256xf32>
    %72 = tpu.matmul %71, %69, %cst_29 {dimension_numbers = #tpu.dot_dimension_numbers<[1], [0], [0], [1], [0, 0, 1, 1], [], []>} : vector<32x32xf32>, vector<32x256xf32>, vector<32x256xf32> -> vector<32x256xf32>
    %c2 = arith.constant 2 : index
    %c0_30 = arith.constant 0 : index
    %c0_31 = arith.constant 0 : index
    %73 = vector.load %arg4[%c2, %c0_30, %c0_31] : memref<6x32x256xf32, #tpu.memory_space<vmem>>, vector<1x32x256xf32>
    %74 = vector.shape_cast %73 : vector<1x32x256xf32> to vector<32x256xf32>
    %75 = arith.addf %72, %74 : vector<32x256xf32>
    %cst_32 = arith.constant 1.000000e+00 : f32
    %76 = vector.broadcast %cst_32 : f32 to vector<32x256xf32>
    %77 = arith.addf %75, %76 : vector<32x256xf32>
    %cst_33 = arith.constant 5.000000e-01 : f32
    %78 = vector.broadcast %cst_33 : f32 to vector<32x256xf32>
    %79 = arith.mulf %77, %78 : vector<32x256xf32>
    %80 = math.floor %79 : vector<32x256xf32>
    %cst_34 = arith.constant 2.000000e+00 : f32
    %81 = vector.broadcast %cst_34 : f32 to vector<32x256xf32>
    %82 = arith.mulf %81, %80 : vector<32x256xf32>
    %83 = arith.subf %75, %82 : vector<32x256xf32>
    %84 = math.absf %83 : vector<32x256xf32>
    %85 = math.absf %75 : vector<32x256xf32>
    %cst_35 = arith.constant 1.000000e+00 : f32
    %86 = vector.broadcast %cst_35 : f32 to vector<32x256xf32>
    %87 = arith.addf %86, %85 : vector<32x256xf32>
    %88 = arith.divf %75, %87 : vector<32x256xf32>
    %cst_36 = arith.constant 0.000000e+00 : f32
    %89 = vector.broadcast %cst_36 : f32 to vector<32x256xf32>
    %90 = arith.cmpf oge, %75, %89 : vector<32x256xf32>
    %91 = arith.select %90, %84, %88 : vector<32x256xi1>, vector<32x256xf32>
    %c2_37 = arith.constant 2 : index
    %c0_38 = arith.constant 0 : index
    %c0_39 = arith.constant 0 : index
    %92 = vector.load %arg3[%c2_37, %c0_38, %c0_39] : memref<5x32x32xf32, #tpu.memory_space<vmem>>, vector<1x32x32xf32>
    %93 = vector.shape_cast %92 : vector<1x32x32xf32> to vector<32x32xf32>
    %cst_40 = arith.constant dense<0.000000e+00> : vector<32x256xf32>
    %94 = tpu.matmul %93, %91, %cst_40 {dimension_numbers = #tpu.dot_dimension_numbers<[1], [0], [0], [1], [0, 0, 1, 1], [], []>} : vector<32x32xf32>, vector<32x256xf32>, vector<32x256xf32> -> vector<32x256xf32>
    %c3 = arith.constant 3 : index
    %c0_41 = arith.constant 0 : index
    %c0_42 = arith.constant 0 : index
    %95 = vector.load %arg4[%c3, %c0_41, %c0_42] : memref<6x32x256xf32, #tpu.memory_space<vmem>>, vector<1x32x256xf32>
    %96 = vector.shape_cast %95 : vector<1x32x256xf32> to vector<32x256xf32>
    %97 = arith.addf %94, %96 : vector<32x256xf32>
    %cst_43 = arith.constant 1.000000e+00 : f32
    %98 = vector.broadcast %cst_43 : f32 to vector<32x256xf32>
    %99 = arith.addf %97, %98 : vector<32x256xf32>
    %cst_44 = arith.constant 5.000000e-01 : f32
    %100 = vector.broadcast %cst_44 : f32 to vector<32x256xf32>
    %101 = arith.mulf %99, %100 : vector<32x256xf32>
    %102 = math.floor %101 : vector<32x256xf32>
    %cst_45 = arith.constant 2.000000e+00 : f32
    %103 = vector.broadcast %cst_45 : f32 to vector<32x256xf32>
    %104 = arith.mulf %103, %102 : vector<32x256xf32>
    %105 = arith.subf %97, %104 : vector<32x256xf32>
    %106 = math.absf %105 : vector<32x256xf32>
    %107 = math.absf %97 : vector<32x256xf32>
    %cst_46 = arith.constant 1.000000e+00 : f32
    %108 = vector.broadcast %cst_46 : f32 to vector<32x256xf32>
    %109 = arith.addf %108, %107 : vector<32x256xf32>
    %110 = arith.divf %97, %109 : vector<32x256xf32>
    %cst_47 = arith.constant 0.000000e+00 : f32
    %111 = vector.broadcast %cst_47 : f32 to vector<32x256xf32>
    %112 = arith.cmpf oge, %97, %111 : vector<32x256xf32>
    %113 = arith.select %112, %106, %110 : vector<32x256xi1>, vector<32x256xf32>
    %114 = arith.addf %113, %69 : vector<32x256xf32>
    %c3_48 = arith.constant 3 : index
    %c0_49 = arith.constant 0 : index
    %c0_50 = arith.constant 0 : index
    %115 = vector.load %arg3[%c3_48, %c0_49, %c0_50] : memref<5x32x32xf32, #tpu.memory_space<vmem>>, vector<1x32x32xf32>
    %116 = vector.shape_cast %115 : vector<1x32x32xf32> to vector<32x32xf32>
    %cst_51 = arith.constant dense<0.000000e+00> : vector<32x256xf32>
    %117 = tpu.matmul %116, %114, %cst_51 {dimension_numbers = #tpu.dot_dimension_numbers<[1], [0], [0], [1], [0, 0, 1, 1], [], []>} : vector<32x32xf32>, vector<32x256xf32>, vector<32x256xf32> -> vector<32x256xf32>
    %c4 = arith.constant 4 : index
    %c0_52 = arith.constant 0 : index
    %c0_53 = arith.constant 0 : index
    %118 = vector.load %arg4[%c4, %c0_52, %c0_53] : memref<6x32x256xf32, #tpu.memory_space<vmem>>, vector<1x32x256xf32>
    %119 = vector.shape_cast %118 : vector<1x32x256xf32> to vector<32x256xf32>
    %120 = arith.addf %117, %119 : vector<32x256xf32>
    %cst_54 = arith.constant 1.000000e+00 : f32
    %121 = vector.broadcast %cst_54 : f32 to vector<32x256xf32>
    %122 = arith.addf %120, %121 : vector<32x256xf32>
    %cst_55 = arith.constant 5.000000e-01 : f32
    %123 = vector.broadcast %cst_55 : f32 to vector<32x256xf32>
    %124 = arith.mulf %122, %123 : vector<32x256xf32>
    %125 = math.floor %124 : vector<32x256xf32>
    %cst_56 = arith.constant 2.000000e+00 : f32
    %126 = vector.broadcast %cst_56 : f32 to vector<32x256xf32>
    %127 = arith.mulf %126, %125 : vector<32x256xf32>
    %128 = arith.subf %120, %127 : vector<32x256xf32>
    %129 = math.absf %128 : vector<32x256xf32>
    %130 = math.absf %120 : vector<32x256xf32>
    %cst_57 = arith.constant 1.000000e+00 : f32
    %131 = vector.broadcast %cst_57 : f32 to vector<32x256xf32>
    %132 = arith.addf %131, %130 : vector<32x256xf32>
    %133 = arith.divf %120, %132 : vector<32x256xf32>
    %cst_58 = arith.constant 0.000000e+00 : f32
    %134 = vector.broadcast %cst_58 : f32 to vector<32x256xf32>
    %135 = arith.cmpf oge, %120, %134 : vector<32x256xf32>
    %136 = arith.select %135, %129, %133 : vector<32x256xi1>, vector<32x256xf32>
    %c4_59 = arith.constant 4 : index
    %c0_60 = arith.constant 0 : index
    %c0_61 = arith.constant 0 : index
    %137 = vector.load %arg3[%c4_59, %c0_60, %c0_61] : memref<5x32x32xf32, #tpu.memory_space<vmem>>, vector<1x32x32xf32>
    %138 = vector.shape_cast %137 : vector<1x32x32xf32> to vector<32x32xf32>
    %cst_62 = arith.constant dense<0.000000e+00> : vector<32x256xf32>
    %139 = tpu.matmul %138, %136, %cst_62 {dimension_numbers = #tpu.dot_dimension_numbers<[1], [0], [0], [1], [0, 0, 1, 1], [], []>} : vector<32x32xf32>, vector<32x256xf32>, vector<32x256xf32> -> vector<32x256xf32>
    %c5 = arith.constant 5 : index
    %c0_63 = arith.constant 0 : index
    %c0_64 = arith.constant 0 : index
    %140 = vector.load %arg4[%c5, %c0_63, %c0_64] : memref<6x32x256xf32, #tpu.memory_space<vmem>>, vector<1x32x256xf32>
    %141 = vector.shape_cast %140 : vector<1x32x256xf32> to vector<32x256xf32>
    %142 = arith.addf %139, %141 : vector<32x256xf32>
    %cst_65 = arith.constant 1.000000e+00 : f32
    %143 = vector.broadcast %cst_65 : f32 to vector<32x256xf32>
    %144 = arith.addf %142, %143 : vector<32x256xf32>
    %cst_66 = arith.constant 5.000000e-01 : f32
    %145 = vector.broadcast %cst_66 : f32 to vector<32x256xf32>
    %146 = arith.mulf %144, %145 : vector<32x256xf32>
    %147 = math.floor %146 : vector<32x256xf32>
    %cst_67 = arith.constant 2.000000e+00 : f32
    %148 = vector.broadcast %cst_67 : f32 to vector<32x256xf32>
    %149 = arith.mulf %148, %147 : vector<32x256xf32>
    %150 = arith.subf %142, %149 : vector<32x256xf32>
    %151 = math.absf %150 : vector<32x256xf32>
    %152 = math.absf %142 : vector<32x256xf32>
    %cst_68 = arith.constant 1.000000e+00 : f32
    %153 = vector.broadcast %cst_68 : f32 to vector<32x256xf32>
    %154 = arith.addf %153, %152 : vector<32x256xf32>
    %155 = arith.divf %142, %154 : vector<32x256xf32>
    %cst_69 = arith.constant 0.000000e+00 : f32
    %156 = vector.broadcast %cst_69 : f32 to vector<32x256xf32>
    %157 = arith.cmpf oge, %142, %156 : vector<32x256xf32>
    %158 = arith.select %157, %151, %155 : vector<32x256xi1>, vector<32x256xf32>
    %159 = arith.addf %158, %114 : vector<32x256xf32>
    %160 = vector.broadcast %1 : vector<32x1xf32> to vector<32x256xf32>
    %161 = arith.mulf %159, %160 : vector<32x256xf32>
    %cst_70 = arith.constant dense<0.000000e+00> : vector<256xf32>
    %162 = vector.multi_reduction <add>, %161, %cst_70 [0] : vector<32x256xf32> to vector<256xf32>
    %163 = vector.shape_cast %162 : vector<256xf32> to vector<1x256xf32>
    %c0_71 = arith.constant 0 : index
    %c0_72 = arith.constant 0 : index
    %164 = vector.load %arg6[%c0_71, %c0_72] : memref<1x1024xf32, #tpu.memory_space<vmem>>, vector<1x256xf32>
    tpu.vector_store %arg6[%c0_71, %c0_72], %163 {strides = array<i32>} : memref<1x1024xf32, #tpu.memory_space<vmem>>, vector<1x256xf32>,
    %c0_73 = arith.constant 0 : index
    %c256 = arith.constant 256 : index
    %165 = vector.load %arg1[%c0_73, %c256] : memref<2x1024xf32, #tpu.memory_space<vmem>>, vector<2x256xf32>
    %166 = tpu.iota {dimensions = array<i32: 0>} : vector<32x256xi32>
    %c0_74 = arith.constant 0 : index
    %c0_75 = arith.constant 0 : index
    %c0_76 = arith.constant 0 : index
    %167 = vector.load %arg4[%c0_74, %c0_75, %c0_76] : memref<6x32x256xf32, #tpu.memory_space<vmem>>, vector<1x32x256xf32>
    %168 = vector.shape_cast %167 : vector<1x32x256xf32> to vector<32x256xf32>
    %cst_77 = arith.constant 0.000000e+00 : f32
    %169 = vector.broadcast %cst_77 : f32 to vector<32x256xf32>
    %170 = vector.extract_strided_slice %165 {offsets = [0, 0], sizes = [1, 256], strides = [1, 1]} : vector<2x256xf32> to vector<1x256xf32>
    %171 = vector.shape_cast %170 : vector<1x256xf32> to vector<1x256xf32>
    %172 = vector.broadcast %171 : vector<1x256xf32> to vector<32x256xf32>
    %173 = vector.extract_strided_slice %0 {offsets = [0, 0], sizes = [32, 1], strides = [1, 1]} : vector<32x2xf32> to vector<32x1xf32>
    %174 = vector.broadcast %173 : vector<32x1xf32> to vector<32x256xf32>
    %175 = arith.mulf %174, %172 : vector<32x256xf32>
    %176 = arith.addf %168, %175 : vector<32x256xf32>
    %c0_i32_78 = arith.constant 0 : i32
    %177 = vector.broadcast %c0_i32_78 : i32 to vector<32x256xi32>
    %178 = arith.cmpi eq, %166, %177 : vector<32x256xi32>
    %cst_79 = arith.constant 0.000000e+00 : f32
    %179 = vector.broadcast %cst_79 : f32 to vector<32x256xf32>
    %180 = arith.select %178, %172, %179 : vector<32x256xi1>, vector<32x256xf32>
    %181 = arith.addf %169, %180 : vector<32x256xf32>
    %182 = vector.extract_strided_slice %165 {offsets = [1, 0], sizes = [1, 256], strides = [1, 1]} : vector<2x256xf32> to vector<1x256xf32>
    %183 = vector.shape_cast %182 : vector<1x256xf32> to vector<1x256xf32>
    %184 = vector.broadcast %183 : vector<1x256xf32> to vector<32x256xf32>
    %185 = vector.extract_strided_slice %0 {offsets = [0, 1], sizes = [32, 1], strides = [1, 1]} : vector<32x2xf32> to vector<32x1xf32>
    %186 = vector.broadcast %185 : vector<32x1xf32> to vector<32x256xf32>
    %187 = arith.mulf %186, %184 : vector<32x256xf32>
    %188 = arith.addf %176, %187 : vector<32x256xf32>
    %c1_i32_80 = arith.constant 1 : i32
    %189 = vector.broadcast %c1_i32_80 : i32 to vector<32x256xi32>
    %190 = arith.cmpi eq, %166, %189 : vector<32x256xi32>
    %cst_81 = arith.constant 0.000000e+00 : f32
    %191 = vector.broadcast %cst_81 : f32 to vector<32x256xf32>
    %192 = arith.select %190, %184, %191 : vector<32x256xi1>, vector<32x256xf32>
    %193 = arith.addf %181, %192 : vector<32x256xf32>
    %cst_82 = arith.constant 1.000000e+00 : f32
    %194 = vector.broadcast %cst_82 : f32 to vector<32x256xf32>
    %195 = arith.addf %188, %194 : vector<32x256xf32>
    %cst_83 = arith.constant 5.000000e-01 : f32
    %196 = vector.broadcast %cst_83 : f32 to vector<32x256xf32>
    %197 = arith.mulf %195, %196 : vector<32x256xf32>
    %198 = math.floor %197 : vector<32x256xf32>
    %cst_84 = arith.constant 2.000000e+00 : f32
    %199 = vector.broadcast %cst_84 : f32 to vector<32x256xf32>
    %200 = arith.mulf %199, %198 : vector<32x256xf32>
    %201 = arith.subf %188, %200 : vector<32x256xf32>
    %202 = math.absf %201 : vector<32x256xf32>
    %203 = math.absf %188 : vector<32x256xf32>
    %cst_85 = arith.constant 1.000000e+00 : f32
    %204 = vector.broadcast %cst_85 : f32 to vector<32x256xf32>
    %205 = arith.addf %204, %203 : vector<32x256xf32>
    %206 = arith.divf %188, %205 : vector<32x256xf32>
    %cst_86 = arith.constant 0.000000e+00 : f32
    %207 = vector.broadcast %cst_86 : f32 to vector<32x256xf32>
    %208 = arith.cmpf oge, %188, %207 : vector<32x256xf32>
    %209 = arith.select %208, %202, %206 : vector<32x256xi1>, vector<32x256xf32>
    %c0_87 = arith.constant 0 : index
    %c0_88 = arith.constant 0 : index
    %c0_89 = arith.constant 0 : index
    %210 = vector.load %arg3[%c0_87, %c0_88, %c0_89] : memref<5x32x32xf32, #tpu.memory_space<vmem>>, vector<1x32x32xf32>
    %211 = vector.shape_cast %210 : vector<1x32x32xf32> to vector<32x32xf32>
    %cst_90 = arith.constant dense<0.000000e+00> : vector<32x256xf32>
    %212 = tpu.matmul %211, %209, %cst_90 {dimension_numbers = #tpu.dot_dimension_numbers<[1], [0], [0], [1], [0, 0, 1, 1], [], []>} : vector<32x32xf32>, vector<32x256xf32>, vector<32x256xf32> -> vector<32x256xf32>
    %c1_91 = arith.constant 1 : index
    %c0_92 = arith.constant 0 : index
    %c0_93 = arith.constant 0 : index
    %213 = vector.load %arg4[%c1_91, %c0_92, %c0_93] : memref<6x32x256xf32, #tpu.memory_space<vmem>>, vector<1x32x256xf32>
    %214 = vector.shape_cast %213 : vector<1x32x256xf32> to vector<32x256xf32>
    %215 = arith.addf %212, %214 : vector<32x256xf32>
    %cst_94 = arith.constant 1.000000e+00 : f32
    %216 = vector.broadcast %cst_94 : f32 to vector<32x256xf32>
    %217 = arith.addf %215, %216 : vector<32x256xf32>
    %cst_95 = arith.constant 5.000000e-01 : f32
    %218 = vector.broadcast %cst_95 : f32 to vector<32x256xf32>
    %219 = arith.mulf %217, %218 : vector<32x256xf32>
    %220 = math.floor %219 : vector<32x256xf32>
    %cst_96 = arith.constant 2.000000e+00 : f32
    %221 = vector.broadcast %cst_96 : f32 to vector<32x256xf32>
    %222 = arith.mulf %221, %220 : vector<32x256xf32>
    %223 = arith.subf %215, %222 : vector<32x256xf32>
    %224 = math.absf %223 : vector<32x256xf32>
    %225 = math.absf %215 : vector<32x256xf32>
    %cst_97 = arith.constant 1.000000e+00 : f32
    %226 = vector.broadcast %cst_97 : f32 to vector<32x256xf32>
    %227 = arith.addf %226, %225 : vector<32x256xf32>
    %228 = arith.divf %215, %227 : vector<32x256xf32>
    %cst_98 = arith.constant 0.000000e+00 : f32
    %229 = vector.broadcast %cst_98 : f32 to vector<32x256xf32>
    %230 = arith.cmpf oge, %215, %229 : vector<32x256xf32>
    %231 = arith.select %230, %224, %228 : vector<32x256xi1>, vector<32x256xf32>
    %232 = arith.addf %231, %193 : vector<32x256xf32>
    %c1_99 = arith.constant 1 : index
    %c0_100 = arith.constant 0 : index
    %c0_101 = arith.constant 0 : index
    %233 = vector.load %arg3[%c1_99, %c0_100, %c0_101] : memref<5x32x32xf32, #tpu.memory_space<vmem>>, vector<1x32x32xf32>
    %234 = vector.shape_cast %233 : vector<1x32x32xf32> to vector<32x32xf32>
    %cst_102 = arith.constant dense<0.000000e+00> : vector<32x256xf32>
    %235 = tpu.matmul %234, %232, %cst_102 {dimension_numbers = #tpu.dot_dimension_numbers<[1], [0], [0], [1], [0, 0, 1, 1], [], []>} : vector<32x32xf32>, vector<32x256xf32>, vector<32x256xf32> -> vector<32x256xf32>
    %c2_103 = arith.constant 2 : index
    %c0_104 = arith.constant 0 : index
    %c0_105 = arith.constant 0 : index
    %236 = vector.load %arg4[%c2_103, %c0_104, %c0_105] : memref<6x32x256xf32, #tpu.memory_space<vmem>>, vector<1x32x256xf32>
    %237 = vector.shape_cast %236 : vector<1x32x256xf32> to vector<32x256xf32>
    %238 = arith.addf %235, %237 : vector<32x256xf32>
    %cst_106 = arith.constant 1.000000e+00 : f32
    %239 = vector.broadcast %cst_106 : f32 to vector<32x256xf32>
    %240 = arith.addf %238, %239 : vector<32x256xf32>
    %cst_107 = arith.constant 5.000000e-01 : f32
    %241 = vector.broadcast %cst_107 : f32 to vector<32x256xf32>
    %242 = arith.mulf %240, %241 : vector<32x256xf32>
    %243 = math.floor %242 : vector<32x256xf32>
    %cst_108 = arith.constant 2.000000e+00 : f32
    %244 = vector.broadcast %cst_108 : f32 to vector<32x256xf32>
    %245 = arith.mulf %244, %243 : vector<32x256xf32>
    %246 = arith.subf %238, %245 : vector<32x256xf32>
    %247 = math.absf %246 : vector<32x256xf32>
    %248 = math.absf %238 : vector<32x256xf32>
    %cst_109 = arith.constant 1.000000e+00 : f32
    %249 = vector.broadcast %cst_109 : f32 to vector<32x256xf32>
    %250 = arith.addf %249, %248 : vector<32x256xf32>
    %251 = arith.divf %238, %250 : vector<32x256xf32>
    %cst_110 = arith.constant 0.000000e+00 : f32
    %252 = vector.broadcast %cst_110 : f32 to vector<32x256xf32>
    %253 = arith.cmpf oge, %238, %252 : vector<32x256xf32>
    %254 = arith.select %253, %247, %251 : vector<32x256xi1>, vector<32x256xf32>
    %c2_111 = arith.constant 2 : index
    %c0_112 = arith.constant 0 : index
    %c0_113 = arith.constant 0 : index
    %255 = vector.load %arg3[%c2_111, %c0_112, %c0_113] : memref<5x32x32xf32, #tpu.memory_space<vmem>>, vector<1x32x32xf32>
    %256 = vector.shape_cast %255 : vector<1x32x32xf32> to vector<32x32xf32>
    %cst_114 = arith.constant dense<0.000000e+00> : vector<32x256xf32>
    %257 = tpu.matmul %256, %254, %cst_114 {dimension_numbers = #tpu.dot_dimension_numbers<[1], [0], [0], [1], [0, 0, 1, 1], [], []>} : vector<32x32xf32>, vector<32x256xf32>, vector<32x256xf32> -> vector<32x256xf32>
    %c3_115 = arith.constant 3 : index
    %c0_116 = arith.constant 0 : index
    %c0_117 = arith.constant 0 : index
    %258 = vector.load %arg4[%c3_115, %c0_116, %c0_117] : memref<6x32x256xf32, #tpu.memory_space<vmem>>, vector<1x32x256xf32>
    %259 = vector.shape_cast %258 : vector<1x32x256xf32> to vector<32x256xf32>
    %260 = arith.addf %257, %259 : vector<32x256xf32>
    %cst_118 = arith.constant 1.000000e+00 : f32
    %261 = vector.broadcast %cst_118 : f32 to vector<32x256xf32>
    %262 = arith.addf %260, %261 : vector<32x256xf32>
    %cst_119 = arith.constant 5.000000e-01 : f32
    %263 = vector.broadcast %cst_119 : f32 to vector<32x256xf32>
    %264 = arith.mulf %262, %263 : vector<32x256xf32>
    %265 = math.floor %264 : vector<32x256xf32>
    %cst_120 = arith.constant 2.000000e+00 : f32
    %266 = vector.broadcast %cst_120 : f32 to vector<32x256xf32>
    %267 = arith.mulf %266, %265 : vector<32x256xf32>
    %268 = arith.subf %260, %267 : vector<32x256xf32>
    %269 = math.absf %268 : vector<32x256xf32>
    %270 = math.absf %260 : vector<32x256xf32>
    %cst_121 = arith.constant 1.000000e+00 : f32
    %271 = vector.broadcast %cst_121 : f32 to vector<32x256xf32>
    %272 = arith.addf %271, %270 : vector<32x256xf32>
    %273 = arith.divf %260, %272 : vector<32x256xf32>
    %cst_122 = arith.constant 0.000000e+00 : f32
    %274 = vector.broadcast %cst_122 : f32 to vector<32x256xf32>
    %275 = arith.cmpf oge, %260, %274 : vector<32x256xf32>
    %276 = arith.select %275, %269, %273 : vector<32x256xi1>, vector<32x256xf32>
    %277 = arith.addf %276, %232 : vector<32x256xf32>
    %c3_123 = arith.constant 3 : index
    %c0_124 = arith.constant 0 : index
    %c0_125 = arith.constant 0 : index
    %278 = vector.load %arg3[%c3_123, %c0_124, %c0_125] : memref<5x32x32xf32, #tpu.memory_space<vmem>>, vector<1x32x32xf32>
    %279 = vector.shape_cast %278 : vector<1x32x32xf32> to vector<32x32xf32>
    %cst_126 = arith.constant dense<0.000000e+00> : vector<32x256xf32>
    %280 = tpu.matmul %279, %277, %cst_126 {dimension_numbers = #tpu.dot_dimension_numbers<[1], [0], [0], [1], [0, 0, 1, 1], [], []>} : vector<32x32xf32>, vector<32x256xf32>, vector<32x256xf32> -> vector<32x256xf32>
    %c4_127 = arith.constant 4 : index
    %c0_128 = arith.constant 0 : index
    %c0_129 = arith.constant 0 : index
    %281 = vector.load %arg4[%c4_127, %c0_128, %c0_129] : memref<6x32x256xf32, #tpu.memory_space<vmem>>, vector<1x32x256xf32>
    %282 = vector.shape_cast %281 : vector<1x32x256xf32> to vector<32x256xf32>
    %283 = arith.addf %280, %282 : vector<32x256xf32>
    %cst_130 = arith.constant 1.000000e+00 : f32
    %284 = vector.broadcast %cst_130 : f32 to vector<32x256xf32>
    %285 = arith.addf %283, %284 : vector<32x256xf32>
    %cst_131 = arith.constant 5.000000e-01 : f32
    %286 = vector.broadcast %cst_131 : f32 to vector<32x256xf32>
    %287 = arith.mulf %285, %286 : vector<32x256xf32>
    %288 = math.floor %287 : vector<32x256xf32>
    %cst_132 = arith.constant 2.000000e+00 : f32
    %289 = vector.broadcast %cst_132 : f32 to vector<32x256xf32>
    %290 = arith.mulf %289, %288 : vector<32x256xf32>
    %291 = arith.subf %283, %290 : vector<32x256xf32>
    %292 = math.absf %291 : vector<32x256xf32>
    %293 = math.absf %283 : vector<32x256xf32>
    %cst_133 = arith.constant 1.000000e+00 : f32
    %294 = vector.broadcast %cst_133 : f32 to vector<32x256xf32>
    %295 = arith.addf %294, %293 : vector<32x256xf32>
    %296 = arith.divf %283, %295 : vector<32x256xf32>
    %cst_134 = arith.constant 0.000000e+00 : f32
    %297 = vector.broadcast %cst_134 : f32 to vector<32x256xf32>
    %298 = arith.cmpf oge, %283, %297 : vector<32x256xf32>
    %299 = arith.select %298, %292, %296 : vector<32x256xi1>, vector<32x256xf32>
    %c4_135 = arith.constant 4 : index
    %c0_136 = arith.constant 0 : index
    %c0_137 = arith.constant 0 : index
    %300 = vector.load %arg3[%c4_135, %c0_136, %c0_137] : memref<5x32x32xf32, #tpu.memory_space<vmem>>, vector<1x32x32xf32>
    %301 = vector.shape_cast %300 : vector<1x32x32xf32> to vector<32x32xf32>
    %cst_138 = arith.constant dense<0.000000e+00> : vector<32x256xf32>
    %302 = tpu.matmul %301, %299, %cst_138 {dimension_numbers = #tpu.dot_dimension_numbers<[1], [0], [0], [1], [0, 0, 1, 1], [], []>} : vector<32x32xf32>, vector<32x256xf32>, vector<32x256xf32> -> vector<32x256xf32>
    %c5_139 = arith.constant 5 : index
    %c0_140 = arith.constant 0 : index
    %c0_141 = arith.constant 0 : index
    %303 = vector.load %arg4[%c5_139, %c0_140, %c0_141] : memref<6x32x256xf32, #tpu.memory_space<vmem>>, vector<1x32x256xf32>
    %304 = vector.shape_cast %303 : vector<1x32x256xf32> to vector<32x256xf32>
    %305 = arith.addf %302, %304 : vector<32x256xf32>
    %cst_142 = arith.constant 1.000000e+00 : f32
    %306 = vector.broadcast %cst_142 : f32 to vector<32x256xf32>
    %307 = arith.addf %305, %306 : vector<32x256xf32>
    %cst_143 = arith.constant 5.000000e-01 : f32
    %308 = vector.broadcast %cst_143 : f32 to vector<32x256xf32>
    %309 = arith.mulf %307, %308 : vector<32x256xf32>
    %310 = math.floor %309 : vector<32x256xf32>
    %cst_144 = arith.constant 2.000000e+00 : f32
    %311 = vector.broadcast %cst_144 : f32 to vector<32x256xf32>
    %312 = arith.mulf %311, %310 : vector<32x256xf32>
    %313 = arith.subf %305, %312 : vector<32x256xf32>
    %314 = math.absf %313 : vector<32x256xf32>
    %315 = math.absf %305 : vector<32x256xf32>
    %cst_145 = arith.constant 1.000000e+00 : f32
    %316 = vector.broadcast %cst_145 : f32 to vector<32x256xf32>
    %317 = arith.addf %316, %315 : vector<32x256xf32>
    %318 = arith.divf %305, %317 : vector<32x256xf32>
    %cst_146 = arith.constant 0.000000e+00 : f32
    %319 = vector.broadcast %cst_146 : f32 to vector<32x256xf32>
    %320 = arith.cmpf oge, %305, %319 : vector<32x256xf32>
    %321 = arith.select %320, %314, %318 : vector<32x256xi1>, vector<32x256xf32>
    %322 = arith.addf %321, %277 : vector<32x256xf32>
    %323 = vector.broadcast %1 : vector<32x1xf32> to vector<32x256xf32>
    %324 = arith.mulf %322, %323 : vector<32x256xf32>
    %cst_147 = arith.constant dense<0.000000e+00> : vector<256xf32>
    %325 = vector.multi_reduction <add>, %324, %cst_147 [0] : vector<32x256xf32> to vector<256xf32>
    %326 = vector.shape_cast %325 : vector<256xf32> to vector<1x256xf32>
    %c0_148 = arith.constant 0 : index
    %c256_149 = arith.constant 256 : index
    %327 = vector.load %arg6[%c0_148, %c256_149] : memref<1x1024xf32, #tpu.memory_space<vmem>>, vector<1x256xf32>
    tpu.vector_store %arg6[%c0_148, %c256_149], %326 {strides = array<i32>} : memref<1x1024xf32, #tpu.memory_space<vmem>>, vector<1x256xf32>,
    %c0_150 = arith.constant 0 : index
    %c512 = arith.constant 512 : index
    %328 = vector.load %arg1[%c0_150, %c512] : memref<2x1024xf32, #tpu.memory_space<vmem>>, vector<2x256xf32>
    %329 = tpu.iota {dimensions = array<i32: 0>} : vector<32x256xi32>
    %c0_151 = arith.constant 0 : index
    %c0_152 = arith.constant 0 : index
    %c0_153 = arith.constant 0 : index
    %330 = vector.load %arg4[%c0_151, %c0_152, %c0_153] : memref<6x32x256xf32, #tpu.memory_space<vmem>>, vector<1x32x256xf32>
    %331 = vector.shape_cast %330 : vector<1x32x256xf32> to vector<32x256xf32>
    %cst_154 = arith.constant 0.000000e+00 : f32
    %332 = vector.broadcast %cst_154 : f32 to vector<32x256xf32>
    %333 = vector.extract_strided_slice %328 {offsets = [0, 0], sizes = [1, 256], strides = [1, 1]} : vector<2x256xf32> to vector<1x256xf32>
    %334 = vector.shape_cast %333 : vector<1x256xf32> to vector<1x256xf32>
    %335 = vector.broadcast %334 : vector<1x256xf32> to vector<32x256xf32>
    %336 = vector.extract_strided_slice %0 {offsets = [0, 0], sizes = [32, 1], strides = [1, 1]} : vector<32x2xf32> to vector<32x1xf32>
    %337 = vector.broadcast %336 : vector<32x1xf32> to vector<32x256xf32>
    %338 = arith.mulf %337, %335 : vector<32x256xf32>
    %339 = arith.addf %331, %338 : vector<32x256xf32>
    %c0_i32_155 = arith.constant 0 : i32
    %340 = vector.broadcast %c0_i32_155 : i32 to vector<32x256xi32>
    %341 = arith.cmpi eq, %329, %340 : vector<32x256xi32>
    %cst_156 = arith.constant 0.000000e+00 : f32
    %342 = vector.broadcast %cst_156 : f32 to vector<32x256xf32>
    %343 = arith.select %341, %335, %342 : vector<32x256xi1>, vector<32x256xf32>
    %344 = arith.addf %332, %343 : vector<32x256xf32>
    %345 = vector.extract_strided_slice %328 {offsets = [1, 0], sizes = [1, 256], strides = [1, 1]} : vector<2x256xf32> to vector<1x256xf32>
    %346 = vector.shape_cast %345 : vector<1x256xf32> to vector<1x256xf32>
    %347 = vector.broadcast %346 : vector<1x256xf32> to vector<32x256xf32>
    %348 = vector.extract_strided_slice %0 {offsets = [0, 1], sizes = [32, 1], strides = [1, 1]} : vector<32x2xf32> to vector<32x1xf32>
    %349 = vector.broadcast %348 : vector<32x1xf32> to vector<32x256xf32>
    %350 = arith.mulf %349, %347 : vector<32x256xf32>
    %351 = arith.addf %339, %350 : vector<32x256xf32>
    %c1_i32_157 = arith.constant 1 : i32
    %352 = vector.broadcast %c1_i32_157 : i32 to vector<32x256xi32>
    %353 = arith.cmpi eq, %329, %352 : vector<32x256xi32>
    %cst_158 = arith.constant 0.000000e+00 : f32
    %354 = vector.broadcast %cst_158 : f32 to vector<32x256xf32>
    %355 = arith.select %353, %347, %354 : vector<32x256xi1>, vector<32x256xf32>
    %356 = arith.addf %344, %355 : vector<32x256xf32>
    %cst_159 = arith.constant 1.000000e+00 : f32
    %357 = vector.broadcast %cst_159 : f32 to vector<32x256xf32>
    %358 = arith.addf %351, %357 : vector<32x256xf32>
    %cst_160 = arith.constant 5.000000e-01 : f32
    %359 = vector.broadcast %cst_160 : f32 to vector<32x256xf32>
    %360 = arith.mulf %358, %359 : vector<32x256xf32>
    %361 = math.floor %360 : vector<32x256xf32>
    %cst_161 = arith.constant 2.000000e+00 : f32
    %362 = vector.broadcast %cst_161 : f32 to vector<32x256xf32>
    %363 = arith.mulf %362, %361 : vector<32x256xf32>
    %364 = arith.subf %351, %363 : vector<32x256xf32>
    %365 = math.absf %364 : vector<32x256xf32>
    %366 = math.absf %351 : vector<32x256xf32>
    %cst_162 = arith.constant 1.000000e+00 : f32
    %367 = vector.broadcast %cst_162 : f32 to vector<32x256xf32>
    %368 = arith.addf %367, %366 : vector<32x256xf32>
    %369 = arith.divf %351, %368 : vector<32x256xf32>
    %cst_163 = arith.constant 0.000000e+00 : f32
    %370 = vector.broadcast %cst_163 : f32 to vector<32x256xf32>
    %371 = arith.cmpf oge, %351, %370 : vector<32x256xf32>
    %372 = arith.select %371, %365, %369 : vector<32x256xi1>, vector<32x256xf32>
    %c0_164 = arith.constant 0 : index
    %c0_165 = arith.constant 0 : index
    %c0_166 = arith.constant 0 : index
    %373 = vector.load %arg3[%c0_164, %c0_165, %c0_166] : memref<5x32x32xf32, #tpu.memory_space<vmem>>, vector<1x32x32xf32>
    %374 = vector.shape_cast %373 : vector<1x32x32xf32> to vector<32x32xf32>
    %cst_167 = arith.constant dense<0.000000e+00> : vector<32x256xf32>
    %375 = tpu.matmul %374, %372, %cst_167 {dimension_numbers = #tpu.dot_dimension_numbers<[1], [0], [0], [1], [0, 0, 1, 1], [], []>} : vector<32x32xf32>, vector<32x256xf32>, vector<32x256xf32> -> vector<32x256xf32>
    %c1_168 = arith.constant 1 : index
    %c0_169 = arith.constant 0 : index
    %c0_170 = arith.constant 0 : index
    %376 = vector.load %arg4[%c1_168, %c0_169, %c0_170] : memref<6x32x256xf32, #tpu.memory_space<vmem>>, vector<1x32x256xf32>
    %377 = vector.shape_cast %376 : vector<1x32x256xf32> to vector<32x256xf32>
    %378 = arith.addf %375, %377 : vector<32x256xf32>
    %cst_171 = arith.constant 1.000000e+00 : f32
    %379 = vector.broadcast %cst_171 : f32 to vector<32x256xf32>
    %380 = arith.addf %378, %379 : vector<32x256xf32>
    %cst_172 = arith.constant 5.000000e-01 : f32
    %381 = vector.broadcast %cst_172 : f32 to vector<32x256xf32>
    %382 = arith.mulf %380, %381 : vector<32x256xf32>
    %383 = math.floor %382 : vector<32x256xf32>
    %cst_173 = arith.constant 2.000000e+00 : f32
    %384 = vector.broadcast %cst_173 : f32 to vector<32x256xf32>
    %385 = arith.mulf %384, %383 : vector<32x256xf32>
    %386 = arith.subf %378, %385 : vector<32x256xf32>
    %387 = math.absf %386 : vector<32x256xf32>
    %388 = math.absf %378 : vector<32x256xf32>
    %cst_174 = arith.constant 1.000000e+00 : f32
    %389 = vector.broadcast %cst_174 : f32 to vector<32x256xf32>
    %390 = arith.addf %389, %388 : vector<32x256xf32>
    %391 = arith.divf %378, %390 : vector<32x256xf32>
    %cst_175 = arith.constant 0.000000e+00 : f32
    %392 = vector.broadcast %cst_175 : f32 to vector<32x256xf32>
    %393 = arith.cmpf oge, %378, %392 : vector<32x256xf32>
    %394 = arith.select %393, %387, %391 : vector<32x256xi1>, vector<32x256xf32>
    %395 = arith.addf %394, %356 : vector<32x256xf32>
    %c1_176 = arith.constant 1 : index
    %c0_177 = arith.constant 0 : index
    %c0_178 = arith.constant 0 : index
    %396 = vector.load %arg3[%c1_176, %c0_177, %c0_178] : memref<5x32x32xf32, #tpu.memory_space<vmem>>, vector<1x32x32xf32>
    %397 = vector.shape_cast %396 : vector<1x32x32xf32> to vector<32x32xf32>
    %cst_179 = arith.constant dense<0.000000e+00> : vector<32x256xf32>
    %398 = tpu.matmul %397, %395, %cst_179 {dimension_numbers = #tpu.dot_dimension_numbers<[1], [0], [0], [1], [0, 0, 1, 1], [], []>} : vector<32x32xf32>, vector<32x256xf32>, vector<32x256xf32> -> vector<32x256xf32>
    %c2_180 = arith.constant 2 : index
    %c0_181 = arith.constant 0 : index
    %c0_182 = arith.constant 0 : index
    %399 = vector.load %arg4[%c2_180, %c0_181, %c0_182] : memref<6x32x256xf32, #tpu.memory_space<vmem>>, vector<1x32x256xf32>
    %400 = vector.shape_cast %399 : vector<1x32x256xf32> to vector<32x256xf32>
    %401 = arith.addf %398, %400 : vector<32x256xf32>
    %cst_183 = arith.constant 1.000000e+00 : f32
    %402 = vector.broadcast %cst_183 : f32 to vector<32x256xf32>
    %403 = arith.addf %401, %402 : vector<32x256xf32>
    %cst_184 = arith.constant 5.000000e-01 : f32
    %404 = vector.broadcast %cst_184 : f32 to vector<32x256xf32>
    %405 = arith.mulf %403, %404 : vector<32x256xf32>
    %406 = math.floor %405 : vector<32x256xf32>
    %cst_185 = arith.constant 2.000000e+00 : f32
    %407 = vector.broadcast %cst_185 : f32 to vector<32x256xf32>
    %408 = arith.mulf %407, %406 : vector<32x256xf32>
    %409 = arith.subf %401, %408 : vector<32x256xf32>
    %410 = math.absf %409 : vector<32x256xf32>
    %411 = math.absf %401 : vector<32x256xf32>
    %cst_186 = arith.constant 1.000000e+00 : f32
    %412 = vector.broadcast %cst_186 : f32 to vector<32x256xf32>
    %413 = arith.addf %412, %411 : vector<32x256xf32>
    %414 = arith.divf %401, %413 : vector<32x256xf32>
    %cst_187 = arith.constant 0.000000e+00 : f32
    %415 = vector.broadcast %cst_187 : f32 to vector<32x256xf32>
    %416 = arith.cmpf oge, %401, %415 : vector<32x256xf32>
    %417 = arith.select %416, %410, %414 : vector<32x256xi1>, vector<32x256xf32>
    %c2_188 = arith.constant 2 : index
    %c0_189 = arith.constant 0 : index
    %c0_190 = arith.constant 0 : index
    %418 = vector.load %arg3[%c2_188, %c0_189, %c0_190] : memref<5x32x32xf32, #tpu.memory_space<vmem>>, vector<1x32x32xf32>
    %419 = vector.shape_cast %418 : vector<1x32x32xf32> to vector<32x32xf32>
    %cst_191 = arith.constant dense<0.000000e+00> : vector<32x256xf32>
    %420 = tpu.matmul %419, %417, %cst_191 {dimension_numbers = #tpu.dot_dimension_numbers<[1], [0], [0], [1], [0, 0, 1, 1], [], []>} : vector<32x32xf32>, vector<32x256xf32>, vector<32x256xf32> -> vector<32x256xf32>
    %c3_192 = arith.constant 3 : index
    %c0_193 = arith.constant 0 : index
    %c0_194 = arith.constant 0 : index
    %421 = vector.load %arg4[%c3_192, %c0_193, %c0_194] : memref<6x32x256xf32, #tpu.memory_space<vmem>>, vector<1x32x256xf32>
    %422 = vector.shape_cast %421 : vector<1x32x256xf32> to vector<32x256xf32>
    %423 = arith.addf %420, %422 : vector<32x256xf32>
    %cst_195 = arith.constant 1.000000e+00 : f32
    %424 = vector.broadcast %cst_195 : f32 to vector<32x256xf32>
    %425 = arith.addf %423, %424 : vector<32x256xf32>
    %cst_196 = arith.constant 5.000000e-01 : f32
    %426 = vector.broadcast %cst_196 : f32 to vector<32x256xf32>
    %427 = arith.mulf %425, %426 : vector<32x256xf32>
    %428 = math.floor %427 : vector<32x256xf32>
    %cst_197 = arith.constant 2.000000e+00 : f32
    %429 = vector.broadcast %cst_197 : f32 to vector<32x256xf32>
    %430 = arith.mulf %429, %428 : vector<32x256xf32>
    %431 = arith.subf %423, %430 : vector<32x256xf32>
    %432 = math.absf %431 : vector<32x256xf32>
    %433 = math.absf %423 : vector<32x256xf32>
    %cst_198 = arith.constant 1.000000e+00 : f32
    %434 = vector.broadcast %cst_198 : f32 to vector<32x256xf32>
    %435 = arith.addf %434, %433 : vector<32x256xf32>
    %436 = arith.divf %423, %435 : vector<32x256xf32>
    %cst_199 = arith.constant 0.000000e+00 : f32
    %437 = vector.broadcast %cst_199 : f32 to vector<32x256xf32>
    %438 = arith.cmpf oge, %423, %437 : vector<32x256xf32>
    %439 = arith.select %438, %432, %436 : vector<32x256xi1>, vector<32x256xf32>
    %440 = arith.addf %439, %395 : vector<32x256xf32>
    %c3_200 = arith.constant 3 : index
    %c0_201 = arith.constant 0 : index
    %c0_202 = arith.constant 0 : index
    %441 = vector.load %arg3[%c3_200, %c0_201, %c0_202] : memref<5x32x32xf32, #tpu.memory_space<vmem>>, vector<1x32x32xf32>
    %442 = vector.shape_cast %441 : vector<1x32x32xf32> to vector<32x32xf32>
    %cst_203 = arith.constant dense<0.000000e+00> : vector<32x256xf32>
    %443 = tpu.matmul %442, %440, %cst_203 {dimension_numbers = #tpu.dot_dimension_numbers<[1], [0], [0], [1], [0, 0, 1, 1], [], []>} : vector<32x32xf32>, vector<32x256xf32>, vector<32x256xf32> -> vector<32x256xf32>
    %c4_204 = arith.constant 4 : index
    %c0_205 = arith.constant 0 : index
    %c0_206 = arith.constant 0 : index
    %444 = vector.load %arg4[%c4_204, %c0_205, %c0_206] : memref<6x32x256xf32, #tpu.memory_space<vmem>>, vector<1x32x256xf32>
    %445 = vector.shape_cast %444 : vector<1x32x256xf32> to vector<32x256xf32>
    %446 = arith.addf %443, %445 : vector<32x256xf32>
    %cst_207 = arith.constant 1.000000e+00 : f32
    %447 = vector.broadcast %cst_207 : f32 to vector<32x256xf32>
    %448 = arith.addf %446, %447 : vector<32x256xf32>
    %cst_208 = arith.constant 5.000000e-01 : f32
    %449 = vector.broadcast %cst_208 : f32 to vector<32x256xf32>
    %450 = arith.mulf %448, %449 : vector<32x256xf32>
    %451 = math.floor %450 : vector<32x256xf32>
    %cst_209 = arith.constant 2.000000e+00 : f32
    %452 = vector.broadcast %cst_209 : f32 to vector<32x256xf32>
    %453 = arith.mulf %452, %451 : vector<32x256xf32>
    %454 = arith.subf %446, %453 : vector<32x256xf32>
    %455 = math.absf %454 : vector<32x256xf32>
    %456 = math.absf %446 : vector<32x256xf32>
    %cst_210 = arith.constant 1.000000e+00 : f32
    %457 = vector.broadcast %cst_210 : f32 to vector<32x256xf32>
    %458 = arith.addf %457, %456 : vector<32x256xf32>
    %459 = arith.divf %446, %458 : vector<32x256xf32>
    %cst_211 = arith.constant 0.000000e+00 : f32
    %460 = vector.broadcast %cst_211 : f32 to vector<32x256xf32>
    %461 = arith.cmpf oge, %446, %460 : vector<32x256xf32>
    %462 = arith.select %461, %455, %459 : vector<32x256xi1>, vector<32x256xf32>
    %c4_212 = arith.constant 4 : index
    %c0_213 = arith.constant 0 : index
    %c0_214 = arith.constant 0 : index
    %463 = vector.load %arg3[%c4_212, %c0_213, %c0_214] : memref<5x32x32xf32, #tpu.memory_space<vmem>>, vector<1x32x32xf32>
    %464 = vector.shape_cast %463 : vector<1x32x32xf32> to vector<32x32xf32>
    %cst_215 = arith.constant dense<0.000000e+00> : vector<32x256xf32>
    %465 = tpu.matmul %464, %462, %cst_215 {dimension_numbers = #tpu.dot_dimension_numbers<[1], [0], [0], [1], [0, 0, 1, 1], [], []>} : vector<32x32xf32>, vector<32x256xf32>, vector<32x256xf32> -> vector<32x256xf32>
    %c5_216 = arith.constant 5 : index
    %c0_217 = arith.constant 0 : index
    %c0_218 = arith.constant 0 : index
    %466 = vector.load %arg4[%c5_216, %c0_217, %c0_218] : memref<6x32x256xf32, #tpu.memory_space<vmem>>, vector<1x32x256xf32>
    %467 = vector.shape_cast %466 : vector<1x32x256xf32> to vector<32x256xf32>
    %468 = arith.addf %465, %467 : vector<32x256xf32>
    %cst_219 = arith.constant 1.000000e+00 : f32
    %469 = vector.broadcast %cst_219 : f32 to vector<32x256xf32>
    %470 = arith.addf %468, %469 : vector<32x256xf32>
    %cst_220 = arith.constant 5.000000e-01 : f32
    %471 = vector.broadcast %cst_220 : f32 to vector<32x256xf32>
    %472 = arith.mulf %470, %471 : vector<32x256xf32>
    %473 = math.floor %472 : vector<32x256xf32>
    %cst_221 = arith.constant 2.000000e+00 : f32
    %474 = vector.broadcast %cst_221 : f32 to vector<32x256xf32>
    %475 = arith.mulf %474, %473 : vector<32x256xf32>
    %476 = arith.subf %468, %475 : vector<32x256xf32>
    %477 = math.absf %476 : vector<32x256xf32>
    %478 = math.absf %468 : vector<32x256xf32>
    %cst_222 = arith.constant 1.000000e+00 : f32
    %479 = vector.broadcast %cst_222 : f32 to vector<32x256xf32>
    %480 = arith.addf %479, %478 : vector<32x256xf32>
    %481 = arith.divf %468, %480 : vector<32x256xf32>
    %cst_223 = arith.constant 0.000000e+00 : f32
    %482 = vector.broadcast %cst_223 : f32 to vector<32x256xf32>
    %483 = arith.cmpf oge, %468, %482 : vector<32x256xf32>
    %484 = arith.select %483, %477, %481 : vector<32x256xi1>, vector<32x256xf32>
    %485 = arith.addf %484, %440 : vector<32x256xf32>
    %486 = vector.broadcast %1 : vector<32x1xf32> to vector<32x256xf32>
    %487 = arith.mulf %485, %486 : vector<32x256xf32>
    %cst_224 = arith.constant dense<0.000000e+00> : vector<256xf32>
    %488 = vector.multi_reduction <add>, %487, %cst_224 [0] : vector<32x256xf32> to vector<256xf32>
    %489 = vector.shape_cast %488 : vector<256xf32> to vector<1x256xf32>
    %c0_225 = arith.constant 0 : index
    %c512_226 = arith.constant 512 : index
    %490 = vector.load %arg6[%c0_225, %c512_226] : memref<1x1024xf32, #tpu.memory_space<vmem>>, vector<1x256xf32>
    tpu.vector_store %arg6[%c0_225, %c512_226], %489 {strides = array<i32>} : memref<1x1024xf32, #tpu.memory_space<vmem>>, vector<1x256xf32>,
    %c0_227 = arith.constant 0 : index
    %c768 = arith.constant 768 : index
    %491 = vector.load %arg1[%c0_227, %c768] : memref<2x1024xf32, #tpu.memory_space<vmem>>, vector<2x256xf32>
    %492 = tpu.iota {dimensions = array<i32: 0>} : vector<32x256xi32>
    %c0_228 = arith.constant 0 : index
    %c0_229 = arith.constant 0 : index
    %c0_230 = arith.constant 0 : index
    %493 = vector.load %arg4[%c0_228, %c0_229, %c0_230] : memref<6x32x256xf32, #tpu.memory_space<vmem>>, vector<1x32x256xf32>
    %494 = vector.shape_cast %493 : vector<1x32x256xf32> to vector<32x256xf32>
    %cst_231 = arith.constant 0.000000e+00 : f32
    %495 = vector.broadcast %cst_231 : f32 to vector<32x256xf32>
    %496 = vector.extract_strided_slice %491 {offsets = [0, 0], sizes = [1, 256], strides = [1, 1]} : vector<2x256xf32> to vector<1x256xf32>
    %497 = vector.shape_cast %496 : vector<1x256xf32> to vector<1x256xf32>
    %498 = vector.broadcast %497 : vector<1x256xf32> to vector<32x256xf32>
    %499 = vector.extract_strided_slice %0 {offsets = [0, 0], sizes = [32, 1], strides = [1, 1]} : vector<32x2xf32> to vector<32x1xf32>
    %500 = vector.broadcast %499 : vector<32x1xf32> to vector<32x256xf32>
    %501 = arith.mulf %500, %498 : vector<32x256xf32>
    %502 = arith.addf %494, %501 : vector<32x256xf32>
    %c0_i32_232 = arith.constant 0 : i32
    %503 = vector.broadcast %c0_i32_232 : i32 to vector<32x256xi32>
    %504 = arith.cmpi eq, %492, %503 : vector<32x256xi32>
    %cst_233 = arith.constant 0.000000e+00 : f32
    %505 = vector.broadcast %cst_233 : f32 to vector<32x256xf32>
    %506 = arith.select %504, %498, %505 : vector<32x256xi1>, vector<32x256xf32>
    %507 = arith.addf %495, %506 : vector<32x256xf32>
    %508 = vector.extract_strided_slice %491 {offsets = [1, 0], sizes = [1, 256], strides = [1, 1]} : vector<2x256xf32> to vector<1x256xf32>
    %509 = vector.shape_cast %508 : vector<1x256xf32> to vector<1x256xf32>
    %510 = vector.broadcast %509 : vector<1x256xf32> to vector<32x256xf32>
    %511 = vector.extract_strided_slice %0 {offsets = [0, 1], sizes = [32, 1], strides = [1, 1]} : vector<32x2xf32> to vector<32x1xf32>
    %512 = vector.broadcast %511 : vector<32x1xf32> to vector<32x256xf32>
    %513 = arith.mulf %512, %510 : vector<32x256xf32>
    %514 = arith.addf %502, %513 : vector<32x256xf32>
    %c1_i32_234 = arith.constant 1 : i32
    %515 = vector.broadcast %c1_i32_234 : i32 to vector<32x256xi32>
    %516 = arith.cmpi eq, %492, %515 : vector<32x256xi32>
    %cst_235 = arith.constant 0.000000e+00 : f32
    %517 = vector.broadcast %cst_235 : f32 to vector<32x256xf32>
    %518 = arith.select %516, %510, %517 : vector<32x256xi1>, vector<32x256xf32>
    %519 = arith.addf %507, %518 : vector<32x256xf32>
    %cst_236 = arith.constant 1.000000e+00 : f32
    %520 = vector.broadcast %cst_236 : f32 to vector<32x256xf32>
    %521 = arith.addf %514, %520 : vector<32x256xf32>
    %cst_237 = arith.constant 5.000000e-01 : f32
    %522 = vector.broadcast %cst_237 : f32 to vector<32x256xf32>
    %523 = arith.mulf %521, %522 : vector<32x256xf32>
    %524 = math.floor %523 : vector<32x256xf32>
    %cst_238 = arith.constant 2.000000e+00 : f32
    %525 = vector.broadcast %cst_238 : f32 to vector<32x256xf32>
    %526 = arith.mulf %525, %524 : vector<32x256xf32>
    %527 = arith.subf %514, %526 : vector<32x256xf32>
    %528 = math.absf %527 : vector<32x256xf32>
    %529 = math.absf %514 : vector<32x256xf32>
    %cst_239 = arith.constant 1.000000e+00 : f32
    %530 = vector.broadcast %cst_239 : f32 to vector<32x256xf32>
    %531 = arith.addf %530, %529 : vector<32x256xf32>
    %532 = arith.divf %514, %531 : vector<32x256xf32>
    %cst_240 = arith.constant 0.000000e+00 : f32
    %533 = vector.broadcast %cst_240 : f32 to vector<32x256xf32>
    %534 = arith.cmpf oge, %514, %533 : vector<32x256xf32>
    %535 = arith.select %534, %528, %532 : vector<32x256xi1>, vector<32x256xf32>
    %c0_241 = arith.constant 0 : index
    %c0_242 = arith.constant 0 : index
    %c0_243 = arith.constant 0 : index
    %536 = vector.load %arg3[%c0_241, %c0_242, %c0_243] : memref<5x32x32xf32, #tpu.memory_space<vmem>>, vector<1x32x32xf32>
    %537 = vector.shape_cast %536 : vector<1x32x32xf32> to vector<32x32xf32>
    %cst_244 = arith.constant dense<0.000000e+00> : vector<32x256xf32>
    %538 = tpu.matmul %537, %535, %cst_244 {dimension_numbers = #tpu.dot_dimension_numbers<[1], [0], [0], [1], [0, 0, 1, 1], [], []>} : vector<32x32xf32>, vector<32x256xf32>, vector<32x256xf32> -> vector<32x256xf32>
    %c1_245 = arith.constant 1 : index
    %c0_246 = arith.constant 0 : index
    %c0_247 = arith.constant 0 : index
    %539 = vector.load %arg4[%c1_245, %c0_246, %c0_247] : memref<6x32x256xf32, #tpu.memory_space<vmem>>, vector<1x32x256xf32>
    %540 = vector.shape_cast %539 : vector<1x32x256xf32> to vector<32x256xf32>
    %541 = arith.addf %538, %540 : vector<32x256xf32>
    %cst_248 = arith.constant 1.000000e+00 : f32
    %542 = vector.broadcast %cst_248 : f32 to vector<32x256xf32>
    %543 = arith.addf %541, %542 : vector<32x256xf32>
    %cst_249 = arith.constant 5.000000e-01 : f32
    %544 = vector.broadcast %cst_249 : f32 to vector<32x256xf32>
    %545 = arith.mulf %543, %544 : vector<32x256xf32>
    %546 = math.floor %545 : vector<32x256xf32>
    %cst_250 = arith.constant 2.000000e+00 : f32
    %547 = vector.broadcast %cst_250 : f32 to vector<32x256xf32>
    %548 = arith.mulf %547, %546 : vector<32x256xf32>
    %549 = arith.subf %541, %548 : vector<32x256xf32>
    %550 = math.absf %549 : vector<32x256xf32>
    %551 = math.absf %541 : vector<32x256xf32>
    %cst_251 = arith.constant 1.000000e+00 : f32
    %552 = vector.broadcast %cst_251 : f32 to vector<32x256xf32>
    %553 = arith.addf %552, %551 : vector<32x256xf32>
    %554 = arith.divf %541, %553 : vector<32x256xf32>
    %cst_252 = arith.constant 0.000000e+00 : f32
    %555 = vector.broadcast %cst_252 : f32 to vector<32x256xf32>
    %556 = arith.cmpf oge, %541, %555 : vector<32x256xf32>
    %557 = arith.select %556, %550, %554 : vector<32x256xi1>, vector<32x256xf32>
    %558 = arith.addf %557, %519 : vector<32x256xf32>
    %c1_253 = arith.constant 1 : index
    %c0_254 = arith.constant 0 : index
    %c0_255 = arith.constant 0 : index
    %559 = vector.load %arg3[%c1_253, %c0_254, %c0_255] : memref<5x32x32xf32, #tpu.memory_space<vmem>>, vector<1x32x32xf32>
    %560 = vector.shape_cast %559 : vector<1x32x32xf32> to vector<32x32xf32>
    %cst_256 = arith.constant dense<0.000000e+00> : vector<32x256xf32>
    %561 = tpu.matmul %560, %558, %cst_256 {dimension_numbers = #tpu.dot_dimension_numbers<[1], [0], [0], [1], [0, 0, 1, 1], [], []>} : vector<32x32xf32>, vector<32x256xf32>, vector<32x256xf32> -> vector<32x256xf32>
    %c2_257 = arith.constant 2 : index
    %c0_258 = arith.constant 0 : index
    %c0_259 = arith.constant 0 : index
    %562 = vector.load %arg4[%c2_257, %c0_258, %c0_259] : memref<6x32x256xf32, #tpu.memory_space<vmem>>, vector<1x32x256xf32>
    %563 = vector.shape_cast %562 : vector<1x32x256xf32> to vector<32x256xf32>
    %564 = arith.addf %561, %563 : vector<32x256xf32>
    %cst_260 = arith.constant 1.000000e+00 : f32
    %565 = vector.broadcast %cst_260 : f32 to vector<32x256xf32>
    %566 = arith.addf %564, %565 : vector<32x256xf32>
    %cst_261 = arith.constant 5.000000e-01 : f32
    %567 = vector.broadcast %cst_261 : f32 to vector<32x256xf32>
    %568 = arith.mulf %566, %567 : vector<32x256xf32>
    %569 = math.floor %568 : vector<32x256xf32>
    %cst_262 = arith.constant 2.000000e+00 : f32
    %570 = vector.broadcast %cst_262 : f32 to vector<32x256xf32>
    %571 = arith.mulf %570, %569 : vector<32x256xf32>
    %572 = arith.subf %564, %571 : vector<32x256xf32>
    %573 = math.absf %572 : vector<32x256xf32>
    %574 = math.absf %564 : vector<32x256xf32>
    %cst_263 = arith.constant 1.000000e+00 : f32
    %575 = vector.broadcast %cst_263 : f32 to vector<32x256xf32>
    %576 = arith.addf %575, %574 : vector<32x256xf32>
    %577 = arith.divf %564, %576 : vector<32x256xf32>
    %cst_264 = arith.constant 0.000000e+00 : f32
    %578 = vector.broadcast %cst_264 : f32 to vector<32x256xf32>
    %579 = arith.cmpf oge, %564, %578 : vector<32x256xf32>
    %580 = arith.select %579, %573, %577 : vector<32x256xi1>, vector<32x256xf32>
    %c2_265 = arith.constant 2 : index
    %c0_266 = arith.constant 0 : index
    %c0_267 = arith.constant 0 : index
    %581 = vector.load %arg3[%c2_265, %c0_266, %c0_267] : memref<5x32x32xf32, #tpu.memory_space<vmem>>, vector<1x32x32xf32>
    %582 = vector.shape_cast %581 : vector<1x32x32xf32> to vector<32x32xf32>
    %cst_268 = arith.constant dense<0.000000e+00> : vector<32x256xf32>
    %583 = tpu.matmul %582, %580, %cst_268 {dimension_numbers = #tpu.dot_dimension_numbers<[1], [0], [0], [1], [0, 0, 1, 1], [], []>} : vector<32x32xf32>, vector<32x256xf32>, vector<32x256xf32> -> vector<32x256xf32>
    %c3_269 = arith.constant 3 : index
    %c0_270 = arith.constant 0 : index
    %c0_271 = arith.constant 0 : index
    %584 = vector.load %arg4[%c3_269, %c0_270, %c0_271] : memref<6x32x256xf32, #tpu.memory_space<vmem>>, vector<1x32x256xf32>
    %585 = vector.shape_cast %584 : vector<1x32x256xf32> to vector<32x256xf32>
    %586 = arith.addf %583, %585 : vector<32x256xf32>
    %cst_272 = arith.constant 1.000000e+00 : f32
    %587 = vector.broadcast %cst_272 : f32 to vector<32x256xf32>
    %588 = arith.addf %586, %587 : vector<32x256xf32>
    %cst_273 = arith.constant 5.000000e-01 : f32
    %589 = vector.broadcast %cst_273 : f32 to vector<32x256xf32>
    %590 = arith.mulf %588, %589 : vector<32x256xf32>
    %591 = math.floor %590 : vector<32x256xf32>
    %cst_274 = arith.constant 2.000000e+00 : f32
    %592 = vector.broadcast %cst_274 : f32 to vector<32x256xf32>
    %593 = arith.mulf %592, %591 : vector<32x256xf32>
    %594 = arith.subf %586, %593 : vector<32x256xf32>
    %595 = math.absf %594 : vector<32x256xf32>
    %596 = math.absf %586 : vector<32x256xf32>
    %cst_275 = arith.constant 1.000000e+00 : f32
    %597 = vector.broadcast %cst_275 : f32 to vector<32x256xf32>
    %598 = arith.addf %597, %596 : vector<32x256xf32>
    %599 = arith.divf %586, %598 : vector<32x256xf32>
    %cst_276 = arith.constant 0.000000e+00 : f32
    %600 = vector.broadcast %cst_276 : f32 to vector<32x256xf32>
    %601 = arith.cmpf oge, %586, %600 : vector<32x256xf32>
    %602 = arith.select %601, %595, %599 : vector<32x256xi1>, vector<32x256xf32>
    %603 = arith.addf %602, %558 : vector<32x256xf32>
    %c3_277 = arith.constant 3 : index
    %c0_278 = arith.constant 0 : index
    %c0_279 = arith.constant 0 : index
    %604 = vector.load %arg3[%c3_277, %c0_278, %c0_279] : memref<5x32x32xf32, #tpu.memory_space<vmem>>, vector<1x32x32xf32>
    %605 = vector.shape_cast %604 : vector<1x32x32xf32> to vector<32x32xf32>
    %cst_280 = arith.constant dense<0.000000e+00> : vector<32x256xf32>
    %606 = tpu.matmul %605, %603, %cst_280 {dimension_numbers = #tpu.dot_dimension_numbers<[1], [0], [0], [1], [0, 0, 1, 1], [], []>} : vector<32x32xf32>, vector<32x256xf32>, vector<32x256xf32> -> vector<32x256xf32>
    %c4_281 = arith.constant 4 : index
    %c0_282 = arith.constant 0 : index
    %c0_283 = arith.constant 0 : index
    %607 = vector.load %arg4[%c4_281, %c0_282, %c0_283] : memref<6x32x256xf32, #tpu.memory_space<vmem>>, vector<1x32x256xf32>
    %608 = vector.shape_cast %607 : vector<1x32x256xf32> to vector<32x256xf32>
    %609 = arith.addf %606, %608 : vector<32x256xf32>
    %cst_284 = arith.constant 1.000000e+00 : f32
    %610 = vector.broadcast %cst_284 : f32 to vector<32x256xf32>
    %611 = arith.addf %609, %610 : vector<32x256xf32>
    %cst_285 = arith.constant 5.000000e-01 : f32
    %612 = vector.broadcast %cst_285 : f32 to vector<32x256xf32>
    %613 = arith.mulf %611, %612 : vector<32x256xf32>
    %614 = math.floor %613 : vector<32x256xf32>
    %cst_286 = arith.constant 2.000000e+00 : f32
    %615 = vector.broadcast %cst_286 : f32 to vector<32x256xf32>
    %616 = arith.mulf %615, %614 : vector<32x256xf32>
    %617 = arith.subf %609, %616 : vector<32x256xf32>
    %618 = math.absf %617 : vector<32x256xf32>
    %619 = math.absf %609 : vector<32x256xf32>
    %cst_287 = arith.constant 1.000000e+00 : f32
    %620 = vector.broadcast %cst_287 : f32 to vector<32x256xf32>
    %621 = arith.addf %620, %619 : vector<32x256xf32>
    %622 = arith.divf %609, %621 : vector<32x256xf32>
    %cst_288 = arith.constant 0.000000e+00 : f32
    %623 = vector.broadcast %cst_288 : f32 to vector<32x256xf32>
    %624 = arith.cmpf oge, %609, %623 : vector<32x256xf32>
    %625 = arith.select %624, %618, %622 : vector<32x256xi1>, vector<32x256xf32>
    %c4_289 = arith.constant 4 : index
    %c0_290 = arith.constant 0 : index
    %c0_291 = arith.constant 0 : index
    %626 = vector.load %arg3[%c4_289, %c0_290, %c0_291] : memref<5x32x32xf32, #tpu.memory_space<vmem>>, vector<1x32x32xf32>
    %627 = vector.shape_cast %626 : vector<1x32x32xf32> to vector<32x32xf32>
    %cst_292 = arith.constant dense<0.000000e+00> : vector<32x256xf32>
    %628 = tpu.matmul %627, %625, %cst_292 {dimension_numbers = #tpu.dot_dimension_numbers<[1], [0], [0], [1], [0, 0, 1, 1], [], []>} : vector<32x32xf32>, vector<32x256xf32>, vector<32x256xf32> -> vector<32x256xf32>
    %c5_293 = arith.constant 5 : index
    %c0_294 = arith.constant 0 : index
    %c0_295 = arith.constant 0 : index
    %629 = vector.load %arg4[%c5_293, %c0_294, %c0_295] : memref<6x32x256xf32, #tpu.memory_space<vmem>>, vector<1x32x256xf32>
    %630 = vector.shape_cast %629 : vector<1x32x256xf32> to vector<32x256xf32>
    %631 = arith.addf %628, %630 : vector<32x256xf32>
    %cst_296 = arith.constant 1.000000e+00 : f32
    %632 = vector.broadcast %cst_296 : f32 to vector<32x256xf32>
    %633 = arith.addf %631, %632 : vector<32x256xf32>
    %cst_297 = arith.constant 5.000000e-01 : f32
    %634 = vector.broadcast %cst_297 : f32 to vector<32x256xf32>
    %635 = arith.mulf %633, %634 : vector<32x256xf32>
    %636 = math.floor %635 : vector<32x256xf32>
    %cst_298 = arith.constant 2.000000e+00 : f32
    %637 = vector.broadcast %cst_298 : f32 to vector<32x256xf32>
    %638 = arith.mulf %637, %636 : vector<32x256xf32>
    %639 = arith.subf %631, %638 : vector<32x256xf32>
    %640 = math.absf %639 : vector<32x256xf32>
    %641 = math.absf %631 : vector<32x256xf32>
    %cst_299 = arith.constant 1.000000e+00 : f32
    %642 = vector.broadcast %cst_299 : f32 to vector<32x256xf32>
    %643 = arith.addf %642, %641 : vector<32x256xf32>
    %644 = arith.divf %631, %643 : vector<32x256xf32>
    %cst_300 = arith.constant 0.000000e+00 : f32
    %645 = vector.broadcast %cst_300 : f32 to vector<32x256xf32>
    %646 = arith.cmpf oge, %631, %645 : vector<32x256xf32>
    %647 = arith.select %646, %640, %644 : vector<32x256xi1>, vector<32x256xf32>
    %648 = arith.addf %647, %603 : vector<32x256xf32>
    %649 = vector.broadcast %1 : vector<32x1xf32> to vector<32x256xf32>
    %650 = arith.mulf %648, %649 : vector<32x256xf32>
    %cst_301 = arith.constant dense<0.000000e+00> : vector<256xf32>
    %651 = vector.multi_reduction <add>, %650, %cst_301 [0] : vector<32x256xf32> to vector<256xf32>
    %652 = vector.shape_cast %651 : vector<256xf32> to vector<1x256xf32>
    %c0_302 = arith.constant 0 : index
    %c768_303 = arith.constant 768 : index
    %653 = vector.load %arg6[%c0_302, %c768_303] : memref<1x1024xf32, #tpu.memory_space<vmem>>, vector<1x256xf32>
    tpu.vector_store %arg6[%c0_302, %c768_303], %652 {strides = array<i32>} : memref<1x1024xf32, #tpu.memory_space<vmem>>, vector<1x256xf32>,
    return
  }
  func.func @transform_0(%arg0: i32) -> (i32, i32) {
    %c0_i32 = arith.constant 0 : i32
    %c0_i32_0 = arith.constant 0 : i32
    return %c0_i32, %arg0 : i32, i32
  }
  func.func @transform_1(%arg0: i32) -> (i32, i32) {
    %c0_i32 = arith.constant 0 : i32
    %c0_i32_0 = arith.constant 0 : i32
    %c0_i32_1 = arith.constant 0 : i32
    return %c0_i32, %c0_i32_0 : i32, i32
  }
  func.func @transform_2(%arg0: i32) -> (i32, i32, i32) {
    %c0_i32 = arith.constant 0 : i32
    %c0_i32_0 = arith.constant 0 : i32
    %c0_i32_1 = arith.constant 0 : i32
    %c0_i32_2 = arith.constant 0 : i32
    return %c0_i32, %c0_i32_0, %c0_i32_1 : i32, i32, i32
  }
  func.func @transform_3(%arg0: i32) -> (i32, i32, i32) {
    %c0_i32 = arith.constant 0 : i32
    %c0_i32_0 = arith.constant 0 : i32
    %c0_i32_1 = arith.constant 0 : i32
    %c0_i32_2 = arith.constant 0 : i32
    return %c0_i32, %c0_i32_0, %c0_i32_1 : i32, i32, i32
  }
  func.func @transform_4(%arg0: i32) -> (i32, i32) {
    %c0_i32 = arith.constant 0 : i32
    %c0_i32_0 = arith.constant 0 : i32
    %c0_i32_1 = arith.constant 0 : i32
    return %c0_i32, %c0_i32_0 : i32, i32
  }
  func.func @transform_5(%arg0: i32) -> (i32, i32) {
    %c0_i32 = arith.constant 0 : i32
    %c0_i32_0 = arith.constant 0 : i32
    return %c0_i32, %arg0 : i32, i32
  }
}

</mosaic_0001>

<bundles_post_ra>
// kernel: resnet_st_forward.1
= control target key start
LH: loop header
LB: loop body
LE: loop exit
PB: predicated region body
PF: predicated region fallthrough
CT: control target
= control target key end

     0   :  { %10 = vsyncpa [#allocation3], 0  ;;  %s14605_s0 = inlined_call_operand.vmem [shape: f32[2,2048], index: 0, kind: input, shape index: {}]   ;;  %s14606_s1 = inlined_call_operand.vmem [shape: f32[32,2], index: 1, kind: input, shape index: {}]   ;;  %s14607_s2 = inlined_call_operand.hbm [shape: f32[5,32,32], index: 2, kind: input, shape index: {}]   ;;  %s14608_s3 = inlined_call_operand.hbm [shape: f32[6,32,256], index: 3, kind: input, shape index: {}]   ;;  %s14609_s4 = inlined_call_operand.vmem [shape: f32[32,1], index: 4, kind: input, shape index: {}]   ;;  %s14610_s5 = inlined_call_operand.hbm [shape: f32[1,2048], index: 5, kind: output, shape index: {}]  }
   0x1   :  { %11 = vsyncpa [#allocation6], 0 }
   0x2   :  { %12 = vsyncpa [#allocation4], 0 }
   0x3   :  { %14 = vsyncpa [#allocation4 + $0x1], 0  ;;  %s8261_s18 = smov 0   ;;  %s8263_s19 = smov 0  }
   0x4   :  { %s8265_s20 = smov 0   ;;  %s8267_s21 = smov 0  }
   0x5 LB: > { %s8282_s22 = sadd.s32 4294967295, %s8221_s21   ;;  %s7457_s23 = sadd.s32 4294967294, %s8221_s21   ;;  %s8221_s21 = sphi %s8267_s21, %s15493_s21   ;;  %s8217_s20 = sphi %s8265_s20, %s15492_s20   ;;  %s8213_s19 = sphi %s8263_s19, %s15491_s19   ;;  %s8209_s18 = sphi %s8261_s18, %s15490_s18  }
   0x6   : > { %s8286_s24 = sadd.s32 1, %s8221_s21   ;;  %s137_s25 = sadd.s32 1, %s8217_s20 }
   0x7   : > { %s134_s26 = ssub.s32 %s8221_s21, %s8286_s24  ;;  %p147_p0 = scmp.ne.s32.totalorder %s8217_s20, %s8213_s19 }
   0x8   : > { %p135_p1 = scmp.eq.s32.totalorder %s134_s26, 0  ;;  %p148_p2 = scmp.eq.s32.totalorder %s8282_s22, 1 }
   0x9   : > { %p153_p3 = scmp.ne.s32.totalorder %s8213_s19, %s8209_s18  ;;  %p154_p4 = scmp.eq.s32.totalorder %s7457_s23, 1 }
   0xa   : > { %s8297_s27 = scalar_select %p135_p1, %s8217_s20, %s137_s25  }
   0xb   : > { %p8299_p5 = por %p148_p2, %p147_p0  ;;  %p8303_p6 = por %p154_p4, %p153_p3 }
   0xc   : > { %p7458_p7 = scmp.ge.s32.totalorder %s8221_s21, 1  ;;  %p161_p8 = scmp.lt.s32.totalorder %s8221_s21, 3 }
   0xd   : > { %p7653_p9 = scmp.eq.s32.totalorder %s8282_s22, 0  ;;  %s175_s8 = sshll.u32 %s14607_s2, 4  ;;  %s176_s8 = int_to_ptr.hbm [resolvable:$true] %s175_s8 }
   0xe   : > { %p8310_p10 = pnand %p7458_p7, %p161_p8  ;;  %s8223_s9 = smov [#allocation2]  }
   0xf   : > { %s177_s10 = sshll.u32 %s8223_s9, 4  ;;  %s189_s13 = sshll.u32 %s14608_s3, 4  ;;  %s178_s10 = int_to_ptr.vmem [resolvable:$true] %s177_s10  ;;  %s190_s13 = int_to_ptr.hbm [resolvable:$true] %s189_s13 }
  0x10   : > { %p7642_p11 = pneg %p8310_p10  ;;  %s8224_s14 = smov 128  }
  0x11   : > { %s8225_s15 = smov 8   ;;  %s8226_s16 = smov [#allocation5]  }
  0x12   : > { %p7643_p12 = pnand %p7653_p9, %p7642_p11  ;;  %s191_s17 = sshll.u32 %s8226_s16, 4  ;;  %s192_s17 = int_to_ptr.vmem [resolvable:$true] %s191_s17 }
  0x13   : > { %s8227_s23 = smov 256   ;;  %s8228_s25 = smov 16  }
  0x14   : > { %7645 = dma.hbm_to_vmem [thread:$0]  (!%p7643_p12), %s176_s8, 2560, %s178_s10, [#allocation3], %s8224_s14, %s8224_s14, %s8225_s15  }
  0x15   : > { %7648 = dma.hbm_to_vmem [thread:$0]  (!%p7643_p12), %s190_s13, 6144, %s192_s17, [#allocation6], %s8227_s23, %s8227_s23, %s8228_s25  }
  0x16   : > { %219 = sbr.rel (%p8310_p10) target bundleno = 3170 (0xc62), region = 40 }
  0x1b   : > { %8196 = dma.done.wait (%p7653_p9), [#allocation3], 2560  }
  0x1c   : > { %8198 = vsyncadd (%p7653_p9), [#allocation3], 4294964736 }
  0x1d   : > { %8200 = dma.done.wait (%p7653_p9), [#allocation6], 6144  }
  0x1e   : > { %8202 = vsyncadd (%p7653_p9), [#allocation6], 4294961152  ;;  %v8229_v0 = vmov 1   ;;  %v8230_v1 = vmov 0   ;;  %v263_v2 = vld [vmem:[%s14606_s1 + $0x18] sm:$0xff]  ;;  %v262_v3 = vld [vmem:[%s14606_s1 + $0x10] sm:$0xff] }
  0x1f   : > { %7699 = vset.pattern.permute.xlu1 %v8229_v0  ;;  %7698 = vset.pattern.permute.xlu0 %v8230_v1  ;;  %v261_v4 = vld [vmem:[%s14606_s1 + $0x8] sm:$0xff]  ;;  %v260_v5 = vld [vmem:[%s14606_s1] sm:$0xff]  ;;  %v266_v7 = vld [vmem:[%s14609_s4 + $0x10] sm:$0xff]  ;;  %s8353_s16 = sshll.u32 %s8282_s22, 3  ;;  %s250_s9 = sand.u32 1, %s8213_s19  }
  0x20   : > { %7701 = vset.pattern.permute.xlu2 %v8229_v0  ;;  %364 = vperm.xlu1 %7699, %v263_v2   ;;  %v264_v6 = vld [vmem:[%s14609_s4] sm:$0xff]  ;;  %p254_p13 = scmp.lt.s32.totalorder %s8353_s16, 15  ;;  %v280_v19 = vld [vmem:[#allocation5 + $0x30] sm:$0xff]  ;;  %v281_v20 = vld [vmem:[#allocation5 + $0x38] sm:$0xff]  ;;  %s11327_s10 = sshll.u32 %s250_s9, 3 }
  0x21   : > { %306 = vperm.xlu0 %7698, %v263_v2   ;;  %360 = vperm.xlu2 %7701, %v262_v3   ;;  %v278_v34 = vld [vmem:[#allocation5 + $0x20] sm:$0xff]  ;;  %v279_v35 = vld [vmem:[#allocation5 + $0x28] sm:$0xff]  ;;  %s11371_s11 = scalar_lea.vmem [#allocation7], %s11327_s10  ;;  %s7371_s14 = scalar_lea.hbm %s14610_s5, %s8353_s16 }
  0x22   : > { %s255_s17 = scalar_select %p254_p13, %s8353_s16, 15  ;;  %v274_v51 = vld [vmem:[#allocation5] sm:$0xff] }
  0x23   : > { %s7373_s15 = sshll.u32 %s11371_s11, 4  ;;  %s8171_s22 = scalar_lea.hbm %s14610_s5, 16  ;;  %s7374_s15 = int_to_ptr.vmem [resolvable:$true] %s7373_s15 }
  0x24   : > { %s7467_s23 = sshll.u32 %s255_s17, 1  ;;  %s7375_s17 = sshll.u32 %s7371_s14, 4  ;;  %s7376_s17 = int_to_ptr.hbm [resolvable:$true] %s7375_s17 }
  0x25   : > { %s8360_s30 = scalar_lea.vmem %s14605_s0, %s7467_s23  ;;  %s7361_s23 = scalar_lea.sflag [#allocation4], %s250_s9 }
  0x26   : > { %v268_v8 = vld [vmem:[%s8360_s30] sm:$0xf]  ;;  %s8165_s25 = sshra.s32 %s7376_s17, 4  ;;  %s8166_s25 = int_to_ptr.hbm [resolvable:$true] %s8165_s25 }
  0x27   : > { %v283_v9 = vperm.slane %v268_v8, 0  ;;  %v345_v10 = vperm.slane %v268_v8, 1  ;;  %v284_v11 = vperm.slane %v268_v8, 2  ;;  %v346_v12 = vperm.slane %v268_v8, 3  ;;  %s8167_s16 = scalar_lea.hbm %s8166_s25, 8  ;;  %p8172_p3 = scmp.lt.s32.totalorder %s8166_s25, %s14610_s5 }
  0x28   : > { %7700 = vset.pattern.permute.xlu1 %v8230_v1  ;;  %p8168_p0 = scmp.ne.s32.totalorder %s8166_s25, %s8167_s16  ;;  %p8173_p4 = scmp.lt.s32.totalorder %s8171_s22, %s8167_s16 }
  0x29   : > { %301 = vperm.xlu0 %7698, %v262_v3   ;;  %296 = vperm.xlu1 %7700, %v261_v4   ;;  %v8365_v14 = vperm.slane %v283_v9, 0  ;;  %v8367_v15 = vperm.slane %v345_v10, 1  ;;  %v8369_v16 = vperm.slane %v284_v11, 0  ;;  %v8371_v17 = vperm.slane %v346_v12, 1 }
  0x2a   : > { %7702 = vset.pattern.permute.xlu2 %v8230_v1  ;;  %p8169_p1 = pnand %p8168_p0, %p8299_p5  ;;  %p8174_p7 = por %p8173_p4, %p8172_p3 }
  0x2b   : > { %291 = vperm.xlu2 %7702, %v260_v5  }
  0x2c   : > { %p8170_p2 = pneg %p8169_p1 }
  0x2e   : > { %p8175_p8 = pnand %p8174_p7, %p8170_p2 }
  0x31   : > { %7703 = vset.pattern.permute.xlu0 %v8229_v0  ;;  %7704 = vset.pattern.permute.xlu1 %v8229_v0 }
  0x32   : > { %356 = vperm.xlu0 %7703, %v261_v4   ;;  %352 = vperm.xlu1 %7704, %v260_v5  }
  0x33   : > { %2049 = vperm.xlu2 %7702, %v264_v6  }
  0x3a   : > { %7706 = vset.pattern.permute.xlu0 %v8230_v1  ;;  %7705 = vset.pattern.permute.xlu1 %v8230_v1 }
  0x3b   : > { %2059 = vperm.xlu2 %7702, %v266_v7  }
  0x7b   : > { %v8383_v25 = vpop.permute.xlu2 %360 }
  0x7c   : > { %14771 = vst [vmem:[#allocation11_spill] sm:$0xff] %v8383_v25  ;;  %v371_v49 = vmul.f32 %v8383_v25, %v8367_v15  ;;  %v372_v50 = vmul.f32 %v8383_v25, %v8371_v17 }
  0x85   : > { %v8399_v41 = vpop.permute.xlu2 %291 }
  0x86   : > { %14773 = vst [vmem:[#allocation13_spill] sm:$0xff] %v8399_v41  ;;  %v309_v46 = vmul.f32 %v8399_v41, %v8365_v14 }
  0x88   : > { %v8418_v56 = vadd.f32 %v309_v46, %v274_v51 }
  0x92   : > { %v8373_v18 = vpop.permute.xlu1 %364 }
  0x93   : > { %v8363_v13 = vpop.permute.xlu0 %306  ;;  %v373_v22 = vmul.f32 %v8373_v18, %v8367_v15  ;;  %v374_v24 = vmul.f32 %v8373_v18, %v8371_v17 }
  0x94   : > { %v315_v21 = vmul.f32 %v8363_v13, %v8365_v14  ;;  %v316_v23 = vmul.f32 %v8363_v13, %v8369_v16 }
  0x96   : > { %v323_v26 = vadd.f32 %v315_v21, %v280_v19  ;;  %v324_v27 = vadd.f32 %v316_v23, %v281_v20  ;;  %v276_v20 = vld [vmem:[#allocation5 + $0x10] sm:$0xff] }
  0x98   : > { %v8385_v28 = vadd.f32 %v373_v22, %v323_v26  ;;  %v8387_v29 = vadd.f32 %v374_v24, %v324_v27 }
  0x9a   : > { %v409_v31 = vadd.f32 1.0, %v8385_v28  ;;  %v457_v32 = vand.u32 2147483647, %v8385_v28  ;;  %v410_v33 = vadd.f32 1.0, %v8387_v29  ;;  %v458_v36 = vand.u32 2147483647, %v8387_v29 }
  0x9b   : > { %v8389_v30 = vpop.permute.xlu0 %301  ;;  %v8405_v47 = vpop.permute.xlu1 %296  ;;  %vm593_vm2 = vcmp.ge.f32.partialorder %v8385_v28, 0.0  ;;  %vm594_vm4 = vcmp.ge.f32.partialorder %v8387_v29, 0.0 }
  0x9c   : > { %14772 = vst [vmem:[#allocation12_spill] sm:$0xff] %v8389_v30  ;;  %v313_v37 = vmul.f32 %v8389_v30, %v8365_v14  ;;  %v314_v38 = vmul.f32 %v8389_v30, %v8369_v16  ;;  %v417_v39 = vmul.f32 0.5, %v409_v31  ;;  %v465_v40 = vadd.f32 1.0, %v457_v32 }
  0x9d   : > { %v418_v42 = vmul.f32 0.5, %v410_v33  ;;  %v8401_v43 = vadd.f32 1.0, %v458_v36  ;;  %14774 = vst [vmem:[#allocation14_spill] sm:$0xff] %v8405_v47  ;;  %v311_v55 = vmul.f32 %v8405_v47, %v8365_v14  ;;  %v8424_v60 = vmul.f32 %v8405_v47, %v8369_v16 }
  0x9e   : > { %v321_v44 = vadd.f32 %v313_v37, %v278_v34  ;;  %v322_v45 = vadd.f32 %v314_v38, %v279_v35  ;;  %7707 = vrcp.f32 %v465_v40  ;;  %v425_v48 = vfloor.f32 %v417_v39 }
  0x9f   : > { %7709 = vrcp.f32 %v8401_v43  ;;  %v426_v52 = vfloor.f32 %v418_v42  ;;  %vm562_vm0 = vweird.f32 %v465_v40  ;;  %v566_v62 = vand.u32 2147483647, %v465_v40 }
  0xa0   : > { %v8412_v53 = vadd.f32 %v371_v49, %v321_v44  ;;  %v8414_v54 = vadd.f32 %v372_v50, %v322_v45  ;;  %v433_v57 = vmul.f32 2.0, %v425_v48  ;;  %v568_v63 = vand.u32 2147483648, %v465_v40 }
  0xa1   : > { %v434_v4 = vmul.f32 2.0, %v426_v52  ;;  %vm577_vm1 = vweird.f32 %v8401_v43  ;;  %v581_v8 = vand.u32 2147483647, %v8401_v43  ;;  %v583_v12 = vand.u32 2147483648, %v8401_v43 }
  0xa2   : > { %v407_v58 = vadd.f32 1.0, %v8412_v53  ;;  %v455_v59 = vand.u32 2147483647, %v8412_v53  ;;  %v456_v0 = vand.u32 2147483647, %v8414_v54  ;;  %v408_v6 = vadd.f32 1.0, %v8414_v54 }
  0xa3   : > { %v441_v10 = vsub.f32 %v8385_v28, %v433_v57  ;;  %v442_v26 = vsub.f32 %v8387_v29, %v434_v4  ;;  %v319_v32 = vadd.f32 %v311_v55, %v276_v20  ;;  %vm567_vm6 = vcmp.eq.f32.partialorder %v566_v62, 8.507059e+37 }
  0xa4   : > { %v7708_v61 = vpop.eup %7707  ;;  %v8427_v2 = vpop.permute.xlu0 %356  ;;  %v415_v5 = vmul.f32 0.5, %v407_v58  ;;  %v8433_v9 = vadd.f32 1.0, %v455_v59  ;;  %v8437_v19 = vadd.f32 1.0, %v456_v0  ;;  %v416_v27 = vmul.f32 0.5, %v408_v6  ;;  %v277_v58 = vld [vmem:[#allocation5 + $0x18] sm:$0xff] }
  0xa5   : > { %v7710_v1 = vpop.eup %7709  ;;  %14775 = vst [vmem:[#allocation15_spill] sm:$0xff] %v8427_v2  ;;  %v558_v3 = vmul.f32 %v7708_v61, %v465_v40  ;;  %v369_v23 = vmul.f32 %v8427_v2, %v8367_v15  ;;  %vm563_vm3 = vweird.f32 %v7708_v61  ;;  %v569_v34 = vor.u32 1.1754944e-38, %v568_v63  ;;  %v8463_v59 = vpop.permute.xlu1 %352 }
  0xa6   : > { %v573_v7 = vmul.f32 %v7710_v1, %v8401_v43  ;;  %v423_v22 = vfloor.f32 %v415_v5  ;;  %7711 = vrcp.f32 %v8433_v9  ;;  %vm578_vm5 = vweird.f32 %v7710_v1  ;;  %vm564_vm8 = vmor %vm562_vm0, %vm563_vm3  ;;  %14778 = vst [vmem:[#allocation16_spill] sm:$0xff] %v8463_v59 }
  0xa7   : > { %v559_v11 = vsub.f32 1.0, %v558_v3  ;;  %7713 = vrcp.f32 %v8437_v19  ;;  %vm8446_vm7 = vcmp.eq.f32.partialorder %v581_v8, 8.507059e+37  ;;  %v584_v37 = vor.u32 1.1754944e-38, %v583_v12  ;;  %vm579_vm9 = vmor %vm577_vm1, %vm578_vm5 }
  0xa8   : > { %v574_v21 = vsub.f32 1.0, %v573_v7  ;;  %v431_v38 = vmul.f32 2.0, %v423_v22  ;;  %v8451_v39 = vadd.f32 %v369_v23, %v319_v32  ;;  %v449_v42 = vand.u32 2147483647, %v441_v10 }
  0xa9   : > { %v560_v24 = vmul.f32 %v7708_v61, %v559_v11  ;;  %v450_v45 = vand.u32 2147483647, %v442_v26  ;;  %v424_v46 = vfloor.f32 %v416_v27  ;;  %vm532_vm10 = vweird.f32 %v8433_v9 }
  0xaa   : > { %v575_v31 = vmul.f32 %v7710_v1, %v574_v21  ;;  %v536_v40 = vand.u32 2147483647, %v8433_v9  ;;  %v538_v57 = vand.u32 2147483648, %v8433_v9  ;;  %v439_v62 = vsub.f32 %v8412_v53, %v431_v38 }
  0xab   : > { %v561_v33 = vadd.f32 %v7708_v61, %v560_v24  ;;  %v405_v63 = vadd.f32 1.0, %v8451_v39  ;;  %v453_v0 = vand.u32 2147483647, %v8451_v39  ;;  %v432_v4 = vmul.f32 2.0, %v424_v46 }
  0xac   : > { %v576_v36 = vadd.f32 %v7710_v1, %v575_v31  ;;  %v7712_v48 = vpop.eup %7711  ;;  %v320_v8 = vadd.f32 %v8424_v60, %v277_v58  ;;  %v367_v12 = vmul.f32 %v8463_v59, %v8367_v15  ;;  %v551_v20 = vand.u32 2147483647, %v8437_v19  ;;  %v275_v58 = vld [vmem:[#allocation5 + $0x8] sm:$0xff] }
  0xad   : > { %v565_v44 = vsel %vm564_vm8, %v7708_v61, %v561_v33  ;;  %v528_v55 = vmul.f32 %v7712_v48, %v8433_v9  ;;  %v7714_v43 = vpop.eup %7713  ;;  %vm533_vm11 = vweird.f32 %v7712_v48  ;;  %v8474_v7 = vadd.f32 1.0, %v453_v0 }
  0xae   : > { %v570_v49 = vsel %vm567_vm6, %v569_v34, %v565_v44  ;;  %v580_v50 = vsel %vm579_vm9, %v7710_v1, %v576_v36  ;;  %v543_v5 = vmul.f32 %v7714_v43, %v8437_v19  ;;  %v553_v21 = vand.u32 2147483648, %v8437_v19  ;;  %vm534_vm13 = vmor %vm532_vm10, %vm533_vm11 }
  0xaf   : > { %v571_v51 = vmul.f32 %v570_v49, %v8385_v28  ;;  %v585_v52 = vsel %vm8446_vm7, %v584_v37, %v580_v50  ;;  %v529_v3 = vsub.f32 1.0, %v528_v55  ;;  %v370_v28 = vmul.f32 %v8427_v2, %v8371_v17 }
  0xb0   : > { %v586_v61 = vmul.f32 %v585_v52, %v8387_v29  ;;  %v544_v11 = vsub.f32 1.0, %v543_v5  ;;  %v413_v29 = vmul.f32 0.5, %v405_v63  ;;  %7715 = vrcp.f32 %v8474_v7 }
  0xb1   : > { %v601_v1 = vsel %vm593_vm2, %v449_v42, %v571_v51  ;;  %v530_v10 = vmul.f32 %v7712_v48, %v529_v3  ;;  %vm548_vm12 = vweird.f32 %v7714_v43  ;;  %v8484_v60 = vadd.f32 %v370_v28, %v320_v8 }
  0xb2   : > { %641 = vmatpush.msra.mxu0 %v601_v1  ;;  %v602_v6 = vsel %vm594_vm4, %v450_v45, %v586_v61  ;;  %v545_v23 = vmul.f32 %v7714_v43, %v544_v11  ;;  %vm537_vm14 = vcmp.eq.f32.partialorder %v536_v40, 8.507059e+37  ;;  %v539_v24 = vor.u32 1.1754944e-38, %v538_v57 }
  0xb3   : > { %670 = vmatpush.msra.mxu1 %v602_v6  ;;  %v531_v22 = vadd.f32 %v7712_v48, %v530_v10  ;;  %vm547_vm15 = vweird.f32 %v8437_v19  ;;  %v8491_v26 = vadd.f32 %v367_v12, %v8418_v56  ;;  %v447_v27 = vand.u32 2147483647, %v439_v62 }
  0xb4   : > { %v440_v32 = vsub.f32 %v8414_v54, %v432_v4  ;;  %v546_v33 = vadd.f32 %v7714_v43, %v545_v23  ;;  %vm549_vm0 = vmor %vm547_vm15, %vm548_vm12  ;;  %v554_v35 = vor.u32 1.1754944e-38, %v553_v21  ;;  %v421_v36 = vfloor.f32 %v413_v29 }
  0xb5   : > { %v535_v31 = vsel %vm534_vm13, %v7712_v48, %v531_v22  ;;  %v454_v37 = vand.u32 2147483647, %v8484_v60  ;;  %vm552_vm1 = vcmp.eq.f32.partialorder %v551_v20, 8.507059e+37  ;;  %v406_v19 = vadd.f32 1.0, %v8484_v60 }
  0xb6   : > { %v540_v34 = vsel %vm537_vm14, %v539_v24, %v535_v31  ;;  %v550_v38 = vsel %vm549_vm0, %v7714_v43, %v546_v33  ;;  %v7716_v42 = vpop.eup %7715  ;;  %vm591_vm2 = vcmp.ge.f32.partialorder %v8412_v53, 0.0  ;;  %v451_v45 = vand.u32 2147483647, %v8491_v26 }
  0xb7   : > { %v541_v9 = vmul.f32 %v540_v34, %v8412_v53  ;;  %v555_v56 = vsel %vm552_vm1, %v554_v35, %v550_v38  ;;  %v462_v44 = vadd.f32 1.0, %v454_v37  ;;  %v448_v48 = vand.u32 2147483647, %v440_v32 }
  0xb8   : > { %v556_v49 = vmul.f32 %v555_v56, %v8414_v54  ;;  %v498_v50 = vmul.f32 %v7716_v42, %v8474_v7  ;;  %vm592_vm3 = vcmp.ge.f32.partialorder %v8414_v54, 0.0  ;;  %v429_v40 = vmul.f32 2.0, %v421_v36  ;;  %v2112_v36 = vld [vmem:[#allocation5 + $0x38] sm:$0xff] }
  0xb9   : > { %v599_v46 = vsel %vm591_vm2, %v447_v27, %v541_v9  ;;  %7717 = vrcp.f32 %v462_v44  ;;  %v310_v51 = vmul.f32 %v8399_v41, %v8369_v16  ;;  %v414_v55 = vmul.f32 0.5, %v406_v19 }
  0xba   : > { %642 = vmatpush.msra.mxu0 %v599_v46  ;;  %v600_v52 = vsel %vm592_vm3, %v448_v48, %v556_v49  ;;  %v499_v53 = vsub.f32 1.0, %v498_v50  ;;  %v403_v57 = vadd.f32 1.0, %v8491_v26  ;;  %v508_v43 = vand.u32 2147483648, %v8474_v7 }
  0xbb   : > { %671 = vmatpush.msra.mxu1 %v600_v52  ;;  %v8506_v61 = vadd.f32 1.0, %v451_v45  ;;  %vm503_vm4 = vweird.f32 %v7716_v42  ;;  %v506_v54 = vand.u32 2147483647, %v8474_v7  ;;  %v437_v63 = vsub.f32 %v8451_v39, %v429_v40 }
  0xbc   : > { %v500_v62 = vmul.f32 %v7716_v42, %v499_v53  ;;  %vm502_vm5 = vweird.f32 %v8474_v7  ;;  %v318_v0 = vadd.f32 %v310_v51, %v275_v58  ;;  %v422_v3 = vfloor.f32 %v414_v55 }
  0xbd   : > { %7719 = vrcp.f32 %v8506_v61  ;;  %v411_v4 = vmul.f32 0.5, %v403_v57  ;;  %v368_v5 = vmul.f32 %v8463_v59, %v8371_v17  ;;  %vm504_vm6 = vmor %vm502_vm5, %vm503_vm4  ;;  %v509_v8 = vor.u32 1.1754944e-38, %v508_v43 }
  0xbe   : > { %v501_v1 = vadd.f32 %v7716_v42, %v500_v62  ;;  %vm507_vm7 = vcmp.eq.f32.partialorder %v506_v54, 8.507059e+37  ;;  %v445_v28 = vand.u32 2147483647, %v437_v63  ;;  %v521_v20 = vand.u32 2147483647, %v462_v44 }
  0xbf   : > { %v7718_v6 = vpop.eup %7717  ;;  %v8514_v21 = vadd.f32 %v368_v5, %v318_v0  ;;  %v430_v29 = vmul.f32 2.0, %v422_v3  ;;  %v419_v23 = vfloor.f32 %v411_v4  ;;  %vm589_vm8 = vcmp.ge.f32.partialorder %v8451_v39, 0.0 }
  0xc0   : > { %v505_v10 = vsel %vm504_vm6, %v7716_v42, %v501_v1  ;;  %v513_v11 = vmul.f32 %v7718_v6, %v462_v44  ;;  %vm518_vm9 = vweird.f32 %v7718_v6  ;;  %v523_v27 = vand.u32 2147483648, %v462_v44 }
  0xc1   : > { %v510_v12 = vsel %vm507_vm7, %v509_v8, %v505_v10  ;;  %v452_v31 = vand.u32 2147483647, %v8514_v21  ;;  %v404_v35 = vadd.f32 1.0, %v8514_v21  ;;  %vm517_vm10 = vweird.f32 %v462_v44  ;;  %v2104_v44 = vld [vmem:[%s8360_s30 + $0x4] sm:$0xf] }
  0xc2   : > { %v511_v7 = vmul.f32 %v510_v12, %v8451_v39  ;;  %v514_v22 = vsub.f32 1.0, %v513_v11  ;;  %vm8521_vm11 = vcmp.eq.f32.partialorder %v521_v20, 8.507059e+37  ;;  %v438_v39 = vsub.f32 %v8484_v60, %v430_v29  ;;  %vm519_vm12 = vmor %vm517_vm10, %vm518_vm9 }
  0xc3   : > { %v7720_v24 = vpop.eup %7719  ;;  %v8525_v37 = vadd.f32 1.0, %v452_v31  ;;  %v427_v38 = vmul.f32 2.0, %v419_v23  ;;  %v524_v42 = vor.u32 1.1754944e-38, %v523_v27  ;;  %v476_v56 = vand.u32 2147483647, %v8506_v61 }
  0xc4   : > { %v597_v32 = vsel %vm589_vm8, %v445_v28, %v511_v7  ;;  %v515_v33 = vmul.f32 %v7718_v6, %v514_v22  ;;  %v468_v34 = vmul.f32 %v7720_v24, %v8506_v61  ;;  %v478_v45 = vand.u32 2147483648, %v8506_v61 }
  0xc5   : > { %643 = vmatpush.msra.mxu0 %v597_v32  ;;  %7721 = vrcp.f32 %v8525_v37  ;;  %vm473_vm13 = vweird.f32 %v7720_v24  ;;  %v412_v49 = vmul.f32 0.5, %v404_v35  ;;  %vm472_vm14 = vweird.f32 %v8506_v61  ;;  %v2111_v35 = vld [vmem:[#allocation5 + $0x30] sm:$0xff] }
  0xc6   : > { %v516_v9 = vadd.f32 %v7718_v6, %v515_v33  ;;  %v469_v19 = vsub.f32 1.0, %v468_v34  ;;  %v446_v40 = vand.u32 2147483647, %v438_v39  ;;  %v435_v52 = vsub.f32 %v8491_v26, %v427_v38  ;;  %vm474_vm0 = vmor %vm472_vm14, %vm473_vm13 }
  0xc7   : > { %v2114_v55 = vperm.slane %v2104_v44, 0  ;;  %v2115_v57 = vperm.slane %v2104_v44, 2  ;;  %vm590_vm15 = vcmp.ge.f32.partialorder %v8484_v60, 0.0  ;;  %v479_v58 = vor.u32 1.1754944e-38, %v478_v45 }
  0xc8   : > { %v520_v46 = vsel %vm519_vm12, %v7718_v6, %v516_v9  ;;  %v470_v48 = vmul.f32 %v7720_v24, %v469_v19  ;;  %vm477_vm1 = vcmp.eq.f32.partialorder %v476_v56, 8.507059e+37  ;;  %v420_v54 = vfloor.f32 %v412_v49  ;;  %v604_v9 = vld [vmem:[#allocation2 + $0x8] sm:$0xff] }
  0xc9   : > { %v525_v50 = vsel %vm8521_vm11, %v524_v42, %v520_v46  ;;  %v2152_v0 = vperm.slane %v2104_v44, 1  ;;  %v2153_v1 = vperm.slane %v2104_v44, 3  ;;  %v443_v3 = vand.u32 2147483647, %v435_v52  ;;  %v605_v46 = vld [vmem:[#allocation2 + $0x10] sm:$0xff] }
  0xca   : > { %v526_v51 = vmul.f32 %v525_v50, %v8484_v60  ;;  %v471_v53 = vadd.f32 %v7720_v24, %v470_v48  ;;  %v8541_v6 = vperm.slane %v2114_v55, 0  ;;  %v8543_v8 = vperm.slane %v2115_v57, 0  ;;  %v603_v60 = vld [vmem:[#allocation2] sm:$0xff]  ;;  %v606_v48 = vld [vmem:[#allocation2 + $0x18] sm:$0xff] }
  0xcb   : > { %v7722_v63 = vpop.eup %7721  ;;  %vm587_vm2 = vcmp.ge.f32.partialorder %v8491_v26, 0.0  ;;  %vm14684_vm3 = vcmask 261120   ;;  %v428_v11 = vmul.f32 2.0, %v420_v54  ;;  %v8546_v12 = vperm.slane %v2152_v0, 1  ;;  %v3864_v0 = vld [vmem:[#allocation5 + $0x38] sm:$0xff] }
  0xcc   : > { %v598_v43 = vsel %vm590_vm15, %v446_v40, %v526_v51  ;;  %v475_v62 = vsel %vm474_vm0, %v7720_v24, %v471_v53  ;;  %v483_v5 = vmul.f32 %v7722_v63, %v8525_v37  ;;  %14781 = vst [vmem:[#allocation17_spill] sm:$0xff] %v8541_v6  ;;  %v8548_v20 = vperm.slane %v2153_v1, 1 }
  0xcd   : > { %672 = vmatpush.msra.mxu1 %v598_v43  ;;  %v480_v61 = vsel %vm477_vm1, %v479_v58, %v475_v62  ;;  %14782 = vst [vmem:[#allocation18_spill] sm:$0xff] %v8543_v8  ;;  %v493_v7 = vand.u32 2147483648, %v8525_v37  ;;  %vm488_vm4 = vweird.f32 %v7722_v63  ;;  %v491_v22 = vand.u32 2147483647, %v8525_v37 }
  0xce   : > { %v481_v4 = vmul.f32 %v480_v61, %v8491_v26  ;;  %v484_v28 = vsub.f32 1.0, %v483_v5  ;;  %14783 = vst [vmem:[#allocation19_spill] sm:$0xff] %v8546_v12  ;;  %v2126_v26 = vmul.f32 %v8541_v6, %v8363_v13  ;;  %v2127_v23 = vmul.f32 %v8543_v8, %v8363_v13  ;;  %v608_v5 = vld [vmem:[#allocation5 + $0x40] sm:$0xff] }
  0xcf   : > { %14784 = vst [vmem:[#allocation20_spill] sm:$0xff] %v8548_v20  ;;  %v436_v24 = vsub.f32 %v8514_v21, %v428_v11  ;;  %vm487_vm5 = vweird.f32 %v8525_v37  ;;  %v2164_v31 = vmul.f32 %v8546_v12, %v8373_v18  ;;  %v2165_v32 = vmul.f32 %v8548_v20, %v8373_v18 }
  0xd0   : > { %v595_v10 = vsel %vm587_vm2, %v443_v3, %v481_v4  ;;  %v485_v29 = vmul.f32 %v7722_v63, %v484_v28  ;;  %vm489_vm6 = vmor %vm487_vm5, %vm488_vm4  ;;  %v494_v33 = vor.u32 1.1754944e-38, %v493_v7  ;;  %vm492_vm7 = vcmp.eq.f32.partialorder %v491_v22, 8.507059e+37  ;;  %v5608_v22 = vld [vmem:[%s8360_s30 + $0xc] sm:$0xf] }
  0xd1   : > { %644 = vmatpush.msra.mxu0 %v595_v10  ;;  %v2134_v38 = vadd.f32 %v2126_v26, %v2111_v35  ;;  %v2135_v19 = vadd.f32 %v2127_v23, %v2112_v36  ;;  %v444_v42 = vand.u32 2147483647, %v436_v24  ;;  %vm588_vm8 = vcmp.ge.f32.partialorder %v8514_v21, 0.0  ;;  %v609_v23 = vld [vmem:[#allocation5 + $0x48] sm:$0xff] }
  0xd2   : > { %7468 = vmatmul.msk.f32.vlgmr.msra.gmra.mxu0 %vm14684_vm3, %v603_v60  ;;  %v486_v27 = vadd.f32 %v7722_v63, %v485_v29  ;;  %v610_v29 = vld [vmem:[#allocation5 + $0x50] sm:$0xff]  ;;  %v5619_v35 = vperm.slane %v5608_v22, 2 }
  0xd3   : > { %v8565_v56 = vadd.f32 %v2164_v31, %v2134_v38  ;;  %v8567_v45 = vadd.f32 %v2165_v32, %v2135_v19  ;;  %v5618_v32 = vperm.slane %v5608_v22, 0  ;;  %v5656_v19 = vperm.slane %v5608_v22, 1 }
  0xd4   : > { %v490_v34 = vsel %vm489_vm6, %v7722_v63, %v486_v27  ;;  %v3863_v63 = vld [vmem:[#allocation5 + $0x30] sm:$0xff] }
  0xd5   : > { %v495_v39 = vsel %vm492_vm7, %v494_v33, %v490_v34  ;;  %14785 = vst [vmem:[#allocation21_spill] sm:$0xff] %v8567_v45 }
  0xd6   : > { %v496_v37 = vmul.f32 %v495_v39, %v8514_v21  ;;  %v3856_v21 = vld [vmem:[%s8360_s30 + $0x8] sm:$0xf] }
  0xd7   : > { %v3866_v49 = vperm.slane %v3856_v21, 0  ;;  %v3867_v50 = vperm.slane %v3856_v21, 2  ;;  %v3904_v40 = vperm.slane %v3856_v21, 1  ;;  %v3905_v51 = vperm.slane %v3856_v21, 3 }
  0xd8   : > { %v596_v44 = vsel %vm588_vm8, %v444_v42, %v496_v37  ;;  %v5657_v42 = vperm.slane %v5608_v22, 3  ;;  %v612_v37 = vld [vmem:[#allocation5 + $0x60] sm:$0xff] }
  0xd9   : > { %673 = vmatpush.msra.mxu1 %v596_v44  ;;  %v8577_v52 = vperm.slane %v3866_v49, 0  ;;  %v8579_v53 = vperm.slane %v3867_v50, 0  ;;  %v8581_v55 = vperm.slane %v3904_v40, 1  ;;  %v8583_v57 = vperm.slane %v3905_v51, 1  ;;  %v611_v51 = vld [vmem:[#allocation5 + $0x58] sm:$0xff] }
  0xda   : > { %7469 = vmatmul.msk.f32.gmra.mxu0 %vm14684_vm3, %v604_v9  ;;  %7472 = vmatmul.msk.f32.vlgmr.msra.gmra.mxu1 %vm14684_vm3, %v603_v60 }
  0xdb   : > { %14786 = vst [vmem:[#allocation22_spill] sm:$0xff] %v8577_v52  ;;  %v3878_v58 = vmul.f32 %v8577_v52, %v8363_v13  ;;  %v3879_v43 = vmul.f32 %v8579_v53, %v8363_v13  ;;  %v3916_v62 = vmul.f32 %v8581_v55, %v8373_v18  ;;  %v3917_v54 = vmul.f32 %v8583_v57, %v8373_v18 }
  0xdc   : > { %14787 = vst [vmem:[#allocation23_spill] sm:$0xff] %v8579_v53 }
  0xdd   : > { %14788 = vst [vmem:[#allocation24_spill] sm:$0xff] %v8581_v55  ;;  %v3886_v1 = vadd.f32 %v3878_v58, %v3863_v63  ;;  %v3887_v61 = vadd.f32 %v3879_v43, %v3864_v0 }
  0xde   : > { %14789 = vst [vmem:[#allocation25_spill] sm:$0xff] %v8583_v57 }
  0xdf   : > { %v8593_v3 = vadd.f32 %v3916_v62, %v3886_v1  ;;  %v8595_v4 = vadd.f32 %v3917_v54, %v3887_v61  ;;  %v8626_v62 = vperm.slane %v5656_v19, 1  ;;  %v8628_v54 = vperm.slane %v5657_v42, 1 }
  0xe1   : > { %14790 = vst [vmem:[#allocation26_spill] sm:$0xff] %v8593_v3 }
  0xe2   : > { %7470 = vmatmul.msk.f32.gmra.mxu0 %vm14684_vm3, %v605_v46  ;;  %7473 = vmatmul.msk.f32.gmra.mxu1 %vm14684_vm3, %v604_v9  ;;  %14791 = vst [vmem:[#allocation27_spill] sm:$0xff] %v8595_v4 }
  0xe3   : > { %14794 = vst [vmem:[#allocation30_spill] sm:$0xff] %v8626_v62 }
  0xe4   : > { %14795 = vst [vmem:[#allocation31_spill] sm:$0xff] %v8628_v54 }
  0xea   : > { %7471 = vmatmul.msk.f32.gmra.mxu0 %vm14684_vm3, %v606_v48  ;;  %7474 = vmatmul.msk.f32.gmra.mxu1 %vm14684_vm3, %v605_v46  ;;  %v8615_v46 = vperm.slane %v5618_v32, 0 }
  0xec   : > { %14792 = vst [vmem:[#allocation28_spill] sm:$0xff] %v8615_v46  ;;  %v8632_v1 = vmul.f32 %v8615_v46, %v8363_v13 }
  0xf2   : > { %7475 = vmatmul.msk.f32.gmra.mxu1 %vm14684_vm3, %v606_v48  ;;  %v8618_v48 = vperm.slane %v5619_v35, 0 }
  0xf4   : > { %14793 = vst [vmem:[#allocation29_spill] sm:$0xff] %v8618_v48 }
 0x14f   : > { %v646_v60 = vpop.f32.mrf.mxu0 }
 0x150   : > { %v8597_v10 = vadd.f32 %v646_v60, %v608_v5 }
 0x152   : > { %v735_v11 = vand.u32 2147483647, %v8597_v10  ;;  %v687_v7 = vadd.f32 1.0, %v8597_v10 }
 0x154   : > { %v8600_v28 = vadd.f32 1.0, %v735_v11  ;;  %v695_v27 = vmul.f32 0.5, %v687_v7  ;;  %v8639_v11 = vmul.f32 %v8618_v48, %v8363_v13  ;;  %v8656_v13 = vmul.f32 %v8628_v54, %v8373_v18 }
 0x156   : > { %7723 = vrcp.f32 %v8600_v28  ;;  %v703_v38 = vfloor.f32 %v695_v27  ;;  %v762_v60 = vand.u32 2147483648, %v8600_v28  ;;  %vm756_vm4 = vweird.f32 %v8600_v28 }
 0x157   : > { %v649_v26 = vpop.f32.mrf.mxu0  ;;  %v675_v31 = vpop.f32.mrf.mxu1 }
 0x158   : > { %v8605_v24 = vadd.f32 %v649_v26, %v610_v29  ;;  %v8609_v36 = vadd.f32 %v675_v31, %v609_v23  ;;  %v711_v43 = vmul.f32 2.0, %v703_v38 }
 0x15a   : > { %v737_v33 = vand.u32 2147483647, %v8605_v24  ;;  %v689_v34 = vadd.f32 1.0, %v8605_v24  ;;  %v688_v50 = vadd.f32 1.0, %v8609_v36  ;;  %v736_v40 = vand.u32 2147483647, %v8609_v36 }
 0x15b   : > { %v719_v32 = vsub.f32 %v8597_v10, %v711_v43 }
 0x15c   : > { %v8611_v39 = vpop.eup %7723  ;;  %v8613_v9 = vadd.f32 1.0, %v737_v33  ;;  %v697_v44 = vmul.f32 0.5, %v689_v34  ;;  %v696_v22 = vmul.f32 0.5, %v688_v50  ;;  %v8645_v23 = vadd.f32 1.0, %v736_v40  ;;  %v614_v34 = vld [vmem:[#allocation5 + $0x70] sm:$0xff] }
 0x15d   : > { %v752_v49 = vmul.f32 %v8611_v39, %v8600_v28  ;;  %v8652_v33 = vmul.f32 %v8626_v62, %v8373_v18  ;;  %vm757_vm0 = vweird.f32 %v8611_v39 }
 0x15e   : > { %7725 = vrcp.f32 %v8613_v9  ;;  %v705_v0 = vfloor.f32 %v697_v44  ;;  %v792_v38 = vand.u32 2147483648, %v8613_v9  ;;  %v613_v44 = vld [vmem:[#allocation5 + $0x68] sm:$0xff]  ;;  %v704_v40 = vfloor.f32 %v696_v22 }
 0x15f   : > { %v652_v21 = vpop.f32.mrf.mxu0  ;;  %v678_v63 = vpop.f32.mrf.mxu1  ;;  %v753_v29 = vsub.f32 1.0, %v752_v49  ;;  %v790_v43 = vand.u32 2147483647, %v8613_v9  ;;  %vm786_vm9 = vweird.f32 %v8613_v9 }
 0x160   : > { %v8624_v58 = vadd.f32 %v652_v21, %v612_v37  ;;  %v8641_v7 = vadd.f32 %v678_v63, %v611_v51  ;;  %v713_v35 = vmul.f32 2.0, %v705_v0  ;;  %v8663_v37 = vor.u32 1.1754944e-38, %v762_v60 }
 0x161   : > { %v754_v18 = vmul.f32 %v8611_v39, %v753_v29  ;;  %v8671_v63 = vand.u32 2147483647, %v719_v32  ;;  %v8675_v60 = vor.u32 1.1754944e-38, %v792_v38  ;;  %v8684_v62 = vmul.f32 2.0, %v704_v40 }
 0x162   : > { %v739_v61 = vand.u32 2147483647, %v8624_v58  ;;  %v691_v5 = vadd.f32 1.0, %v8624_v58  ;;  %v690_v50 = vadd.f32 1.0, %v8641_v7  ;;  %v738_v0 = vand.u32 2147483647, %v8641_v7 }
 0x163   : > { %v8682_v32 = vadd.f32 %v8611_v39, %v754_v18  ;;  %vm8716_vm14 = vcmp.eq.f32.partialorder %v790_v43, 8.507059e+37  ;;  %vm875_vm2 = vcmp.ge.f32.partialorder %v8624_v58, 0.0 }
 0x164   : > { %v8643_v26 = vpop.eup %7725  ;;  %v8647_v27 = vadd.f32 1.0, %v739_v61  ;;  %v699_v31 = vmul.f32 0.5, %v691_v5  ;;  %v721_v5 = vsub.f32 %v8605_v24, %v713_v35  ;;  %v698_v54 = vmul.f32 0.5, %v690_v50 }
 0x165   : > { %v782_v19 = vmul.f32 %v8643_v26, %v8613_v9  ;;  %vm787_vm11 = vweird.f32 %v8643_v26 }
 0x166   : > { %7727 = vrcp.f32 %v8647_v27  ;;  %v707_v49 = vfloor.f32 %v699_v31  ;;  %v822_v40 = vand.u32 2147483648, %v8647_v27  ;;  %v706_v53 = vfloor.f32 %v698_v54  ;;  %vm8762_vm7 = vmor %vm786_vm9, %vm787_vm11 }
 0x167   : > { %v655_v21 = vpop.f32.mrf.mxu0  ;;  %7729 = vrcp.f32 %v8645_v23  ;;  %v681_v61 = vpop.f32.mrf.mxu1  ;;  %vm816_vm10 = vweird.f32 %v8647_v27 }
 0x168   : > { %v8668_v51 = vadd.f32 %v655_v21, %v614_v34  ;;  %v8677_v42 = vadd.f32 %v681_v61, %v613_v44  ;;  %v783_v34 = vsub.f32 1.0, %v782_v19  ;;  %v715_v21 = vmul.f32 2.0, %v707_v49 }
 0x169   : > { %v8690_v61 = vadd.f32 1.0, %v738_v0  ;;  %v820_v19 = vand.u32 2147483647, %v8647_v27  ;;  %v8694_v49 = vand.u32 2147483647, %v721_v5  ;;  %v823_v54 = vor.u32 1.1754944e-38, %v822_v40 }
 0x16a   : > { %v741_v29 = vand.u32 2147483647, %v8668_v51  ;;  %v693_v22 = vadd.f32 1.0, %v8668_v51  ;;  %v740_v35 = vand.u32 2147483647, %v8677_v42  ;;  %v692_v44 = vadd.f32 1.0, %v8677_v42 }
 0x16b   : > { %v723_v5 = vsub.f32 %v8624_v58, %v715_v21  ;;  %vm8711_vm13 = vcmp.eq.f32.partialorder %v820_v19, 8.507059e+37  ;;  %v8720_v59 = vmul.f32 2.0, %v706_v53  ;;  %vm877_vm6 = vcmp.ge.f32.partialorder %v8668_v51, 0.0 }
 0x16c   : > { %v7728_v48 = vpop.eup %7727  ;;  %v8687_v38 = vadd.f32 1.0, %v741_v29  ;;  %v701_v31 = vmul.f32 0.5, %v693_v22  ;;  %v8698_v18 = vadd.f32 1.0, %v740_v35  ;;  %v784_v29 = vmul.f32 %v8643_v26, %v783_v34  ;;  %v615_v22 = vld [vmem:[#allocation5 + $0x78] sm:$0xff] }
 0x16d   : > { %v812_v46 = vmul.f32 %v7728_v48, %v8647_v27  ;;  %v8696_v50 = vpop.eup %7729  ;;  %v700_v55 = vmul.f32 0.5, %v692_v44  ;;  %vm817_vm12 = vweird.f32 %v7728_v48  ;;  %vm801_vm9 = vweird.f32 %v8690_v61 }
 0x16e   : > { %7731 = vrcp.f32 %v8687_v38  ;;  %v709_v57 = vfloor.f32 %v701_v31  ;;  %v785_v44 = vadd.f32 %v8643_v26, %v784_v29  ;;  %vm8728_vm15 = vmor %vm816_vm10, %vm817_vm12  ;;  %vm846_vm1 = vweird.f32 %v8687_v38 }
 0x16f   : > { %v813_v0 = vsub.f32 1.0, %v812_v46  ;;  %7733 = vrcp.f32 %v8698_v18  ;;  %v684_v35 = vpop.f32.mrf.mxu1  ;;  %v708_v34 = vfloor.f32 %v700_v55  ;;  %v850_v43 = vand.u32 2147483647, %v8687_v38 }
 0x170   : > { %7735 = vrcp.f32 %v8690_v61  ;;  %v8709_v31 = vadd.f32 %v684_v35, %v615_v22  ;;  %v717_v21 = vmul.f32 2.0, %v709_v57  ;;  %v731_v35 = vand.u32 2147483647, %v723_v5 }
 0x171   : > { %v814_v52 = vmul.f32 %v7728_v48, %v813_v0  ;;  %v852_v5 = vand.u32 2147483648, %v8687_v38  ;;  %v835_v0 = vand.u32 2147483647, %v8698_v18  ;;  %vm831_vm5 = vweird.f32 %v8698_v18 }
 0x172   : > { %v742_v22 = vand.u32 2147483647, %v8709_v31  ;;  %v694_v19 = vadd.f32 1.0, %v8709_v31  ;;  %v725_v2 = vsub.f32 %v8668_v51, %v717_v21  ;;  %v837_v57 = vand.u32 2147483648, %v8698_v18 }
 0x173   : > { %v815_v4 = vadd.f32 %v7728_v48, %v814_v52  ;;  %v716_v52 = vmul.f32 2.0, %v708_v34  ;;  %vm8775_vm12 = vcmp.eq.f32.partialorder %v850_v43, 8.507059e+37  ;;  %v853_v9 = vor.u32 1.1754944e-38, %v852_v5 }
 0x174   : > { %v7732_v55 = vpop.eup %7731  ;;  %v8741_v27 = vadd.f32 1.0, %v742_v22  ;;  %v702_v34 = vmul.f32 0.5, %v694_v19  ;;  %v838_v5 = vor.u32 1.1754944e-38, %v837_v57  ;;  %v767_v43 = vmul.f32 %v8696_v50, %v8645_v23 }
 0x175   : > { %v842_v53 = vmul.f32 %v7732_v55, %v8687_v38  ;;  %v819_v40 = vsel %vm8728_vm15, %v7728_v48, %v815_v4  ;;  %v8739_v29 = vpop.eup %7733  ;;  %v724_v19 = vsub.f32 %v8677_v42, %v716_v52  ;;  %vm847_vm8 = vweird.f32 %v7732_v55 }
 0x176   : > { %v8746_v41 = vpop.eup %7735  ;;  %v824_v4 = vsel %vm8711_vm13, %v823_v54, %v819_v40  ;;  %v827_v48 = vmul.f32 %v8739_v29, %v8698_v18  ;;  %7737 = vrcp.f32 %v8741_v27  ;;  %v710_v22 = vfloor.f32 %v702_v34  ;;  %vm848_vm11 = vmor %vm846_vm1, %vm847_vm8 }
 0x177   : > { %v843_v47 = vsub.f32 1.0, %v842_v53  ;;  %v789_v53 = vsel %vm8762_vm7, %v8643_v26, %v785_v44  ;;  %v14804_v40 = vand.u32 2147483647, %v8600_v28  ;;  %v825_v20 = vmul.f32 %v824_v4, %v8624_v58 }
 0x178   : > { %v828_v21 = vsub.f32 1.0, %v827_v48  ;;  %v733_v48 = vand.u32 2147483647, %v725_v2  ;;  %v718_v46 = vmul.f32 2.0, %v710_v22  ;;  %v8786_v44 = vand.u32 2147483647, %v724_v19 }
 0x179   : > { %v844_v54 = vmul.f32 %v7732_v55, %v843_v47  ;;  %vm8771_vm10 = vcmp.eq.f32.partialorder %v14804_v40, 8.507059e+37  ;;  %v722_v47 = vsub.f32 %v8641_v7, %v8720_v59  ;;  %vm8788_vm13 = vcmp.eq.f32.partialorder %v835_v0, 8.507059e+37 }
 0x17a   : > { %v829_v26 = vmul.f32 %v8739_v29, %v828_v21  ;;  %v794_v2 = vsel %vm8716_vm14, %v8675_v60, %v789_v53  ;;  %vm873_vm15 = vcmp.ge.f32.partialorder %v8605_v24, 0.0  ;;  %v797_v4 = vmul.f32 %v8746_v41, %v8690_v61  ;;  %vm8817_vm14 = vmor %vm756_vm4, %vm757_vm0 }
 0x17b   : > { %v845_v45 = vadd.f32 %v7732_v55, %v844_v54  ;;  %v865_v38 = vand.u32 2147483647, %v8741_v27  ;;  %vm832_vm1 = vweird.f32 %v8739_v29  ;;  %vm871_vm7 = vcmp.ge.f32.partialorder %v8597_v10, 0.0 }
 0x17c   : > { %v830_v19 = vadd.f32 %v8739_v29, %v829_v26  ;;  %v7738_v0 = vpop.eup %7737  ;;  %v867_v3 = vand.u32 2147483648, %v8741_v27  ;;  %v8807_v60 = vsel %vm875_vm2, %v731_v35, %v825_v20  ;;  %v798_v54 = vsub.f32 1.0, %v797_v4  ;;  %vm8823_vm2 = vmor %vm831_vm5, %vm832_vm1 }
 0x17d   : > { %v849_v22 = vsel %vm848_vm11, %v7732_v55, %v845_v45  ;;  %v726_v55 = vsub.f32 %v8709_v31, %v718_v46  ;;  %v857_v21 = vmul.f32 %v7738_v0, %v8741_v27  ;;  %v795_v53 = vmul.f32 %v794_v2, %v8605_v24 }
 0x17e   : > { %v854_v57 = vsel %vm8775_vm12, %v853_v9, %v849_v22  ;;  %v799_v58 = vmul.f32 %v8746_v41, %v798_v54  ;;  %vm802_vm8 = vweird.f32 %v8746_v41  ;;  %v807_v35 = vand.u32 2147483648, %v8690_v61 }
 0x17f   : > { %v855_v45 = vmul.f32 %v854_v57, %v8668_v51  ;;  %v14815_v34 = vlaneseq  ;;  %v858_v46 = vsub.f32 1.0, %v857_v21  ;;  %v834_v18 = vsel %vm8823_vm2, %v8739_v29, %v830_v19  ;;  %vm8869_vm1 = vmor %vm801_vm9, %vm802_vm8 }
 0x180   : > { %v759_v26 = vsel %vm8817_vm14, %v8611_v39, %v8682_v32  ;;  %vm878_vm0 = vcmp.ge.f32.partialorder %v8709_v31, 0.0  ;;  %v800_v2 = vadd.f32 %v8746_v41, %v799_v58  ;;  %vm861_vm12 = vweird.f32 %v8741_v27 }
 0x181   : > { %v8831_v9 = vshrl.u32 %v14815_v34, 7  ;;  %v8835_v28 = vsel %vm877_vm6, %v733_v48, %v855_v45  ;;  %v764_v51 = vsel %vm8771_vm10, %v8663_v37, %v759_v26  ;;  %v859_v29 = vmul.f32 %v7738_v0, %v858_v46  ;;  %v5615_v45 = vld [vmem:[#allocation5 + $0x30] sm:$0xff]  ;;  %v901_v48 = vld [vmem:[#allocation5 + $0x80] sm:$0xff] }
 0x182   : > { %933 = vmatpush.msra.mxu2 %v8835_v28  ;;  %vm862_vm6 = vweird.f32 %v7738_v0  ;;  %vm8859_vm11 = vcmp.eq.f32.partialorder %v865_v38, 8.507059e+37  ;;  %vm876_vm10 = vcmp.ge.f32.partialorder %v8677_v42, 0.0  ;;  %v839_v52 = vsel %vm8788_vm13, %v838_v5, %v834_v18 }
 0x183   : > { %14816 = vst [vmem:[#allocation32_spill] sm:$0xff] %v8831_v9  ;;  %vm14675_vm4 = vcmp.eq.s32.totalorder %v8831_v9, 0  ;;  %vm14674_vm5 = vcmp.eq.s32.totalorder %v8831_v9, 1  ;;  %v860_v27 = vadd.f32 %v7738_v0, %v859_v29  ;;  %v8879_v4 = vsel %vm873_vm15, %v8694_v49, %v795_v53  ;;  %vm863_vm9 = vmor %vm861_vm12, %vm862_vm6 }
 0x184   : > { %v329_v39 = vsel %vm14675_vm4, %v8365_v14, 0.0  ;;  %v387_v32 = vsel %vm14674_vm5, %v8367_v15, 0.0  ;;  %934 = vmatpush.msra.mxu2 %v8807_v60  ;;  %v765_v15 = vmul.f32 %v764_v51, %v8597_v10  ;;  %v804_v22 = vsel %vm8869_vm1, %v8746_v41, %v800_v2  ;;  %v896_v41 = vld [vmem:[#allocation2 + $0x20] sm:$0xff] }
 0x185   : > { %v395_v37 = vadd.f32 %v387_v32, %v329_v39  ;;  %v868_v38 = vor.u32 1.1754944e-38, %v867_v3  ;;  %v808_v19 = vor.u32 1.1754944e-38, %v807_v35  ;;  %v734_v5 = vand.u32 2147483647, %v726_v55  ;;  %v5616_v3 = vld [vmem:[#allocation5 + $0x38] sm:$0xff]  ;;  %v905_v14 = vld [vmem:[#allocation5 + $0xa0] sm:$0xff] }
 0x186   : > { %935 = vmatpush.msra.mxu2 %v8879_v4  ;;  %v879_v57 = vsel %vm871_vm7, %v8671_v63, %v765_v15  ;;  %v864_v24 = vsel %vm863_vm9, %v7738_v0, %v860_v27  ;;  %v14821_v49 = vand.u32 2147483647, %v8690_v61  ;;  %v840_v53 = vmul.f32 %v839_v52, %v8677_v42  ;;  %v902_v52 = vld [vmem:[#allocation5 + $0x88] sm:$0xff] }
 0x187   : > { %v8892_v54 = vadd.f32 %v879_v57, %v395_v37  ;;  %v869_v21 = vsel %vm8859_vm11, %v868_v38, %v864_v24  ;;  %v768_v63 = vsub.f32 1.0, %v767_v43  ;;  %v330_v61 = vsel %vm14675_vm4, %v8369_v16, 0.0  ;;  %v903_v37 = vld [vmem:[#allocation5 + $0x90] sm:$0xff] }
 0x188   : > { %vm806_vm13 = vcmp.eq.f32.partialorder %v14821_v49, 8.507059e+37  ;;  %v870_v40 = vmul.f32 %v869_v21, %v8709_v31  ;;  %vm772_vm15 = vweird.f32 %v8696_v50  ;;  %v777_v0 = vand.u32 2147483648, %v8645_v23 }
 0x189   : > { %14822 = vst [vmem:[#allocation33_spill] sm:$0xff] %v8892_v54  ;;  %v809_v10 = vsel %vm806_vm13, %v808_v19, %v804_v22  ;;  %936 = vmatpush.msra.mxu2 %v8892_v54  ;;  %v769_v55 = vmul.f32 %v8696_v50, %v768_v63  ;;  %v775_v20 = vand.u32 2147483647, %v8645_v23  ;;  %v5638_v58 = vadd.f32 %v8632_v1, %v5615_v45  ;;  %v904_v19 = vld [vmem:[#allocation5 + $0x98] sm:$0xff] }
 0x18a   : > { %7476 = vmatmul.msk.f32.vlgmr.msra.gmra.mxu2 %vm14684_vm3, %v896_v41  ;;  %v5639_v35 = vadd.f32 %v8639_v11, %v5616_v3  ;;  %v8911_v46 = vsel %vm878_vm0, %v734_v5, %v870_v40  ;;  %v810_v16 = vmul.f32 %v809_v10, %v8641_v7  ;;  %v388_v18 = vsel %vm14674_vm5, %v8371_v17, 0.0  ;;  %v907_v3 = vld [vmem:[#allocation5 + $0xb0] sm:$0xff] }
 0x18b   : > { %v720_v26 = vsub.f32 %v8609_v36, %v8684_v62  ;;  %962 = vmatpush.msra.mxu3 %v8911_v46  ;;  %v770_v2 = vadd.f32 %v8696_v50, %v769_v55  ;;  %vm771_vm7 = vweird.f32 %v8645_v23  ;;  %v8923_v1 = vadd.f32 %v8652_v33, %v5638_v58 }
 0x18c   : > { %v8926_v11 = vadd.f32 %v8656_v13, %v5639_v35  ;;  %v8931_v31 = vsel %vm876_vm10, %v8786_v44, %v840_v53  ;;  %v730_v17 = vand.u32 2147483647, %v722_v47  ;;  %vm773_vm14 = vmor %vm771_vm7, %vm772_vm15  ;;  %v778_v62 = vor.u32 1.1754944e-38, %v777_v0  ;;  %v897_v44 = vld [vmem:[#allocation2 + $0x28] sm:$0xff] }
 0x18d   : > { %14823 = vst [vmem:[#allocation34_spill] sm:$0xff] %v8923_v1  ;;  %963 = vmatpush.msra.mxu3 %v8931_v31  ;;  %vm874_vm2 = vcmp.ge.f32.partialorder %v8641_v7, 0.0  ;;  %v774_v23 = vsel %vm773_vm14, %v8696_v50, %v770_v2  ;;  %vm776_vm8 = vcmp.eq.f32.partialorder %v775_v20, 8.507059e+37  ;;  %v396_v13 = vadd.f32 %v388_v18, %v330_v61  ;;  %v898_v7 = vld [vmem:[#allocation2 + $0x30] sm:$0xff]  ;;  %v899_v50 = vld [vmem:[#allocation2 + $0x38] sm:$0xff]  ;;  %v906_v0 = vld [vmem:[#allocation5 + $0xa8] sm:$0xff] }
 0x18e   : > { %14824 = vst [vmem:[#allocation35_spill] sm:$0xff] %v8926_v11  ;;  %v8941_v33 = vsel %vm874_vm2, %v730_v17, %v810_v16  ;;  %v779_v42 = vsel %vm776_vm8, %v778_v62, %v774_v23  ;;  %v728_v59 = vand.u32 2147483647, %v720_v26  ;;  %vm872_vm0 = vcmp.ge.f32.partialorder %v8609_v36, 0.0 }
 0x18f   : > { %964 = vmatpush.msra.mxu3 %v8941_v33  ;;  %v780_v47 = vmul.f32 %v779_v42, %v8609_v36 }
 0x191   : > { %v880_v51 = vsel %vm872_vm0, %v728_v59, %v780_v47 }
 0x192   : > { %7477 = vmatmul.msk.f32.gmra.mxu2 %vm14684_vm3, %v897_v44  ;;  %v8947_v29 = vadd.f32 %v880_v51, %v396_v13 }
 0x194   : > { %14825 = vst [vmem:[#allocation36_spill] sm:$0xff] %v8947_v29  ;;  %965 = vmatpush.msra.mxu3 %v8947_v29 }
 0x195   : > { %7480 = vmatmul.msk.f32.vlgmr.msra.gmra.mxu3 %vm14684_vm3, %v896_v41 }
 0x19a   : > { %7478 = vmatmul.msk.f32.gmra.mxu2 %vm14684_vm3, %v898_v7 }
 0x19d   : > { %7481 = vmatmul.msk.f32.gmra.mxu3 %vm14684_vm3, %v897_v44 }
 0x1a2   : > { %7479 = vmatmul.msk.f32.gmra.mxu2 %vm14684_vm3, %v899_v50 }
 0x1a5   : > { %7482 = vmatmul.msk.f32.gmra.mxu3 %vm14684_vm3, %v898_v7 }
 0x1ad   : > { %7483 = vmatmul.msk.f32.gmra.mxu3 %vm14684_vm3, %v899_v50  ;;  %v908_v50 = vld [vmem:[#allocation5 + $0xb8] sm:$0xff] }
 0x20d   : > { %v938_v36 = vpop.f32.mrf.mxu2 }
 0x20e   : > { %v8956_v15 = vadd.f32 %v938_v36, %v901_v48 }
 0x210   : > { %v1027_v43 = vand.u32 2147483647, %v8956_v15  ;;  %v979_v55 = vadd.f32 1.0, %v8956_v15 }
 0x212   : > { %v8972_v21 = vadd.f32 1.0, %v1027_v43  ;;  %v8993_v23 = vmul.f32 0.5, %v979_v55 }
 0x214   : > { %v995_v48 = vfloor.f32 %v8993_v23 }
 0x215   : > { %v941_v39 = vpop.f32.mrf.mxu2 }
 0x216   : > { %v8960_v38 = vadd.f32 %v941_v39, %v903_v37 }
 0x218   : > { %v967_v32 = vpop.f32.mrf.mxu3  ;;  %v1029_v45 = vand.u32 2147483647, %v8960_v38 }
 0x219   : > { %v8964_v5 = vadd.f32 %v967_v32, %v902_v52 }
 0x21a   : > { %v8978_v61 = vadd.f32 1.0, %v1029_v45 }
 0x21b   : > { %v1028_v53 = vand.u32 2147483647, %v8964_v5  ;;  %v980_v44 = vadd.f32 1.0, %v8964_v5 }
 0x21d   : > { %v944_v27 = vpop.f32.mrf.mxu2  ;;  %v8984_v35 = vadd.f32 1.0, %v1028_v53  ;;  %v9009_v37 = vmul.f32 0.5, %v980_v44 }
 0x21e   : > { %v8958_v22 = vadd.f32 %v944_v27, %v905_v14 }
 0x220   : > { %v1031_v57 = vand.u32 2147483647, %v8958_v22  ;;  %v970_v24 = vpop.f32.mrf.mxu3  ;;  %v983_v59 = vadd.f32 1.0, %v8958_v22  ;;  %vm1167_vm7 = vcmp.ge.f32.partialorder %v8958_v22, 0.0 }
 0x221   : > { %v8966_v49 = vadd.f32 %v970_v24, %v904_v19 }
 0x222   : > { %v8968_v41 = vadd.f32 1.0, %v1031_v57  ;;  %v991_v39 = vmul.f32 0.5, %v983_v59 }
 0x223   : > { %v1030_v63 = vand.u32 2147483647, %v8966_v49 }
 0x224   : > { %7739 = vrcp.f32 %v8968_v41  ;;  %v1114_v14 = vand.u32 2147483648, %v8968_v41  ;;  %v999_v19 = vfloor.f32 %v991_v39  ;;  %v1112_v43 = vand.u32 2147483647, %v8968_v41 }
 0x225   : > { %v947_v10 = vpop.f32.mrf.mxu2  ;;  %7741 = vrcp.f32 %v8972_v21  ;;  %v8986_v26 = vadd.f32 1.0, %v1030_v63  ;;  %vm1108_vm11 = vweird.f32 %v8968_v41 }
 0x226   : > { %v8976_v40 = vadd.f32 %v947_v10, %v907_v3  ;;  %7743 = vrcp.f32 %v8978_v61  ;;  %vm1113_vm1 = vcmp.eq.f32.partialorder %v1112_v43, 8.507059e+37 }
 0x228   : > { %v1033_v20 = vand.u32 2147483647, %v8976_v40  ;;  %v985_v58 = vadd.f32 1.0, %v8976_v40  ;;  %v973_v16 = vpop.f32.mrf.mxu3  ;;  %vm1169_vm9 = vcmp.ge.f32.partialorder %v8976_v40, 0.0 }
 0x229   : > { %v8988_v2 = vadd.f32 %v973_v16, %v906_v0 }
 0x22a   : > { %v7740_v18 = vpop.eup %7739  ;;  %v8990_v17 = vadd.f32 1.0, %v1033_v20  ;;  %v993_v62 = vmul.f32 0.5, %v985_v58  ;;  %v1007_v20 = vmul.f32 2.0, %v999_v19 }
 0x22b   : > { %v1032_v13 = vand.u32 2147483647, %v8988_v2  ;;  %v1104_v47 = vmul.f32 %v7740_v18, %v8968_v41  ;;  %v9004_v7 = vpop.eup %7741  ;;  %vm1109_vm6 = vweird.f32 %v7740_v18  ;;  %v984_v24 = vadd.f32 1.0, %v8988_v2 }
 0x22c   : > { %7745 = vrcp.f32 %v8990_v17  ;;  %v1001_v42 = vfloor.f32 %v993_v62  ;;  %v9011_v27 = vpop.eup %7743  ;;  %vm1138_vm12 = vweird.f32 %v8990_v17  ;;  %v1142_v53 = vand.u32 2147483647, %v8990_v17  ;;  %vm1110_vm10 = vmor %vm1108_vm11, %vm1109_vm6 }
 0x22d   : > { %7747 = vrcp.f32 %v8984_v35  ;;  %v9002_v51 = vadd.f32 1.0, %v1032_v13  ;;  %v1105_v32 = vsub.f32 1.0, %v1104_v47  ;;  %v1144_v10 = vand.u32 2147483648, %v8990_v17 }
 0x22e   : > { %7749 = vrcp.f32 %v8986_v26  ;;  %v1009_v36 = vmul.f32 2.0, %v1001_v42  ;;  %v1115_v42 = vor.u32 1.1754944e-38, %v1114_v14  ;;  %v992_v44 = vmul.f32 0.5, %v984_v24 }
 0x22f   : > { %7751 = vrcp.f32 %v9002_v51  ;;  %v1106_v57 = vmul.f32 %v7740_v18, %v1105_v32  ;;  %v1015_v41 = vsub.f32 %v8958_v22, %v1007_v20  ;;  %vm9034_vm15 = vcmp.eq.f32.partialorder %v1142_v53, 8.507059e+37 }
 0x230   : > { %v976_v52 = vpop.f32.mrf.mxu3  ;;  %v1017_v0 = vsub.f32 %v8976_v40, %v1009_v36  ;;  %vm1123_vm0 = vweird.f32 %v9002_v51 }
 0x231   : > { %v9016_v3 = vadd.f32 %v976_v52, %v908_v50  ;;  %v1107_v58 = vadd.f32 %v7740_v18, %v1106_v57  ;;  %v1000_v52 = vfloor.f32 %v992_v44 }
 0x232   : > { %v7746_v45 = vpop.eup %7745  ;;  %v1025_v24 = vand.u32 2147483647, %v1017_v0 }
 0x233   : > { %v9021_v63 = vpop.eup %7747  ;;  %v1134_v55 = vmul.f32 %v7746_v45, %v8990_v17  ;;  %v1034_v62 = vand.u32 2147483647, %v9016_v3  ;;  %v986_v13 = vadd.f32 1.0, %v9016_v3  ;;  %v1111_v47 = vsel %vm1110_vm10, %v7740_v18, %v1107_v58 }
 0x234   : > { %v9025_v16 = vpop.eup %7749  ;;  %v1116_v32 = vsel %vm1113_vm1, %v1115_v42, %v1111_v47  ;;  %vm1139_vm13 = vweird.f32 %v7746_v45  ;;  %v1145_v18 = vor.u32 1.1754944e-38, %v1144_v10  ;;  %v1008_v58 = vmul.f32 2.0, %v1000_v52 }
 0x235   : > { %v1135_v59 = vsub.f32 1.0, %v1134_v55  ;;  %v7752_v50 = vpop.eup %7751  ;;  %v9031_v36 = vadd.f32 1.0, %v1034_v62  ;;  %v994_v39 = vmul.f32 0.5, %v986_v13  ;;  %v1117_v20 = vmul.f32 %v1116_v32, %v8958_v22  ;;  %vm1140_vm14 = vmor %vm1138_vm12, %vm1139_vm13 }
 0x236   : > { %v1119_v14 = vmul.f32 %v7752_v50, %v9002_v51  ;;  %v1023_v13 = vand.u32 2147483647, %v1015_v41  ;;  %v1016_v10 = vsub.f32 %v8988_v2, %v1008_v58  ;;  %vm1124_vm2 = vweird.f32 %v7752_v50 }
 0x237   : > { %v1136_v19 = vmul.f32 %v7746_v45, %v1135_v59  ;;  %7753 = vrcp.f32 %v9031_v36  ;;  %v1002_v43 = vfloor.f32 %v994_v39  ;;  %v1159_v62 = vand.u32 2147483648, %v9031_v36  ;;  %vm1125_vm12 = vmor %vm1123_vm0, %vm1124_vm2 }
 0x238   : > { %v1120_v42 = vsub.f32 1.0, %v1119_v14  ;;  %v1157_v59 = vand.u32 2147483647, %v9031_v36  ;;  %v1127_v39 = vand.u32 2147483647, %v9002_v51  ;;  %v1129_v17 = vand.u32 2147483648, %v9002_v51 }
 0x239   : > { %v1137_v55 = vadd.f32 %v7746_v45, %v1136_v19  ;;  %v1010_v53 = vmul.f32 2.0, %v1002_v43  ;;  %vm1153_vm8 = vweird.f32 %v9031_v36  ;;  %v1160_v19 = vor.u32 1.1754944e-38, %v1159_v62 }
 0x23a   : > { %v1121_v47 = vmul.f32 %v7752_v50, %v1120_v42  ;;  %v981_v14 = vadd.f32 1.0, %v8960_v38  ;;  %vm9061_vm6 = vcmp.eq.f32.partialorder %v1157_v59, 8.507059e+37  ;;  %v1130_v22 = vor.u32 1.1754944e-38, %v1129_v17 }
 0x23b   : > { %v1141_v44 = vsel %vm1140_vm14, %v7746_v45, %v1137_v55  ;;  %v1175_v45 = vsel %vm1167_vm7, %v1023_v13, %v1117_v20  ;;  %v1018_v52 = vsub.f32 %v9016_v3, %v1010_v53  ;;  %v1074_v51 = vmul.f32 %v9011_v27, %v8978_v61 }
 0x23c   : > { %v1146_v0 = vsel %vm9034_vm15, %v1145_v18, %v1141_v44  ;;  %v1122_v57 = vadd.f32 %v7752_v50, %v1121_v47  ;;  %v1024_v20 = vand.u32 2147483647, %v1016_v10  ;;  %vm1128_vm11 = vcmp.eq.f32.partialorder %v1127_v39, 8.507059e+37 }
 0x23d   : > { %v1147_v32 = vmul.f32 %v1146_v0, %v8976_v40  ;;  %v7754_v41 = vpop.eup %7753  ;;  %v989_v53 = vmul.f32 0.5, %v981_v14  ;;  %v1082_v13 = vand.u32 2147483647, %v8978_v61  ;;  %v1026_v42 = vand.u32 2147483647, %v1018_v52 }
 0x23e   : > { %v1149_v43 = vmul.f32 %v7754_v41, %v9031_v36  ;;  %v1126_v58 = vsel %vm1125_vm12, %v7752_v50, %v1122_v57  ;;  %vm1154_vm10 = vweird.f32 %v7754_v41  ;;  %vm1170_vm1 = vcmp.ge.f32.partialorder %v9016_v3, 0.0 }
 0x23f   : > { %v1177_v18 = vsel %vm1169_vm9, %v1025_v24, %v1147_v32  ;;  %v1131_v40 = vsel %vm1128_vm11, %v1130_v22, %v1126_v58  ;;  %v1075_v24 = vsub.f32 1.0, %v1074_v51  ;;  %v997_v44 = vfloor.f32 %v989_v53  ;;  %vm1155_vm15 = vmor %vm1153_vm8, %vm1154_vm10 }
 0x240   : > { %1217 = vmatpush.msrb.mxu0 %v1177_v18  ;;  %v1150_v62 = vsub.f32 1.0, %v1149_v43  ;;  %v1084_v59 = vand.u32 2147483648, %v8978_v61  ;;  %vm1079_vm9 = vweird.f32 %v9011_v27  ;;  %v982_v50 = vadd.f32 1.0, %v8966_v49 }
 0x241   : > { %v1076_v47 = vmul.f32 %v9011_v27, %v1075_v24  ;;  %v1132_v10 = vmul.f32 %v1131_v40, %v8988_v2  ;;  %v1005_v39 = vmul.f32 2.0, %v997_v44  ;;  %vm1078_vm13 = vweird.f32 %v8978_v61 }
 0x242   : > { %1218 = vmatpush.msrb.mxu0 %v1175_v45  ;;  %v1151_v0 = vmul.f32 %v7754_v41, %v1150_v62  ;;  %v1089_v17 = vmul.f32 %v9025_v16, %v8986_v26  ;;  %vm1083_vm7 = vcmp.eq.f32.partialorder %v1082_v13, 8.507059e+37  ;;  %v990_v52 = vmul.f32 0.5, %v982_v50  ;;  %vm1080_vm14 = vmor %vm1078_vm13, %vm1079_vm9 }
 0x243   : > { %v1077_v45 = vadd.f32 %v9011_v27, %v1076_v47  ;;  %v1013_v57 = vsub.f32 %v8960_v38, %v1005_v39  ;;  %v1085_v14 = vor.u32 1.1754944e-38, %v1084_v59  ;;  %vm1094_vm2 = vweird.f32 %v9025_v16 }
 0x244   : > { %v1152_v32 = vadd.f32 %v7754_v41, %v1151_v0  ;;  %v1090_v18 = vsub.f32 1.0, %v1089_v17  ;;  %v998_v22 = vfloor.f32 %v990_v52  ;;  %v1099_v51 = vand.u32 2147483648, %v8986_v26 }
 0x245   : > { %v1081_v61 = vsel %vm1080_vm14, %v9011_v27, %v1077_v45  ;;  %v1097_v62 = vand.u32 2147483647, %v8986_v26  ;;  %v1021_v24 = vand.u32 2147483647, %v1013_v57  ;;  %vm1165_vm8 = vcmp.ge.f32.partialorder %v8960_v38, 0.0 }
 0x246   : > { %v1156_v43 = vsel %vm1155_vm15, %v7754_v41, %v1152_v32  ;;  %v1086_v58 = vsel %vm1083_vm7, %v1085_v14, %v1081_v61  ;;  %v1091_v53 = vmul.f32 %v9025_v16, %v1090_v18  ;;  %v1006_v44 = vmul.f32 2.0, %v998_v22 }
 0x247   : > { %v1161_v36 = vsel %vm9061_vm6, %v1160_v19, %v1156_v43  ;;  %v1087_v13 = vmul.f32 %v1086_v58, %v8960_v38  ;;  %vm1093_vm0 = vweird.f32 %v8986_v26  ;;  %v1100_v41 = vor.u32 1.1754944e-38, %v1099_v51 }
 0x248   : > { %v1162_v40 = vmul.f32 %v1161_v36, %v9016_v3  ;;  %v1092_v27 = vadd.f32 %v9025_v16, %v1091_v53  ;;  %v1014_v59 = vsub.f32 %v8966_v49, %v1006_v44  ;;  %vm1095_vm6 = vmor %vm1093_vm0, %vm1094_vm2  ;;  %v1044_v0 = vmul.f32 %v9004_v7, %v8972_v21  ;;  %v1180_v36 = vld [vmem:[#allocation2 + $0x40] sm:$0xff] }
 0x249   : > { %v1173_v55 = vsel %vm1165_vm8, %v1021_v24, %v1087_v13  ;;  %vm1168_vm12 = vcmp.ge.f32.partialorder %v8988_v2, 0.0  ;;  %vm1098_vm11 = vcmp.eq.f32.partialorder %v1097_v62, 8.507059e+37  ;;  %v1003_v26 = vmul.f32 2.0, %v995_v48  ;;  %v2109_v44 = vld [vmem:[#allocation5 + $0x20] sm:$0xff] }
 0x24a   : > { %v1178_v19 = vsel %vm1170_vm1, %v1026_v42, %v1162_v40  ;;  %1219 = vmatpush.msrb.mxu0 %v1173_v55  ;;  %v1096_v38 = vsel %vm1095_vm6, %v9025_v16, %v1092_v27  ;;  %v1176_v3 = vsel %vm1168_vm12, %v1024_v20, %v1132_v10  ;;  %v1022_v42 = vand.u32 2147483647, %v1014_v59  ;;  %v2110_v59 = vld [vmem:[#allocation5 + $0x28] sm:$0xff] }
 0x24b   : > { %1246 = vmatpush.msrb.mxu1 %v1178_v19  ;;  %v1101_v47 = vsel %vm1098_vm11, %v1100_v41, %v1096_v38  ;;  %v1045_v50 = vsub.f32 1.0, %v1044_v0  ;;  %v1052_v17 = vand.u32 2147483647, %v8972_v21  ;;  %v1054_v32 = vand.u32 2147483648, %v8972_v21  ;;  %v14830_v38 = vld [vmem:[#allocation21_spill] sm:$0xff] }
 0x24c   : > { %v1102_v39 = vmul.f32 %v1101_v47, %v8966_v49  ;;  %v996_v2 = vfloor.f32 %v9009_v37  ;;  %vm1166_vm10 = vcmp.ge.f32.partialorder %v8966_v49, 0.0  ;;  %vm1049_vm1 = vweird.f32 %v9004_v7  ;;  %v14831_v47 = vld [vmem:[#allocation20_spill] sm:$0xff] }
 0x24d   : > { %1247 = vmatpush.msrb.mxu1 %v1176_v3  ;;  %v1046_v16 = vmul.f32 %v9004_v7, %v1045_v50  ;;  %v1059_v23 = vmul.f32 %v9021_v63, %v8984_v35  ;;  %v1011_v20 = vsub.f32 %v8956_v15, %v1003_v26  ;;  %vm1048_vm9 = vweird.f32 %v8972_v21 }
 0x24e   : > { %v1174_v48 = vsel %vm1166_vm10, %v1022_v42, %v1102_v39  ;;  %v1004_v45 = vmul.f32 2.0, %v996_v2  ;;  %vm1050_vm13 = vmor %vm1048_vm9, %vm1049_vm1  ;;  %vm1053_vm15 = vcmp.eq.f32.partialorder %v1052_v17, 8.507059e+37  ;;  %v1055_v49 = vor.u32 1.1754944e-38, %v1054_v32  ;;  %v14832_v32 = vld [vmem:[#allocation14_spill] sm:$0xff] }
 0x24f   : > { %1248 = vmatpush.msrb.mxu1 %v1174_v48  ;;  %v1047_v10 = vadd.f32 %v9004_v7, %v1046_v16  ;;  %v1060_v52 = vsub.f32 1.0, %v1059_v23  ;;  %v1069_v37 = vand.u32 2147483648, %v8984_v35  ;;  %vm1064_vm7 = vweird.f32 %v9021_v63  ;;  %v2107_v23 = vld [vmem:[#allocation5 + $0x10] sm:$0xff] }
 0x250   : > { %v1067_v18 = vand.u32 2147483647, %v8984_v35  ;;  %v1019_v43 = vand.u32 2147483647, %v1011_v20  ;;  %v1012_v21 = vsub.f32 %v8964_v5, %v1004_v45  ;;  %vm1063_vm14 = vweird.f32 %v8984_v35  ;;  %v1182_v35 = vld [vmem:[#allocation2 + $0x50] sm:$0xff] }
 0x251   : > { %v1051_v57 = vsel %vm1050_vm13, %v9004_v7, %v1047_v10  ;;  %v1061_v14 = vmul.f32 %v9021_v63, %v1060_v52  ;;  %vm1163_vm2 = vcmp.ge.f32.partialorder %v8956_v15, 0.0  ;;  %vm1065_vm8 = vmor %vm1063_vm14, %vm1064_vm7  ;;  %v1070_v7 = vor.u32 1.1754944e-38, %v1069_v37  ;;  %v14834_v48 = vld [vmem:[#allocation15_spill] sm:$0xff] }
 0x252   : > { %v1056_v61 = vsel %vm1053_vm15, %v1055_v49, %v1051_v57  ;;  %vm1068_vm0 = vcmp.eq.f32.partialorder %v1067_v18, 8.507059e+37  ;;  %v1020_v40 = vand.u32 2147483647, %v1012_v21  ;;  %vm1164_vm6 = vcmp.ge.f32.partialorder %v8964_v5, 0.0 }
 0x253   : > { %v1057_v22 = vmul.f32 %v1056_v61, %v8956_v15  ;;  %v1062_v51 = vadd.f32 %v9021_v63, %v1061_v14  ;;  %v1181_v15 = vld [vmem:[#allocation2 + $0x48] sm:$0xff]  ;;  %v2244_v27 = vand.u32 2147483647, %v8565_v56  ;;  %v2125_v19 = vmul.f32 %v8543_v8, %v8389_v30 }
 0x254   : > { %v2162_v55 = vmul.f32 %v8546_v12, %v8383_v25  ;;  %v2245_v26 = vand.u32 2147483647, %v14830_v38  ;;  %v2163_v50 = vmul.f32 %v14831_v47, %v8383_v25  ;;  %v2122_v2 = vmul.f32 %v8541_v6, %v14832_v32 }
 0x255   : > { %v1171_v58 = vsel %vm1163_vm2, %v1019_v43, %v1057_v22  ;;  %v1066_v53 = vsel %vm1065_vm8, %v9021_v63, %v1062_v51  ;;  %v1183_v63 = vld [vmem:[#allocation2 + $0x58] sm:$0xff]  ;;  %v9145_v0 = vadd.f32 1.0, %v2244_v27  ;;  %v2133_v42 = vadd.f32 %v2125_v19, %v2110_v59  ;;  %v2105_v27 = vld [vmem:[#allocation5] sm:$0xff] }
 0x256   : > { %1220 = vmatpush.msrb.mxu0 %v1171_v58  ;;  %v1071_v62 = vsel %vm1068_vm0, %v1070_v7, %v1066_v53  ;;  %v9153_v39 = vadd.f32 1.0, %v2245_v26  ;;  %v2160_v20 = vmul.f32 %v8546_v12, %v14834_v48  ;;  %v2196_v10 = vadd.f32 1.0, %v8565_v56 }
 0x257   : > { %v1072_v24 = vmul.f32 %v1071_v62, %v8964_v5  ;;  %7484 = vmatmul.msk.f32.vlgmr.msrb.gmra.mxu0 %vm14684_vm3, %v1180_v36  ;;  %v2124_v5 = vmul.f32 %v8541_v6, %v8389_v30  ;;  %7755 = vrcp.f32 %v9145_v0  ;;  %v9158_v16 = vadd.f32 %v2163_v50, %v2133_v42 }
 0x258   : > { %7757 = vrcp.f32 %v9153_v39  ;;  %v2130_v49 = vadd.f32 %v2122_v2, %v2107_v23  ;;  %v2197_v57 = vadd.f32 1.0, %v14830_v38  ;;  %v2204_v18 = vmul.f32 0.5, %v2196_v10 }
 0x259   : > { %v1172_v13 = vsel %vm1164_vm6, %v1020_v40, %v1072_v24  ;;  %v2132_v41 = vadd.f32 %v2124_v5, %v2109_v44  ;;  %14833 = vst [vmem:[#allocation37_spill] sm:$0xff] %v9158_v16  ;;  %v2243_v52 = vand.u32 2147483647, %v9158_v16  ;;  %v14835_v40 = vld [vmem:[#allocation13_spill] sm:$0xff]  ;;  %v2108_v44 = vld [vmem:[#allocation5 + $0x18] sm:$0xff]  ;;  %vm2349_vm12 = vweird.f32 %v9145_v0 }
 0x25a   : > { %1249 = vmatpush.msrb.mxu1 %v1172_v13  ;;  %v9170_v14 = vadd.f32 %v2160_v20, %v2130_v49  ;;  %v2205_v21 = vmul.f32 0.5, %v2197_v57  ;;  %v2212_v7 = vfloor.f32 %v2204_v18  ;;  %v2120_v24 = vmul.f32 %v8541_v6, %v14835_v40  ;;  %v14836_v20 = vld [vmem:[#allocation16_spill] sm:$0xff] }
 0x25b   : > { %7488 = vmatmul.msk.f32.vlgmr.msrb.gmra.mxu1 %vm14684_vm3, %v1180_v36  ;;  %v9148_v3 = vadd.f32 %v2162_v55, %v2132_v41  ;;  %v9175_v61 = vadd.f32 1.0, %v2243_v52  ;;  %v2123_v13 = vmul.f32 %v8543_v8, %v14832_v32  ;;  %v2161_v55 = vmul.f32 %v14831_v47, %v14834_v48 }
 0x25c   : > { %v2240_v51 = vand.u32 2147483647, %v9170_v14  ;;  %v2220_v41 = vmul.f32 2.0, %v2212_v7  ;;  %v2355_v26 = vand.u32 2147483648, %v9145_v0  ;;  %v2128_v23 = vadd.f32 %v2120_v24, %v2105_v27 }
 0x25d   : > { %v2242_v17 = vand.u32 2147483647, %v9148_v3  ;;  %v9167_v37 = vpop.eup %7755  ;;  %v2194_v36 = vadd.f32 1.0, %v9148_v3  ;;  %v2131_v2 = vadd.f32 %v2123_v13, %v2108_v44  ;;  %v2158_v10 = vmul.f32 %v8546_v12, %v14836_v20 }
 0x25e   : > { %v2345_v43 = vmul.f32 %v9167_v37, %v9145_v0  ;;  %v9177_v22 = vpop.eup %7757  ;;  %v9193_v5 = vadd.f32 1.0, %v2240_v51  ;;  %vm2364_vm10 = vweird.f32 %v9153_v39  ;;  %v2370_v18 = vand.u32 2147483648, %v9153_v39 }
 0x25f   : > { %7485 = vmatmul.msk.f32.gmra.mxu0 %vm14684_vm3, %v1181_v15  ;;  %v9164_v45 = vadd.f32 1.0, %v2242_v17  ;;  %v2360_v53 = vmul.f32 %v9177_v22, %v9153_v39  ;;  %v2202_v19 = vmul.f32 0.5, %v2194_v36  ;;  %v2368_v17 = vand.u32 2147483647, %v9153_v39 }
 0x260   : > { %v2346_v58 = vsub.f32 1.0, %v2345_v43  ;;  %v2195_v43 = vadd.f32 1.0, %v9158_v16  ;;  %v2228_v51 = vsub.f32 %v8565_v56, %v2220_v41  ;;  %vm2350_vm1 = vweird.f32 %v9167_v37 }
 0x261   : > { %7759 = vrcp.f32 %v9164_v45  ;;  %v2361_v42 = vsub.f32 1.0, %v2360_v53  ;;  %v2210_v7 = vfloor.f32 %v2202_v19  ;;  %v9217_v36 = vadd.f32 %v2161_v55, %v2131_v2  ;;  %vm9233_vm9 = vmor %vm2349_vm12, %vm2350_vm1 }
 0x262   : > { %7761 = vrcp.f32 %v9175_v61  ;;  %v2347_v59 = vmul.f32 %v9167_v37, %v2346_v58  ;;  %v2192_v13 = vadd.f32 1.0, %v9170_v14  ;;  %v2159_v27 = vmul.f32 %v14831_v47, %v14836_v20 }
 0x263   : > { %7489 = vmatmul.msk.f32.gmra.mxu1 %vm14684_vm3, %v1181_v15  ;;  %v2121_v15 = vmul.f32 %v8543_v8, %v14835_v40  ;;  %7763 = vrcp.f32 %v9193_v5  ;;  %14839 = vst [vmem:[#allocation38_spill] sm:$0xff] %v9217_v36  ;;  %v2362_v53 = vmul.f32 %v9177_v22, %v2361_v42  ;;  %v2356_v41 = vor.u32 1.1754944e-38, %v2355_v26 }
 0x264   : > { %v2348_v58 = vadd.f32 %v9167_v37, %v2347_v59  ;;  %v2371_v55 = vor.u32 1.1754944e-38, %v2370_v18  ;;  %v2203_v2 = vmul.f32 0.5, %v2195_v43  ;;  %vm2365_vm13 = vweird.f32 %v9177_v22 }
 0x265   : > { %vm9238_vm15 = vcmp.eq.f32.partialorder %v2368_v17, 8.507059e+37  ;;  %v2218_v42 = vmul.f32 2.0, %v2210_v7  ;;  %v2323_v26 = vand.u32 2147483647, %v9164_v45  ;;  %v2200_v17 = vmul.f32 0.5, %v2192_v13  ;;  %vm9265_vm2 = vmor %vm2364_vm10, %vm2365_vm13 }
 0x266   : > { %v2236_v43 = vand.u32 2147483647, %v2228_v51  ;;  %vm2319_vm7 = vweird.f32 %v9164_v45  ;;  %v2325_v34 = vand.u32 2147483648, %v9164_v45  ;;  %v2211_v20 = vfloor.f32 %v2203_v2 }
 0x267   : > { %7486 = vmatmul.msk.f32.gmra.mxu0 %vm14684_vm3, %v1182_v35  ;;  %v9184_v62 = vpop.eup %7759  ;;  %vm2380_vm14 = vcmp.ge.f32.partialorder %v8565_v56, 0.0  ;;  %vm9270_vm8 = vcmp.eq.f32.partialorder %v2323_v26, 8.507059e+37  ;;  %vm2334_vm0 = vweird.f32 %v9175_v61  ;;  %v2338_v26 = vand.u32 2147483647, %v9175_v61 }
 0x268   : > { %v2315_v50 = vmul.f32 %v9184_v62, %v9164_v45  ;;  %v9205_v52 = vpop.eup %7761  ;;  %vm2320_vm6 = vweird.f32 %v9184_v62  ;;  %v2326_v59 = vor.u32 1.1754944e-38, %v2325_v34 }
 0x269   : > { %vm9296_vm12 = vmor %vm2319_vm7, %vm2320_vm6  ;;  %vm9321_vm10 = vcmp.eq.f32.partialorder %v2338_v26, 8.507059e+37 }
 0x26a   : > { %v2316_v24 = vsub.f32 1.0, %v2315_v50  ;;  %v2241_v50 = vand.u32 2147483647, %v9217_v36 }
 0x26b   : > { %7490 = vmatmul.msk.f32.gmra.mxu1 %vm14684_vm3, %v1182_v35  ;;  %v2353_v35 = vand.u32 2147483647, %v9145_v0  ;;  %v2352_v0 = vsel %vm9233_vm9, %v9167_v37, %v2348_v58  ;;  %v2226_v58 = vsub.f32 %v9148_v3, %v2218_v42  ;;  %v9289_v42 = vmul.f32 2.0, %v2211_v20 }
 0x26c   : > { %v2317_v18 = vmul.f32 %v9184_v62, %v2316_v24  ;;  %v9277_v24 = vadd.f32 1.0, %v2241_v50  ;;  %vm2289_vm9 = vweird.f32 %v9193_v5 }
 0x26d   : > { %vm9207_vm11 = vcmp.eq.f32.partialorder %v2353_v35, 8.507059e+37  ;;  %v2330_v35 = vmul.f32 %v9205_v52, %v9175_v61  ;;  %14851 = vst [vmem:[#allocation42_spill] sm:$0xff] %v9289_v42 }
 0x26e   : > { %v2357_v37 = vsel %vm9207_vm11, %v2356_v41, %v2352_v0  ;;  %v2193_v41 = vadd.f32 1.0, %v9217_v36  ;;  %7765 = vrcp.f32 %v9277_v24  ;;  %vm2335_vm11 = vweird.f32 %v9205_v52 }
 0x26f   : > { %7487 = vmatmul.msk.f32.gmra.mxu0 %vm14684_vm3, %v1183_v63  ;;  %v2358_v50 = vmul.f32 %v2357_v37, %v8565_v56  ;;  %vm9338_vm1 = vmor %vm2334_vm0, %vm2335_vm11 }
 0x270   : > { %v2201_v37 = vmul.f32 0.5, %v2193_v41 }
 0x273   : > { %7491 = vmatmul.msk.f32.gmra.mxu1 %vm14684_vm3, %v1183_v63  ;;  %v2213_v63 = vfloor.f32 %v2205_v21  ;;  %v2106_v21 = vld [vmem:[#allocation5 + $0x8] sm:$0xff] }
 0x274   : > { %v2129_v44 = vadd.f32 %v2121_v15, %v2106_v21  ;;  %v2331_v21 = vsub.f32 1.0, %v2330_v35  ;;  %v2318_v35 = vadd.f32 %v9184_v62, %v2317_v18  ;;  %v2293_v15 = vand.u32 2147483647, %v9193_v5 }
 0x275   : > { %v2221_v57 = vmul.f32 2.0, %v2213_v63  ;;  %v9224_v63 = vadd.f32 %v2158_v10, %v2128_v23  ;;  %v9244_v23 = vpop.eup %7763 }
 0x276   : > { %v9252_v11 = vadd.f32 %v2159_v27, %v2129_v44  ;;  %v2285_v49 = vmul.f32 %v9244_v23, %v9193_v5  ;;  %v2208_v44 = vfloor.f32 %v2200_v17  ;;  %v2332_v27 = vmul.f32 %v9205_v52, %v2331_v21  ;;  %v1185_v21 = vld [vmem:[#allocation5 + $0xc0] sm:$0xff] }
 0x277   : > { %14840 = vst [vmem:[#allocation39_spill] sm:$0xff] %v9224_v63  ;;  %v2229_v19 = vsub.f32 %v14830_v38, %v2221_v57  ;;  %v2363_v57 = vadd.f32 %v9177_v22, %v2362_v53  ;;  %v2238_v7 = vand.u32 2147483647, %v9224_v63  ;;  %v2190_v18 = vadd.f32 1.0, %v9224_v63 }
 0x278   : > { %14845 = vst [vmem:[#allocation40_spill] sm:$0xff] %v9252_v11  ;;  %v2239_v2 = vand.u32 2147483647, %v9252_v11  ;;  %v2322_v17 = vsel %vm9296_vm12, %v9184_v62, %v2318_v35  ;;  %v2216_v45 = vmul.f32 2.0, %v2208_v44  ;;  %v2295_v62 = vand.u32 2147483648, %v9193_v5 }
 0x279   : > { %v9254_v1 = vand.u32 2147483647, %v2229_v19  ;;  %v2367_v39 = vsel %vm9265_vm2, %v9177_v22, %v2363_v57  ;;  %v9286_v19 = vadd.f32 1.0, %v2238_v7  ;;  %v2340_v22 = vand.u32 2147483648, %v9175_v61  ;;  %v1189_v61 = vld [vmem:[#allocation5 + $0xe0] sm:$0xff] }
 0x27a   : > { %v2286_v57 = vsub.f32 1.0, %v2285_v49  ;;  %v2372_v20 = vsel %vm9238_vm15, %v2371_v55, %v2367_v39  ;;  %v2333_v7 = vadd.f32 %v9205_v52, %v2332_v27  ;;  %v9310_v51 = vadd.f32 1.0, %v2239_v2  ;;  %v1186_v39 = vld [vmem:[#allocation5 + $0xc8] sm:$0xff]  ;;  %v1187_v2 = vld [vmem:[#allocation5 + $0xd0] sm:$0xff] }
 0x27b   : > { %14846 = vst [vmem:[#allocation41_spill] sm:$0xff] %v9254_v1  ;;  %7767 = vrcp.f32 %v9286_v19  ;;  %v9312_v49 = vand.u32 2147483647, %v2226_v58  ;;  %v9319_v35 = vmul.f32 %v2372_v20, %v14830_v38  ;;  %v2198_v41 = vmul.f32 0.5, %v2190_v18 }
 0x27c   : > { %14854 = vst [vmem:[#allocation43_spill] sm:$0xff] %v9310_v51  ;;  %v2287_v27 = vmul.f32 %v9244_v23, %v2286_v57  ;;  %v9330_v55 = vsel %vm2380_vm14, %v2236_v43, %v2358_v50  ;;  %v2327_v48 = vsel %vm9270_vm8, %v2326_v59, %v2322_v17  ;;  %v2341_v57 = vor.u32 1.1754944e-38, %v2340_v22  ;;  %v1188_v59 = vld [vmem:[#allocation5 + $0xd8] sm:$0xff] }
 0x27d   : > { %14855 = vst [vmem:[#allocation44_spill] sm:$0xff] %v9312_v49  ;;  %v2337_v56 = vsel %vm9338_vm1, %v9205_v52, %v2333_v7  ;;  %v2224_v43 = vsub.f32 %v9170_v14, %v2216_v45  ;;  %v2209_v50 = vfloor.f32 %v2201_v37  ;;  %7769 = vrcp.f32 %v9310_v51 }
 0x27e   : > { %14856 = vst [vmem:[#allocation45_spill] sm:$0xff] %v9319_v35  ;;  %vm9352_vm13 = vcmp.eq.f32.partialorder %v2293_v15, 8.507059e+37  ;;  %v2296_v22 = vor.u32 1.1754944e-38, %v2295_v62  ;;  %v2288_v52 = vadd.f32 %v9244_v23, %v2287_v27  ;;  %vm2290_vm15 = vweird.f32 %v9244_v23 }
 0x27f   : > { %14859 = vst [vmem:[#allocation46_spill] sm:$0xff] %v9330_v55  ;;  %v2206_v45 = vfloor.f32 %v2198_v41  ;;  %v9364_v7 = vmul.f32 %v2327_v48, %v9148_v3  ;;  %v9368_v37 = vsel %vm9321_vm10, %v2341_v57, %v2337_v56  ;;  %v9378_v27 = vmul.f32 2.0, %v2209_v50  ;;  %vm9383_vm7 = vmor %vm2289_vm9, %vm2290_vm15 }
 0x280   : > { %14866 = vst [vmem:[#allocation49_spill] sm:$0xff] %v9368_v37  ;;  %v2292_v5 = vsel %vm9383_vm7, %v9244_v23, %v2288_v52  ;;  %v2191_v44 = vadd.f32 1.0, %v9252_v11  ;;  %v1191_v23 = vld [vmem:[#allocation5 + $0xf0] sm:$0xff] }
 0x281   : > { %14865 = vst [vmem:[#allocation48_spill] sm:$0xff] %v9364_v7  ;;  %v9398_v50 = vmul.f32 2.0, %v2206_v45  ;;  %v9414_v52 = vsel %vm9352_vm13, %v2296_v22, %v2292_v5 }
 0x282   : > { %14868 = vst [vmem:[#allocation51_spill] sm:$0xff] %v9378_v27 }
 0x283   : > { %14871 = vst [vmem:[#allocation52_spill] sm:$0xff] %v9398_v50 }
 0x284   : > { %14872 = vst [vmem:[#allocation53_spill] sm:$0xff] %v9414_v52 }
 0x2d4   : > { %v1222_v10 = vpop.f32.mrf.mxu0 }
 0x2d5   : > { %v9326_v58 = vadd.f32 %v1222_v10, %v1185_v21  ;;  %v9342_v10 = vpop.eup %7765 }
 0x2d6   : > { %v9356_v20 = vpop.eup %7767  ;;  %v2300_v15 = vmul.f32 %v9342_v10, %v9277_v24 }
 0x2d7   : > { %v2255_v26 = vmul.f32 %v9356_v20, %v9286_v19  ;;  %v9391_v57 = vpop.eup %7769 }
 0x2d8   : > { %v1251_v13 = vpop.f32.mrf.mxu1 }
 0x2d9   : > { %v9349_v53 = vadd.f32 %v1251_v13, %v1186_v39  ;;  %v1311_v13 = vand.u32 2147483647, %v9326_v58  ;;  %v9376_v39 = vand.u32 2147483647, %v2224_v43  ;;  %v2256_v45 = vsub.f32 1.0, %v2255_v26 }
 0x2da   : > { %v9431_v26 = vmul.f32 0.5, %v2191_v44 }
 0x2db   : > { %14862 = vst [vmem:[#allocation47_spill] sm:$0xff] %v9349_v53  ;;  %v1312_v41 = vand.u32 2147483647, %v9349_v53  ;;  %v1264_v12 = vadd.f32 1.0, %v9349_v53 }
 0x2dc   : > { %v1225_v34 = vpop.f32.mrf.mxu0  ;;  %14867 = vst [vmem:[#allocation50_spill] sm:$0xff] %v9376_v39 }
 0x2dd   : > { %v9358_v17 = vadd.f32 %v1225_v34, %v1187_v2  ;;  %v1190_v2 = vld [vmem:[#allocation5 + $0xe8] sm:$0xff]  ;;  %v9410_v48 = vadd.f32 1.0, %v1312_v41  ;;  %14874 = vst [vmem:[#allocation55_spill] sm:$0xff] %v9431_v26 }
 0x2df   : > { %v1313_v56 = vand.u32 2147483647, %v9358_v17 }
 0x2e0   : > { %v1254_v0 = vpop.f32.mrf.mxu1 }
 0x2e1   : > { %v9372_v34 = vadd.f32 %v1254_v0, %v1188_v59  ;;  %v9400_v59 = vadd.f32 1.0, %v1311_v13  ;;  %v9418_v13 = vmul.f32 %v9391_v57, %v9310_v51  ;;  %v1192_v0 = vld [vmem:[#allocation5 + $0xf8] sm:$0xff] }
 0x2e3   : > { %v1314_v32 = vand.u32 2147483647, %v9372_v34 }
 0x2e4   : > { %v1228_v21 = vpop.f32.mrf.mxu0 }
 0x2e5   : > { %v9374_v62 = vadd.f32 %v1228_v21, %v1189_v61  ;;  %v2301_v21 = vsub.f32 1.0, %v2300_v15  ;;  %v9420_v15 = vadd.f32 1.0, %v1313_v56  ;;  %v9433_v5 = vadd.f32 1.0, %v1314_v32 }
 0x2e7   : > { %v1315_v43 = vand.u32 2147483647, %v9374_v62  ;;  %v9427_v18 = vmul.f32 %v9342_v10, %v2301_v21  ;;  %v1267_v30 = vadd.f32 1.0, %v9374_v62  ;;  %v9443_v21 = vmul.f32 %v9356_v20, %v2256_v45 }
 0x2e8   : > { %v1257_v61 = vpop.f32.mrf.mxu1  ;;  %vm1451_vm11 = vcmp.ge.f32.partialorder %v9374_v62, 0.0 }
 0x2e9   : > { %v9405_v40 = vadd.f32 1.0, %v1315_v43  ;;  %v9407_v25 = vadd.f32 %v1257_v61, %v1190_v2  ;;  %v1263_v43 = vadd.f32 1.0, %v9326_v58  ;;  %14873 = vst [vmem:[#allocation54_spill] sm:$0xff] %v9427_v18 }
 0x2eb   : > { %7771 = vrcp.f32 %v9405_v40  ;;  %v1316_v2 = vand.u32 2147483647, %v9407_v25  ;;  %v1268_v47 = vadd.f32 1.0, %v9407_v25  ;;  %vm1392_vm14 = vweird.f32 %v9405_v40 }
 0x2ec   : > { %7773 = vrcp.f32 %v9400_v59  ;;  %v1231_v41 = vpop.f32.mrf.mxu0  ;;  %vm1452_vm5 = vcmp.ge.f32.partialorder %v9407_v25, 0.0 }
 0x2ed   : > { %v9435_v56 = vadd.f32 1.0, %v1316_v2  ;;  %v9437_v61 = vadd.f32 %v1231_v41, %v1191_v23  ;;  %7775 = vrcp.f32 %v9410_v48  ;;  %v9449_v23 = vmul.f32 0.5, %v1263_v43 }
 0x2ee   : > { %7777 = vrcp.f32 %v9420_v15  ;;  %v1275_v41 = vmul.f32 0.5, %v1267_v30  ;;  %v1276_v8 = vmul.f32 0.5, %v1268_v47  ;;  %v1396_v30 = vand.u32 2147483647, %v9405_v40 }
 0x2ef   : > { %v1317_v32 = vand.u32 2147483647, %v9437_v61  ;;  %v1269_v44 = vadd.f32 1.0, %v9437_v61  ;;  %7779 = vrcp.f32 %v9435_v56  ;;  %vm1407_vm8 = vweird.f32 %v9435_v56 }
 0x2f0   : > { %v1260_v2 = vpop.f32.mrf.mxu1  ;;  %7781 = vrcp.f32 %v9433_v5  ;;  %v1283_v43 = vfloor.f32 %v1275_v41  ;;  %v1284_v47 = vfloor.f32 %v1276_v8  ;;  %vm9487_vm2 = vcmp.eq.f32.partialorder %v1396_v30, 8.507059e+37 }
 0x2f1   : > { %v9453_v9 = vpop.eup %7771  ;;  %v9456_v45 = vadd.f32 1.0, %v1317_v32  ;;  %v9458_v22 = vadd.f32 %v1260_v2, %v1192_v0  ;;  %v1277_v6 = vmul.f32 0.5, %v1269_v44  ;;  %v1398_v32 = vand.u32 2147483648, %v9405_v40 }
 0x2f2   : > { %v9460_v11 = vpop.eup %7773  ;;  %v1388_v1 = vmul.f32 %v9453_v9, %v9405_v40  ;;  %v9473_v2 = vmul.f32 0.5, %v1264_v12  ;;  %v1291_v16 = vmul.f32 2.0, %v1283_v43  ;;  %v1292_v29 = vmul.f32 2.0, %v1284_v47 }
 0x2f3   : > { %7783 = vrcp.f32 %v9456_v45  ;;  %v1318_v35 = vand.u32 2147483647, %v9458_v22  ;;  %v1285_v42 = vfloor.f32 %v1277_v6  ;;  %v9468_v38 = vpop.eup %7775  ;;  %v1270_v0 = vadd.f32 1.0, %v9458_v22 }
 0x2f4   : > { %v9475_v41 = vpop.eup %7777  ;;  %v1428_v36 = vand.u32 2147483648, %v9456_v45  ;;  %v1389_v6 = vsub.f32 1.0, %v1388_v1  ;;  %v1426_v39 = vand.u32 2147483647, %v9456_v45  ;;  %vm1422_vm0 = vweird.f32 %v9456_v45 }
 0x2f5   : > { %v9477_v8 = vadd.f32 1.0, %v1318_v35  ;;  %v1293_v50 = vmul.f32 2.0, %v1285_v42  ;;  %v9480_v27 = vpop.eup %7779  ;;  %v1278_v37 = vmul.f32 0.5, %v1270_v0  ;;  %v1399_v42 = vor.u32 1.1754944e-38, %v1398_v32 }
 0x2f6   : > { %v9483_v63 = vpop.eup %7781  ;;  %v1390_v49 = vmul.f32 %v9453_v9, %v1389_v6  ;;  %v1429_v47 = vor.u32 1.1754944e-38, %v1428_v36  ;;  %vm1393_vm6 = vweird.f32 %v9453_v9  ;;  %vm9499_vm12 = vcmp.eq.f32.partialorder %v1426_v39, 8.507059e+37 }
 0x2f7   : > { %7785 = vrcp.f32 %v9477_v8  ;;  %v1301_v12 = vsub.f32 %v9437_v61, %v1293_v50  ;;  %v1286_v44 = vfloor.f32 %v1278_v37  ;;  %v1443_v1 = vand.u32 2147483648, %v9477_v8  ;;  %vm1394_vm9 = vmor %vm1392_vm14, %vm1393_vm6 }
 0x2f8   : > { %v1403_v50 = vmul.f32 %v9480_v27, %v9435_v56  ;;  %v1441_v37 = vand.u32 2147483647, %v9477_v8  ;;  %v1299_v0 = vsub.f32 %v9374_v62, %v1291_v16  ;;  %v1300_v6 = vsub.f32 %v9407_v25, %v1292_v29 }
 0x2f9   : > { %v7784_v43 = vpop.eup %7783  ;;  %v1309_v36 = vand.u32 2147483647, %v1301_v12  ;;  %v1294_v7 = vmul.f32 2.0, %v1286_v44  ;;  %v1391_v55 = vadd.f32 %v9453_v9, %v1390_v49  ;;  %vm1437_vm1 = vweird.f32 %v9477_v8 }
 0x2fa   : > { %v1418_v30 = vmul.f32 %v7784_v43, %v9456_v45  ;;  %v1404_v51 = vsub.f32 1.0, %v1403_v50  ;;  %vm1423_vm10 = vweird.f32 %v7784_v43  ;;  %v1444_v39 = vor.u32 1.1754944e-38, %v1443_v1 }
 0x2fb   : > { %vm1408_vm13 = vweird.f32 %v9480_v27  ;;  %vm1453_vm15 = vcmp.ge.f32.partialorder %v9437_v61, 0.0  ;;  %v1395_v29 = vsel %vm1394_vm9, %v9453_v9, %v1391_v55  ;;  %v1411_v44 = vand.u32 2147483647, %v9435_v56  ;;  %vm1424_vm6 = vmor %vm1422_vm0, %vm1423_vm10 }
 0x2fc   : > { %v1419_v26 = vsub.f32 1.0, %v1418_v30  ;;  %v1405_v49 = vmul.f32 %v9480_v27, %v1404_v51  ;;  %v1413_v12 = vand.u32 2147483648, %v9435_v56  ;;  %vm9520_vm7 = vcmp.eq.f32.partialorder %v1441_v37, 8.507059e+37  ;;  %vm1409_vm14 = vmor %vm1407_vm8, %vm1408_vm13 }
 0x2fd   : > { %v7786_v16 = vpop.eup %7785  ;;  %v1307_v40 = vand.u32 2147483647, %v1299_v0  ;;  %v1308_v52 = vand.u32 2147483647, %v1300_v6  ;;  %v1302_v54 = vsub.f32 %v9458_v22, %v1294_v7  ;;  %v1400_v9 = vsel %vm9487_vm2, %v1399_v42, %v1395_v29 }
 0x2fe   : > { %v1420_v50 = vmul.f32 %v7784_v43, %v1419_v26  ;;  %v1433_v1 = vmul.f32 %v7786_v16, %v9477_v8  ;;  %v1406_v51 = vadd.f32 %v9480_v27, %v1405_v49  ;;  %v1414_v55 = vor.u32 1.1754944e-38, %v1413_v12 }
 0x2ff   : > { %v1401_v26 = vmul.f32 %v1400_v9, %v9374_v62  ;;  %v1265_v37 = vadd.f32 1.0, %v9358_v17  ;;  %vm1454_vm2 = vcmp.ge.f32.partialorder %v9458_v22, 0.0  ;;  %vm1412_vm9 = vcmp.eq.f32.partialorder %v1411_v44, 8.507059e+37 }
 0x300   : > { %v1421_v53 = vadd.f32 %v7784_v43, %v1420_v50  ;;  %v1434_v18 = vsub.f32 1.0, %v1433_v1  ;;  %v1410_v7 = vsel %vm1409_vm14, %v9480_v27, %v1406_v51  ;;  %v1358_v35 = vmul.f32 %v9475_v41, %v9420_v15 }
 0x301   : > { %vm1438_vm4 = vweird.f32 %v7786_v16  ;;  %v1415_v56 = vsel %vm1412_vm9, %v1414_v55, %v1410_v7  ;;  %v1310_v29 = vand.u32 2147483647, %v1302_v54  ;;  %v1459_v45 = vsel %vm1451_vm11, %v1307_v40, %v1401_v26 }
 0x302   : > { %v1425_v42 = vsel %vm1424_vm6, %v7784_v43, %v1421_v53  ;;  %v1435_v0 = vmul.f32 %v7786_v16, %v1434_v18  ;;  %v1273_v49 = vmul.f32 0.5, %v1265_v37  ;;  %v1416_v12 = vmul.f32 %v1415_v56, %v9407_v25  ;;  %vm1439_vm8 = vmor %vm1437_vm1, %vm1438_vm4 }
 0x303   : > { %v1430_v6 = vsel %vm9499_vm12, %v1429_v47, %v1425_v42  ;;  %v1359_v50 = vsub.f32 1.0, %v1358_v35  ;;  %vm1362_vm0 = vweird.f32 %v9420_v15  ;;  %vm1363_vm10 = vweird.f32 %v9475_v41 }
 0x304   : > { %v1431_v27 = vmul.f32 %v1430_v6, %v9437_v61  ;;  %v1436_v44 = vadd.f32 %v7786_v16, %v1435_v0  ;;  %v1281_v53 = vfloor.f32 %v1273_v49  ;;  %v1368_v54 = vand.u32 2147483648, %v9420_v15  ;;  %vm1364_vm4 = vmor %vm1362_vm0, %vm1363_vm10 }
 0x305   : > { %v1360_v43 = vmul.f32 %v9475_v41, %v1359_v50  ;;  %v1366_v47 = vand.u32 2147483647, %v9420_v15  ;;  %v9563_v1 = vadd.f32 %v1459_v45, %v8807_v60  ;;  %v1460_v61 = vsel %vm1452_vm5, %v1308_v52, %v1416_v12 }
 0x306   : > { %v1461_v62 = vsel %vm1453_vm15, %v1309_v36, %v1431_v27  ;;  %v1440_v18 = vsel %vm1439_vm8, %v7786_v16, %v1436_v44  ;;  %v1289_v40 = vmul.f32 2.0, %v1281_v53  ;;  %v1266_v16 = vadd.f32 1.0, %v9372_v34 }
 0x307   : > { %v9558_v32 = vadd.f32 %v1461_v62, %v8835_v28  ;;  %v1445_v8 = vsel %vm9520_vm7, %v1444_v39, %v1440_v18  ;;  %v1361_v36 = vadd.f32 %v9475_v41, %v1360_v43  ;;  %v1369_v60 = vor.u32 1.1754944e-38, %v1368_v54 }
 0x308   : > { %v1446_v9 = vmul.f32 %v1445_v8, %v9458_v22  ;;  %v1297_v28 = vsub.f32 %v9358_v17, %v1289_v40  ;;  %vm1449_vm12 = vcmp.ge.f32.partialorder %v9358_v17, 0.0  ;;  %v1373_v25 = vmul.f32 %v9483_v63, %v9433_v5 }
 0x309   : > { %14881 = vst [vmem:[#allocation56_spill] sm:$0xff] %v9558_v32  ;;  %1509 = vmatpush.msrb.mxu2 %v9558_v32  ;;  %v1365_v39 = vsel %vm1364_vm4, %v9475_v41, %v1361_v36  ;;  %vm1367_vm5 = vcmp.eq.f32.partialorder %v1366_v47, 8.507059e+37  ;;  %v1274_v30 = vmul.f32 0.5, %v1266_v16  ;;  %v1381_v26 = vand.u32 2147483647, %v9433_v5 }
 0x30a   : > { %v1462_v52 = vsel %vm1454_vm2, %v1310_v29, %v1446_v9  ;;  %v1370_v15 = vsel %vm1367_vm5, %v1369_v60, %v1365_v39  ;;  %v1374_v55 = vsub.f32 1.0, %v1373_v25  ;;  %v1305_v37 = vand.u32 2147483647, %v1297_v28 }
 0x30b   : > { %v9583_v51 = vadd.f32 %v1462_v52, %v8911_v46  ;;  %1510 = vmatpush.msrb.mxu2 %v9563_v1  ;;  %v1371_v7 = vmul.f32 %v1370_v15, %v9358_v17  ;;  %v1282_v35 = vfloor.f32 %v1274_v30  ;;  %v1383_v22 = vand.u32 2147483648, %v9433_v5 }
 0x30c   : > { %vm2260_vm11 = vweird.f32 %v9356_v20  ;;  %v9592_v41 = vadd.f32 %v1460_v61, %v8931_v31  ;;  %v1375_v46 = vmul.f32 %v9483_v63, %v1374_v55  ;;  %vm1378_vm1 = vweird.f32 %v9483_v63 }
 0x30d   : > { %14882 = vst [vmem:[#allocation57_spill] sm:$0xff] %v9583_v51  ;;  %1538 = vmatpush.msrb.mxu3 %v9583_v51  ;;  %v1328_v42 = vmul.f32 %v9460_v11, %v9400_v59  ;;  %v1457_v0 = vsel %vm1449_vm12, %v1305_v37, %v1371_v7  ;;  %v1290_v56 = vmul.f32 2.0, %v1282_v35  ;;  %vm1377_vm13 = vweird.f32 %v9433_v5  ;;  %v14892_v37 = vld [vmem:[#allocation47_spill] sm:$0xff] }
 0x30e   : > { %v14883_v6 = vfloor.f32 %v9449_v23  ;;  %vm2259_vm15 = vweird.f32 %v9286_v19  ;;  %v9606_v31 = vadd.f32 %v1457_v0, %v8879_v4  ;;  %v1376_v45 = vadd.f32 %v9483_v63, %v1375_v46  ;;  %vm1379_vm14 = vmor %vm1377_vm13, %vm1378_vm1  ;;  %v14894_v0 = vld [vmem:[#allocation53_spill] sm:$0xff] }
 0x30f   : > { %1539 = vmatpush.msrb.mxu3 %v9592_v41  ;;  %vm1382_vm7 = vcmp.eq.f32.partialorder %v1381_v26, 8.507059e+37  ;;  %v1329_v49 = vsub.f32 1.0, %v1328_v42  ;;  %v1298_v17 = vsub.f32 %v9372_v34, %v1290_v56  ;;  %v1384_v27 = vor.u32 1.1754944e-38, %v1383_v22  ;;  %vm9651_vm13 = vmor %vm2259_vm15, %vm2260_vm11  ;;  %v1472_v42 = vld [vmem:[#allocation2 + $0x60] sm:$0xff] }
 0x310   : > { %v1287_v29 = vmul.f32 2.0, %v14883_v6  ;;  %v1336_v5 = vand.u32 2147483647, %v9400_v59  ;;  %v1338_v23 = vand.u32 2147483648, %v9400_v59  ;;  %1511 = vmatpush.msrb.mxu2 %v9606_v31  ;;  %v1380_v44 = vsel %vm1379_vm14, %v9483_v63, %v1376_v45  ;;  %v2390_v45 = vld [vmem:[#allocation2] sm:$0xff] }
 0x311   : > { %v1330_v12 = vmul.f32 %v9460_v11, %v1329_v49  ;;  %vm1333_vm6 = vweird.f32 %v9460_v11  ;;  %v1280_v4 = vfloor.f32 %v9473_v2  ;;  %vm2305_vm2 = vweird.f32 %v9342_v10 }
 0x312   : > { %v1385_v50 = vsel %vm1382_vm7, %v1384_v27, %v1380_v44  ;;  %v1295_v53 = vsub.f32 %v9326_v58, %v1287_v29  ;;  %vm1332_vm9 = vweird.f32 %v9400_v59  ;;  %v2258_v54 = vadd.f32 %v9356_v20, %v9443_v21 }
 0x313   : > { %v1306_v62 = vand.u32 2147483647, %v1298_v17  ;;  %v1386_v18 = vmul.f32 %v1385_v50, %v9372_v34  ;;  %v1331_v63 = vadd.f32 %v9460_v11, %v1330_v12  ;;  %v1343_v43 = vmul.f32 %v9468_v38, %v9410_v48  ;;  %vm1334_vm4 = vmor %vm1332_vm9, %vm1333_vm6  ;;  %v14899_v12 = vld [vmem:[#allocation46_spill] sm:$0xff]  ;;  %v14901_v50 = vld [vmem:[#allocation44_spill] sm:$0xff] }
 0x314   : > { %vm2304_vm8 = vweird.f32 %v9277_v24  ;;  %v14884_v2 = vand.u32 2147483647, %v9286_v19  ;;  %vm1450_vm10 = vcmp.ge.f32.partialorder %v9372_v34, 0.0  ;;  %vm1337_vm12 = vcmp.eq.f32.partialorder %v1336_v5, 8.507059e+37 }
 0x315   : > { %v1339_v59 = vor.u32 1.1754944e-38, %v1338_v23  ;;  %v14887_v21 = vsub.f32 1.0, %v9418_v13  ;;  %v1458_v40 = vsel %vm1450_vm10, %v1306_v62, %v1386_v18  ;;  %v1335_v9 = vsel %vm1334_vm4, %v9460_v11, %v1331_v63  ;;  %vm9682_vm10 = vmor %vm2304_vm8, %vm2305_vm2  ;;  %v14915_v11 = vld [vmem:[#allocation21_spill] sm:$0xff] }
 0x316   : > { %vm9629_vm0 = vcmp.eq.f32.partialorder %v14884_v2, 8.507059e+37  ;;  %v1288_v61 = vmul.f32 2.0, %v1280_v4  ;;  %v1344_v36 = vsub.f32 1.0, %v1343_v43  ;;  %vm2378_vm5 = vcmp.ge.f32.partialorder %v9148_v3, 0.0  ;;  %v14900_v4 = vld [vmem:[#allocation48_spill] sm:$0xff]  ;;  %v14906_v43 = vld [vmem:[#allocation39_spill] sm:$0xff] }
 0x317   : > { %v2272_v8 = vmul.f32 %v9391_v57, %v14887_v21  ;;  %v9640_v16 = vadd.f32 %v1458_v40, %v8941_v33  ;;  %v1303_v28 = vand.u32 2147483647, %v1295_v53  ;;  %v1340_v60 = vsel %vm1337_vm12, %v1339_v59, %v1335_v9  ;;  %v14890_v33 = vld [vmem:[#allocation54_spill] sm:$0xff]  ;;  %v14907_v59 = vld [vmem:[#allocation36_spill] sm:$0xff] }
 0x318   : > { %v1353_v34 = vand.u32 2147483648, %v9410_v48  ;;  %v1341_v25 = vmul.f32 %v1340_v60, %v9326_v58  ;;  %v1345_v13 = vmul.f32 %v9468_v38, %v1344_v36  ;;  %vm1348_vm1 = vweird.f32 %v9468_v38  ;;  %v14910_v36 = vld [vmem:[#allocation50_spill] sm:$0xff]  ;;  %v14911_v60 = vld [vmem:[#allocation51_spill] sm:$0xff] }
 0x319   : > { %v1351_v52 = vand.u32 2147483647, %v9410_v48  ;;  %1540 = vmatpush.msrb.mxu3 %v9640_v16  ;;  %vm1447_vm7 = vcmp.ge.f32.partialorder %v9326_v58, 0.0  ;;  %vm2376_vm14 = vcmp.ge.f32.partialorder %v9170_v14, 0.0  ;;  %v2303_v39 = vadd.f32 %v9342_v10, %v14890_v33  ;;  %v14893_v58 = vld [vmem:[#allocation33_spill] sm:$0xff]  ;;  %v14916_v33 = vld [vmem:[#allocation42_spill] sm:$0xff] }
 0x31a   : > { %v2262_v30 = vsel %vm9651_vm13, %v9356_v20, %v2258_v54  ;;  %v14891_v15 = vand.u32 2147483648, %v9286_v19  ;;  %v1455_v26 = vsel %vm1447_vm7, %v1303_v28, %v1341_v25  ;;  %v1296_v7 = vsub.f32 %v14892_v37, %v1288_v61  ;;  %v14895_v20 = vld [vmem:[#allocation55_spill] sm:$0xff] }
 0x31b   : > { %v1346_v35 = vadd.f32 %v9468_v38, %v1345_v13  ;;  %vm1347_vm11 = vweird.f32 %v9410_v48  ;;  %v9669_v22 = vadd.f32 %v1455_v26, %v14893_v58  ;;  %v1354_v46 = vor.u32 1.1754944e-38, %v1353_v34  ;;  %v14912_v34 = vld [vmem:[#allocation38_spill] sm:$0xff]  ;;  %v14913_v13 = vld [vmem:[#allocation52_spill] sm:$0xff]  ;;  %v14919_v26 = vld [vmem:[#allocation41_spill] sm:$0xff] }
 0x31c   : > { %v2266_v55 = vor.u32 1.1754944e-38, %v14891_v15  ;;  %vm1349_vm15 = vmor %vm1347_vm11, %vm1348_vm1  ;;  %v2298_v56 = vmul.f32 %v14894_v0, %v9170_v14  ;;  %v2207_v6 = vfloor.f32 %v14895_v20  ;;  %vm1352_vm6 = vcmp.eq.f32.partialorder %v1351_v52, 8.507059e+37  ;;  %v1473_v15 = vld [vmem:[#allocation2 + $0x68] sm:$0xff]  ;;  %v14920_v58 = vld [vmem:[#allocation40_spill] sm:$0xff] }
 0x31d   : > { %v1350_v19 = vsel %vm1349_vm15, %v9468_v38, %v1346_v35  ;;  %v2273_v29 = vadd.f32 %v9391_v57, %v2272_v8  ;;  %vm2275_vm9 = vweird.f32 %v9391_v57  ;;  %1512 = vmatpush.msrb.mxu2 %v9669_v22  ;;  %v14898_v38 = vld [vmem:[#allocation43_spill] sm:$0xff]  ;;  %v1304_v27 = vand.u32 2147483647, %v1296_v7  ;;  %v14909_v8 = vld [vmem:[#allocation49_spill] sm:$0xff] }
 0x31e   : > { %v1355_v48 = vsel %vm1352_vm6, %v1354_v46, %v1350_v19  ;;  %v2267_v49 = vsel %vm9629_vm0, %v2266_v55, %v2262_v30  ;;  %vm2274_vm4 = vweird.f32 %v14898_v38  ;;  %v2280_v17 = vand.u32 2147483648, %v14898_v38  ;;  %7492 = vmatmul.msk.f32.vlgmr.msrb.gmra.mxu2 %vm14684_vm3, %v1472_v42  ;;  %v14918_v55 = vld [vmem:[#allocation45_spill] sm:$0xff] }
 0x31f   : > { %v1356_v5 = vmul.f32 %v1355_v48, %v14892_v37  ;;  %v2307_v23 = vsel %vm9682_vm10, %v9342_v10, %v2303_v39  ;;  %v2278_v44 = vand.u32 2147483647, %v14898_v38  ;;  %vm1448_vm2 = vcmp.ge.f32.partialorder %v14892_v37, 0.0  ;;  %2426 = vmatpush.msra.mxu2 %v14899_v12  ;;  %vm9708_vm0 = vmor %vm2274_vm4, %vm2275_vm9  ;;  %v1475_v48 = vld [vmem:[#allocation2 + $0x78] sm:$0xff]  ;;  %v2392_v38 = vld [vmem:[#allocation2 + $0x10] sm:$0xff] }
 0x320   : > { %v2386_v53 = vsel %vm2378_vm5, %v14901_v50, %v14900_v4  ;;  %v14902_v54 = vand.u32 2147483647, %v9277_v24  ;;  %v14903_v62 = vand.u32 2147483648, %v9277_v24  ;;  %v2268_v2 = vmul.f32 %v2267_v49, %v14906_v43  ;;  %v14908_v24 = vld [vmem:[#allocation37_spill] sm:$0xff]  ;;  %v2391_v49 = vld [vmem:[#allocation2 + $0x8] sm:$0xff] }
 0x321   : > { %v1456_v63 = vsel %vm1448_vm2, %v1304_v27, %v1356_v5  ;;  %v2215_v47 = vmul.f32 2.0, %v2207_v6  ;;  %v2277_v3 = vsel %vm9708_vm0, %v9391_v57, %v2273_v29  ;;  %2427 = vmatpush.msra.mxu2 %v2386_v53  ;;  %v2343_v40 = vmul.f32 %v14909_v8, %v14908_v24  ;;  %v1474_v29 = vld [vmem:[#allocation2 + $0x70] sm:$0xff]  ;;  %v1481_v4 = vld [vmem:[#allocation5 + $0x120] sm:$0xff]  ;;  %v1478_v50 = vld [vmem:[#allocation5 + $0x108] sm:$0xff] }
 0x322   : > { %vm2309_vm8 = vcmp.eq.f32.partialorder %v14902_v54, 8.507059e+37  ;;  %v2311_v18 = vor.u32 1.1754944e-38, %v14903_v62  ;;  %v9717_v21 = vadd.f32 %v1456_v63, %v14907_v59  ;;  %v2281_v61 = vor.u32 1.1754944e-38, %v2280_v17  ;;  %v2393_v17 = vld [vmem:[#allocation2 + $0x18] sm:$0xff]  ;;  %v1479_v62 = vld [vmem:[#allocation5 + $0x110] sm:$0xff]  ;;  %v1482_v59 = vld [vmem:[#allocation5 + $0x128] sm:$0xff] }
 0x323   : > { %v2384_v28 = vsel %vm2376_vm14, %v14910_v36, %v2298_v56  ;;  %v2225_v25 = vsub.f32 %v14912_v34, %v14911_v60  ;;  %v14914_v52 = vsub.f32 %v14906_v43, %v14913_v13  ;;  %vm2279_vm12 = vcmp.eq.f32.partialorder %v2278_v44, 8.507059e+37  ;;  %v1477_v44 = vld [vmem:[#allocation5 + $0x100] sm:$0xff]  ;;  %v1480_v63 = vld [vmem:[#allocation5 + $0x118] sm:$0xff] }
 0x324   : > { %v2312_v9 = vsel %vm2309_vm8, %v2311_v18, %v2307_v23  ;;  %1541 = vmatpush.msrb.mxu3 %v9717_v21  ;;  %vm2381_vm5 = vcmp.ge.f32.partialorder %v14915_v11, 0.0  ;;  %v14917_v39 = vsub.f32 %v14908_v24, %v14916_v33  ;;  %2428 = vmatpush.msra.mxu2 %v2384_v28  ;;  %vm2374_vm1 = vcmp.ge.f32.partialorder %v14906_v43, 0.0  ;;  %v1484_v33 = vld [vmem:[#allocation5 + $0x138] sm:$0xff] }
 0x325   : > { %v2230_v57 = vand.u32 2147483647, %v14914_v52  ;;  %v2282_v14 = vsel %vm2279_vm12, %v2281_v61, %v2277_v3  ;;  %7496 = vmatmul.msk.f32.vlgmr.msrb.gmra.mxu3 %vm14684_vm3, %v1472_v42  ;;  %v2389_v37 = vsel %vm2381_vm5, %v14919_v26, %v14918_v55  ;;  %v2313_v7 = vmul.f32 %v2312_v9, %v14912_v34  ;;  %v1483_v9 = vld [vmem:[#allocation5 + $0x130] sm:$0xff] }
 0x326   : > { %v2235_v30 = vand.u32 2147483647, %v14917_v39  ;;  %v2223_v46 = vsub.f32 %v14920_v58, %v2215_v47  ;;  %2455 = vmatpush.msra.mxu3 %v2389_v37  ;;  %vm2379_vm13 = vcmp.ge.f32.partialorder %v14908_v24, 0.0  ;;  %v2233_v56 = vand.u32 2147483647, %v2225_v25  ;;  %7493 = vmatmul.msk.f32.gmra.mxu2 %vm14684_vm3, %v1473_v15 }
 0x327   : > { %v2382_v35 = vsel %vm2374_vm1, %v2230_v57, %v2268_v2  ;;  %v2283_v20 = vmul.f32 %v2282_v14, %v14920_v58  ;;  %vm2377_vm7 = vcmp.ge.f32.partialorder %v14912_v34, 0.0  ;;  %vm2375_vm14 = vcmp.ge.f32.partialorder %v14920_v58, 0.0  ;;  %v2394_v58 = vld [vmem:[#allocation5 + $0x40] sm:$0xff] }
 0x328   : > { %2429 = vmatpush.msra.mxu2 %v2382_v35  ;;  %v2387_v0 = vsel %vm2379_vm13, %v2235_v30, %v2343_v40  ;;  %v2385_v42 = vsel %vm2377_vm7, %v2233_v56, %v2313_v7  ;;  %v2231_v6 = vand.u32 2147483647, %v2223_v46 }
 0x329   : > { %2456 = vmatpush.msra.mxu3 %v2387_v0 }
 0x32a   : > { %v2383_v19 = vsel %vm2375_vm14, %v2231_v6, %v2283_v20 }
 0x32b   : > { %2457 = vmatpush.msra.mxu3 %v2385_v42 }
 0x32d   : > { %2458 = vmatpush.msra.mxu3 %v2383_v19 }
 0x32e   : > { %7497 = vmatmul.msk.f32.gmra.mxu3 %vm14684_vm3, %v1473_v15  ;;  %7494 = vmatmul.msk.f32.gmra.mxu2 %vm14684_vm3, %v1474_v29 }
 0x336   : > { %7498 = vmatmul.msk.f32.gmra.mxu3 %vm14684_vm3, %v1474_v29  ;;  %7495 = vmatmul.msk.f32.gmra.mxu2 %vm14684_vm3, %v1475_v48 }
 0x33e   : > { %7499 = vmatmul.msk.f32.gmra.mxu3 %vm14684_vm3, %v1475_v48  ;;  %7508 = vmatmul.msk.f32.vlgmr.msra.gmra.mxu2 %vm14684_vm3, %v2390_v45 }
 0x346   : > { %7512 = vmatmul.msk.f32.vlgmr.msra.gmra.mxu3 %vm14684_vm3, %v2390_v45  ;;  %7509 = vmatmul.msk.f32.gmra.mxu2 %vm14684_vm3, %v2391_v49 }
 0x34e   : > { %7513 = vmatmul.msk.f32.gmra.mxu3 %vm14684_vm3, %v2391_v49  ;;  %7510 = vmatmul.msk.f32.gmra.mxu2 %vm14684_vm3, %v2392_v38 }
 0x356   : > { %7514 = vmatmul.msk.f32.gmra.mxu3 %vm14684_vm3, %v2392_v38  ;;  %7511 = vmatmul.msk.f32.gmra.mxu2 %vm14684_vm3, %v2393_v17 }
 0x35e   : > { %7515 = vmatmul.msk.f32.gmra.mxu3 %vm14684_vm3, %v2393_v17 }
 0x3a1   : > { %v1514_v27 = vpop.f32.mrf.mxu2 }
 0x3a2   : > { %v9758_v54 = vadd.f32 %v1514_v27, %v1477_v44 }
 0x3a4   : > { %v1603_v47 = vand.u32 2147483647, %v9758_v54  ;;  %v1555_v39 = vadd.f32 1.0, %v9758_v54 }
 0x3a6   : > { %v9777_v60 = vadd.f32 1.0, %v1603_v47  ;;  %v9807_v42 = vmul.f32 0.5, %v1555_v39 }
 0x3a8   : > { %v1543_v5 = vpop.f32.mrf.mxu3 }
 0x3a9   : > { %v1517_v23 = vpop.f32.mrf.mxu2  ;;  %v9762_v10 = vadd.f32 %v1543_v5, %v1478_v50  ;;  %v1571_v50 = vfloor.f32 %v9807_v42 }
 0x3aa   : > { %v9765_v2 = vadd.f32 %v1517_v23, %v1479_v62 }
 0x3ab   : > { %v1604_v24 = vand.u32 2147483647, %v9762_v10 }
 0x3ac   : > { %v1605_v61 = vand.u32 2147483647, %v9765_v2 }
 0x3ad   : > { %v9781_v25 = vadd.f32 1.0, %v1604_v24 }
 0x3ae   : > { %v9785_v57 = vadd.f32 1.0, %v1605_v61 }
 0x3b1   : > { %v1546_v12 = vpop.f32.mrf.mxu3  ;;  %v1520_v53 = vpop.f32.mrf.mxu2 }
 0x3b2   : > { %v9760_v18 = vadd.f32 %v1520_v53, %v1481_v4  ;;  %v9771_v8 = vadd.f32 %v1546_v12, %v1480_v63  ;;  %v2395_v4 = vld [vmem:[#allocation5 + $0x48] sm:$0xff] }
 0x3b4   : > { %v1607_v43 = vand.u32 2147483647, %v9760_v18  ;;  %v1606_v13 = vand.u32 2147483647, %v9771_v8  ;;  %v1559_v37 = vadd.f32 1.0, %v9760_v18  ;;  %vm1743_vm7 = vcmp.ge.f32.partialorder %v9760_v18, 0.0 }
 0x3b6   : > { %v9768_v3 = vadd.f32 1.0, %v1607_v43  ;;  %v9796_v55 = vadd.f32 1.0, %v1606_v13  ;;  %v1567_v20 = vmul.f32 0.5, %v1559_v37 }
 0x3b8   : > { %7787 = vrcp.f32 %v9768_v3  ;;  %v1575_v38 = vfloor.f32 %v1567_v20  ;;  %vm1684_vm11 = vweird.f32 %v9768_v3  ;;  %v1688_v20 = vand.u32 2147483647, %v9768_v3 }
 0x3b9   : > { %v1549_v40 = vpop.f32.mrf.mxu3  ;;  %v1523_v28 = vpop.f32.mrf.mxu2  ;;  %7789 = vrcp.f32 %v9777_v60 }
 0x3ba   : > { %v9775_v36 = vadd.f32 %v1549_v40, %v1482_v59  ;;  %v9779_v34 = vadd.f32 %v1523_v28, %v1483_v9  ;;  %7791 = vrcp.f32 %v9781_v25  ;;  %v1583_v63 = vmul.f32 2.0, %v1575_v38 }
 0x3bb   : > { %vm1689_vm5 = vcmp.eq.f32.partialorder %v1688_v20, 8.507059e+37 }
 0x3bc   : > { %v1609_v52 = vand.u32 2147483647, %v9779_v34  ;;  %v1608_v11 = vand.u32 2147483647, %v9775_v36  ;;  %v1561_v15 = vadd.f32 1.0, %v9779_v34  ;;  %vm1745_vm10 = vcmp.ge.f32.partialorder %v9779_v34, 0.0 }
 0x3be   : > { %v9789_v30 = vpop.eup %7787  ;;  %v9792_v14 = vadd.f32 1.0, %v1609_v52  ;;  %v1569_v46 = vmul.f32 0.5, %v1561_v15  ;;  %v9805_v0 = vadd.f32 1.0, %v1608_v11 }
 0x3bf   : > { %v1680_v7 = vmul.f32 %v9789_v30, %v9768_v3  ;;  %v9815_v17 = vpop.eup %7789  ;;  %vm1685_vm15 = vweird.f32 %v9789_v30 }
 0x3c0   : > { %7793 = vrcp.f32 %v9792_v14  ;;  %v1577_v19 = vfloor.f32 %v1569_v46  ;;  %v1718_v49 = vand.u32 2147483647, %v9792_v14  ;;  %v1720_v23 = vand.u32 2147483648, %v9792_v14  ;;  %v9820_v12 = vpop.eup %7791  ;;  %vm9861_vm8 = vmor %vm1684_vm11, %vm1685_vm15 }
 0x3c1   : > { %v1552_v26 = vpop.f32.mrf.mxu3  ;;  %7795 = vrcp.f32 %v9785_v57  ;;  %v2431_v56 = vpop.f32.mrf.mxu2  ;;  %v1681_v48 = vsub.f32 1.0, %v1680_v7  ;;  %vm1714_vm6 = vweird.f32 %v9792_v14  ;;  %v1690_v7 = vand.u32 2147483648, %v9768_v3 }
 0x3c2   : > { %v9802_v35 = vadd.f32 %v1552_v26, %v1484_v33  ;;  %7797 = vrcp.f32 %v9796_v55  ;;  %v9812_v45 = vadd.f32 %v2431_v56, %v2394_v58  ;;  %v1585_v5 = vmul.f32 2.0, %v1577_v19  ;;  %v2396_v33 = vld [vmem:[#allocation5 + $0x50] sm:$0xff] }
 0x3c3   : > { %7799 = vrcp.f32 %v9805_v0  ;;  %v1682_v43 = vmul.f32 %v9789_v30, %v1681_v48  ;;  %vm9833_vm9 = vcmp.eq.f32.partialorder %v1718_v49, 8.507059e+37  ;;  %v1721_v13 = vor.u32 1.1754944e-38, %v1720_v23 }
 0x3c4   : > { %v1610_v6 = vand.u32 2147483647, %v9802_v35  ;;  %v1562_v29 = vadd.f32 1.0, %v9802_v35  ;;  %v2520_v59 = vand.u32 2147483647, %v9812_v45  ;;  %v1593_v28 = vsub.f32 %v9779_v34, %v1585_v5 }
 0x3c5   : > { %v1591_v46 = vsub.f32 %v9760_v18, %v1583_v63  ;;  %v1683_v56 = vadd.f32 %v9789_v30, %v1682_v43  ;;  %vm1746_vm13 = vcmp.ge.f32.partialorder %v9802_v35, 0.0  ;;  %vm1699_vm11 = vweird.f32 %v9805_v0 }
 0x3c6   : > { %v9817_v27 = vadd.f32 1.0, %v1610_v6  ;;  %v1570_v44 = vmul.f32 0.5, %v1562_v29  ;;  %v7794_v53 = vpop.eup %7793  ;;  %v9854_v19 = vadd.f32 1.0, %v2520_v59  ;;  %v1601_v5 = vand.u32 2147483647, %v1593_v28 }
 0x3c7   : > { %v9828_v47 = vpop.eup %7795  ;;  %v1710_v40 = vmul.f32 %v7794_v53, %v9792_v14  ;;  %vm1715_vm4 = vweird.f32 %v7794_v53  ;;  %v1691_v59 = vor.u32 1.1754944e-38, %v1690_v7 }
 0x3c8   : > { %7801 = vrcp.f32 %v9817_v27  ;;  %v1578_v62 = vfloor.f32 %v1570_v44  ;;  %v9842_v11 = vpop.eup %7797  ;;  %v1733_v26 = vand.u32 2147483647, %v9817_v27  ;;  %v1735_v37 = vand.u32 2147483648, %v9817_v27  ;;  %vm1716_vm12 = vmor %vm1714_vm6, %vm1715_vm4 }
 0x3c9   : > { %v2460_v24 = vpop.f32.mrf.mxu3  ;;  %v2434_v39 = vpop.f32.mrf.mxu2  ;;  %v1711_v15 = vsub.f32 1.0, %v1710_v40  ;;  %vm1729_vm2 = vweird.f32 %v9817_v27  ;;  %v1687_v44 = vsel %vm9861_vm8, %v9789_v30, %v1683_v56  ;;  %v1599_v40 = vand.u32 2147483647, %v1591_v46 }
 0x3ca   : > { %v9837_v61 = vadd.f32 %v2460_v24, %v2395_v4  ;;  %v9840_v52 = vmul.f32 2.0, %v1578_v62  ;;  %v9852_v6 = vpop.eup %7799  ;;  %v9865_v38 = vadd.f32 %v2434_v39, %v2396_v33  ;;  %v2397_v4 = vld [vmem:[#allocation5 + $0x58] sm:$0xff]  ;;  %vm9873_vm0 = vcmp.eq.f32.partialorder %v1733_v26, 8.507059e+37 }
 0x3cb   : > { %v1712_v29 = vmul.f32 %v7794_v53, %v1711_v15  ;;  %v1736_v43 = vor.u32 1.1754944e-38, %v1735_v37  ;;  %v1560_v30 = vadd.f32 1.0, %v9775_v36  ;;  %v1692_v15 = vsel %vm1689_vm5, %v1691_v59, %v1687_v44 }
 0x3cc   : > { %v2521_v58 = vand.u32 2147483647, %v9837_v61  ;;  %v1594_v23 = vsub.f32 %v9802_v35, %v9840_v52  ;;  %v2398_v52 = vld [vmem:[#allocation5 + $0x60] sm:$0xff]  ;;  %v1695_v26 = vmul.f32 %v9852_v6, %v9805_v0  ;;  %v1693_v14 = vmul.f32 %v1692_v15, %v9760_v18 }
 0x3cd   : > { %v1713_v62 = vadd.f32 %v7794_v53, %v1712_v29  ;;  %v2522_v29 = vand.u32 2147483647, %v9865_v38  ;;  %vm1700_vm15 = vweird.f32 %v9852_v6  ;;  %v1703_v59 = vand.u32 2147483647, %v9805_v0 }
 0x3ce   : > { %v7802_v49 = vpop.eup %7801  ;;  %v9877_v24 = vadd.f32 1.0, %v2521_v58  ;;  %v1696_v20 = vsub.f32 1.0, %v1695_v26  ;;  %7803 = vrcp.f32 %v9854_v19  ;;  %vm1701_vm6 = vmor %vm1699_vm11, %vm1700_vm15  ;;  %vm1655_vm4 = vweird.f32 %v9828_v47 }
 0x3cf   : > { %v1725_v63 = vmul.f32 %v7802_v49, %v9817_v27  ;;  %v1717_v33 = vsel %vm1716_vm12, %v7794_v53, %v1713_v62  ;;  %vm1730_vm1 = vweird.f32 %v7802_v49  ;;  %v1568_v53 = vmul.f32 0.5, %v1560_v30 }
 0x3d0   : > { %v1722_v7 = vsel %vm9833_vm9, %v1721_v13, %v1717_v33  ;;  %v1697_v62 = vmul.f32 %v9852_v6, %v1696_v20  ;;  %vm1731_vm14 = vmor %vm1729_vm2, %vm1730_vm1  ;;  %vm1704_vm9 = vcmp.eq.f32.partialorder %v1703_v59, 8.507059e+37  ;;  %7805 = vrcp.f32 %v9877_v24  ;;  %v2400_v59 = vld [vmem:[#allocation5 + $0x70] sm:$0xff] }
 0x3d1   : > { %v2463_v28 = vpop.f32.mrf.mxu3  ;;  %v1726_v39 = vsub.f32 1.0, %v1725_v63  ;;  %v2437_v58 = vpop.f32.mrf.mxu2  ;;  %v1723_v46 = vmul.f32 %v1722_v7, %v9779_v34  ;;  %v1751_v63 = vsel %vm1743_vm7, %v1599_v40, %v1693_v14  ;;  %v1650_v7 = vmul.f32 %v9828_v47, %v9785_v57 }
 0x3d2   : > { %v9885_v37 = vadd.f32 %v2463_v28, %v2397_v4  ;;  %v9894_v44 = vadd.f32 %v2437_v58, %v2398_v52  ;;  %v1576_v4 = vfloor.f32 %v1568_v53  ;;  %v1698_v34 = vadd.f32 %v9852_v6, %v1697_v62 }
 0x3d3   : > { %v1727_v56 = vmul.f32 %v7802_v49, %v1726_v39  ;;  %v1753_v9 = vsel %vm1745_vm10, %v1601_v5, %v1723_v46  ;;  %v1705_v5 = vand.u32 2147483648, %v9805_v0  ;;  %v9909_v28 = vadd.f32 1.0, %v2522_v29 }
 0x3d4   : > { %v2523_v48 = vand.u32 2147483647, %v9885_v37  ;;  %1793 = vmatpush.msra.mxu0 %v1753_v9  ;;  %v1584_v30 = vmul.f32 2.0, %v1576_v4  ;;  %v1602_v52 = vand.u32 2147483647, %v1594_v23  ;;  %v1702_v39 = vsel %vm1701_vm6, %v9852_v6, %v1698_v34  ;;  %v2399_v6 = vld [vmem:[#allocation5 + $0x68] sm:$0xff]  ;;  %v9930_v20 = vpop.eup %7803 }
 0x3d5   : > { %v1728_v13 = vadd.f32 %v7802_v49, %v1727_v56  ;;  %v1706_v15 = vor.u32 1.1754944e-38, %v1705_v5  ;;  %v2524_v0 = vand.u32 2147483647, %v9894_v44  ;;  %v1557_v23 = vadd.f32 1.0, %v9765_v2 }
 0x3d6   : > { %1794 = vmatpush.msra.mxu0 %v1751_v63  ;;  %v9916_v26 = vadd.f32 1.0, %v2523_v48  ;;  %7807 = vrcp.f32 %v9909_v28  ;;  %vm1744_vm10 = vcmp.ge.f32.partialorder %v9775_v36, 0.0  ;;  %v1651_v56 = vsub.f32 1.0, %v1650_v7 }
 0x3d7   : > { %v1732_v18 = vsel %vm1731_vm14, %v7802_v49, %v1728_v13  ;;  %v1592_v49 = vsub.f32 %v9775_v36, %v1584_v30  ;;  %v1565_v46 = vmul.f32 0.5, %v1557_v23  ;;  %v1658_v53 = vand.u32 2147483647, %v9785_v57  ;;  %v9944_v30 = vpop.eup %7805 }
 0x3d8   : > { %v1737_v27 = vsel %vm9873_vm0, %v1736_v43, %v1732_v18  ;;  %v1707_v43 = vsel %vm1704_vm9, %v1706_v15, %v1702_v39  ;;  %7809 = vrcp.f32 %v9916_v26  ;;  %v9933_v29 = vadd.f32 1.0, %v2524_v0  ;;  %v2401_v39 = vld [vmem:[#allocation5 + $0x78] sm:$0xff] }
 0x3d9   : > { %v2466_v40 = vpop.f32.mrf.mxu3  ;;  %v1738_v33 = vmul.f32 %v1737_v27, %v9802_v35  ;;  %v1600_v14 = vand.u32 2147483647, %v1592_v49  ;;  %v1708_v58 = vmul.f32 %v1707_v43, %v9775_v36  ;;  %v1660_v35 = vand.u32 2147483648, %v9785_v57  ;;  %v2440_v18 = vpop.f32.mrf.mxu2 }
 0x3da   : > { %v1573_v9 = vfloor.f32 %v1565_v46  ;;  %v9935_v13 = vadd.f32 %v2466_v40, %v2399_v6  ;;  %v1652_v4 = vmul.f32 %v9828_v47, %v1651_v56  ;;  %v1558_v36 = vadd.f32 1.0, %v9771_v8 }
 0x3db   : > { %v1754_v3 = vsel %vm1746_vm13, %v1602_v52, %v1738_v33  ;;  %v1752_v48 = vsel %vm1744_vm10, %v1600_v14, %v1708_v58  ;;  %vm1654_vm2 = vweird.f32 %v9785_v57  ;;  %vm1741_vm8 = vcmp.ge.f32.partialorder %v9765_v2, 0.0 }
 0x3dc   : > { %1822 = vmatpush.msra.mxu1 %v1754_v3  ;;  %v1581_v62 = vmul.f32 2.0, %v1573_v9  ;;  %v1665_v63 = vmul.f32 %v9842_v11, %v9796_v55  ;;  %v1653_v34 = vadd.f32 %v9828_v47, %v1652_v4  ;;  %vm9947_vm0 = vcmp.eq.f32.partialorder %v1658_v53, 8.507059e+37  ;;  %v9951_v40 = vpop.eup %7807  ;;  %vm1656_vm12 = vmor %vm1654_vm2, %vm1655_vm4 }
 0x3dd   : > { %v1661_v52 = vor.u32 1.1754944e-38, %v1660_v35  ;;  %v1566_v27 = vmul.f32 0.5, %v1558_v36  ;;  %vm1669_vm5 = vweird.f32 %v9796_v55  ;;  %v1675_v49 = vand.u32 2147483648, %v9796_v55 }
 0x3de   : > { %1823 = vmatpush.msra.mxu1 %v1752_v48  ;;  %v1589_v57 = vsub.f32 %v9765_v2, %v1581_v62  ;;  %v1666_v33 = vsub.f32 1.0, %v1665_v63  ;;  %v1657_v0 = vsel %vm1656_vm12, %v9828_v47, %v1653_v34  ;;  %vm1670_vm1 = vweird.f32 %v9842_v11  ;;  %v9962_v43 = vpop.eup %7809 }
 0x3df   : > { %v1574_v23 = vfloor.f32 %v1566_v27  ;;  %v9960_v3 = vadd.f32 %v2440_v18, %v2400_v59  ;;  %v1662_v6 = vsel %vm9947_vm0, %v1661_v52, %v1657_v0  ;;  %v1673_v58 = vand.u32 2147483647, %v9796_v55  ;;  %vm1671_vm13 = vmor %vm1669_vm5, %vm1670_vm1 }
 0x3e0   : > { %v1597_v7 = vand.u32 2147483647, %v1589_v57  ;;  %v1667_v14 = vmul.f32 %v9842_v11, %v1666_v33  ;;  %v1663_v46 = vmul.f32 %v1662_v6, %v9765_v2  ;;  %v1676_v48 = vor.u32 1.1754944e-38, %v1675_v49 }
 0x3e1   : > { %v2469_v15 = vpop.f32.mrf.mxu3  ;;  %v1582_v56 = vmul.f32 2.0, %v1574_v23  ;;  %v2526_v47 = vand.u32 2147483647, %v9960_v3  ;;  %v1579_v9 = vmul.f32 2.0, %v1571_v50  ;;  %v1620_v4 = vmul.f32 %v9815_v17, %v9777_v60 }
 0x3e2   : > { %v9970_v53 = vadd.f32 %v2469_v15, %v2401_v39  ;;  %v1668_v35 = vadd.f32 %v9842_v11, %v1667_v14  ;;  %v1749_v36 = vsel %vm1741_vm8, %v1597_v7, %v1663_v46  ;;  %v2525_v42 = vand.u32 2147483647, %v9935_v13 }
 0x3e3   : > { %v1590_v62 = vsub.f32 %v9771_v8, %v1582_v56  ;;  %v9984_v63 = vadd.f32 1.0, %v2526_v47  ;;  %1795 = vmatpush.msra.mxu0 %v1749_v36  ;;  %vm1674_vm7 = vcmp.eq.f32.partialorder %v1673_v58, 8.507059e+37  ;;  %v1621_v18 = vsub.f32 1.0, %v1620_v4 }
 0x3e4   : > { %v2527_v59 = vand.u32 2147483647, %v9970_v53  ;;  %v1672_v50 = vsel %vm1671_vm13, %v9842_v11, %v1668_v35  ;;  %vm1625_vm14 = vweird.f32 %v9815_v17  ;;  %v1628_v27 = vand.u32 2147483647, %v9777_v60 }
 0x3e5   : > { %v1598_v2 = vand.u32 2147483647, %v1590_v62  ;;  %v1677_v34 = vsel %vm1674_vm7, %v1676_v48, %v1672_v50  ;;  %7811 = vrcp.f32 %v9984_v63  ;;  %v1622_v52 = vmul.f32 %v9815_v17, %v1621_v18 }
 0x3e6   : > { %v1678_v55 = vmul.f32 %v1677_v34, %v9771_v8  ;;  %v9992_v5 = vadd.f32 1.0, %v2527_v59  ;;  %vm1742_vm11 = vcmp.ge.f32.partialorder %v9771_v8, 0.0  ;;  %v1587_v11 = vsub.f32 %v9758_v54, %v1579_v9  ;;  %v1756_v9 = vld [vmem:[#allocation2 + $0x80] sm:$0xff] }
 0x3e7   : > { %v1630_v57 = vand.u32 2147483648, %v9777_v60  ;;  %v1556_v33 = vadd.f32 1.0, %v9762_v10  ;;  %v1623_v39 = vadd.f32 %v9815_v17, %v1622_v52  ;;  %vm1624_vm15 = vweird.f32 %v9777_v60 }
 0x3e8   : > { %v1750_v49 = vsel %vm1742_vm11, %v1598_v2, %v1678_v55  ;;  %v1635_v15 = vmul.f32 %v9820_v12, %v9781_v25  ;;  %7813 = vrcp.f32 %v9933_v29  ;;  %v10005_v0 = vadd.f32 1.0, %v2525_v42  ;;  %vm1626_vm6 = vmor %vm1624_vm15, %vm1625_vm14 }
 0x3e9   : > { %1824 = vmatpush.msra.mxu1 %v1750_v49  ;;  %v1631_v8 = vor.u32 1.1754944e-38, %v1630_v57  ;;  %v1564_v23 = vmul.f32 0.5, %v1556_v33  ;;  %7815 = vrcp.f32 %v9992_v5  ;;  %v1627_v7 = vsel %vm1626_vm6, %v9815_v17, %v1623_v39 }
 0x3ea   : > { %vm1629_vm9 = vcmp.eq.f32.partialorder %v1628_v27, 8.507059e+37  ;;  %v1636_v6 = vsub.f32 1.0, %v1635_v15  ;;  %v1595_v14 = vand.u32 2147483647, %v1587_v11  ;;  %v1645_v56 = vand.u32 2147483648, %v9781_v25 }
 0x3eb   : > { %v7812_v60 = vpop.eup %7811  ;;  %v1632_v58 = vsel %vm1629_vm9, %v1631_v8, %v1627_v7  ;;  %v1572_v46 = vfloor.f32 %v1564_v23  ;;  %vm1640_vm10 = vweird.f32 %v9820_v12  ;;  %v1643_v48 = vand.u32 2147483647, %v9781_v25 }
 0x3ec   : > { %v1633_v47 = vmul.f32 %v1632_v58, %v9758_v54  ;;  %v1637_v35 = vmul.f32 %v9820_v12, %v1636_v6  ;;  %7817 = vrcp.f32 %v10005_v0  ;;  %vm1739_vm4 = vcmp.ge.f32.partialorder %v9758_v54, 0.0  ;;  %v1757_v58 = vld [vmem:[#allocation2 + $0x88] sm:$0xff] }
 0x3ed   : > { %v1580_v17 = vmul.f32 2.0, %v1572_v46  ;;  %vm1639_vm2 = vweird.f32 %v9781_v25  ;;  %v2478_v62 = vadd.f32 1.0, %v9960_v3  ;;  %v2627_v59 = vmul.f32 %v7812_v60, %v9984_v63 }
 0x3ee   : > { %v1747_v4 = vsel %vm1739_vm4, %v1595_v14, %v1633_v47  ;;  %v1638_v36 = vadd.f32 %v9820_v12, %v1637_v35  ;;  %v10022_v42 = vpop.eup %7813  ;;  %vm1641_vm8 = vmor %vm1639_vm2, %vm1640_vm10  ;;  %v1646_v18 = vor.u32 1.1754944e-38, %v1645_v56  ;;  %vm1740_vm0 = vcmp.ge.f32.partialorder %v9762_v10, 0.0 }
 0x3ef   : > { %1796 = vmatpush.msra.mxu0 %v1747_v4  ;;  %v1588_v50 = vsub.f32 %v9762_v10, %v1580_v17  ;;  %v2635_v54 = vand.u32 2147483647, %v9984_v63  ;;  %v7816_v25 = vpop.eup %7815  ;;  %vm1644_vm12 = vcmp.eq.f32.partialorder %v1643_v48, 8.507059e+37  ;;  %v2486_v34 = vmul.f32 0.5, %v2478_v62 }
 0x3f0   : > { %v1642_v2 = vsel %vm1641_vm8, %v9820_v12, %v1638_v36  ;;  %7500 = vmatmul.msk.f32.vlgmr.msra.gmra.mxu0 %vm14684_vm3, %v1756_v9  ;;  %v2628_v55 = vsub.f32 1.0, %v2627_v59  ;;  %vm2632_vm5 = vweird.f32 %v7812_v60  ;;  %v2637_v27 = vand.u32 2147483648, %v9984_v63  ;;  %v1758_v12 = vld [vmem:[#allocation2 + $0x90] sm:$0xff] }
 0x3f1   : > { %v1647_v52 = vsel %vm1644_vm12, %v1646_v18, %v1642_v2  ;;  %v10031_v11 = vadd.f32 1.0, %v9812_v45  ;;  %v1596_v57 = vand.u32 2147483647, %v1588_v50  ;;  %v2494_v49 = vfloor.f32 %v2486_v34 }
 0x3f2   : > { %v1648_v33 = vmul.f32 %v1647_v52, %v9762_v10  ;;  %v2629_v39 = vmul.f32 %v7812_v60, %v2628_v55  ;;  %v10034_v15 = vpop.eup %7817  ;;  %vm2631_vm1 = vweird.f32 %v9984_v63  ;;  %vm10037_vm13 = vcmp.eq.f32.partialorder %v2635_v54, 8.507059e+37 }
 0x3f3   : > { %v2479_v8 = vadd.f32 1.0, %v9970_v53  ;;  %v2642_v23 = vmul.f32 %v7816_v25, %v9992_v5  ;;  %v2502_v6 = vmul.f32 2.0, %v2494_v49  ;;  %vm2662_vm7 = vcmp.ge.f32.partialorder %v9960_v3, 0.0  ;;  %vm2633_vm14 = vmor %vm2631_vm1, %vm2632_vm5 }
 0x3f4   : > { %v1748_v7 = vsel %vm1740_vm0, %v1596_v57, %v1648_v33  ;;  %v2630_v14 = vadd.f32 %v7812_v60, %v2629_v39  ;;  %v2638_v63 = vor.u32 1.1754944e-38, %v2637_v27  ;;  %v2650_v47 = vand.u32 2147483647, %v9992_v5 }
 0x3f5   : > { %1825 = vmatpush.msra.mxu1 %v1748_v7  ;;  %v2487_v46 = vmul.f32 0.5, %v2479_v8  ;;  %v2643_v56 = vsub.f32 1.0, %v2642_v23  ;;  %v2510_v35 = vsub.f32 %v9960_v3, %v2502_v6  ;;  %v2652_v10 = vand.u32 2147483648, %v9992_v5 }
 0x3f6   : > { %7504 = vmatmul.msk.f32.vlgmr.msra.gmra.mxu1 %vm14684_vm3, %v1756_v9  ;;  %v2634_v48 = vsel %vm2633_vm14, %v7812_v60, %v2630_v14  ;;  %v2476_v17 = vadd.f32 1.0, %v9894_v44  ;;  %vm2647_vm11 = vweird.f32 %v7816_v25  ;;  %v2597_v9 = vmul.f32 %v10022_v42, %v9933_v29 }
 0x3f7   : > { %v2639_v4 = vsel %vm10037_vm13, %v2638_v63, %v2634_v48  ;;  %v2495_v36 = vfloor.f32 %v2487_v46  ;;  %v2644_v62 = vmul.f32 %v7816_v25, %v2643_v56  ;;  %v2518_v59 = vand.u32 2147483647, %v2510_v35 }
 0x3f8   : > { %7501 = vmatmul.msk.f32.gmra.mxu0 %vm14684_vm3, %v1757_v58  ;;  %v2640_v50 = vmul.f32 %v2639_v4, %v9960_v3  ;;  %v2484_v18 = vmul.f32 0.5, %v2476_v17  ;;  %vm2646_vm15 = vweird.f32 %v9992_v5  ;;  %vm2651_vm6 = vcmp.eq.f32.partialorder %v2650_v47, 8.507059e+37 }
 0x3f9   : > { %v2503_v60 = vmul.f32 2.0, %v2495_v36  ;;  %v2645_v54 = vadd.f32 %v7816_v25, %v2644_v62  ;;  %vm2648_vm9 = vmor %vm2646_vm15, %vm2647_vm11  ;;  %v2653_v34 = vor.u32 1.1754944e-38, %v2652_v10  ;;  %v2598_v52 = vsub.f32 1.0, %v2597_v9  ;;  %v1759_v9 = vld [vmem:[#allocation2 + $0x98] sm:$0xff] }
 0x3fa   : > { %v10061_v2 = vsel %vm2662_vm7, %v2518_v59, %v2640_v50  ;;  %v2492_v55 = vfloor.f32 %v2484_v18  ;;  %vm2602_vm10 = vweird.f32 %v10022_v42  ;;  %v2607_v33 = vand.u32 2147483648, %v9933_v29 }
 0x3fb   : > { %14931 = vst [vmem:[#allocation54_spill] sm:$0xff] %v10061_v2  ;;  %2716 = vmatpush.msrb.mxu0 %v10061_v2  ;;  %v2511_v27 = vsub.f32 %v9970_v53, %v2503_v60  ;;  %v2649_v57 = vsel %vm2648_vm9, %v7816_v25, %v2645_v54  ;;  %v2599_v39 = vmul.f32 %v10022_v42, %v2598_v52  ;;  %v2605_v3 = vand.u32 2147483647, %v9933_v29 }
 0x3fc   : > { %v2654_v49 = vsel %vm2651_vm6, %v2653_v34, %v2649_v57  ;;  %v2500_v5 = vmul.f32 2.0, %v2492_v55  ;;  %vm2663_vm4 = vcmp.ge.f32.partialorder %v9970_v53, 0.0  ;;  %v2477_v7 = vadd.f32 1.0, %v9935_v13 }
 0x3fd   : > { %v2519_v8 = vand.u32 2147483647, %v2511_v27  ;;  %v2655_v23 = vmul.f32 %v2654_v49, %v9970_v53  ;;  %v2600_v6 = vadd.f32 %v10022_v42, %v2599_v39  ;;  %vm2601_vm2 = vweird.f32 %v9933_v29 }
 0x3fe   : > { %7505 = vmatmul.msk.f32.gmra.mxu1 %vm14684_vm3, %v1757_v58  ;;  %v2508_v25 = vsub.f32 %v9894_v44, %v2500_v5  ;;  %v2612_v14 = vmul.f32 %v10034_v15, %v10005_v0  ;;  %vm2603_vm8 = vmor %vm2601_vm2, %vm2602_vm10  ;;  %v2608_v46 = vor.u32 1.1754944e-38, %v2607_v33  ;;  %v2485_v53 = vmul.f32 0.5, %v2477_v7 }
 0x3ff   : > { %v10078_v63 = vsel %vm2663_vm4, %v2519_v8, %v2655_v23  ;;  %v10083_v56 = vmul.f32 0.5, %v10031_v11  ;;  %v2604_v58 = vsel %vm2603_vm8, %v10022_v42, %v2600_v6  ;;  %vm2606_vm0 = vcmp.eq.f32.partialorder %v2605_v3, 8.507059e+37 }
 0x400   : > { %14932 = vst [vmem:[#allocation47_spill] sm:$0xff] %v10078_v63  ;;  %7502 = vmatmul.msk.f32.gmra.mxu0 %vm14684_vm3, %v1758_v12  ;;  %2745 = vmatpush.msrb.mxu1 %v10078_v63  ;;  %v2613_v29 = vsub.f32 1.0, %v2612_v14  ;;  %v2620_v47 = vand.u32 2147483647, %v10005_v0  ;;  %v2609_v35 = vsel %vm2606_vm0, %v2608_v46, %v2604_v58  ;;  %v2493_v48 = vfloor.f32 %v2485_v53 }
 0x401   : > { %vm2617_vm12 = vweird.f32 %v10034_v15  ;;  %v2622_v10 = vand.u32 2147483648, %v10005_v0  ;;  %v2516_v17 = vand.u32 2147483647, %v2508_v25  ;;  %v2610_v11 = vmul.f32 %v2609_v35, %v9894_v44 }
 0x402   : > { %v2614_v4 = vmul.f32 %v10034_v15, %v2613_v29  ;;  %v2474_v36 = vadd.f32 1.0, %v9865_v38  ;;  %vm2660_vm5 = vcmp.ge.f32.partialorder %v9894_v44, 0.0  ;;  %v2501_v42 = vmul.f32 2.0, %v2493_v48  ;;  %v265_v29 = vld [vmem:[%s14609_s4 + $0x8] sm:$0xff] }
 0x403   : > { %vm2616_vm1 = vweird.f32 %v10005_v0  ;;  %v2567_v62 = vmul.f32 %v9951_v40, %v9909_v28  ;;  %v10098_v59 = vsel %vm2660_vm5, %v2516_v17, %v2610_v11  ;;  %vm2621_vm13 = vcmp.eq.f32.partialorder %v2620_v47, 8.507059e+37  ;;  %2054 = vperm.xlu1 %7705, %v265_v29  }
 0x404   : > { %14933 = vst [vmem:[#allocation33_spill] sm:$0xff] %v10098_v59  ;;  %v2615_v50 = vadd.f32 %v10034_v15, %v2614_v4  ;;  %v2482_v18 = vmul.f32 0.5, %v2474_v36  ;;  %2717 = vmatpush.msrb.mxu0 %v10098_v59  ;;  %v2509_v60 = vsub.f32 %v9935_v13, %v2501_v42  ;;  %vm2618_vm7 = vmor %vm2616_vm1, %vm2617_vm12  ;;  %v2623_v44 = vor.u32 1.1754944e-38, %v2622_v10  ;;  %v14937_v42 = vld [vmem:[#allocation32_spill] sm:$0xff] }
 0x405   : > { %v2568_v54 = vsub.f32 1.0, %v2567_v62  ;;  %v2577_v0 = vand.u32 2147483648, %v9909_v28  ;;  %vm2572_vm14 = vweird.f32 %v9951_v40  ;;  %v2475_v52 = vadd.f32 1.0, %v9885_v37 }
 0x406   : > { %7506 = vmatmul.msk.f32.gmra.mxu1 %vm14684_vm3, %v1758_v12  ;;  %v2619_v34 = vsel %vm2618_vm7, %v10034_v15, %v2615_v50  ;;  %v2490_v55 = vfloor.f32 %v2482_v18  ;;  %v2517_v27 = vand.u32 2147483647, %v2509_v60  ;;  %v2575_v49 = vand.u32 2147483647, %v9909_v28 }
 0x407   : > { %v2624_v57 = vsel %vm2621_vm13, %v2623_v44, %v2619_v34  ;;  %v2569_v33 = vmul.f32 %v9951_v40, %v2568_v54  ;;  %v2483_v3 = vmul.f32 0.5, %v2475_v52  ;;  %v2582_v15 = vmul.f32 %v9962_v43, %v9916_v26  ;;  %v14939_v44 = vld [vmem:[#allocation19_spill] sm:$0xff] }
 0x408   : > { %7503 = vmatmul.msk.f32.gmra.mxu0 %vm14684_vm3, %v1759_v9  ;;  %v2625_v5 = vmul.f32 %v2624_v57, %v9935_v13  ;;  %v2498_v39 = vmul.f32 2.0, %v2490_v55  ;;  %vm2661_vm11 = vcmp.ge.f32.partialorder %v9935_v13, 0.0  ;;  %vm2571_vm15 = vweird.f32 %v9909_v28 }
 0x409   : > { %v2570_v12 = vadd.f32 %v9951_v40, %v2569_v33  ;;  %v2578_v8 = vor.u32 1.1754944e-38, %v2577_v0  ;;  %vm2573_vm6 = vmor %vm2571_vm15, %vm2572_vm14  ;;  %v2491_v25 = vfloor.f32 %v2483_v3  ;;  %v2583_v6 = vsub.f32 1.0, %v2582_v15 }
 0x40a   : > { %v10119_v23 = vsel %vm2661_vm11, %v2517_v27, %v2625_v5  ;;  %v2506_v7 = vsub.f32 %v9865_v38, %v2498_v39  ;;  %vm2576_vm9 = vcmp.eq.f32.partialorder %v2575_v49, 8.507059e+37  ;;  %vm2587_vm10 = vweird.f32 %v9962_v43 }
 0x40b   : > { %14934 = vst [vmem:[#allocation53_spill] sm:$0xff] %v10119_v23  ;;  %2746 = vmatpush.msrb.mxu1 %v10119_v23  ;;  %v2574_v14 = vsel %vm2573_vm6, %v9951_v40, %v2570_v12  ;;  %v2592_v13 = vand.u32 2147483648, %v9916_v26  ;;  %v2499_v46 = vmul.f32 2.0, %v2491_v25  ;;  %v2584_v53 = vmul.f32 %v9962_v43, %v2583_v6 }
 0x40c   : > { %v2579_v28 = vsel %vm2576_vm9, %v2578_v8, %v2574_v14  ;;  %v2590_v58 = vand.u32 2147483647, %v9916_v26  ;;  %v2514_v47 = vand.u32 2147483647, %v2506_v7  ;;  %vm2658_vm4 = vcmp.ge.f32.partialorder %v9865_v38, 0.0  ;;  %v14942_v14 = vld [vmem:[#allocation18_spill] sm:$0xff] }
 0x40d   : > { %v2580_v35 = vmul.f32 %v2579_v28, %v9865_v38  ;;  %v2507_v40 = vsub.f32 %v9885_v37, %v2499_v46  ;;  %v2585_v48 = vadd.f32 %v9962_v43, %v2584_v53  ;;  %vm2586_vm2 = vweird.f32 %v9916_v26 }
 0x40e   : > { %7507 = vmatmul.msk.f32.gmra.mxu1 %vm14684_vm3, %v1759_v9  ;;  %v2488_v10 = vfloor.f32 %v10083_v56  ;;  %vm2588_vm8 = vmor %vm2586_vm2, %vm2587_vm10  ;;  %v2593_v11 = vor.u32 1.1754944e-38, %v2592_v13  ;;  %v2537_v38 = vmul.f32 %v9930_v20, %v9854_v19  ;;  %v2473_v4 = vadd.f32 1.0, %v9837_v61  ;;  %v14936_v56 = vld [vmem:[#allocation17_spill] sm:$0xff]  ;;  %v14944_v13 = vld [vmem:[#allocation20_spill] sm:$0xff] }
 0x40f   : > { %v10140_v17 = vsel %vm2658_vm4, %v2514_v47, %v2580_v35  ;;  %v2589_v36 = vsel %vm2588_vm8, %v9962_v43, %v2585_v48  ;;  %vm2591_vm0 = vcmp.eq.f32.partialorder %v2590_v58, 8.507059e+37  ;;  %vm2659_vm12 = vcmp.ge.f32.partialorder %v9885_v37, 0.0  ;;  %v2680_v35 = vld [vmem:[#allocation2 + $0x20] sm:$0xff] }
 0x410   : > { %14935 = vst [vmem:[#allocation55_spill] sm:$0xff] %v10140_v17  ;;  %2718 = vmatpush.msrb.mxu0 %v10140_v17  ;;  %v2594_v26 = vsel %vm2591_vm0, %v2593_v11, %v2589_v36  ;;  %vm14938_vm5 = vcmp.eq.s32.totalorder %v14937_v42, 0  ;;  %v2496_v50 = vmul.f32 2.0, %v2488_v10  ;;  %v2538_v18 = vsub.f32 1.0, %v2537_v38  ;;  %v2682_v36 = vld [vmem:[#allocation2 + $0x30] sm:$0xff] }
 0x411   : > { %v2136_v62 = vsel %vm14938_vm5, %v14936_v56, 0.0  ;;  %v2515_v9 = vand.u32 2147483647, %v2507_v40  ;;  %v2595_v60 = vmul.f32 %v2594_v26, %v9885_v37  ;;  %vm14940_vm1 = vcmp.eq.s32.totalorder %v14937_v42, 1  ;;  %vm14943_vm9 = vmmov %vm14938_vm5  ;;  %v267_v40 = vld [vmem:[%s14609_s4 + $0x18] sm:$0xff] }
 0x412   : > { %v2174_v54 = vsel %vm14940_vm1, %v14939_v44, 0.0  ;;  %v2547_v0 = vand.u32 2147483648, %v9854_v19  ;;  %v2539_v43 = vmul.f32 %v9930_v20, %v2538_v18  ;;  %vm2542_vm13 = vweird.f32 %v9930_v20  ;;  %vm14945_vm10 = vmmov %vm14940_vm1  ;;  %2064 = vperm.xlu0 %7706, %v267_v40  }
 0x413   : > { %v2545_v34 = vand.u32 2147483647, %v9854_v19  ;;  %v2481_v55 = vmul.f32 0.5, %v2473_v4  ;;  %v10161_v52 = vsel %vm2659_vm12, %v2515_v9, %v2595_v60  ;;  %v2552_v27 = vmul.f32 %v9944_v30, %v9877_v24  ;;  %v2681_v4 = vld [vmem:[#allocation2 + $0x28] sm:$0xff] }
 0x414   : > { %14941 = vst [vmem:[#allocation43_spill] sm:$0xff] %v10161_v52  ;;  %2747 = vmatpush.msrb.mxu1 %v10161_v52  ;;  %v2504_v37 = vsub.f32 %v9812_v45, %v2496_v50  ;;  %v2540_v57 = vadd.f32 %v9930_v20, %v2539_v43  ;;  %vm2541_vm7 = vweird.f32 %v9854_v19  ;;  %v2182_v49 = vadd.f32 %v2174_v54, %v2136_v62 }
 0x415   : > { %v2489_v33 = vfloor.f32 %v2481_v55  ;;  %vm2543_vm14 = vmor %vm2541_vm7, %vm2542_vm13  ;;  %v2548_v5 = vor.u32 1.1754944e-38, %v2547_v0  ;;  %v2553_v39 = vsub.f32 1.0, %v2552_v27  ;;  %vm2546_vm11 = vcmp.eq.f32.partialorder %v2545_v34, 8.507059e+37  ;;  %v2684_v55 = vld [vmem:[#allocation5 + $0x80] sm:$0xff] }
 0x416   : > { %v2544_v3 = vsel %vm2543_vm14, %v9930_v20, %v2540_v57  ;;  %v2562_v12 = vand.u32 2147483648, %v9877_v24  ;;  %vm2557_vm15 = vweird.f32 %v9944_v30  ;;  %v2560_v25 = vand.u32 2147483647, %v9877_v24  ;;  %v2688_v27 = vld [vmem:[#allocation5 + $0xa0] sm:$0xff] }
 0x417   : > { %v2497_v15 = vmul.f32 2.0, %v2489_v33  ;;  %v2549_v8 = vsel %vm2546_vm11, %v2548_v5, %v2544_v3  ;;  %v2554_v7 = vmul.f32 %v9944_v30, %v2553_v39  ;;  %v2512_v6 = vand.u32 2147483647, %v2504_v37  ;;  %v2685_v33 = vld [vmem:[#allocation5 + $0x88] sm:$0xff]  ;;  %v2686_v5 = vld [vmem:[#allocation5 + $0x90] sm:$0xff] }
 0x418   : > { %v2550_v19 = vmul.f32 %v2549_v8, %v9812_v45  ;;  %vm2656_vm6 = vcmp.ge.f32.partialorder %v9812_v45, 0.0  ;;  %v2137_v20 = vsel %vm14943_vm9, %v14942_v14, 0.0  ;;  %v2175_v28 = vsel %vm14945_vm10, %v14944_v13, 0.0  ;;  %v2689_v3 = vld [vmem:[#allocation5 + $0xa8] sm:$0xff]  ;;  %v2690_v14 = vld [vmem:[#allocation5 + $0xb0] sm:$0xff] }
 0x419   : > { %v2505_v46 = vsub.f32 %v9837_v61, %v2497_v15  ;;  %v2555_v53 = vadd.f32 %v9944_v30, %v2554_v7  ;;  %vm2556_vm4 = vweird.f32 %v9877_v24  ;;  %v2563_v29 = vor.u32 1.1754944e-38, %v2562_v12  ;;  %v2687_v12 = vld [vmem:[#allocation5 + $0x98] sm:$0xff] }
 0x41a   : > { %v2664_v58 = vsel %vm2656_vm6, %v2512_v6, %v2550_v19  ;;  %vm2558_vm2 = vmor %vm2556_vm4, %vm2557_vm15  ;;  %vm2561_vm8 = vcmp.eq.f32.partialorder %v2560_v25, 8.507059e+37  ;;  %v2183_v48 = vadd.f32 %v2175_v28, %v2137_v20  ;;  %vm2657_vm0 = vcmp.ge.f32.partialorder %v9837_v61, 0.0 }
 0x41b   : > { %v10185_v47 = vadd.f32 %v2664_v58, %v2182_v49  ;;  %v2559_v45 = vsel %vm2558_vm2, %v9944_v30, %v2555_v53  ;;  %v2513_v11 = vand.u32 2147483647, %v2505_v46 }
 0x41c   : > { %v2564_v10 = vsel %vm2561_vm8, %v2563_v29, %v2559_v45 }
 0x41d   : > { %14946 = vst [vmem:[#allocation46_spill] sm:$0xff] %v10185_v47  ;;  %2719 = vmatpush.msrb.mxu0 %v10185_v47  ;;  %v2565_v24 = vmul.f32 %v2564_v10, %v9837_v61  ;;  %v2683_v61 = vld [vmem:[#allocation2 + $0x38] sm:$0xff] }
 0x41e   : > { %7516 = vmatmul.msk.f32.vlgmr.msrb.gmra.mxu0 %vm14684_vm3, %v2680_v35 }
 0x41f   : > { %v2665_v38 = vsel %vm2657_vm0, %v2513_v11, %v2565_v24  ;;  %v2691_v11 = vld [vmem:[#allocation5 + $0xb8] sm:$0xff] }
 0x420   : > { %v10195_v30 = vadd.f32 %v2665_v38, %v2183_v48 }
 0x422   : > { %14947 = vst [vmem:[#allocation48_spill] sm:$0xff] %v10195_v30  ;;  %2748 = vmatpush.msrb.mxu1 %v10195_v30 }
 0x423   : > { %7520 = vmatmul.msk.f32.vlgmr.msrb.gmra.mxu1 %vm14684_vm3, %v2680_v35 }
 0x426   : > { %7517 = vmatmul.msk.f32.gmra.mxu0 %vm14684_vm3, %v2681_v4 }
 0x42b   : > { %7521 = vmatmul.msk.f32.gmra.mxu1 %vm14684_vm3, %v2681_v4 }
 0x42e   : > { %7518 = vmatmul.msk.f32.gmra.mxu0 %vm14684_vm3, %v2682_v36 }
 0x433   : > { %7522 = vmatmul.msk.f32.gmra.mxu1 %vm14684_vm3, %v2682_v36 }
 0x436   : > { %7519 = vmatmul.msk.f32.gmra.mxu0 %vm14684_vm3, %v2683_v61 }
 0x43b   : > { %7523 = vmatmul.msk.f32.gmra.mxu1 %vm14684_vm3, %v2683_v61 }
 0x46d   : > { %v10205_v26 = vpop.f32.mrf.mxu0 }
 0x473   : > { %v10207_v56 = vpop.f32.mrf.mxu1 }
 0x475   : > { %v10209_v62 = vpop.f32.mrf.mxu0 }
 0x47b   : > { %v10211_v50 = vpop.f32.mrf.mxu1 }
 0x47d   : > { %v10213_v18 = vpop.f32.mrf.mxu0 }
 0x483   : > { %v10215_v9 = vpop.f32.mrf.mxu1 }
 0x485   : > { %v10217_v60 = vpop.f32.mrf.mxu0 }
 0x48b   : > { %v10219_v44 = vpop.f32.mrf.mxu1 }
 0x49b   : > { %v2721_v54 = vpop.f32.mrf.mxu0 }
 0x49c   : > { %v10221_v57 = vadd.f32 %v2721_v54, %v2684_v55 }
 0x49e   : > { %v2810_v8 = vand.u32 2147483647, %v10221_v57  ;;  %v2762_v4 = vadd.f32 1.0, %v10221_v57 }
 0x4a0   : > { %v2750_v0 = vpop.f32.mrf.mxu1  ;;  %v10240_v58 = vadd.f32 1.0, %v2810_v8 }
 0x4a1   : > { %v10226_v15 = vadd.f32 %v2750_v0, %v2685_v33 }
 0x4a3   : > { %v2724_v43 = vpop.f32.mrf.mxu0  ;;  %v2811_v13 = vand.u32 2147483647, %v10226_v15 }
 0x4a4   : > { %v10229_v25 = vadd.f32 %v2724_v43, %v2686_v5 }
 0x4a5   : > { %v10251_v38 = vadd.f32 1.0, %v2811_v13 }
 0x4a6   : > { %v2812_v45 = vand.u32 2147483647, %v10229_v25 }
 0x4a8   : > { %v2753_v34 = vpop.f32.mrf.mxu1  ;;  %v10257_v43 = vadd.f32 1.0, %v2812_v45 }
 0x4a9   : > { %v10235_v20 = vadd.f32 %v2753_v34, %v2687_v12 }
 0x4ab   : > { %v2727_v37 = vpop.f32.mrf.mxu0  ;;  %v2813_v48 = vand.u32 2147483647, %v10235_v20 }
 0x4ac   : > { %v10223_v49 = vadd.f32 %v2727_v37, %v2688_v27 }
 0x4ad   : > { %v10262_v55 = vadd.f32 1.0, %v2813_v48 }
 0x4ae   : > { %v2814_v39 = vand.u32 2147483647, %v10223_v49  ;;  %v2766_v53 = vadd.f32 1.0, %v10223_v49  ;;  %vm2950_vm6 = vcmp.ge.f32.partialorder %v10223_v49, 0.0 }
 0x4b0   : > { %v2756_v7 = vpop.f32.mrf.mxu1  ;;  %v10231_v6 = vadd.f32 1.0, %v2814_v39  ;;  %v2774_v40 = vmul.f32 0.5, %v2766_v53  ;;  %v10270_v39 = vmul.f32 0.5, %v2762_v4 }
 0x4b1   : > { %v10233_v19 = vadd.f32 %v2756_v7, %v2689_v3 }
 0x4b2   : > { %7819 = vrcp.f32 %v10231_v6  ;;  %v2782_v0 = vfloor.f32 %v2774_v40  ;;  %v2895_v5 = vand.u32 2147483647, %v10231_v6  ;;  %v2897_v7 = vand.u32 2147483648, %v10231_v6 }
 0x4b3   : > { %v2815_v28 = vand.u32 2147483647, %v10233_v19  ;;  %v2730_v46 = vpop.f32.mrf.mxu0  ;;  %7821 = vrcp.f32 %v10240_v58  ;;  %vm2891_vm12 = vweird.f32 %v10231_v6 }
 0x4b4   : > { %v10242_v29 = vadd.f32 %v2730_v46, %v2690_v14  ;;  %v2790_v8 = vmul.f32 2.0, %v2782_v0  ;;  %vm10292_vm1 = vcmp.eq.f32.partialorder %v2895_v5, 8.507059e+37  ;;  %v2767_v5 = vadd.f32 1.0, %v10233_v19 }
 0x4b5   : > { %v10246_v35 = vadd.f32 1.0, %v2815_v28 }
 0x4b6   : > { %v2816_v10 = vand.u32 2147483647, %v10242_v29  ;;  %v2768_v24 = vadd.f32 1.0, %v10242_v29  ;;  %v2798_v4 = vsub.f32 %v10223_v49, %v2790_v8  ;;  %vm2952_vm11 = vcmp.ge.f32.partialorder %v10242_v29, 0.0 }
 0x4b7   : > { %7823 = vrcp.f32 %v10246_v35  ;;  %vm2906_vm9 = vweird.f32 %v10246_v35 }
 0x4b8   : > { %v10255_v36 = vadd.f32 1.0, %v2816_v10  ;;  %v2759_v61 = vpop.f32.mrf.mxu1  ;;  %v2776_v54 = vmul.f32 0.5, %v2768_v24  ;;  %v10265_v37 = vpop.eup %7819 }
 0x4b9   : > { %v10260_v34 = vadd.f32 %v2759_v61, %v2691_v11  ;;  %v10279_v46 = vpop.eup %7821  ;;  %v2887_v45 = vmul.f32 %v10265_v37, %v10231_v6  ;;  %vm2892_vm7 = vweird.f32 %v10265_v37 }
 0x4ba   : > { %7825 = vrcp.f32 %v10255_v36  ;;  %v2784_v27 = vfloor.f32 %v2776_v54  ;;  %v2925_v13 = vand.u32 2147483647, %v10255_v36  ;;  %v2927_v28 = vand.u32 2147483648, %v10255_v36  ;;  %vm2893_vm2 = vmor %vm2891_vm12, %vm2892_vm7 }
 0x4bb   : > { %7827 = vrcp.f32 %v10251_v38  ;;  %v2817_v33 = vand.u32 2147483647, %v10260_v34  ;;  %v2769_v12 = vadd.f32 1.0, %v10260_v34  ;;  %vm2921_vm5 = vweird.f32 %v10255_v36 }
 0x4bc   : > { %v2792_v3 = vmul.f32 2.0, %v2784_v27  ;;  %7829 = vrcp.f32 %v10257_v43  ;;  %v2898_v54 = vor.u32 1.1754944e-38, %v2897_v7  ;;  %vm10299_vm13 = vcmp.eq.f32.partialorder %v2925_v13, 8.507059e+37 }
 0x4bd   : > { %v10275_v14 = vadd.f32 1.0, %v2817_v33  ;;  %7831 = vrcp.f32 %v10262_v55  ;;  %v2777_v53 = vmul.f32 0.5, %v2769_v12  ;;  %v10284_v40 = vpop.eup %7823  ;;  %v2888_v8 = vsub.f32 1.0, %v2887_v45 }
 0x4be   : > { %v2800_v48 = vsub.f32 %v10242_v29, %v2792_v3  ;;  %v2928_v3 = vor.u32 1.1754944e-38, %v2927_v28  ;;  %v2902_v13 = vmul.f32 %v10284_v40, %v10246_v35  ;;  %v2806_v28 = vand.u32 2147483647, %v2798_v4 }
 0x4bf   : > { %7833 = vrcp.f32 %v10275_v14  ;;  %v2785_v24 = vfloor.f32 %v2777_v53  ;;  %v2940_v53 = vand.u32 2147483647, %v10275_v14  ;;  %v2942_v30 = vand.u32 2147483648, %v10275_v14 }
 0x4c0   : > { %v7826_v11 = vpop.eup %7825  ;;  %v2808_v7 = vand.u32 2147483647, %v2800_v48  ;;  %vm2936_vm15 = vweird.f32 %v10275_v14  ;;  %v2889_v45 = vmul.f32 %v10265_v37, %v2888_v8  ;;  %v2903_v48 = vsub.f32 1.0, %v2902_v13 }
 0x4c1   : > { %v10296_v0 = vpop.eup %7827  ;;  %v2917_v27 = vmul.f32 %v7826_v11, %v10255_v36  ;;  %v2793_v12 = vmul.f32 2.0, %v2785_v24  ;;  %vm2922_vm14 = vweird.f32 %v7826_v11  ;;  %v2775_v24 = vmul.f32 0.5, %v2767_v5 }
 0x4c2   : > { %v10306_v10 = vpop.eup %7829  ;;  %v2890_v2 = vadd.f32 %v10265_v37, %v2889_v45  ;;  %vm2907_vm10 = vweird.f32 %v10284_v40  ;;  %v2904_v8 = vmul.f32 %v10284_v40, %v2903_v48  ;;  %vm2923_vm8 = vmor %vm2921_vm5, %vm2922_vm14  ;;  %vm2953_vm3 = vcmp.ge.f32.partialorder %v10260_v34, 0.0 }
 0x4c3   : > { %v2918_v42 = vsub.f32 1.0, %v2917_v27  ;;  %v10311_v47 = vpop.eup %7831  ;;  %v2910_v27 = vand.u32 2147483647, %v10246_v35  ;;  %v2801_v23 = vsub.f32 %v10260_v34, %v2793_v12  ;;  %vm2908_vm12 = vmor %vm2906_vm9, %vm2907_vm10  ;;  %vm2941_vm5 = vcmp.eq.f32.partialorder %v2940_v53, 8.507059e+37 }
 0x4c4   : > { %v2894_v5 = vsel %vm2893_vm2, %v10265_v37, %v2890_v2  ;;  %v2905_v48 = vadd.f32 %v10284_v40, %v2904_v8  ;;  %v2943_v8 = vor.u32 1.1754944e-38, %v2942_v30  ;;  %v2865_v30 = vand.u32 2147483647, %v10257_v43 }
 0x4c5   : > { %v7834_v52 = vpop.eup %7833  ;;  %v2919_v17 = vmul.f32 %v7826_v11, %v2918_v42  ;;  %v2783_v42 = vfloor.f32 %v2775_v24  ;;  %vm10332_vm0 = vcmp.eq.f32.partialorder %v2910_v27, 8.507059e+37  ;;  %v2899_v6 = vsel %vm10292_vm1, %v2898_v54, %v2894_v5 }
 0x4c6   : > { %v2932_v63 = vmul.f32 %v7834_v52, %v10275_v14  ;;  %vm2937_vm4 = vweird.f32 %v7834_v52  ;;  %v2900_v2 = vmul.f32 %v2899_v6, %v10223_v49  ;;  %v2909_v54 = vsel %vm2908_vm12, %v10284_v40, %v2905_v48 }
 0x4c7   : > { %v2920_v4 = vadd.f32 %v7826_v11, %v2919_v17  ;;  %v2912_v17 = vand.u32 2147483648, %v10246_v35  ;;  %v2791_v24 = vmul.f32 2.0, %v2783_v42  ;;  %v2764_v27 = vadd.f32 1.0, %v10229_v25  ;;  %vm2938_vm1 = vmor %vm2936_vm15, %vm2937_vm4 }
 0x4c8   : > { %v2933_v12 = vsub.f32 1.0, %v2932_v63  ;;  %v2809_v42 = vand.u32 2147483647, %v2801_v23  ;;  %v2958_v53 = vsel %vm2950_vm6, %v2806_v28, %v2900_v2  ;;  %vm2951_vm7 = vcmp.ge.f32.partialorder %v10233_v19, 0.0 }
 0x4c9   : > { %v2924_v45 = vsel %vm2923_vm8, %v7826_v11, %v2920_v4  ;;  %v2913_v37 = vor.u32 1.1754944e-38, %v2912_v17  ;;  %v2799_v61 = vsub.f32 %v10233_v19, %v2791_v24  ;;  %v2772_v40 = vmul.f32 0.5, %v2764_v27 }
 0x4ca   : > { %v2929_v63 = vsel %vm10299_vm13, %v2928_v3, %v2924_v45  ;;  %v2934_v36 = vmul.f32 %v7834_v52, %v2933_v12  ;;  %v2857_v3 = vmul.f32 %v10306_v10, %v10257_v43  ;;  %vm2862_vm13 = vweird.f32 %v10306_v10 }
 0x4cb   : > { %v2930_v11 = vmul.f32 %v2929_v63, %v10242_v29  ;;  %v2914_v33 = vsel %vm10332_vm0, %v2913_v37, %v2909_v54  ;;  %v2807_v45 = vand.u32 2147483647, %v2799_v61  ;;  %v2780_v6 = vfloor.f32 %v2772_v40 }
 0x4cc   : > { %v2935_v4 = vadd.f32 %v7834_v52, %v2934_v36  ;;  %v2915_v5 = vmul.f32 %v2914_v33, %v10233_v19  ;;  %v2858_v13 = vsub.f32 1.0, %v2857_v3  ;;  %v2765_v14 = vadd.f32 1.0, %v10235_v20 }
 0x4cd   : > { %v2960_v35 = vsel %vm2952_vm11, %v2808_v7, %v2930_v11  ;;  %v2788_v49 = vmul.f32 2.0, %v2780_v6  ;;  %v2872_v7 = vmul.f32 %v10311_v47, %v10262_v55  ;;  %vm2861_vm14 = vweird.f32 %v10257_v43 }
 0x4ce   : > { %2998 = vmatpush.msrb.mxu2 %v2960_v35  ;;  %v2939_v12 = vsel %vm2938_vm1, %v7834_v52, %v2935_v4  ;;  %v2859_v29 = vmul.f32 %v10306_v10, %v2858_v13  ;;  %v2867_v52 = vand.u32 2147483648, %v10257_v43  ;;  %v2959_v24 = vsel %vm2951_vm7, %v2807_v45, %v2915_v5  ;;  %vm2863_vm11 = vmor %vm2861_vm14, %vm2862_vm13 }
 0x4cf   : > { %v2944_v17 = vsel %vm2941_vm5, %v2943_v8, %v2939_v12  ;;  %v2796_v63 = vsub.f32 %v10229_v25, %v2788_v49  ;;  %v2773_v36 = vmul.f32 0.5, %v2765_v14  ;;  %v2873_v2 = vsub.f32 1.0, %v2872_v7 }
 0x4d0   : > { %v2945_v23 = vmul.f32 %v2944_v17, %v10260_v34  ;;  %2999 = vmatpush.msrb.mxu2 %v2958_v53  ;;  %v2860_v48 = vadd.f32 %v10306_v10, %v2859_v29  ;;  %v2868_v19 = vor.u32 1.1754944e-38, %v2867_v52  ;;  %vm2866_vm15 = vcmp.eq.f32.partialorder %v2865_v30, 8.507059e+37 }
 0x4d1   : > { %vm2877_vm6 = vweird.f32 %v10311_v47  ;;  %v2882_v34 = vand.u32 2147483648, %v10262_v55  ;;  %v2781_v61 = vfloor.f32 %v2773_v36  ;;  %v2874_v43 = vmul.f32 %v10311_v47, %v2873_v2 }
 0x4d2   : > { %v2961_v28 = vsel %vm2953_vm3, %v2809_v42, %v2945_v23  ;;  %v2864_v37 = vsel %vm2863_vm11, %v10306_v10, %v2860_v48  ;;  %v2880_v54 = vand.u32 2147483647, %v10262_v55  ;;  %v2804_v27 = vand.u32 2147483647, %v2796_v63 }
 0x4d3   : > { %3027 = vmatpush.msrb.mxu3 %v2961_v28  ;;  %v2869_v11 = vsel %vm2866_vm15, %v2868_v19, %v2864_v37  ;;  %vm2948_vm3 = vcmp.ge.f32.partialorder %v10229_v25, 0.0  ;;  %v2789_v33 = vmul.f32 2.0, %v2781_v61  ;;  %v2875_v10 = vadd.f32 %v10311_v47, %v2874_v43  ;;  %v2962_v37 = vld [vmem:[#allocation2 + $0x40] sm:$0xff] }
 0x4d4   : > { %v2870_v4 = vmul.f32 %v2869_v11, %v10229_v25  ;;  %vm2876_vm9 = vweird.f32 %v10262_v55  ;;  %v2827_v3 = vmul.f32 %v10279_v46, %v10240_v58  ;;  %v2883_v42 = vor.u32 1.1754944e-38, %v2882_v34 }
 0x4d5   : > { %3028 = vmatpush.msrb.mxu3 %v2959_v24  ;;  %vm2878_vm10 = vmor %vm2876_vm9, %vm2877_vm6  ;;  %v14954_v8 = vfloor.f32 %v10270_v39  ;;  %v2797_v12 = vsub.f32 %v10235_v20, %v2789_v33  ;;  %vm2881_vm4 = vcmp.eq.f32.partialorder %v2880_v54, 8.507059e+37  ;;  %vm2832_vm2 = vweird.f32 %v10279_v46 }
 0x4d6   : > { %v2956_v35 = vsel %vm2948_vm3, %v2804_v27, %v2870_v4  ;;  %v2879_v25 = vsel %vm2878_vm10, %v10311_v47, %v2875_v10  ;;  %v2828_v53 = vsub.f32 1.0, %v2827_v3  ;;  %v2837_v55 = vand.u32 2147483648, %v10240_v58  ;;  %v2964_v4 = vld [vmem:[#allocation2 + $0x50] sm:$0xff] }
 0x4d7   : > { %v2786_v40 = vmul.f32 2.0, %v14954_v8  ;;  %3000 = vmatpush.msrb.mxu2 %v2956_v35  ;;  %v2884_v5 = vsel %vm2881_vm4, %v2883_v42, %v2879_v25  ;;  %v2763_v13 = vadd.f32 1.0, %v10226_v15  ;;  %v2805_v17 = vand.u32 2147483647, %v2797_v12  ;;  %v14964_v10 = vld [vmem:[#allocation27_spill] sm:$0xff]  ;;  %v14965_v42 = vld [vmem:[#allocation12_spill] sm:$0xff] }
 0x4d8   : > { %v2885_v45 = vmul.f32 %v2884_v5, %v10235_v20  ;;  %v2829_v39 = vmul.f32 %v10279_v46, %v2828_v53  ;;  %v2835_v6 = vand.u32 2147483647, %v10240_v58  ;;  %vm2949_vm8 = vcmp.ge.f32.partialorder %v10235_v20, 0.0  ;;  %v14966_v8 = vld [vmem:[#allocation22_spill] sm:$0xff]  ;;  %v3861_v25 = vld [vmem:[#allocation5 + $0x20] sm:$0xff]  ;;  %v14967_v53 = vld [vmem:[#allocation23_spill] sm:$0xff] }
 0x4d9   : > { %v2771_v23 = vmul.f32 0.5, %v2763_v13  ;;  %v2842_v47 = vmul.f32 %v10296_v0, %v10251_v38  ;;  %v2794_v30 = vsub.f32 %v10221_v57, %v2786_v40  ;;  %vm2831_vm0 = vweird.f32 %v10240_v58 }
 0x4da   : > { %v2957_v29 = vsel %vm2949_vm8, %v2805_v17, %v2885_v45  ;;  %v2830_v52 = vadd.f32 %v10279_v46, %v2829_v39  ;;  %vm2833_vm12 = vmor %vm2831_vm0, %vm2832_vm2  ;;  %v2838_v49 = vor.u32 1.1754944e-38, %v2837_v55  ;;  %vm2836_vm5 = vcmp.eq.f32.partialorder %v2835_v6, 8.507059e+37  ;;  %v3862_v17 = vld [vmem:[#allocation5 + $0x28] sm:$0xff]  ;;  %v14968_v45 = vld [vmem:[#allocation11_spill] sm:$0xff] }
 0x4db   : > { %3029 = vmatpush.msrb.mxu3 %v2957_v29  ;;  %v2779_v14 = vfloor.f32 %v2771_v23  ;;  %v2843_v7 = vsub.f32 1.0, %v2842_v47  ;;  %vm2847_vm1 = vweird.f32 %v10296_v0  ;;  %v2852_v28 = vand.u32 2147483648, %v10251_v38  ;;  %v14969_v39 = vld [vmem:[#allocation24_spill] sm:$0xff]  ;;  %v1761_v29 = vld [vmem:[#allocation5 + $0x140] sm:$0xff] }
 0x4dc   : > { %v2834_v20 = vsel %vm2833_vm12, %v10279_v46, %v2830_v52  ;;  %v2850_v58 = vand.u32 2147483647, %v10251_v38  ;;  %v2802_v19 = vand.u32 2147483647, %v2794_v30  ;;  %vm2946_vm13 = vcmp.ge.f32.partialorder %v10221_v57, 0.0 }
 0x4dd   : > { %v2839_v24 = vsel %vm2836_vm5, %v2838_v49, %v2834_v20  ;;  %v2787_v48 = vmul.f32 2.0, %v2779_v14  ;;  %v2844_v63 = vmul.f32 %v10296_v0, %v2843_v7  ;;  %vm2846_vm7 = vweird.f32 %v10251_v38  ;;  %v2963_v38 = vld [vmem:[#allocation2 + $0x48] sm:$0xff]  ;;  %v14972_v20 = vld [vmem:[#allocation25_spill] sm:$0xff] }
 0x4de   : > { %v2840_v36 = vmul.f32 %v2839_v24, %v10221_v57  ;;  %vm2848_vm14 = vmor %vm2846_vm7, %vm2847_vm1  ;;  %v2853_v11 = vor.u32 1.1754944e-38, %v2852_v28  ;;  %vm2851_vm11 = vcmp.eq.f32.partialorder %v2850_v58, 8.507059e+37  ;;  %vm14955_vm15 = vcmask 261120  }
 0x4df   : > { %v2795_v2 = vsub.f32 %v10226_v15, %v2787_v48  ;;  %v2845_v46 = vadd.f32 %v10296_v0, %v2844_v63  ;;  %vm2947_vm6 = vcmp.ge.f32.partialorder %v10226_v15, 0.0  ;;  %vm14956_vm3 = vmmov %vm14955_vm15  ;;  %v3997_v3 = vand.u32 2147483647, %v14964_v10 }
 0x4e0   : > { %v2954_v34 = vsel %vm2946_vm13, %v2802_v19, %v2840_v36  ;;  %vm14957_vm9 = vmmov %vm14956_vm3  ;;  %v3876_v40 = vmul.f32 %v14966_v8, %v14965_v42  ;;  %v3877_v5 = vmul.f32 %v14967_v53, %v14965_v42  ;;  %v3914_v6 = vmul.f32 %v14969_v39, %v14968_v45  ;;  %v14995_v42 = vld [vmem:[#allocation16_spill] sm:$0xff] }
 0x4e1   : > { %3001 = vmatpush.msrb.mxu2 %v2954_v34  ;;  %v2849_v61 = vsel %vm2848_vm14, %v10296_v0, %v2845_v46  ;;  %v2803_v54 = vand.u32 2147483647, %v2795_v2  ;;  %vm14958_vm10 = vmmov %vm14956_vm3  ;;  %v2965_v0 = vld [vmem:[#allocation2 + $0x58] sm:$0xff]  ;;  %v10438_v12 = vadd.f32 1.0, %v3997_v3  ;;  %v3949_v47 = vadd.f32 1.0, %v14964_v10 }
 0x4e2   : > { %v2854_v43 = vsel %vm2851_vm11, %v2853_v11, %v2849_v61  ;;  %7524 = vmatmul.msk.f32.vlgmr.msrb.gmra.mxu2 %vm14955_vm15, %v2962_v37  ;;  %vm14959_vm4 = vmmov %vm14956_vm3  ;;  %v3884_v55 = vadd.f32 %v3876_v40, %v3861_v25  ;;  %v3885_v52 = vadd.f32 %v3877_v5, %v3862_v17  ;;  %v3915_v28 = vmul.f32 %v14972_v20, %v14968_v45 }
 0x4e3   : > { %v2855_v57 = vmul.f32 %v2854_v43, %v10226_v15  ;;  %vm14960_vm2 = vmmov %vm14956_vm3  ;;  %v14963_v15 = vld [vmem:[#allocation26_spill] sm:$0xff]  ;;  %v10459_v24 = vadd.f32 %v10205_v26, %v1761_v29  ;;  %v3957_v48 = vmul.f32 0.5, %v3949_v47  ;;  %vm4116_vm5 = vweird.f32 %v10438_v12 }
 0x4e4   : > { %vm14961_vm8 = vmmov %vm14960_vm2  ;;  %v3996_v33 = vand.u32 2147483647, %v14963_v15  ;;  %v3948_v13 = vadd.f32 1.0, %v14963_v15  ;;  %v10450_v30 = vadd.f32 %v3914_v6, %v3884_v55  ;;  %v10463_v19 = vadd.f32 %v3915_v28, %v3885_v52  ;;  %v1762_v43 = vld [vmem:[#allocation5 + $0x148] sm:$0xff] }
 0x4e5   : > { %v2955_v27 = vsel %vm2947_vm6, %v2803_v54, %v2855_v57  ;;  %vm14962_vm0 = vmmov %vm14960_vm2  ;;  %v1887_v11 = vand.u32 2147483647, %v10459_v24  ;;  %v3965_v61 = vfloor.f32 %v3957_v48  ;;  %v10491_v6 = vadd.f32 %v10207_v56, %v1762_v43  ;;  %v3859_v48 = vld [vmem:[#allocation5 + $0x10] sm:$0xff] }
 0x4e6   : > { %3030 = vmatpush.msrb.mxu3 %v2955_v27  ;;  %v10434_v35 = vadd.f32 1.0, %v3996_v33  ;;  %14970 = vst [vmem:[#allocation44_spill] sm:$0xff] %v10450_v30  ;;  %v3956_v49 = vmul.f32 0.5, %v3948_v13  ;;  %v3946_v63 = vadd.f32 1.0, %v10450_v30  ;;  %v3994_v58 = vand.u32 2147483647, %v10450_v30 }
 0x4e7   : > { %7528 = vmatmul.msk.f32.vlgmr.msrb.gmra.mxu3 %vm14956_vm3, %v2962_v37  ;;  %14973 = vst [vmem:[#allocation36_spill] sm:$0xff] %v10463_v19  ;;  %v14974_v37 = vld [vmem:[#allocation13_spill] sm:$0xff]  ;;  %v1763_v33 = vld [vmem:[#allocation5 + $0x150] sm:$0xff]  ;;  %v3995_v13 = vand.u32 2147483647, %v10463_v19  ;;  %v10488_v17 = vadd.f32 1.0, %v1887_v11 }
 0x4e8   : > { %7835 = vrcp.f32 %v10434_v35  ;;  %v3964_v36 = vfloor.f32 %v3956_v49  ;;  %v10469_v34 = vmul.f32 %v14966_v8, %v14974_v37  ;;  %v10473_v26 = vmul.f32 %v14967_v53, %v14974_v37 }
 0x4e9   : > { %7837 = vrcp.f32 %v10438_v12  ;;  %v4105_v54 = vand.u32 2147483647, %v10434_v35  ;;  %v3954_v57 = vmul.f32 0.5, %v3946_v63  ;;  %v10477_v27 = vadd.f32 1.0, %v3994_v58 }
 0x4ea   : > { %7525 = vmatmul.msk.f32.gmra.mxu2 %vm14957_vm9, %v2963_v38  ;;  %v3972_v3 = vmul.f32 2.0, %v3964_v36  ;;  %v4107_v40 = vand.u32 2147483648, %v10434_v35  ;;  %vm4101_vm12 = vweird.f32 %v10434_v35  ;;  %v3973_v47 = vmul.f32 2.0, %v3965_v61  ;;  %v3860_v61 = vld [vmem:[#allocation5 + $0x18] sm:$0xff] }
 0x4eb   : > { %v10496_v52 = vadd.f32 %v10209_v62, %v1763_v33  ;;  %vm10498_vm1 = vcmp.eq.f32.partialorder %v4105_v54, 8.507059e+37  ;;  %7839 = vrcp.f32 %v10477_v27  ;;  %v4122_v36 = vand.u32 2147483648, %v10438_v12  ;;  %v1764_v33 = vld [vmem:[#allocation5 + $0x158] sm:$0xff] }
 0x4ec   : > { %v3980_v56 = vsub.f32 %v14963_v15, %v3972_v3  ;;  %v4108_v63 = vor.u32 1.1754944e-38, %v4107_v40  ;;  %v10508_v62 = vadd.f32 1.0, %v3995_v13  ;;  %7841 = vrcp.f32 %v10488_v17 }
 0x4ed   : > { %v1888_v43 = vand.u32 2147483647, %v10491_v6  ;;  %v3981_v54 = vsub.f32 %v14964_v10, %v3973_v47  ;;  %v4077_v40 = vand.u32 2147483648, %v10477_v27  ;;  %vm1908_vm15 = vweird.f32 %v10488_v17 }
 0x4ee   : > { %v10447_v23 = vpop.eup %7835  ;;  %14978 = vst [vmem:[#allocation37_spill] sm:$0xff] %v10508_v62  ;;  %7843 = vrcp.f32 %v10508_v62 }
 0x4ef   : > { %7529 = vmatmul.msk.f32.gmra.mxu3 %vm14958_vm10, %v2963_v38  ;;  %v10452_v14 = vpop.eup %7837  ;;  %v4097_v7 = vmul.f32 %v10447_v23, %v10434_v35  ;;  %v3947_v38 = vadd.f32 1.0, %v10463_v19  ;;  %vm4102_vm13 = vweird.f32 %v10447_v23  ;;  %v10541_v29 = vadd.f32 1.0, %v1888_v43  ;;  %v3857_v43 = vld [vmem:[#allocation5] sm:$0xff] }
 0x4f0   : > { %14971 = vst [vmem:[#allocation39_spill] sm:$0xff] %v10452_v14  ;;  %v4112_v2 = vmul.f32 %v10452_v14, %v10438_v12  ;;  %vm10521_vm7 = vmor %vm4101_vm12, %vm4102_vm13  ;;  %vm4117_vm14 = vweird.f32 %v10452_v14  ;;  %v10546_v37 = vand.u32 2147483647, %v3981_v54 }
 0x4f1   : > { %v4098_v46 = vsub.f32 1.0, %v4097_v7  ;;  %v3962_v7 = vfloor.f32 %v3954_v57  ;;  %v3955_v28 = vmul.f32 0.5, %v3947_v38  ;;  %v1889_v38 = vand.u32 2147483647, %v10496_v52  ;;  %vm10555_vm11 = vmor %vm4116_vm5, %vm4117_vm14 }
 0x4f2   : > { %7526 = vmatmul.msk.f32.gmra.mxu2 %vm14959_vm4, %v2964_v4  ;;  %v4113_v25 = vsub.f32 1.0, %v4112_v2  ;;  %14987 = vst [vmem:[#allocation21_spill] sm:$0xff] %v10546_v37  ;;  %7845 = vrcp.f32 %v10541_v29  ;;  %vm1923_vm10 = vweird.f32 %v10541_v29 }
 0x4f3   : > { %v4099_v55 = vmul.f32 %v10447_v23, %v4098_v46  ;;  %v14979_v46 = vld [vmem:[#allocation15_spill] sm:$0xff]  ;;  %v10516_v3 = vmul.f32 2.0, %v3962_v7  ;;  %v10533_v7 = vand.u32 2147483647, %v3980_v56  ;;  %v10549_v56 = vadd.f32 1.0, %v1889_v38 }
 0x4f4   : > { %v4114_v58 = vmul.f32 %v10452_v14, %v4113_v25  ;;  %v3912_v11 = vmul.f32 %v14969_v39, %v14979_v46  ;;  %v3963_v25 = vfloor.f32 %v3955_v28  ;;  %v1767_v38 = vld [vmem:[#allocation5 + $0x170] sm:$0xff] }
 0x4f5   : > { %v4100_v2 = vadd.f32 %v10447_v23, %v4099_v55  ;;  %14980 = vst [vmem:[#allocation49_spill] sm:$0xff] %v10516_v3  ;;  %v3880_v55 = vadd.f32 %v10469_v34, %v3857_v43  ;;  %7847 = vrcp.f32 %v10549_v56  ;;  %v3913_v34 = vmul.f32 %v14972_v20, %v14979_v46 }
 0x4f6   : > { %v10526_v13 = vadd.f32 %v10452_v14, %v4114_v58  ;;  %14985 = vst [vmem:[#allocation38_spill] sm:$0xff] %v10533_v7  ;;  %v10544_v58 = vadd.f32 %v10211_v50, %v1764_v33  ;;  %v1841_v43 = vadd.f32 1.0, %v10496_v52  ;;  %v1927_v3 = vand.u32 2147483647, %v10541_v29 }
 0x4f7   : > { %7530 = vmatmul.msk.f32.gmra.mxu3 %vm14960_vm2, %v2964_v4  ;;  %v14975_v4 = vld [vmem:[#allocation14_spill] sm:$0xff]  ;;  %v4104_v35 = vsel %vm10521_vm7, %v10447_v23, %v4100_v2  ;;  %v14988_v23 = vmov 0  ;;  %v10561_v2 = vor.u32 1.1754944e-38, %v4077_v40  ;;  %vm1938_vm4 = vweird.f32 %v10549_v56 }
 0x4f8   : > { %v3875_v5 = vmul.f32 %v14967_v53, %v14975_v4  ;;  %14983 = vst [vmem:[#allocation50_spill] sm:$0xff] %v10526_v13  ;;  %v14989_v23 = vsel %vm10555_vm11, 4294967295, %v14988_v23  ;;  %v10570_v33 = vsel %vm10498_vm1, %v4108_v63, %v4104_v35  ;;  %v1890_v63 = vand.u32 2147483647, %v10544_v58 }
 0x4f9   : > { %14990 = vst [vmem:[#allocation42_spill] sm:$0xff] %v14989_v23  ;;  %v3910_v53 = vmul.f32 %v14969_v39, %v14995_v42  ;;  %vm10707_vm2 = vcmp.eq.f32.partialorder %v1927_v3, 8.507059e+37 }
 0x4fa   : > { %7527 = vmatmul.msk.f32.gmra.mxu2 %vm14961_vm8, %v2965_v0  ;;  %v3883_v47 = vadd.f32 %v3875_v5, %v3860_v61  ;;  %v1766_v61 = vld [vmem:[#allocation5 + $0x168] sm:$0xff]  ;;  %14991 = vst [vmem:[#allocation45_spill] sm:$0xff] %v10561_v2  ;;  %v1768_v5 = vld [vmem:[#allocation5 + $0x178] sm:$0xff] }
 0x4fb   : > { %14993 = vst [vmem:[#allocation40_spill] sm:$0xff] %v10570_v33  ;;  %v10589_v35 = vadd.f32 %v10215_v9, %v1766_v61  ;;  %v10603_v37 = vadd.f32 %v10219_v44, %v1768_v5  ;;  %v10623_v39 = vadd.f32 %v3910_v53, %v3880_v55  ;;  %v1842_v53 = vadd.f32 1.0, %v10544_v58 }
 0x4fc   : > { %v10628_v2 = vadd.f32 %v3913_v34, %v3883_v47 }
 0x4fd   : > { %14999 = vst [vmem:[#allocation58_spill] sm:$0xff] %v10623_v39 }
 0x4fe   : > { %15000 = vst [vmem:[#allocation59_spill] sm:$0xff] %v10628_v2 }
 0x4ff   : > { %7531 = vmatmul.msk.f32.gmra.mxu3 %vm14962_vm0, %v2965_v0  ;;  %v3874_v0 = vmul.f32 %v14966_v8, %v14975_v4 }
 0x501   : > { %v3882_v57 = vadd.f32 %v3874_v0, %v3859_v48  ;;  %v10529_v0 = vor.u32 1.1754944e-38, %v4122_v36  ;;  %v10531_v48 = vpop.eup %7839  ;;  %v1765_v36 = vld [vmem:[#allocation5 + $0x160] sm:$0xff] }
 0x502   : > { %v10565_v54 = vpop.eup %7841  ;;  %v10578_v40 = vmul.f32 %v10531_v48, %v10477_v27  ;;  %v10582_v50 = vadd.f32 %v10213_v18, %v1765_v36  ;;  %v10598_v36 = vadd.f32 %v10217_v60, %v1767_v38  ;;  %v3858_v60 = vld [vmem:[#allocation5 + $0x8] sm:$0xff]  ;;  %v10612_v38 = vadd.f32 1.0, %v1890_v63 }
 0x503   : > { %14984 = vst [vmem:[#allocation51_spill] sm:$0xff] %v10529_v0  ;;  %v10539_v28 = vadd.f32 %v3912_v11, %v3882_v57  ;;  %v10563_v11 = vmul.f32 2.0, %v3963_v25  ;;  %v1839_v57 = vadd.f32 1.0, %v10459_v24  ;;  %v1840_v25 = vadd.f32 1.0, %v10491_v6  ;;  %v10592_v45 = vpop.eup %7843 }
 0x504   : > { %14994 = vst [vmem:[#allocation17_spill] sm:$0xff] %v10592_v45  ;;  %v1904_v18 = vmul.f32 %v10565_v54, %v10488_v17  ;;  %v1891_v59 = vand.u32 2147483647, %v10582_v50  ;;  %v10618_v5 = vmul.f32 %v10592_v45, %v10508_v62  ;;  %v1894_v63 = vand.u32 2147483647, %v10603_v37 }
 0x505   : > { %14986 = vst [vmem:[#allocation52_spill] sm:$0xff] %v10539_v28  ;;  %v3944_v4 = vadd.f32 1.0, %v10539_v28  ;;  %v3992_v49 = vand.u32 2147483647, %v10539_v28  ;;  %v1847_v8 = vmul.f32 0.5, %v1839_v57  ;;  %v1848_v61 = vmul.f32 0.5, %v1840_v25 }
 0x506   : > { %14992 = vst [vmem:[#allocation41_spill] sm:$0xff] %v10563_v11  ;;  %v1892_v57 = vand.u32 2147483647, %v10589_v35  ;;  %v1905_v9 = vsub.f32 1.0, %v1904_v18  ;;  %v1893_v25 = vand.u32 2147483647, %v10598_v36  ;;  %v10631_v44 = vadd.f32 %v10473_v26, %v3858_v60 }
 0x507   : > { %v10610_v7 = vadd.f32 1.0, %v3992_v49  ;;  %14997 = vst [vmem:[#allocation18_spill] sm:$0xff] %v10618_v5  ;;  %v10621_v46 = vmul.f32 0.5, %v3944_v4  ;;  %v10625_v49 = vpop.eup %7845  ;;  %v1855_v28 = vfloor.f32 %v1847_v8  ;;  %v1856_v19 = vfloor.f32 %v1848_v61 }
 0x508   : > { %v10633_v10 = vpop.eup %7847  ;;  %v1849_v18 = vmul.f32 0.5, %v1841_v43  ;;  %v10635_v11 = vadd.f32 1.0, %v1891_v59  ;;  %v10640_v8 = vadd.f32 1.0, %v1892_v57  ;;  %v10644_v4 = vmul.f32 %v14972_v20, %v14995_v42 }
 0x509   : > { %14996 = vst [vmem:[#allocation19_spill] sm:$0xff] %v10610_v7  ;;  %7849 = vrcp.f32 %v10610_v7  ;;  %v1906_v26 = vmul.f32 %v10565_v54, %v1905_v9  ;;  %v1919_v47 = vmul.f32 %v10625_v49, %v10541_v29  ;;  %v10649_v55 = vadd.f32 1.0, %v1893_v25 }
 0x50a   : > { %14998 = vst [vmem:[#allocation20_spill] sm:$0xff] %v10621_v46  ;;  %7851 = vrcp.f32 %v10612_v38  ;;  %v1863_v34 = vmul.f32 2.0, %v1855_v28  ;;  %v1934_v61 = vmul.f32 %v10633_v10, %v10549_v56  ;;  %v10655_v43 = vadd.f32 1.0, %v1894_v63 }
 0x50b   : > { %v1912_v60 = vand.u32 2147483647, %v10488_v17  ;;  %v1864_v57 = vmul.f32 2.0, %v1856_v19  ;;  %v1857_v42 = vfloor.f32 %v1849_v18  ;;  %7853 = vrcp.f32 %v10635_v11 }
 0x50c   : > { %vm1909_vm6 = vweird.f32 %v10565_v54  ;;  %v1914_v9 = vand.u32 2147483648, %v10488_v17  ;;  %v1850_v25 = vmul.f32 0.5, %v1842_v53  ;;  %7855 = vrcp.f32 %v10640_v8 }
 0x50d   : > { %v1907_v59 = vadd.f32 %v10565_v54, %v1906_v26  ;;  %v1920_v20 = vsub.f32 1.0, %v1919_v47  ;;  %v1843_v63 = vadd.f32 1.0, %v10582_v50  ;;  %7857 = vrcp.f32 %v10649_v55  ;;  %vm10679_vm3 = vmor %vm1908_vm15, %vm1909_vm6 }
 0x50e   : > { %v1871_v18 = vsub.f32 %v10459_v24, %v1863_v34  ;;  %v1935_v30 = vsub.f32 1.0, %v1934_v61  ;;  %7859 = vrcp.f32 %v10655_v43  ;;  %v1872_v53 = vsub.f32 %v10491_v6, %v1864_v57 }
 0x50f   : > { %v10662_v28 = vpop.eup %7849  ;;  %v1929_v0 = vand.u32 2147483648, %v10541_v29  ;;  %v1865_v13 = vmul.f32 2.0, %v1857_v42  ;;  %v1944_v26 = vand.u32 2147483648, %v10549_v56  ;;  %vm10683_vm9 = vcmp.eq.f32.partialorder %v1912_v60, 8.507059e+37 }
 0x510   : > { %15001 = vst [vmem:[#allocation60_spill] sm:$0xff] %v10662_v28  ;;  %v10667_v19 = vpop.eup %7851  ;;  %v1915_v61 = vor.u32 1.1754944e-38, %v1914_v9  ;;  %v1942_v57 = vand.u32 2147483647, %v10549_v56  ;;  %v1858_v14 = vfloor.f32 %v1850_v25  ;;  %v1911_v42 = vsel %vm10679_vm3, %v10565_v54, %v1907_v59 }
 0x511   : > { %v10688_v23 = vpop.eup %7853  ;;  %v1921_v17 = vmul.f32 %v10625_v49, %v1920_v20  ;;  %v1949_v33 = vmul.f32 %v10667_v19, %v10612_v38  ;;  %v1851_v28 = vmul.f32 0.5, %v1843_v63  ;;  %v10698_v7 = vand.u32 2147483647, %v1871_v18 }
 0x512   : > { %v10696_v60 = vpop.eup %7855  ;;  %v1936_v9 = vmul.f32 %v10633_v10, %v1935_v30  ;;  %v10705_v47 = vand.u32 2147483647, %v1872_v53  ;;  %v1930_v54 = vor.u32 1.1754944e-38, %v1929_v0  ;;  %v1873_v59 = vsub.f32 %v10496_v52, %v1865_v13 }
 0x513   : > { %v10703_v25 = vpop.eup %7857  ;;  %v1945_v63 = vor.u32 1.1754944e-38, %v1944_v26  ;;  %v1916_v45 = vsel %vm10683_vm9, %v1915_v61, %v1911_v42  ;;  %vm1924_vm8 = vweird.f32 %v10625_v49  ;;  %vm10717_vm0 = vcmp.eq.f32.partialorder %v1942_v57, 8.507059e+37 }
 0x514   : > { %v10712_v18 = vpop.eup %7859  ;;  %v10721_v53 = vmul.f32 2.0, %v1858_v14  ;;  %v1964_v3 = vmul.f32 %v10688_v23, %v10635_v11  ;;  %v1922_v0 = vadd.f32 %v10625_v49, %v1921_v17  ;;  %v1950_v13 = vsub.f32 1.0, %v1949_v33  ;;  %vm10745_vm1 = vmor %vm1923_vm10, %vm1924_vm8 }
 0x515   : > { %v1859_v26 = vfloor.f32 %v1851_v28  ;;  %v1979_v15 = vmul.f32 %v10696_v60, %v10640_v8  ;;  %v1937_v34 = vadd.f32 %v10633_v10, %v1936_v9  ;;  %vm1939_vm12 = vweird.f32 %v10633_v10 }
 0x516   : > { %v1844_v61 = vadd.f32 1.0, %v10589_v35  ;;  %v1994_v14 = vmul.f32 %v10703_v25, %v10649_v55  ;;  %v10734_v57 = vmul.f32 %v1916_v45, %v10459_v24  ;;  %v10736_v42 = vand.u32 2147483647, %v1873_v59  ;;  %vm10758_vm13 = vmor %vm1938_vm4, %vm1939_vm12 }
 0x517   : > { %vm1953_vm5 = vweird.f32 %v10612_v38  ;;  %v2009_v33 = vmul.f32 %v10712_v18, %v10655_v43  ;;  %v1957_v45 = vand.u32 2147483647, %v10612_v38  ;;  %v1959_v9 = vand.u32 2147483648, %v10612_v38 }
 0x518   : > { %v1965_v59 = vsub.f32 1.0, %v1964_v3  ;;  %v1926_v62 = vsel %vm10745_vm1, %v10625_v49, %v1922_v0  ;;  %v1951_v46 = vmul.f32 %v10667_v19, %v1950_v13  ;;  %v10763_v51 = vmul.f32 2.0, %v1859_v26 }
 0x519   : > { %v1980_v17 = vsub.f32 1.0, %v1979_v15  ;;  %v1941_v5 = vsel %vm10758_vm13, %v10633_v10, %v1937_v34  ;;  %v1852_v3 = vmul.f32 0.5, %v1844_v61  ;;  %v1845_v32 = vadd.f32 1.0, %v10598_v36 }
 0x51a   : > { %v1995_v28 = vsub.f32 1.0, %v1994_v14  ;;  %v1972_v49 = vand.u32 2147483647, %v10635_v11  ;;  %v1974_v56 = vand.u32 2147483648, %v10635_v11  ;;  %v1846_v0 = vadd.f32 1.0, %v10603_v37 }
 0x51b   : > { %v2010_v39 = vsub.f32 1.0, %v2009_v33  ;;  %v10774_v13 = vsel %vm10707_vm2, %v1930_v54, %v1926_v62  ;;  %vm10776_vm7 = vcmp.eq.f32.partialorder %v1957_v45, 8.507059e+37  ;;  %v1960_v10 = vor.u32 1.1754944e-38, %v1959_v9 }
 0x51c   : > { %v1966_v26 = vmul.f32 %v10688_v23, %v1965_v59  ;;  %vm1968_vm14 = vweird.f32 %v10635_v11  ;;  %v1946_v34 = vsel %vm10717_vm0, %v1945_v63, %v1941_v5  ;;  %v1952_v61 = vadd.f32 %v10667_v19, %v1951_v46 }
 0x51d   : > { %vm1954_vm15 = vweird.f32 %v10667_v19  ;;  %v1981_v20 = vmul.f32 %v10696_v60, %v1980_v17  ;;  %v1875_v62 = vsub.f32 %v10582_v50, %v10763_v51  ;;  %v1860_v54 = vfloor.f32 %v1852_v3 }
 0x51e   : > { %v1853_v14 = vmul.f32 0.5, %v1845_v32  ;;  %v1996_v33 = vmul.f32 %v10703_v25, %v1995_v28  ;;  %vm10790_vm6 = vcmp.eq.f32.partialorder %v1972_v49, 8.507059e+37  ;;  %v1975_v9 = vor.u32 1.1754944e-38, %v1974_v56  ;;  %vm10797_vm3 = vmor %vm1953_vm5, %vm1954_vm15 }
 0x51f   : > { %v1854_v30 = vmul.f32 0.5, %v1846_v0  ;;  %v2011_v5 = vmul.f32 %v10712_v18, %v2010_v39  ;;  %v1967_v63 = vadd.f32 %v10688_v23, %v1966_v26  ;;  %vm1969_vm9 = vweird.f32 %v10688_v23 }
 0x520   : > { %vm1983_vm10 = vweird.f32 %v10640_v8  ;;  %v1987_v32 = vand.u32 2147483647, %v10640_v8  ;;  %v1956_v17 = vsel %vm10797_vm3, %v10667_v19, %v1952_v61  ;;  %v1982_v39 = vadd.f32 %v10696_v60, %v1981_v20  ;;  %vm10816_vm0 = vmor %vm1968_vm14, %vm1969_vm9 }
 0x521   : > { %vm1984_vm4 = vweird.f32 %v10696_v60  ;;  %v1989_v38 = vand.u32 2147483648, %v10640_v8  ;;  %v1868_v59 = vmul.f32 2.0, %v1860_v54  ;;  %v1861_v29 = vfloor.f32 %v1853_v14 }
 0x522   : > { %v1997_v3 = vadd.f32 %v10703_v25, %v1996_v33  ;;  %vm1999_vm2 = vweird.f32 %v10703_v25  ;;  %vm2025_vm8 = vcmp.ge.f32.partialorder %v10496_v52, 0.0  ;;  %v2004_v19 = vand.u32 2147483648, %v10649_v55  ;;  %vm10829_vm1 = vmor %vm1983_vm10, %vm1984_vm4 }
 0x523   : > { %v1862_v49 = vfloor.f32 %v1854_v30  ;;  %v2012_v56 = vadd.f32 %v10712_v18, %v2011_v5  ;;  %vm2014_vm12 = vweird.f32 %v10712_v18  ;;  %vm2023_vm5 = vcmp.ge.f32.partialorder %v10459_v24, 0.0 }
 0x524   : > { %v1971_v0 = vsel %vm10816_vm0, %v10688_v23, %v1967_v63  ;;  %vm1998_vm13 = vweird.f32 %v10649_v55  ;;  %v2002_v26 = vand.u32 2147483647, %v10649_v55  ;;  %v2019_v61 = vand.u32 2147483648, %v10655_v43 }
 0x525   : > { %vm2024_vm14 = vcmp.ge.f32.partialorder %v10491_v6, 0.0  ;;  %v1961_v20 = vsel %vm10776_vm7, %v1960_v10, %v1956_v17  ;;  %v1986_v23 = vsel %vm10829_vm1, %v10696_v60, %v1982_v39  ;;  %vm10844_vm15 = vmor %vm1998_vm13, %vm1999_vm2  ;;  %vm2013_vm3 = vweird.f32 %v10655_v43  ;;  %v10867_v39 = vpop.permute.xlu2 %2049 }
 0x526   : > { %v2017_v55 = vand.u32 2147483647, %v10655_v43  ;;  %vm1988_vm9 = vcmp.eq.f32.partialorder %v1987_v32, 8.507059e+37  ;;  %v1990_v54 = vor.u32 1.1754944e-38, %v1989_v38  ;;  %v1869_v14 = vmul.f32 2.0, %v1861_v29  ;;  %vm10855_vm7 = vmor %vm2013_vm3, %vm2014_vm12  ;;  %15028 = vst [vmem:[#allocation61_spill] sm:$0xff] %v10867_v39 }
 0x527   : > { %v2001_v15 = vsel %vm10844_vm15, %v10703_v25, %v1997_v3  ;;  %v1976_v10 = vsel %vm10790_vm6, %v1975_v9, %v1971_v0  ;;  %v2005_v33 = vor.u32 1.1754944e-38, %v2004_v19  ;;  %v1870_v30 = vmul.f32 2.0, %v1862_v49 }
 0x528   : > { %v2016_v43 = vsel %vm10855_vm7, %v10712_v18, %v2012_v56  ;;  %v1947_v5 = vmul.f32 %v1946_v34, %v10496_v52  ;;  %v1991_v46 = vsel %vm1988_vm9, %v1990_v54, %v1986_v23  ;;  %vm2003_vm10 = vcmp.eq.f32.partialorder %v2002_v26, 8.507059e+37  ;;  %v10932_v54 = vpop.permute.xlu0 %2064 }
 0x529   : > { %v2020_v25 = vor.u32 1.1754944e-38, %v2019_v61  ;;  %v1962_v63 = vmul.f32 %v1961_v20, %v10544_v58  ;;  %v1876_v32 = vsub.f32 %v10589_v35, %v1868_v59  ;;  %v2006_v17 = vsel %vm2003_vm10, %v2005_v33, %v2001_v15  ;;  %v15036_v20 = vld [vmem:[#allocation58_spill] sm:$0xff]  ;;  %v15043_v15 = vld [vmem:[#allocation20_spill] sm:$0xff] }
 0x52a   : > { %vm2018_vm4 = vcmp.eq.f32.partialorder %v2017_v55, 8.507059e+37  ;;  %v1932_v45 = vmul.f32 %v10774_v13, %v10491_v6  ;;  %v1977_v9 = vmul.f32 %v1976_v10, %v10582_v50  ;;  %v1877_v18 = vsub.f32 %v10598_v36, %v1869_v14 }
 0x52b   : > { %v2021_v38 = vsel %vm2018_vm4, %v2020_v25, %v2016_v43  ;;  %v15029_v34 = vsub.f32 %v10544_v58, %v10721_v53  ;;  %vm2026_vm6 = vcmp.ge.f32.partialorder %v10544_v58, 0.0  ;;  %v1992_v59 = vmul.f32 %v1991_v46, %v10589_v35  ;;  %v15047_v25 = vld [vmem:[#allocation37_spill] sm:$0xff] }
 0x52c   : > { %v1878_v3 = vsub.f32 %v10603_v37, %v1870_v30  ;;  %v2033_v28 = vsel %vm2025_vm8, %v10736_v42, %v1947_v5  ;;  %v1883_v13 = vand.u32 2147483647, %v1875_v62  ;;  %vm2027_vm2 = vcmp.ge.f32.partialorder %v10582_v50, 0.0 }
 0x52d   : > { %v1882_v29 = vand.u32 2147483647, %v15029_v34  ;;  %v2007_v19 = vmul.f32 %v2006_v17, %v10598_v36  ;;  %v2031_v58 = vsel %vm2023_vm5, %v10698_v7, %v10734_v57  ;;  %v1884_v49 = vand.u32 2147483647, %v1876_v32  ;;  %v10899_v7 = vpop.permute.xlu1 %2054  ;;  %v10929_v55 = vpop.permute.xlu2 %2059  ;;  %v15048_v34 = vld [vmem:[#allocation26_spill] sm:$0xff] }
 0x52e   : > { %v2022_v56 = vmul.f32 %v2021_v38, %v10603_v37  ;;  %v2032_v52 = vsel %vm2024_vm14, %v10705_v47, %v1932_v45  ;;  %v2035_v42 = vsel %vm2027_vm2, %v1883_v13, %v1977_v9  ;;  %vm2028_vm8 = vcmp.ge.f32.partialorder %v10589_v35, 0.0  ;;  %15030 = vst [vmem:[#allocation62_spill] sm:$0xff] %v10899_v7 }
 0x52f   : > { %v2034_v53 = vsel %vm2026_vm6, %v1882_v29, %v1962_v63  ;;  %v1885_v51 = vand.u32 2147483647, %v1877_v18  ;;  %v2036_v50 = vsel %vm2028_vm8, %v1884_v49, %v1992_v59  ;;  %vm2029_vm0 = vcmp.ge.f32.partialorder %v10598_v36, 0.0  ;;  %15040 = vst [vmem:[#allocation58_spill] sm:$0xff] %v10929_v55  ;;  %v15049_v29 = vld [vmem:[#allocation17_spill] sm:$0xff] }
 0x530   : > { %v1886_v62 = vand.u32 2147483647, %v1878_v3  ;;  %v2041_v0 = vadd.f32 %v2033_v28, %v9606_v31  ;;  %vm2030_vm12 = vcmp.ge.f32.partialorder %v10603_v37, 0.0  ;;  %v2042_v57 = vadd.f32 %v2034_v53, %v9640_v16  ;;  %v15050_v3 = vld [vmem:[#allocation19_spill] sm:$0xff]  ;;  %v15051_v28 = vld [vmem:[#allocation60_spill] sm:$0xff] }
 0x531   : > { %v2037_v24 = vsel %vm2029_vm0, %v1885_v51, %v2007_v19  ;;  %v15031_v6 = vand.u32 2147483647, %v10438_v12  ;;  %v10910_v35 = vadd.f32 %v10644_v4, %v10631_v44  ;;  %v2039_v36 = vadd.f32 %v2031_v58, %v9669_v22  ;;  %v2966_v51 = vld [vmem:[#allocation5 + $0xc0] sm:$0xff] }
 0x532   : > { %v2043_v31 = vadd.f32 %v2035_v42, %v9563_v1  ;;  %v2038_v11 = vsel %vm2030_vm12, %v1886_v62, %v2022_v56  ;;  %v15035_v37 = vsub.f32 1.0, %v10578_v40  ;;  %vm4071_vm1 = vweird.f32 %v10477_v27  ;;  %v15038_v1 = vld [vmem:[#allocation56_spill] sm:$0xff]  ;;  %v15039_v40 = vld [vmem:[#allocation18_spill] sm:$0xff] }
 0x533   : > { %vm10904_vm5 = vcmp.eq.f32.partialorder %v15031_v6, 8.507059e+37  ;;  %15034 = vst [vmem:[#allocation63_spill] sm:$0xff] %v10910_v35  ;;  %v2040_v16 = vadd.f32 %v2032_v52, %v9717_v21  ;;  %v2044_v12 = vadd.f32 %v2036_v50, %v9592_v41  ;;  %v3993_v61 = vand.u32 2147483647, %v10628_v2  ;;  %v15042_v41 = vld [vmem:[#allocation57_spill] sm:$0xff]  ;;  %v15052_v52 = vld [vmem:[#allocation40_spill] sm:$0xff] }
 0x534   : > { %v4069_v26 = vmul.f32 %v10531_v48, %v15035_v37  ;;  %v15037_v44 = vand.u32 2147483647, %v15036_v20  ;;  %v2069_v22 = vmul.f32 %v10899_v7, %v2041_v0  ;;  %v2045_v23 = vadd.f32 %v2037_v24, %v15038_v1  ;;  %15041 = vst [vmem:[#allocation56_spill] sm:$0xff] %v10932_v54  ;;  %v15054_v50 = vld [vmem:[#allocation39_spill] sm:$0xff]  ;;  %v15055_v62 = vld [vmem:[#allocation50_spill] sm:$0xff] }
 0x535   : > { %vm4072_vm13 = vweird.f32 %v10531_v48  ;;  %v4083_v8 = vsub.f32 1.0, %v15039_v40  ;;  %v2070_v21 = vmul.f32 %v10899_v7, %v2042_v57  ;;  %v2046_v14 = vadd.f32 %v2038_v11, %v15042_v41  ;;  %v15057_v24 = vld [vmem:[#allocation51_spill] sm:$0xff] }
 0x536   : > { %v10923_v4 = vadd.f32 1.0, %v15037_v44  ;;  %v3960_v60 = vfloor.f32 %v15043_v15  ;;  %v3991_v10 = vand.u32 2147483647, %v10910_v35  ;;  %v2071_v33 = vmul.f32 %v10929_v55, %v2043_v31  ;;  %vm10979_vm7 = vmor %vm4071_vm1, %vm4072_vm13  ;;  %v15060_v44 = vld [vmem:[#allocation44_spill] sm:$0xff]  ;;  %v15066_v41 = vld [vmem:[#allocation27_spill] sm:$0xff] }
 0x537   : > { %v2067_v30 = vmul.f32 %v10867_v39, %v2039_v36  ;;  %v4070_v43 = vadd.f32 %v10531_v48, %v4069_v26  ;;  %v15044_v5 = vand.u32 2147483647, %v10477_v27  ;;  %vm4086_vm15 = vweird.f32 %v15047_v25  ;;  %v2968_v36 = vld [vmem:[#allocation5 + $0xd0] sm:$0xff] }
 0x538   : > { %v3945_v63 = vadd.f32 1.0, %v10628_v2  ;;  %v2072_v32 = vmul.f32 %v10929_v55, %v2044_v12  ;;  %v2068_v17 = vmul.f32 %v10867_v39, %v2040_v16  ;;  %v10950_v45 = vadd.f32 1.0, %v3993_v61 }
 0x539   : > { %vm10942_vm14 = vcmp.eq.f32.partialorder %v15044_v5, 8.507059e+37  ;;  %7861 = vrcp.f32 %v10923_v4  ;;  %v2075_v9 = vadd.f32 %v2069_v22, %v2067_v30  ;;  %v2073_v18 = vmul.f32 %v10932_v54, %v2045_v23  ;;  %v15061_v22 = vld [vmem:[#allocation49_spill] sm:$0xff] }
 0x53a   : > { %vm4132_vm3 = vcmp.ge.f32.partialorder %v15048_v34, 0.0  ;;  %v4084_v59 = vmul.f32 %v15049_v29, %v4083_v8  ;;  %v4037_v13 = vmul.f32 %v15051_v28, %v15050_v3  ;;  %v2084_v19 = vadd.f32 %v2070_v21, %v2068_v17 }
 0x53b   : > { %v2074_v58 = vmul.f32 %v10932_v54, %v2046_v14  ;;  %v4092_v53 = vand.u32 2147483648, %v15047_v25  ;;  %v10962_v49 = vadd.f32 1.0, %v3991_v10  ;;  %v2076_v56 = vadd.f32 %v2075_v9, %v2071_v33  ;;  %v15068_v10 = vld [vmem:[#allocation45_spill] sm:$0xff] }
 0x53c   : > { %v4110_v42 = vmul.f32 %v15052_v52, %v15048_v34  ;;  %v15056_v0 = vsel %vm10555_vm11, %v15054_v50, %v15055_v62  ;;  %vm4087_vm9 = vweird.f32 %v15049_v29  ;;  %v2085_v6 = vadd.f32 %v2084_v19, %v2072_v32 }
 0x53d   : > { %v4124_v57 = vsel %vm10904_vm5, %v15057_v24, %v15056_v0  ;;  %v3968_v31 = vmul.f32 2.0, %v3960_v60  ;;  %v3953_v11 = vmul.f32 0.5, %v3945_v63  ;;  %7863 = vrcp.f32 %v10950_v45  ;;  %vm11011_vm11 = vmor %vm4086_vm15, %vm4087_vm9  ;;  %v15074_v63 = vld [vmem:[#allocation52_spill] sm:$0xff] }
 0x53e   : > { %v2077_v37 = vadd.f32 %v2076_v56, %v2073_v18  ;;  %v4074_v47 = vsel %vm10979_vm7, %v10531_v48, %v4070_v43  ;;  %v4085_v26 = vadd.f32 %v15049_v29, %v4084_v59  ;;  %v4038_v16 = vsub.f32 1.0, %v4037_v13 }
 0x53f   : > { %v10988_v12 = vpop.eup %7861  ;;  %v2086_v61 = vadd.f32 %v2085_v6, %v2074_v58  ;;  %v15062_v1 = vsub.f32 %v15060_v44, %v15061_v22  ;;  %7865 = vrcp.f32 %v10962_v49  ;;  %v10999_v14 = vmul.f32 %v4124_v57, %v15066_v41  ;;  %v15075_v58 = vld [vmem:[#allocation38_spill] sm:$0xff] }
 0x540   : > { %v4045_v48 = vand.u32 2147483647, %v15050_v3  ;;  %v4047_v15 = vand.u32 2147483648, %v15050_v3  ;;  %v3942_v60 = vadd.f32 1.0, %v15036_v20  ;;  %v4079_v33 = vsel %vm10942_vm14, %v15068_v10, %v4074_v47  ;;  %v2967_v57 = vld [vmem:[#allocation5 + $0xc8] sm:$0xff] }
 0x541   : > { %v10993_v23 = vand.u32 2147483647, %v15062_v1  ;;  %15067 = vst [vmem:[#allocation57_spill] sm:$0xff] %v10999_v14  ;;  %v15071_v43 = vand.u32 2147483647, %v15047_v25  ;;  %v3976_v32 = vsub.f32 %v15074_v63, %v3968_v31  ;;  %v3961_v17 = vfloor.f32 %v3953_v11 }
 0x542   : > { %v2078_v9 = vrot.slane %v2077_v37, 4  ;;  %v4089_v18 = vsel %vm11011_vm11, %v15049_v29, %v4085_v26  ;;  %v4039_v59 = vmul.f32 %v15051_v28, %v4038_v16  ;;  %v4007_v13 = vmul.f32 %v10988_v12, %v10923_v4 }
 0x543   : > { %15063 = vst [vmem:[#allocation18_spill] sm:$0xff] %v10993_v23  ;;  %vm11017_vm10 = vcmp.eq.f32.partialorder %v15071_v43, 8.507059e+37  ;;  %v11028_v19 = vpop.eup %7863  ;;  %v2087_v25 = vrot.slane %v2086_v61, 4  ;;  %v11033_v56 = vsel %vm4132_vm3, %v15075_v58, %v4110_v42  ;;  %v4093_v52 = vor.u32 1.1754944e-38, %v4092_v53 }
 0x544   : > { %15076 = vst [vmem:[#allocation20_spill] sm:$0xff] %v11033_v56  ;;  %vm4041_vm4 = vweird.f32 %v15050_v3  ;;  %v11037_v50 = vmul.f32 %v4079_v33, %v15060_v44  ;;  %vm11039_vm6 = vcmp.eq.f32.partialorder %v4045_v48, 8.507059e+37  ;;  %v4048_v62 = vor.u32 1.1754944e-38, %v4047_v15 }
 0x545   : > { %v3950_v0 = vmul.f32 0.5, %v3942_v60  ;;  %v11043_v24 = vpop.eup %7865  ;;  %v11047_v34 = vsel %vm11017_vm10, %v4093_v52, %v4089_v18  ;;  %v11049_v53 = vand.u32 2147483647, %v3976_v32  ;;  %vm4042_vm2 = vweird.f32 %v15051_v28  ;;  %v2969_v60 = vld [vmem:[#allocation5 + $0xd8] sm:$0xff] }
 0x546   : > { %15077 = vst [vmem:[#allocation37_spill] sm:$0xff] %v11037_v50  ;;  %v11052_v42 = vmul.f32 2.0, %v3961_v17  ;;  %v2079_v6 = vadd.f32 %v2078_v9, %v2077_v37  ;;  %v4040_v31 = vadd.f32 %v15051_v28, %v4039_v59  ;;  %v4052_v11 = vmul.f32 %v11028_v19, %v10950_v45  ;;  %v2970_v37 = vld [vmem:[#allocation5 + $0xe0] sm:$0xff]  ;;  %vm11073_vm8 = vmor %vm4041_vm4, %vm4042_vm2 }
 0x547   : > { %15080 = vst [vmem:[#allocation26_spill] sm:$0xff] %v11047_v34  ;;  %v4008_v47 = vsub.f32 1.0, %v4007_v13  ;;  %v2088_v26 = vadd.f32 %v2087_v25, %v2086_v61  ;;  %v3958_v10 = vfloor.f32 %v3950_v0  ;;  %v3943_v33 = vadd.f32 1.0, %v10910_v35 }
 0x548   : > { %15081 = vst [vmem:[#allocation17_spill] sm:$0xff] %v11049_v53  ;;  %v4022_v30 = vmul.f32 %v11043_v24, %v10962_v49  ;;  %vm4011_vm0 = vweird.f32 %v10923_v4  ;;  %v2080_v5 = vrot.slane %v2079_v6, 2  ;;  %v4044_v17 = vsel %vm11073_vm8, %v15051_v28, %v4040_v31 }
 0x549   : > { %15082 = vst [vmem:[#allocation19_spill] sm:$0xff] %v11052_v42  ;;  %v4053_v9 = vsub.f32 1.0, %v4052_v11  ;;  %v2089_v3 = vrot.slane %v2088_v26, 2  ;;  %v11090_v58 = vmul.f32 2.0, %v3958_v10  ;;  %v11092_v52 = vmul.f32 0.5, %v3943_v33 }
 0x54a   : > { %v11099_v31 = vsel %vm11039_vm6, %v4048_v62, %v4044_v17  ;;  %v2081_v11 = vadd.f32 %v2080_v5, %v2079_v6  ;;  %vm4012_vm12 = vweird.f32 %v10988_v12  ;;  %v2972_v62 = vld [vmem:[#allocation5 + $0xf0] sm:$0xff]  ;;  %v2973_v17 = vld [vmem:[#allocation5 + $0xf8] sm:$0xff] }
 0x54b   : > { %15085 = vst [vmem:[#allocation60_spill] sm:$0xff] %v11092_v52  ;;  %vm11122_vm5 = vmor %vm4011_vm0, %vm4012_vm12 }
 0x565   : > { %v10954_v38 = vpop.f32.mrf.mxu2 }
 0x566   : > { %v11058_v16 = vadd.f32 %v10954_v38, %v2966_v51  ;;  %v4023_v51 = vsub.f32 1.0, %v4022_v30 }
 0x568   : > { %v3092_v18 = vand.u32 2147483647, %v11058_v16 }
 0x56a   : > { %v3032_v27 = vpop.f32.mrf.mxu3 }
 0x56b   : > { %v11062_v15 = vadd.f32 %v3032_v27, %v2967_v57  ;;  %v4017_v27 = vand.u32 2147483648, %v10923_v4  ;;  %v2971_v57 = vld [vmem:[#allocation5 + $0xe8] sm:$0xff] }
 0x56d   : > { %v3006_v46 = vpop.f32.mrf.mxu2  ;;  %v3093_v25 = vand.u32 2147483647, %v11062_v15  ;;  %v11115_v5 = vor.u32 1.1754944e-38, %v4017_v27 }
 0x56e   : > { %v11067_v43 = vadd.f32 %v3006_v46, %v2968_v36  ;;  %v4009_v46 = vmul.f32 %v10988_v12, %v4008_v47  ;;  %v3044_v36 = vadd.f32 1.0, %v11058_v16  ;;  %v4054_v47 = vmul.f32 %v11028_v19, %v4053_v9 }
 0x56f   : > { %v11111_v38 = vadd.f32 1.0, %v3093_v25  ;;  %v4024_v9 = vmul.f32 %v11043_v24, %v4023_v51 }
 0x570   : > { %v3094_v0 = vand.u32 2147483647, %v11067_v43  ;;  %v3052_v6 = vmul.f32 0.5, %v3044_v36  ;;  %v11130_v27 = vadd.f32 %v11028_v19, %v4054_v47 }
 0x571   : > { %v11149_v25 = vadd.f32 %v11043_v24, %v4024_v9 }
 0x572   : > { %v3035_v22 = vpop.f32.mrf.mxu3  ;;  %v3060_v47 = vfloor.f32 %v3052_v6 }
 0x573   : > { %v11085_v59 = vadd.f32 %v3035_v22, %v2969_v60  ;;  %v11103_v22 = vadd.f32 %v10988_v12, %v4009_v46  ;;  %v2090_v60 = vadd.f32 %v2089_v3, %v2088_v26  ;;  %v2082_v46 = vrot.slane %v2081_v11, 1  ;;  %15088 = vst [vmem:[#allocation40_spill] sm:$0xff] %v11149_v25 }
 0x575   : > { %v3009_v32 = vpop.f32.mrf.mxu2  ;;  %v3095_v10 = vand.u32 2147483647, %v11085_v59 }
 0x576   : > { %v11087_v13 = vadd.f32 %v3009_v32, %v2970_v37  ;;  %v11106_v37 = vadd.f32 1.0, %v3092_v18  ;;  %v11117_v32 = vadd.f32 1.0, %v3094_v0  ;;  %v2091_v0 = vrot.slane %v2090_v60, 1 }
 0x578   : > { %v3096_v28 = vand.u32 2147483647, %v11087_v13  ;;  %v3048_v36 = vadd.f32 1.0, %v11087_v13  ;;  %v11155_v48 = vadd.f32 %v2091_v0, %v2090_v60  ;;  %vm3232_vm15 = vcmp.ge.f32.partialorder %v11087_v13, 0.0 }
 0x57a   : > { %v11109_v33 = vadd.f32 1.0, %v3096_v28  ;;  %v3038_v30 = vpop.f32.mrf.mxu3  ;;  %v11137_v28 = vadd.f32 1.0, %v3095_v10  ;;  %v11151_v10 = vadd.f32 %v2082_v46, %v2081_v11  ;;  %v11163_v46 = vmul.f32 2.0, %v3060_v47 }
 0x57b   : > { %v11113_v29 = vadd.f32 %v3038_v30, %v2971_v57 }
 0x57c   : > { %7867 = vrcp.f32 %v11109_v33  ;;  %vm3173_vm1 = vweird.f32 %v11109_v33  ;;  %v3179_v47 = vand.u32 2147483648, %v11109_v33 }
 0x57d   : > { %v3097_v3 = vand.u32 2147483647, %v11113_v29  ;;  %v3012_v18 = vpop.f32.mrf.mxu2  ;;  %7869 = vrcp.f32 %v11106_v37  ;;  %v3049_v60 = vadd.f32 1.0, %v11113_v29 }
 0x57e   : > { %v11139_v57 = vadd.f32 %v3012_v18, %v2972_v62  ;;  %7871 = vrcp.f32 %v11111_v38  ;;  %v3056_v62 = vmul.f32 0.5, %v3048_v36  ;;  %v3180_v23 = vor.u32 1.1754944e-38, %v3179_v47 }
 0x57f   : > { %v11142_v51 = vadd.f32 1.0, %v3097_v3  ;;  %7873 = vrcp.f32 %v11117_v32  ;;  %v3177_v3 = vand.u32 2147483647, %v11109_v33  ;;  %v3057_v34 = vmul.f32 0.5, %v3049_v60 }
 0x580   : > { %v3050_v30 = vadd.f32 1.0, %v11139_v57  ;;  %v3098_v21 = vand.u32 2147483647, %v11139_v57  ;;  %v3064_v9 = vfloor.f32 %v3056_v62  ;;  %vm3234_vm10 = vcmp.ge.f32.partialorder %v11139_v57, 0.0 }
 0x581   : > { %7875 = vrcp.f32 %v11142_v51  ;;  %vm11174_vm13 = vcmp.eq.f32.partialorder %v3177_v3, 8.507059e+37  ;;  %vm3188_vm8 = vweird.f32 %v11142_v51 }
 0x582   : > { %v7868_v18 = vpop.eup %7867  ;;  %7877 = vrcp.f32 %v11137_v28  ;;  %v3058_v6 = vmul.f32 0.5, %v3050_v30  ;;  %v11158_v1 = vadd.f32 1.0, %v3098_v21  ;;  %v3041_v61 = vpop.f32.mrf.mxu3  ;;  %v3072_v7 = vmul.f32 2.0, %v3064_v9 }
 0x583   : > { %v11160_v54 = vadd.f32 %v3041_v61, %v2973_v17  ;;  %v3169_v11 = vmul.f32 %v7868_v18, %v11109_v33  ;;  %v11165_v55 = vpop.eup %7869  ;;  %vm3174_vm14 = vweird.f32 %v7868_v18 }
 0x584   : > { %v3066_v36 = vfloor.f32 %v3058_v6  ;;  %7879 = vrcp.f32 %v11158_v1  ;;  %v11170_v0 = vpop.eup %7871  ;;  %v3209_v6 = vand.u32 2147483648, %v11158_v1  ;;  %v3207_v14 = vand.u32 2147483647, %v11158_v1  ;;  %vm3175_vm7 = vmor %vm3173_vm1, %vm3174_vm14 }
 0x585   : > { %v3051_v21 = vadd.f32 1.0, %v11160_v54  ;;  %v3099_v61 = vand.u32 2147483647, %v11160_v54  ;;  %v11179_v30 = vpop.eup %7873  ;;  %v3170_v39 = vsub.f32 1.0, %v3169_v11  ;;  %v3080_v9 = vsub.f32 %v11087_v13, %v3072_v7 }
 0x586   : > { %v3074_v62 = vmul.f32 2.0, %v3066_v36  ;;  %vm3203_vm3 = vweird.f32 %v11158_v1  ;;  %vm11197_vm9 = vcmp.eq.f32.partialorder %v3207_v14, 8.507059e+37  ;;  %vm3235_vm14 = vcmp.ge.f32.partialorder %v11160_v54, 0.0 }
 0x587   : > { %v11182_v35 = vpop.eup %7875  ;;  %v3059_v53 = vmul.f32 0.5, %v3051_v21  ;;  %v11184_v40 = vadd.f32 1.0, %v3099_v61  ;;  %v3171_v42 = vmul.f32 %v7868_v18, %v3170_v39  ;;  %v3210_v21 = vor.u32 1.1754944e-38, %v3209_v6 }
 0x588   : > { %v11187_v3 = vpop.eup %7877  ;;  %v3082_v2 = vsub.f32 %v11139_v57, %v3074_v62  ;;  %v3184_v36 = vmul.f32 %v11182_v35, %v11142_v51  ;;  %v3065_v6 = vfloor.f32 %v3057_v34  ;;  %v3088_v25 = vand.u32 2147483647, %v3080_v9 }
 0x589   : > { %v3067_v8 = vfloor.f32 %v3059_v53  ;;  %7881 = vrcp.f32 %v11184_v40  ;;  %v3172_v61 = vadd.f32 %v7868_v18, %v3171_v42  ;;  %v3222_v62 = vand.u32 2147483647, %v11184_v40 }
 0x58a   : > { %v7880_v11 = vpop.eup %7879  ;;  %v3090_v50 = vand.u32 2147483647, %v3082_v2  ;;  %v3224_v7 = vand.u32 2147483648, %v11184_v40  ;;  %v3185_v42 = vsub.f32 1.0, %v3184_v36  ;;  %vm3218_vm4 = vweird.f32 %v11184_v40 }
 0x58b   : > { %v3199_v39 = vmul.f32 %v7880_v11, %v11158_v1  ;;  %v3075_v53 = vmul.f32 2.0, %v3067_v8  ;;  %v3176_v56 = vsel %vm3175_vm7, %v7868_v18, %v3172_v61  ;;  %vm3204_vm11 = vweird.f32 %v7880_v11 }
 0x58c   : > { %v3181_v14 = vsel %vm11174_vm13, %v3180_v23, %v3176_v56  ;;  %v3073_v33 = vmul.f32 2.0, %v3065_v6  ;;  %v3186_v52 = vmul.f32 %v11182_v35, %v3185_v42  ;;  %vm3189_vm6 = vweird.f32 %v11182_v35  ;;  %vm3205_vm0 = vmor %vm3203_vm3, %vm3204_vm11 }
 0x58d   : > { %v3200_v47 = vsub.f32 1.0, %v3199_v39  ;;  %v3083_v2 = vsub.f32 %v11160_v54, %v3075_v53  ;;  %v3182_v8 = vmul.f32 %v3181_v14, %v11087_v13  ;;  %v3192_v36 = vand.u32 2147483647, %v11142_v51  ;;  %vm3190_vm1 = vmor %vm3188_vm8, %vm3189_vm6 }
 0x58e   : > { %v3194_v9 = vand.u32 2147483648, %v11142_v51  ;;  %vm11217_vm2 = vcmp.eq.f32.partialorder %v3222_v62, 8.507059e+37  ;;  %v3225_v61 = vor.u32 1.1754944e-38, %v3224_v7  ;;  %v3187_v6 = vadd.f32 %v11182_v35, %v3186_v52 }
 0x58f   : > { %v7882_v18 = vpop.eup %7881  ;;  %v3201_v34 = vmul.f32 %v7880_v11, %v3200_v47  ;;  %v3091_v17 = vand.u32 2147483647, %v3083_v2  ;;  %v3240_v53 = vsel %vm3232_vm15, %v3088_v25, %v3182_v8  ;;  %v3081_v62 = vsub.f32 %v11113_v29, %v3073_v33  ;;  %v15095_v2 = vld [vmem:[#allocation33_spill] sm:$0xff] }
 0x590   : > { %v3214_v23 = vmul.f32 %v7882_v18, %v11184_v40  ;;  %vm3219_vm12 = vweird.f32 %v7882_v18  ;;  %vm3193_vm13 = vcmp.eq.f32.partialorder %v3192_v36, 8.507059e+37  ;;  %v3195_v7 = vor.u32 1.1754944e-38, %v3194_v9 }
 0x591   : > { %v3202_v39 = vadd.f32 %v7880_v11, %v3201_v34  ;;  %v3191_v1 = vsel %vm3190_vm1, %v11182_v35, %v3187_v6  ;;  %v3046_v47 = vadd.f32 1.0, %v11067_v43  ;;  %v3139_v13 = vmul.f32 %v11179_v30, %v11117_v32  ;;  %vm3220_vm3 = vmor %vm3218_vm4, %vm3219_vm12  ;;  %v15096_v6 = vld [vmem:[#allocation54_spill] sm:$0xff] }
 0x592   : > { %v3215_v42 = vsub.f32 1.0, %v3214_v23  ;;  %v11239_v14 = vadd.f32 %v3240_v53, %v15095_v2  ;;  %v3196_v8 = vsel %vm3193_vm13, %v3195_v7, %v3191_v1  ;;  %v3089_v9 = vand.u32 2147483647, %v3081_v62 }
 0x593   : > { %v3206_v51 = vsel %vm3205_vm0, %v7880_v11, %v3202_v39  ;;  %v3197_v11 = vmul.f32 %v3196_v8, %v11113_v29  ;;  %v3054_v34 = vmul.f32 0.5, %v3046_v47  ;;  %v3140_v36 = vsub.f32 1.0, %v3139_v13 }
 0x594   : > { %v3211_v52 = vsel %vm11197_vm9, %v3210_v21, %v3206_v51  ;;  %v3216_v25 = vmul.f32 %v7882_v18, %v3215_v42  ;;  %vm3144_vm15 = vweird.f32 %v11179_v30  ;;  %v3149_v23 = vand.u32 2147483648, %v11117_v32 }
 0x595   : > { %v3212_v33 = vmul.f32 %v3211_v52, %v11139_v57  ;;  %v3062_v60 = vfloor.f32 %v3054_v34  ;;  %v3141_v39 = vmul.f32 %v11179_v30, %v3140_v36  ;;  %v3147_v53 = vand.u32 2147483647, %v11117_v32 }
 0x596   : > { %v3217_v35 = vadd.f32 %v7882_v18, %v3216_v25  ;;  %vm3233_vm9 = vcmp.ge.f32.partialorder %v11113_v29, 0.0  ;;  %vm3143_vm7 = vweird.f32 %v11117_v32  ;;  %v3150_v1 = vor.u32 1.1754944e-38, %v3149_v23  ;;  %v15097_v25 = vld [vmem:[#allocation47_spill] sm:$0xff] }
 0x597   : > { %v3242_v21 = vsel %vm3234_vm10, %v3090_v50, %v3212_v33  ;;  %v3241_v57 = vsel %vm3233_vm9, %v3089_v9, %v3197_v11  ;;  %v3070_v7 = vmul.f32 2.0, %v3062_v60  ;;  %v3142_v40 = vadd.f32 %v11179_v30, %v3141_v39  ;;  %vm3145_vm11 = vmor %vm3143_vm7, %vm3144_vm15 }
 0x598   : > { %v11253_v42 = vadd.f32 %v3242_v21, %v15096_v6  ;;  %v3221_v62 = vsel %vm3220_vm3, %v7882_v18, %v3217_v35  ;;  %v3047_v18 = vadd.f32 1.0, %v11085_v59  ;;  %v3154_v29 = vmul.f32 %v11187_v3, %v11137_v28  ;;  %v15099_v21 = vld [vmem:[#allocation55_spill] sm:$0xff] }
 0x599   : > { %v3226_v50 = vsel %vm11217_vm2, %v3225_v61, %v3221_v62  ;;  %v3078_v32 = vsub.f32 %v11067_v43, %v3070_v7  ;;  %v3146_v56 = vsel %vm3145_vm11, %v11179_v30, %v3142_v40  ;;  %vm3148_vm10 = vcmp.eq.f32.partialorder %v3147_v53, 8.507059e+37 }
 0x59a   : > { %3288 = vmatpush.msra.mxu0 %v11253_v42  ;;  %v3227_v51 = vmul.f32 %v3226_v50, %v11160_v54  ;;  %vm3230_vm4 = vcmp.ge.f32.partialorder %v11067_v43, 0.0  ;;  %v3151_v47 = vsel %vm3148_vm10, %v3150_v1, %v3146_v56  ;;  %v3055_v13 = vmul.f32 0.5, %v3047_v18 }
 0x59b   : > { %v3155_v52 = vsub.f32 1.0, %v3154_v29  ;;  %v3086_v8 = vand.u32 2147483647, %v3078_v32  ;;  %v3152_v33 = vmul.f32 %v3151_v47, %v11067_v43  ;;  %v3162_v11 = vand.u32 2147483647, %v11137_v28 }
 0x59c   : > { %v3243_v61 = vsel %vm3235_vm14, %v3091_v17, %v3227_v51  ;;  %3289 = vmatpush.msra.mxu0 %v11239_v14  ;;  %vm3113_vm6 = vweird.f32 %v11106_v37  ;;  %v3063_v30 = vfloor.f32 %v3055_v13  ;;  %vm3159_vm2 = vweird.f32 %v11187_v3  ;;  %v15098_v17 = vld [vmem:[#allocation53_spill] sm:$0xff] }
 0x59d   : > { %v11274_v2 = vadd.f32 %v3243_v61, %v15097_v25  ;;  %v3156_v34 = vmul.f32 %v11187_v3, %v3155_v52  ;;  %v3164_v54 = vand.u32 2147483648, %v11137_v28  ;;  %v11284_v36 = vadd.f32 %v3241_v57, %v15098_v17 }
 0x59e   : > { %v3238_v35 = vsel %vm3230_vm4, %v3086_v8, %v3152_v33  ;;  %v3109_v9 = vmul.f32 %v11165_v55, %v11106_v37  ;;  %v3117_v23 = vand.u32 2147483647, %v11106_v37  ;;  %v3071_v39 = vmul.f32 2.0, %v3063_v30  ;;  %v15105_v8 = vld [vmem:[#allocation43_spill] sm:$0xff] }
 0x59f   : > { %3317 = vmatpush.msra.mxu1 %v11274_v2  ;;  %v11292_v60 = vadd.f32 %v3238_v35, %v15099_v21  ;;  %v3157_v53 = vadd.f32 %v11187_v3, %v3156_v34  ;;  %vm3158_vm8 = vweird.f32 %v11137_v28  ;;  %vm3163_vm12 = vcmp.eq.f32.partialorder %v3162_v11, 8.507059e+37 }
 0x5a0   : > { %vm3160_vm0 = vmor %vm3158_vm8, %vm3159_vm2  ;;  %v3165_v43 = vor.u32 1.1754944e-38, %v3164_v54  ;;  %vm3231_vm1 = vcmp.ge.f32.partialorder %v11085_v59, 0.0  ;;  %v3110_v6 = vsub.f32 1.0, %v3109_v9  ;;  %vm4057_vm13 = vweird.f32 %v11028_v19 }
 0x5a1   : > { %3318 = vmatpush.msra.mxu1 %v11284_v36  ;;  %3290 = vmatpush.msra.mxu0 %v11292_v60  ;;  %v3079_v62 = vsub.f32 %v11085_v59, %v3071_v39  ;;  %v3161_v50 = vsel %vm3160_vm0, %v11187_v3, %v3157_v53  ;;  %vm3114_vm14 = vweird.f32 %v11165_v55  ;;  %v3119_v28 = vand.u32 2147483648, %v11106_v37  ;;  %v15134_v37 = vld [vmem:[#allocation41_spill] sm:$0xff] }
 0x5a2   : > { %v3166_v57 = vsel %vm3163_vm12, %v3165_v43, %v3161_v50  ;;  %v3111_v7 = vmul.f32 %v11165_v55, %v3110_v6  ;;  %v3045_v40 = vadd.f32 1.0, %v11062_v15  ;;  %v3124_v51 = vmul.f32 %v11170_v0, %v11111_v38  ;;  %vm3115_vm11 = vmor %vm3113_vm6, %vm3114_vm14  ;;  %v3252_v50 = vld [vmem:[#allocation2 + $0x60] sm:$0xff] }
 0x5a3   : > { %vm4056_vm15 = vweird.f32 %v10950_v45  ;;  %vm4027_vm3 = vweird.f32 %v11043_v24  ;;  %v3087_v1 = vand.u32 2147483647, %v3079_v62  ;;  %v3167_v3 = vmul.f32 %v3166_v57, %v11085_v59 }
 0x5a4   : > { %v3076_v18 = vsub.f32 %v11058_v16, %v11163_v46  ;;  %vm11314_vm9 = vcmp.eq.f32.partialorder %v3117_v23, 8.507059e+37  ;;  %v3112_v32 = vadd.f32 %v11165_v55, %v3111_v7  ;;  %v3120_v56 = vor.u32 1.1754944e-38, %v3119_v28  ;;  %v3255_v28 = vld [vmem:[#allocation2 + $0x78] sm:$0xff] }
 0x5a5   : > { %v3053_v61 = vmul.f32 0.5, %v3045_v40  ;;  %v3125_v47 = vsub.f32 1.0, %v3124_v51  ;;  %v15102_v13 = vand.u32 2147483647, %v10923_v4  ;;  %v3239_v46 = vsel %vm3231_vm1, %v3087_v1, %v3167_v3 }
 0x5a6   : > { %vm3129_vm10 = vweird.f32 %v11170_v0  ;;  %v3132_v25 = vand.u32 2147483647, %v11111_v38  ;;  %v3134_v4 = vand.u32 2147483648, %v11111_v38  ;;  %v11339_v33 = vadd.f32 %v3239_v46, %v15105_v8  ;;  %v15128_v46 = vld [vmem:[#allocation36_spill] sm:$0xff]  ;;  %v15130_v8 = vld [vmem:[#allocation19_spill] sm:$0xff] }
 0x5a7   : > { %vm11321_vm7 = vcmp.eq.f32.partialorder %v15102_v13, 8.507059e+37  ;;  %v3116_v11 = vsel %vm3115_vm11, %v11165_v55, %v3112_v32  ;;  %v3061_v30 = vfloor.f32 %v3053_v61  ;;  %v3126_v59 = vmul.f32 %v11170_v0, %v3125_v47  ;;  %vm11383_vm11 = vmor %vm4056_vm15, %vm4057_vm13  ;;  %v15126_v61 = vld [vmem:[#allocation37_spill] sm:$0xff]  ;;  %v15127_v47 = vld [vmem:[#allocation18_spill] sm:$0xff] }
 0x5a8   : > { %vm4130_vm4 = vcmp.ge.f32.partialorder %v15060_v44, 0.0  ;;  %v15106_v34 = vand.u32 2147483647, %v10950_v45  ;;  %v3084_v54 = vand.u32 2147483647, %v3076_v18  ;;  %v3121_v17 = vsel %vm11314_vm9, %v3120_v56, %v3116_v11  ;;  %3319 = vmatpush.msra.mxu1 %v11339_v33  ;;  %v15125_v56 = vld [vmem:[#allocation20_spill] sm:$0xff] }
 0x5a9   : > { %vm3128_vm6 = vweird.f32 %v11111_v38  ;;  %v2095_v35 = vrot.slane %v11155_v48, 7  ;;  %v3122_v55 = vmul.f32 %v3121_v17, %v11058_v16  ;;  %v3069_v9 = vmul.f32 2.0, %v3061_v30  ;;  %v15131_v11 = vld [vmem:[#allocation59_spill] sm:$0xff] }
 0x5aa   : > { %vm11346_vm2 = vcmp.eq.f32.partialorder %v15106_v34, 8.507059e+37  ;;  %v3127_v23 = vadd.f32 %v11170_v0, %v3126_v59  ;;  %vm4133_vm8 = vcmp.ge.f32.partialorder %v15066_v41, 0.0  ;;  %vm14738_vm0 = vcmask 1040384   ;;  %vm3130_vm1 = vmor %vm3128_vm6, %vm3129_vm10  ;;  %v15132_v59 = vld [vmem:[#allocation57_spill] sm:$0xff]  ;;  %v3253_v41 = vld [vmem:[#allocation2 + $0x68] sm:$0xff] }
 0x5ab   : > { %vm3228_vm12 = vcmp.ge.f32.partialorder %v11058_v16, 0.0  ;;  %v3135_v21 = vor.u32 1.1754944e-38, %v3134_v4  ;;  %v2097_v48 = vsel %vm14738_vm0, %v11151_v10, %v2095_v35  ;;  %v15109_v38 = vlaneseq  ;;  %v15113_v16 = vld [vmem:[#allocation46_spill] sm:$0xff]  ;;  %v15133_v34 = vld [vmem:[#allocation21_spill] sm:$0xff] }
 0x5ac   : > { %v15110_v39 = vmov 0  ;;  %v3236_v53 = vsel %vm3228_vm12, %v3084_v54, %v3122_v55  ;;  %v3077_v43 = vsub.f32 %v11062_v15, %v3069_v9  ;;  %v3131_v6 = vsel %vm3130_vm1, %v11170_v0, %v3127_v23  ;;  %v15137_v55 = vld [vmem:[#allocation17_spill] sm:$0xff] }
 0x5ad   : > { %vm11364_vm14 = vcmp.lt.s32.totalorder %v15109_v38, 256  ;;  %vm3133_vm9 = vcmp.eq.f32.partialorder %v3132_v25, 8.507059e+37  ;;  %v11377_v62 = vadd.f32 %v3236_v53, %v15113_v16  ;;  %vm4026_vm10 = vweird.f32 %v10962_v49  ;;  %v15129_v25 = vld [vmem:[#allocation26_spill] sm:$0xff] }
 0x5ae   : > { %v15111_v39 = vsel %vm11364_vm14, 4294967295, %v15110_v39  ;;  %2103 = vst.msk [vmem:[%s11371_s11] sm:$0x3] %vm11364_vm14, %v2097_v48  ;;  %v3136_v10 = vsel %vm3133_vm9, %v3135_v21, %v3131_v6  ;;  %v4032_v0 = vand.u32 2147483648, %v10962_v49  ;;  %v3085_v57 = vand.u32 2147483647, %v3077_v43  ;;  %vm11411_vm15 = vmor %vm4026_vm10, %vm4027_vm3 }
 0x5af   : > { %15112 = vst [vmem:[#allocation42_spill] sm:$0xff] %v15111_v39  ;;  %v3137_v7 = vmul.f32 %v3136_v10, %v11062_v15  ;;  %v4059_v40 = vsel %vm11383_vm11, %v11028_v19, %v11130_v27  ;;  %v4030_v51 = vand.u32 2147483647, %v10962_v49  ;;  %3291 = vmatpush.msra.mxu0 %v11377_v62  ;;  %vm3229_vm13 = vcmp.ge.f32.partialorder %v11062_v15, 0.0  ;;  %v15138_v48 = vld [vmem:[#allocation63_spill] sm:$0xff]  ;;  %v3260_v49 = vld [vmem:[#allocation5 + $0x120] sm:$0xff] }
 0x5b0   : > { %v4050_v1 = vmul.f32 %v11099_v31, %v15074_v63  ;;  %v15116_v3 = vand.u32 2147483648, %v10950_v45  ;;  %v15117_v29 = vsel %vm11122_vm5, %v10988_v12, %v11103_v22  ;;  %vm15120_vm6 = vcmask 261120   ;;  %v15121_v31 = vld [vmem:[#allocation60_spill] sm:$0xff] }
 0x5b1   : > { %v4019_v19 = vsel %vm11321_vm7, %v11115_v5, %v15117_v29  ;;  %v3237_v15 = vsel %vm3229_vm13, %v3085_v57, %v3137_v7  ;;  %7532 = vmatmul.msk.f32.vlgmr.msra.gmra.mxu0 %vm15120_vm6, %v3252_v50  ;;  %v3974_v45 = vsub.f32 %v15036_v20, %v11090_v58  ;;  %v15122_v26 = vfloor.f32 %v15121_v31  ;;  %v15123_v12 = vld [vmem:[#allocation40_spill] sm:$0xff]  ;;  %vm15136_vm7 = vmmov %vm15120_vm6  ;;  %v4143_v57 = vld [vmem:[#allocation2 + $0x8] sm:$0xff] }
 0x5b2   : > { %v4063_v18 = vor.u32 1.1754944e-38, %v15116_v3  ;;  %v4029_v22 = vsel %vm11411_vm15, %v11043_v24, %v15123_v12  ;;  %v15124_v5 = vld [vmem:[#allocation48_spill] sm:$0xff]  ;;  %4178 = vmatpush.msrb.mxu0 %v15125_v56  ;;  %v4138_v13 = vsel %vm4130_vm4, %v15127_v47, %v15126_v61  ;;  %v4033_v52 = vor.u32 1.1754944e-38, %v4032_v0  ;;  %vm15139_vm12 = vmmov %vm15120_vm6  ;;  %v4142_v0 = vld [vmem:[#allocation2] sm:$0xff] }
 0x5b3   : > { %v3967_v27 = vmul.f32 2.0, %v15122_v26  ;;  %v11425_v32 = vadd.f32 %v3237_v15, %v15124_v5  ;;  %v4095_v4 = vmul.f32 %v15129_v25, %v15128_v46  ;;  %v3977_v24 = vsub.f32 %v15131_v11, %v15130_v8  ;;  %vm15140_vm9 = vmmov %vm15120_vm6  ;;  %v4144_v7 = vld [vmem:[#allocation2 + $0x10] sm:$0xff]  ;;  %v3256_v29 = vld [vmem:[#allocation5 + $0x100] sm:$0xff] }
 0x5b4   : > { %v4064_v58 = vsel %vm11346_vm2, %v4063_v18, %v4059_v40  ;;  %v4020_v30 = vmul.f32 %v4019_v19, %v15036_v20  ;;  %vm4031_vm5 = vcmp.eq.f32.partialorder %v4030_v51, 8.507059e+37  ;;  %v4141_v44 = vsel %vm4133_vm8, %v15133_v34, %v15132_v59  ;;  %4179 = vmatpush.msrb.mxu0 %v4138_v13  ;;  %vm15141_vm11 = vmmov %vm15120_vm6  ;;  %v4145_v40 = vld [vmem:[#allocation2 + $0x18] sm:$0xff]  ;;  %v3257_v19 = vld [vmem:[#allocation5 + $0x108] sm:$0xff] }
 0x5b5   : > { %3320 = vmatpush.msra.mxu1 %v11425_v32  ;;  %v15135_v54 = vsub.f32 %v15128_v46, %v15134_v37  ;;  %vm4128_vm3 = vcmp.ge.f32.partialorder %v15074_v63, 0.0  ;;  %v4034_v35 = vsel %vm4031_vm5, %v4033_v52, %v4029_v22  ;;  %v4065_v23 = vmul.f32 %v4064_v58, %v15131_v11  ;;  %vm15142_vm10 = vmmov %vm15120_vm6  ;;  %v3258_v15 = vld [vmem:[#allocation5 + $0x110] sm:$0xff]  ;;  %v3261_v56 = vld [vmem:[#allocation5 + $0x128] sm:$0xff] }
 0x5b6   : > { %7536 = vmatmul.msk.f32.vlgmr.msra.gmra.mxu1 %vm15136_vm7, %v3252_v50  ;;  %v4136_v9 = vsel %vm4128_vm3, %v15137_v55, %v4050_v1  ;;  %v3982_v21 = vand.u32 2147483647, %v3974_v45  ;;  %v3975_v38 = vsub.f32 %v15138_v48, %v3967_v27  ;;  %vm4131_vm4 = vcmp.ge.f32.partialorder %v15128_v46, 0.0  ;;  %vm15143_vm13 = vmmov %vm15120_vm6  ;;  %v3259_v27 = vld [vmem:[#allocation5 + $0x118] sm:$0xff] }
 0x5b7   : > { %v3987_v17 = vand.u32 2147483647, %v15135_v54  ;;  %4207 = vmatpush.msrb.mxu1 %v4141_v44  ;;  %4180 = vmatpush.msrb.mxu0 %v4136_v9  ;;  %vm4126_vm2 = vcmp.ge.f32.partialorder %v15036_v20, 0.0  ;;  %v3985_v43 = vand.u32 2147483647, %v3977_v24  ;;  %v4035_v6 = vmul.f32 %v4034_v35, %v15138_v48  ;;  %v3254_v20 = vld [vmem:[#allocation2 + $0x70] sm:$0xff]  ;;  %vm15144_vm15 = vmmov %vm15120_vm6 }
 0x5b8   : > { %v4134_v63 = vsel %vm4126_vm2, %v3982_v21, %v4020_v30  ;;  %vm4129_vm8 = vcmp.ge.f32.partialorder %v15131_v11, 0.0  ;;  %v3983_v10 = vand.u32 2147483647, %v3975_v38  ;;  %vm4127_vm1 = vcmp.ge.f32.partialorder %v15138_v48, 0.0  ;;  %vm15145_vm5 = vmmov %vm15120_vm6  ;;  %v3263_v54 = vld [vmem:[#allocation5 + $0x138] sm:$0xff] }
 0x5b9   : > { %v4139_v53 = vsel %vm4131_vm4, %v3987_v17, %v4095_v4  ;;  %4181 = vmatpush.msrb.mxu0 %v4134_v63  ;;  %v4137_v16 = vsel %vm4129_vm8, %v3985_v43, %v4065_v23  ;;  %vm15146_vm3 = vmmov %vm15145_vm5  ;;  %v3262_v4 = vld [vmem:[#allocation5 + $0x130] sm:$0xff]  ;;  %v4146_v63 = vld [vmem:[#allocation5 + $0x40] sm:$0xff] }
 0x5ba   : > { %4208 = vmatpush.msrb.mxu1 %v4139_v53  ;;  %7533 = vmatmul.msk.f32.gmra.mxu0 %vm15139_vm12, %v3253_v41  ;;  %v4135_v50 = vsel %vm4127_vm1, %v3983_v10, %v4035_v6  ;;  %vm15147_vm7 = vmmov %vm15146_vm3 }
 0x5bb   : > { %vm15148_vm4 = vmmov %vm15146_vm3 }
 0x5bc   : > { %4209 = vmatpush.msrb.mxu1 %v4137_v16  ;;  %vm15149_vm2 = vmmov %vm15146_vm3 }
 0x5bd   : > { %vm15150_vm8 = vmmov %vm15149_vm2 }
 0x5be   : > { %4210 = vmatpush.msrb.mxu1 %v4135_v50  ;;  %vm15151_vm12 = vmmov %vm15149_vm2 }
 0x5bf   : > { %7537 = vmatmul.msk.f32.gmra.mxu1 %vm15140_vm9, %v3253_v41 }
 0x5c2   : > { %7534 = vmatmul.msk.f32.gmra.mxu0 %vm15141_vm11, %v3254_v20 }
 0x5c7   : > { %7538 = vmatmul.msk.f32.gmra.mxu1 %vm15142_vm10, %v3254_v20 }
 0x5ca   : > { %7535 = vmatmul.msk.f32.gmra.mxu0 %vm15143_vm13, %v3255_v28 }
 0x5cf   : > { %7539 = vmatmul.msk.f32.gmra.mxu1 %vm15144_vm15, %v3255_v28 }
 0x5d2   : > { %7548 = vmatmul.msk.f32.vlgmr.msrb.gmra.mxu0 %vm15120_vm6, %v4142_v0 }
 0x5d7   : > { %7552 = vmatmul.msk.f32.vlgmr.msrb.gmra.mxu1 %vm15145_vm5, %v4142_v0 }
 0x5da   : > { %7549 = vmatmul.msk.f32.gmra.mxu0 %vm15146_vm3, %v4143_v57 }
 0x5df   : > { %7553 = vmatmul.msk.f32.gmra.mxu1 %vm15147_vm7, %v4143_v57 }
 0x5e2   : > { %7550 = vmatmul.msk.f32.gmra.mxu0 %vm15148_vm4, %v4144_v7 }
 0x5e7   : > { %7554 = vmatmul.msk.f32.gmra.mxu1 %vm15149_vm2, %v4144_v7 }
 0x5ea   : > { %7551 = vmatmul.msk.f32.gmra.mxu0 %vm15150_vm8, %v4145_v40 }
 0x5ef   : > { %7555 = vmatmul.msk.f32.gmra.mxu1 %vm15151_vm12, %v4145_v40 }
 0x62e   : > { %v3293_v51 = vpop.f32.mrf.mxu0 }
 0x62f   : > { %v11471_v45 = vadd.f32 %v3293_v51, %v3256_v29 }
 0x631   : > { %v3382_v61 = vand.u32 2147483647, %v11471_v45  ;;  %v3334_v30 = vadd.f32 1.0, %v11471_v45 }
 0x633   : > { %v3322_v1 = vpop.f32.mrf.mxu1  ;;  %v11490_v8 = vadd.f32 1.0, %v3382_v61  ;;  %v11507_v21 = vmul.f32 0.5, %v3334_v30 }
 0x634   : > { %v11473_v26 = vadd.f32 %v3322_v1, %v3257_v19 }
 0x636   : > { %v3383_v58 = vand.u32 2147483647, %v11473_v26 }
 0x637   : > { %v3296_v3 = vpop.f32.mrf.mxu0 }
 0x638   : > { %v11477_v22 = vadd.f32 %v3296_v3, %v3258_v15  ;;  %v11494_v59 = vadd.f32 1.0, %v3383_v58  ;;  %v4147_v3 = vld [vmem:[#allocation5 + $0x48] sm:$0xff] }
 0x63a   : > { %v3384_v46 = vand.u32 2147483647, %v11477_v22 }
 0x63c   : > { %v3325_v18 = vpop.f32.mrf.mxu1  ;;  %v11498_v44 = vadd.f32 1.0, %v3384_v46 }
 0x63d   : > { %v11481_v47 = vadd.f32 %v3325_v18, %v3259_v27 }
 0x63f   : > { %v3299_v31 = vpop.f32.mrf.mxu0  ;;  %v3385_v11 = vand.u32 2147483647, %v11481_v47 }
 0x640   : > { %v11475_v12 = vadd.f32 %v3299_v31, %v3260_v49 }
 0x641   : > { %v11504_v55 = vadd.f32 1.0, %v3385_v11 }
 0x642   : > { %v3386_v5 = vand.u32 2147483647, %v11475_v12  ;;  %v3338_v23 = vadd.f32 1.0, %v11475_v12  ;;  %vm3522_vm7 = vcmp.ge.f32.partialorder %v11475_v12, 0.0 }
 0x644   : > { %v3328_v13 = vpop.f32.mrf.mxu1  ;;  %v11484_v52 = vadd.f32 1.0, %v3386_v5  ;;  %v3346_v6 = vmul.f32 0.5, %v3338_v23 }
 0x645   : > { %v11487_v25 = vadd.f32 %v3328_v13, %v3261_v56 }
 0x646   : > { %7883 = vrcp.f32 %v11484_v52  ;;  %v3467_v51 = vand.u32 2147483647, %v11484_v52  ;;  %v3354_v29 = vfloor.f32 %v3346_v6  ;;  %v3469_v19 = vand.u32 2147483648, %v11484_v52 }
 0x647   : > { %v3302_v24 = vpop.f32.mrf.mxu0  ;;  %v3387_v37 = vand.u32 2147483647, %v11487_v25  ;;  %7885 = vrcp.f32 %v11490_v8  ;;  %vm3463_vm1 = vweird.f32 %v11484_v52 }
 0x648   : > { %v11496_v34 = vadd.f32 %v3302_v24, %v3262_v4  ;;  %7887 = vrcp.f32 %v11494_v59  ;;  %vm11551_vm11 = vcmp.eq.f32.partialorder %v3467_v51, 8.507059e+37  ;;  %v3362_v23 = vmul.f32 2.0, %v3354_v29  ;;  %v4149_v29 = vld [vmem:[#allocation5 + $0x58] sm:$0xff] }
 0x649   : > { %7889 = vrcp.f32 %v11498_v44  ;;  %v11517_v43 = vadd.f32 1.0, %v3387_v37 }
 0x64a   : > { %v3388_v17 = vand.u32 2147483647, %v11496_v34  ;;  %v3340_v35 = vadd.f32 1.0, %v11496_v34  ;;  %vm3524_vm5 = vcmp.ge.f32.partialorder %v11496_v34, 0.0 }
 0x64c   : > { %v3331_v9 = vpop.f32.mrf.mxu1  ;;  %v11509_v48 = vpop.eup %7883  ;;  %v11512_v38 = vadd.f32 1.0, %v3388_v17  ;;  %v3348_v53 = vmul.f32 0.5, %v3340_v35 }
 0x64d   : > { %v11514_v41 = vadd.f32 %v3331_v9, %v3263_v54  ;;  %v3459_v28 = vmul.f32 %v11509_v48, %v11484_v52  ;;  %v11531_v1 = vpop.eup %7885  ;;  %vm3464_vm9 = vweird.f32 %v11509_v48  ;;  %v4148_v54 = vld [vmem:[#allocation5 + $0x50] sm:$0xff] }
 0x64e   : > { %7891 = vrcp.f32 %v11512_v38  ;;  %v3356_v10 = vfloor.f32 %v3348_v53  ;;  %v11535_v49 = vpop.eup %7887  ;;  %v3497_v31 = vand.u32 2147483647, %v11512_v38  ;;  %v3499_v27 = vand.u32 2147483648, %v11512_v38  ;;  %vm3465_vm4 = vmor %vm3463_vm1, %vm3464_vm9 }
 0x64f   : > { %v3389_v16 = vand.u32 2147483647, %v11514_v41  ;;  %7893 = vrcp.f32 %v11504_v55  ;;  %v4183_v50 = vpop.f32.mrf.mxu0  ;;  %v3341_v20 = vadd.f32 1.0, %v11514_v41  ;;  %v11542_v5 = vpop.eup %7889  ;;  %v3460_v58 = vsub.f32 1.0, %v3459_v28 }
 0x650   : > { %v11528_v7 = vadd.f32 %v4183_v50, %v4146_v63  ;;  %v3364_v40 = vmul.f32 2.0, %v3356_v10  ;;  %7895 = vrcp.f32 %v11517_v43  ;;  %vm3493_vm10 = vweird.f32 %v11512_v38 }
 0x651   : > { %v11526_v57 = vadd.f32 1.0, %v3389_v16  ;;  %v3349_v18 = vmul.f32 0.5, %v3341_v20  ;;  %vm11561_vm13 = vcmp.eq.f32.partialorder %v3497_v31, 8.507059e+37  ;;  %v3500_v6 = vor.u32 1.1754944e-38, %v3499_v27 }
 0x652   : > { %v4272_v15 = vand.u32 2147483647, %v11528_v7  ;;  %v3372_v61 = vsub.f32 %v11496_v34, %v3364_v40  ;;  %v3461_v40 = vmul.f32 %v11509_v48, %v3460_v58  ;;  %vm3478_vm1 = vweird.f32 %v11517_v43 }
 0x653   : > { %7897 = vrcp.f32 %v11526_v57  ;;  %v3357_v13 = vfloor.f32 %v3349_v18  ;;  %v3512_v24 = vand.u32 2147483647, %v11526_v57  ;;  %v3514_v9 = vand.u32 2147483648, %v11526_v57 }
 0x654   : > { %v4212_v56 = vpop.f32.mrf.mxu1  ;;  %v7892_v46 = vpop.eup %7891  ;;  %v11546_v4 = vadd.f32 1.0, %v4272_v15  ;;  %v3380_v50 = vand.u32 2147483647, %v3372_v61  ;;  %vm3508_vm15 = vweird.f32 %v11526_v57  ;;  %v3339_v18 = vadd.f32 1.0, %v11487_v25 }
 0x655   : > { %v11548_v11 = vadd.f32 %v4212_v56, %v4147_v3  ;;  %v11555_v37 = vpop.eup %7893  ;;  %v3489_v17 = vmul.f32 %v7892_v46, %v11512_v38  ;;  %v3365_v35 = vmul.f32 2.0, %v3357_v13  ;;  %vm3494_vm6 = vweird.f32 %v7892_v46 }
 0x656   : > { %v11565_v16 = vpop.eup %7895  ;;  %7899 = vrcp.f32 %v11546_v4  ;;  %vm11576_vm3 = vcmp.eq.f32.partialorder %v3512_v24, 8.507059e+37  ;;  %v3515_v56 = vor.u32 1.1754944e-38, %v3514_v9  ;;  %v3370_v61 = vsub.f32 %v11475_v12, %v3362_v23  ;;  %vm3495_vm2 = vmor %vm3493_vm10, %vm3494_vm6 }
 0x657   : > { %v4273_v53 = vand.u32 2147483647, %v11548_v11  ;;  %v4186_v10 = vpop.f32.mrf.mxu0  ;;  %v3490_v20 = vsub.f32 1.0, %v3489_v17  ;;  %v3373_v28 = vsub.f32 %v11514_v41, %v3365_v35  ;;  %v3470_v17 = vor.u32 1.1754944e-38, %v3469_v19 }
 0x658   : > { %v11571_v3 = vadd.f32 %v4186_v10, %v4148_v54  ;;  %v3462_v54 = vadd.f32 %v11509_v48, %v3461_v40  ;;  %v3347_v24 = vmul.f32 0.5, %v3339_v18  ;;  %v3474_v9 = vmul.f32 %v11565_v16, %v11517_v43 }
 0x659   : > { %v7898_v51 = vpop.eup %7897  ;;  %v3491_v15 = vmul.f32 %v7892_v46, %v3490_v20  ;;  %v11582_v13 = vadd.f32 1.0, %v4273_v53  ;;  %v3381_v58 = vand.u32 2147483647, %v3373_v28  ;;  %v4150_v28 = vld [vmem:[#allocation5 + $0x60] sm:$0xff]  ;;  %vm3479_vm9 = vweird.f32 %v11565_v16 }
 0x65a   : > { %v3504_v31 = vmul.f32 %v7898_v51, %v11526_v57  ;;  %v4274_v23 = vand.u32 2147483647, %v11571_v3  ;;  %vm3509_vm8 = vweird.f32 %v7898_v51  ;;  %v3466_v19 = vsel %vm3465_vm4, %v11509_v48, %v3462_v54  ;;  %vm3480_vm10 = vmor %vm3478_vm1, %vm3479_vm9 }
 0x65b   : > { %v3492_v10 = vadd.f32 %v7892_v46, %v3491_v15  ;;  %v3471_v52 = vsel %vm11551_vm11, %v3470_v17, %v3466_v19  ;;  %v3355_v18 = vfloor.f32 %v3347_v24  ;;  %vm3510_vm12 = vmor %vm3508_vm15, %vm3509_vm8  ;;  %v3482_v57 = vand.u32 2147483647, %v11517_v43 }
 0x65c   : > { %v4215_v35 = vpop.f32.mrf.mxu1  ;;  %v3505_v20 = vsub.f32 1.0, %v3504_v31  ;;  %v11600_v31 = vpop.eup %7899  ;;  %v3472_v38 = vmul.f32 %v3471_v52, %v11475_v12  ;;  %v3484_v19 = vand.u32 2147483648, %v11517_v43  ;;  %7901 = vrcp.f32 %v11582_v13 }
 0x65d   : > { %v11592_v53 = vadd.f32 %v4215_v35, %v4149_v29  ;;  %v3496_v40 = vsel %vm3495_vm2, %v7892_v46, %v3492_v10  ;;  %v3378_v35 = vand.u32 2147483647, %v3370_v61  ;;  %v3363_v46 = vmul.f32 2.0, %v3355_v18 }
 0x65e   : > { %v3506_v15 = vmul.f32 %v7898_v51, %v3505_v20  ;;  %v3501_v29 = vsel %vm11561_vm13, %v3500_v6, %v3496_v40  ;;  %v3475_v10 = vsub.f32 1.0, %v3474_v9  ;;  %v11607_v20 = vadd.f32 1.0, %v4274_v23  ;;  %v4151_v9 = vld [vmem:[#allocation5 + $0x68] sm:$0xff] }
 0x65f   : > { %v4275_v0 = vand.u32 2147483647, %v11592_v53  ;;  %v4189_v39 = vpop.f32.mrf.mxu0  ;;  %v3502_v48 = vmul.f32 %v3501_v29, %v11496_v34  ;;  %vm3525_vm11 = vcmp.ge.f32.partialorder %v11514_v41, 0.0  ;;  %v3485_v40 = vor.u32 1.1754944e-38, %v3484_v19 }
 0x660   : > { %v3507_v54 = vadd.f32 %v7898_v51, %v3506_v15  ;;  %v11611_v17 = vadd.f32 %v4189_v39, %v4150_v28  ;;  %v3476_v61 = vmul.f32 %v11565_v16, %v3475_v10  ;;  %v11632_v28 = vadd.f32 1.0, %v11528_v7 }
 0x661   : > { %v11609_v30 = vadd.f32 1.0, %v4275_v0  ;;  %v3532_v63 = vsel %vm3524_vm5, %v3380_v50, %v3502_v48  ;;  %v3530_v0 = vsel %vm3522_vm7, %v3378_v35, %v3472_v38  ;;  %v3371_v50 = vsub.f32 %v11487_v25, %v3363_v46 }
 0x662   : > { %v3511_v6 = vsel %vm3510_vm12, %v7898_v51, %v3507_v54  ;;  %v4276_v24 = vand.u32 2147483647, %v11611_v17  ;;  %3570 = vmatpush.msra.mxu2 %v3532_v63  ;;  %v3477_v51 = vadd.f32 %v11565_v16, %v3476_v61  ;;  %v3336_v15 = vadd.f32 1.0, %v11477_v22  ;;  %v11656_v46 = vpop.eup %7901 }
 0x663   : > { %v3516_v39 = vsel %vm11576_vm3, %v3515_v56, %v3511_v6  ;;  %7903 = vrcp.f32 %v11607_v20  ;;  %vm3483_vm13 = vcmp.eq.f32.partialorder %v3482_v57, 8.507059e+37  ;;  %v3379_v18 = vand.u32 2147483647, %v3371_v50 }
 0x664   : > { %v4218_v23 = vpop.f32.mrf.mxu1  ;;  %v3517_v34 = vmul.f32 %v3516_v39, %v11514_v41  ;;  %v11635_v27 = vadd.f32 1.0, %v4276_v24  ;;  %3571 = vmatpush.msra.mxu2 %v3530_v0  ;;  %v3481_v56 = vsel %vm3480_vm10, %v11565_v16, %v3477_v51  ;;  %v3429_v41 = vmul.f32 %v11542_v5, %v11498_v44  ;;  %v4152_v39 = vld [vmem:[#allocation5 + $0x70] sm:$0xff] }
 0x665   : > { %v11645_v52 = vadd.f32 %v4218_v23, %v4151_v9  ;;  %7905 = vrcp.f32 %v11609_v30  ;;  %v3486_v43 = vsel %vm3483_vm13, %v3485_v40, %v3481_v56  ;;  %v3344_v29 = vmul.f32 0.5, %v3336_v15  ;;  %v4153_v56 = vld [vmem:[#allocation5 + $0x78] sm:$0xff] }
 0x666   : > { %v3533_v12 = vsel %vm3525_vm11, %v3381_v58, %v3517_v34  ;;  %v3487_v58 = vmul.f32 %v3486_v43, %v11487_v25  ;;  %v3430_v16 = vsub.f32 1.0, %v3429_v41  ;;  %v3437_v35 = vand.u32 2147483647, %v11498_v44 }
 0x667   : > { %3599 = vmatpush.msra.mxu3 %v3533_v12  ;;  %v3439_v38 = vand.u32 2147483648, %v11498_v44  ;;  %7907 = vrcp.f32 %v11635_v27  ;;  %vm3523_vm15 = vcmp.ge.f32.partialorder %v11487_v25, 0.0  ;;  %v3352_v48 = vfloor.f32 %v3344_v29  ;;  %v4192_v0 = vpop.f32.mrf.mxu0 }
 0x668   : > { %v3337_v54 = vadd.f32 1.0, %v11481_v47  ;;  %v4277_v10 = vand.u32 2147483647, %v11645_v52  ;;  %v3531_v63 = vsel %vm3523_vm15, %v3379_v18, %v3487_v58  ;;  %v3431_v6 = vmul.f32 %v11542_v5, %v3430_v16 }
 0x669   : > { %vm3434_vm6 = vweird.f32 %v11542_v5  ;;  %3600 = vmatpush.msra.mxu3 %v3531_v63  ;;  %v3360_v61 = vmul.f32 2.0, %v3352_v48  ;;  %vm3433_vm5 = vweird.f32 %v11498_v44  ;;  %v3444_v25 = vmul.f32 %v11555_v37, %v11504_v55  ;;  %v11664_v57 = vpop.eup %7903 }
 0x66a   : > { %v3345_v24 = vmul.f32 0.5, %v3337_v54  ;;  %v3432_v9 = vadd.f32 %v11542_v5, %v3431_v6  ;;  %vm11667_vm3 = vcmp.eq.f32.partialorder %v3437_v35, 8.507059e+37  ;;  %v3440_v34 = vor.u32 1.1754944e-38, %v3439_v38  ;;  %vm3435_vm4 = vmor %vm3433_vm5, %vm3434_vm6 }
 0x66b   : > { %vm3520_vm7 = vcmp.ge.f32.partialorder %v11477_v22, 0.0  ;;  %v11672_v50 = vpop.eup %7905  ;;  %v3368_v44 = vsub.f32 %v11477_v22, %v3360_v61  ;;  %v3445_v19 = vsub.f32 1.0, %v3444_v25  ;;  %v3452_v12 = vand.u32 2147483647, %v11504_v55 }
 0x66c   : > { %v3353_v51 = vfloor.f32 %v3345_v24  ;;  %v4221_v40 = vpop.f32.mrf.mxu1  ;;  %v3436_v15 = vsel %vm3435_vm4, %v11542_v5, %v3432_v9  ;;  %vm3448_vm2 = vweird.f32 %v11504_v55  ;;  %v3454_v41 = vand.u32 2147483648, %v11504_v55 }
 0x66d   : > { %v11681_v18 = vadd.f32 %v4192_v0, %v4152_v39  ;;  %v11683_v43 = vpop.eup %7907  ;;  %v3441_v29 = vsel %vm11667_vm3, %v3440_v34, %v3436_v15  ;;  %v3446_v16 = vmul.f32 %v11555_v37, %v3445_v19  ;;  %vm3449_vm8 = vweird.f32 %v11555_v37 }
 0x66e   : > { %v3361_v58 = vmul.f32 2.0, %v3353_v51  ;;  %v3376_v35 = vand.u32 2147483647, %v3368_v44  ;;  %v3442_v38 = vmul.f32 %v3441_v29, %v11477_v22  ;;  %v11691_v48 = vadd.f32 %v4221_v40, %v4153_v56  ;;  %vm3450_vm1 = vmor %vm3448_vm2, %vm3449_vm8 }
 0x66f   : > { %v4278_v5 = vand.u32 2147483647, %v11681_v18  ;;  %v3447_v63 = vadd.f32 %v11555_v37, %v3446_v16  ;;  %vm3453_vm12 = vcmp.eq.f32.partialorder %v3452_v12, 8.507059e+37  ;;  %v3399_v6 = vmul.f32 %v11531_v1, %v11490_v8 }
 0x670   : > { %v3369_v54 = vsub.f32 %v11481_v47, %v3361_v58  ;;  %v3528_v61 = vsel %vm3520_vm7, %v3376_v35, %v3442_v38  ;;  %v3455_v24 = vor.u32 1.1754944e-38, %v3454_v41  ;;  %v4279_v39 = vand.u32 2147483647, %v11691_v48 }
 0x671   : > { %v11701_v25 = vadd.f32 1.0, %v4278_v5  ;;  %3572 = vmatpush.msra.mxu2 %v3528_v61  ;;  %v3451_v9 = vsel %vm3450_vm1, %v11555_v37, %v3447_v63  ;;  %v15160_v23 = vfloor.f32 %v11507_v21  ;;  %v3400_v44 = vsub.f32 1.0, %v3399_v6 }
 0x672   : > { %v3377_v0 = vand.u32 2147483647, %v3369_v54  ;;  %v3456_v51 = vsel %vm3453_vm12, %v3455_v24, %v3451_v9  ;;  %v11708_v22 = vadd.f32 1.0, %v4279_v39  ;;  %vm3404_vm9 = vweird.f32 %v11531_v1  ;;  %v3534_v39 = vld [vmem:[#allocation2 + $0x80] sm:$0xff] }
 0x673   : > { %v3358_v34 = vmul.f32 2.0, %v15160_v23  ;;  %7909 = vrcp.f32 %v11701_v25  ;;  %v3457_v55 = vmul.f32 %v3456_v51, %v11481_v47  ;;  %v3401_v19 = vmul.f32 %v11531_v1, %v3400_v44 }
 0x674   : > { %v3407_v12 = vand.u32 2147483647, %v11490_v8  ;;  %v3409_v56 = vand.u32 2147483648, %v11490_v8  ;;  %v11715_v37 = vadd.f32 1.0, %v4277_v10  ;;  %vm3521_vm11 = vcmp.ge.f32.partialorder %v11481_v47, 0.0 }
 0x675   : > { %v3335_v21 = vadd.f32 1.0, %v11473_v26  ;;  %v3414_v40 = vmul.f32 %v11535_v49, %v11494_v59  ;;  %v3529_v15 = vsel %vm3521_vm11, %v3377_v0, %v3457_v55  ;;  %v3366_v41 = vsub.f32 %v11471_v45, %v3358_v34 }
 0x676   : > { %v3402_v29 = vadd.f32 %v11531_v1, %v3401_v19  ;;  %vm3403_vm10 = vweird.f32 %v11490_v8  ;;  %3601 = vmatpush.msra.mxu3 %v3529_v15  ;;  %7911 = vrcp.f32 %v11708_v22  ;;  %v3410_v10 = vor.u32 1.1754944e-38, %v3409_v56 }
 0x677   : > { %vm3405_vm13 = vmor %vm3403_vm10, %vm3404_vm9  ;;  %v3343_v47 = vmul.f32 0.5, %v3335_v21  ;;  %v3415_v58 = vsub.f32 1.0, %v3414_v40  ;;  %vm3408_vm15 = vcmp.eq.f32.partialorder %v3407_v12, 8.507059e+37  ;;  %v3422_v35 = vand.u32 2147483647, %v11494_v59 }
 0x678   : > { %v3406_v16 = vsel %vm3405_vm13, %v11531_v1, %v3402_v29  ;;  %v3424_v38 = vand.u32 2147483648, %v11494_v59  ;;  %vm3419_vm6 = vweird.f32 %v11535_v49  ;;  %v3374_v6 = vand.u32 2147483647, %v3366_v41 }
 0x679   : > { %v7910_v5 = vpop.eup %7909  ;;  %v3411_v54 = vsel %vm3408_vm15, %v3410_v10, %v3406_v16  ;;  %v3351_v63 = vfloor.f32 %v3343_v47  ;;  %v3416_v8 = vmul.f32 %v11535_v49, %v3415_v58  ;;  %vm3518_vm5 = vcmp.ge.f32.partialorder %v11471_v45, 0.0 }
 0x67a   : > { %v3412_v61 = vmul.f32 %v3411_v54, %v11471_v45  ;;  %vm3418_vm3 = vweird.f32 %v11494_v59  ;;  %v4230_v0 = vadd.f32 1.0, %v11681_v18  ;;  %v4379_v9 = vmul.f32 %v7910_v5, %v11701_v25 }
 0x67b   : > { %v3359_v1 = vmul.f32 2.0, %v3351_v63  ;;  %v3417_v24 = vadd.f32 %v11535_v49, %v3416_v8  ;;  %vm3420_vm7 = vmor %vm3418_vm3, %vm3419_vm6  ;;  %vm3423_vm4 = vcmp.eq.f32.partialorder %v3422_v35, 8.507059e+37  ;;  %v3425_v34 = vor.u32 1.1754944e-38, %v3424_v38 }
 0x67c   : > { %v3526_v23 = vsel %vm3518_vm5, %v3374_v6, %v3412_v61  ;;  %v4387_v44 = vand.u32 2147483647, %v11701_v25  ;;  %v7912_v51 = vpop.eup %7911  ;;  %v4238_v55 = vmul.f32 0.5, %v4230_v0  ;;  %v4380_v19 = vsub.f32 1.0, %v4379_v9 }
 0x67d   : > { %3573 = vmatpush.msra.mxu2 %v3526_v23  ;;  %v3367_v45 = vsub.f32 %v11473_v26, %v3359_v1  ;;  %v3421_v59 = vsel %vm3420_vm7, %v11535_v49, %v3417_v24  ;;  %7913 = vrcp.f32 %v11715_v37  ;;  %vm15161_vm2 = vcmask 261120  }
 0x67e   : > { %v3426_v12 = vsel %vm3423_vm4, %v3425_v34, %v3421_v59  ;;  %7540 = vmatmul.msk.f32.vlgmr.msra.gmra.mxu2 %vm15161_vm2, %v3534_v39  ;;  %vm4384_vm8 = vweird.f32 %v7910_v5  ;;  %v4389_v56 = vand.u32 2147483648, %v11701_v25  ;;  %v4246_v15 = vfloor.f32 %v4238_v55  ;;  %vm15162_vm10 = vmmov %vm15161_vm2 }
 0x67f   : > { %v3375_v21 = vand.u32 2147483647, %v3367_v45  ;;  %v3427_v40 = vmul.f32 %v3426_v12, %v11473_v26  ;;  %v4381_v41 = vmul.f32 %v7910_v5, %v4380_v19  ;;  %vm3519_vm12 = vcmp.ge.f32.partialorder %v11473_v26, 0.0  ;;  %v3535_v26 = vld [vmem:[#allocation2 + $0x88] sm:$0xff]  ;;  %vm15163_vm6 = vmmov %vm15161_vm2 }
 0x680   : > { %vm4383_vm1 = vweird.f32 %v11701_v25  ;;  %v4231_v49 = vadd.f32 1.0, %v11691_v48  ;;  %v4394_v29 = vmul.f32 %v7912_v51, %v11708_v22  ;;  %v4254_v47 = vmul.f32 2.0, %v4246_v15 }
 0x681   : > { %v3527_v10 = vsel %vm3519_vm12, %v3375_v21, %v3427_v40  ;;  %v4382_v58 = vadd.f32 %v7910_v5, %v4381_v41  ;;  %vm4388_vm9 = vcmp.eq.f32.partialorder %v4387_v44, 8.507059e+37  ;;  %vm4385_vm11 = vmor %vm4383_vm1, %vm4384_vm8  ;;  %v4390_v16 = vor.u32 1.1754944e-38, %v4389_v56 }
 0x682   : > { %3602 = vmatpush.msra.mxu3 %v3527_v10  ;;  %v4239_v35 = vmul.f32 0.5, %v4231_v49  ;;  %v4395_v38 = vsub.f32 1.0, %v4394_v29  ;;  %v4402_v54 = vand.u32 2147483647, %v11708_v22  ;;  %v4262_v25 = vsub.f32 %v11681_v18, %v4254_v47 }
 0x683   : > { %7544 = vmatmul.msk.f32.vlgmr.msra.gmra.mxu3 %vm15162_vm10, %v3534_v39  ;;  %v4386_v63 = vsel %vm4385_vm11, %v7910_v5, %v4382_v58  ;;  %v4404_v8 = vand.u32 2147483648, %v11708_v22  ;;  %v4228_v6 = vadd.f32 1.0, %v11611_v17  ;;  %v11755_v61 = vpop.eup %7913  ;;  %vm4399_vm13 = vweird.f32 %v7912_v51  ;;  %vm15164_vm11 = vmmov %vm15161_vm2 }
 0x684   : > { %v4391_v1 = vsel %vm4388_vm9, %v4390_v16, %v4386_v63  ;;  %v4247_v24 = vfloor.f32 %v4239_v35  ;;  %v4396_v0 = vmul.f32 %v7912_v51, %v4395_v38  ;;  %v4270_v9 = vand.u32 2147483647, %v4262_v25 }
 0x685   : > { %v4392_v23 = vmul.f32 %v4391_v1, %v11681_v18  ;;  %vm4414_vm15 = vcmp.ge.f32.partialorder %v11681_v18, 0.0  ;;  %v4236_v39 = vmul.f32 0.5, %v4228_v6  ;;  %vm4398_vm5 = vweird.f32 %v11708_v22 }
 0x686   : > { %7541 = vmatmul.msk.f32.gmra.mxu2 %vm15163_vm6, %v3535_v26  ;;  %v4255_v34 = vmul.f32 2.0, %v4247_v24  ;;  %v4397_v5 = vadd.f32 %v7912_v51, %v4396_v0  ;;  %v4349_v44 = vmul.f32 %v11683_v43, %v11635_v27  ;;  %vm4400_vm3 = vmor %vm4398_vm5, %vm4399_vm13  ;;  %vm4403_vm7 = vcmp.eq.f32.partialorder %v4402_v54, 8.507059e+37 }
 0x687   : > { %v11763_v45 = vsel %vm4414_vm15, %v4270_v9, %v4392_v23  ;;  %v4405_v59 = vor.u32 1.1754944e-38, %v4404_v8  ;;  %v4244_v55 = vfloor.f32 %v4236_v39  ;;  %v4357_v56 = vand.u32 2147483647, %v11635_v27 }
 0x688   : > { %4468 = vmatpush.msrb.mxu2 %v11763_v45  ;;  %v4263_v18 = vsub.f32 %v11691_v48, %v4255_v34  ;;  %v4401_v19 = vsel %vm4400_vm3, %v7912_v51, %v4397_v5  ;;  %v4350_v12 = vsub.f32 1.0, %v4349_v44  ;;  %v4359_v22 = vand.u32 2147483648, %v11635_v27  ;;  %v3536_v51 = vld [vmem:[#allocation2 + $0x90] sm:$0xff]  ;;  %vm15165_vm3 = vmmov %vm15161_vm2 }
 0x689   : > { %v4406_v21 = vsel %vm4403_vm7, %v4405_v59, %v4401_v19  ;;  %v4252_v40 = vmul.f32 2.0, %v4244_v55  ;;  %v11770_v15 = vmul.f32 0.5, %v11632_v28  ;;  %vm4354_vm4 = vweird.f32 %v11683_v43  ;;  %v3537_v59 = vld [vmem:[#allocation2 + $0x98] sm:$0xff] }
 0x68a   : > { %v4271_v41 = vand.u32 2147483647, %v4263_v18  ;;  %v4407_v49 = vmul.f32 %v4406_v21, %v11691_v48  ;;  %v4351_v29 = vmul.f32 %v11683_v43, %v4350_v12  ;;  %vm4415_vm8 = vcmp.ge.f32.partialorder %v11691_v48, 0.0 }
 0x68b   : > { %7545 = vmatmul.msk.f32.gmra.mxu3 %vm15161_vm2, %v3535_v26  ;;  %vm4353_vm12 = vweird.f32 %v11635_v27  ;;  %v4229_v10 = vadd.f32 1.0, %v11645_v52  ;;  %v4364_v28 = vmul.f32 %v11755_v61, %v11715_v37  ;;  %v4260_v58 = vsub.f32 %v11611_v17, %v4252_v40 }
 0x68c   : > { %v11781_v47 = vsel %vm4415_vm8, %v4271_v41, %v4407_v49  ;;  %v4352_v16 = vadd.f32 %v11683_v43, %v4351_v29  ;;  %vm4358_vm1 = vcmp.eq.f32.partialorder %v4357_v56, 8.507059e+37  ;;  %vm4355_vm9 = vmor %vm4353_vm12, %vm4354_vm4  ;;  %v4360_v35 = vor.u32 1.1754944e-38, %v4359_v22 }
 0x68d   : > { %4497 = vmatpush.msrb.mxu3 %v11781_v47  ;;  %v4237_v38 = vmul.f32 0.5, %v4229_v10  ;;  %v4365_v48 = vsub.f32 1.0, %v4364_v28  ;;  %v4372_v27 = vand.u32 2147483647, %v11715_v37  ;;  %vm4412_vm10 = vcmp.ge.f32.partialorder %v11611_v17, 0.0  ;;  %vm15166_vm4 = vmmov %vm15161_vm2 }
 0x68e   : > { %7542 = vmatmul.msk.f32.gmra.mxu2 %vm15164_vm11, %v3536_v51  ;;  %v4356_v54 = vsel %vm4355_vm9, %v11683_v43, %v4352_v16  ;;  %v4374_v26 = vand.u32 2147483648, %v11715_v37  ;;  %v4226_v25 = vadd.f32 1.0, %v11571_v3  ;;  %vm4369_vm13 = vweird.f32 %v11755_v61 }
 0x68f   : > { %v4361_v63 = vsel %vm4358_vm1, %v4360_v35, %v4356_v54  ;;  %v4245_v8 = vfloor.f32 %v4237_v38  ;;  %v4366_v6 = vmul.f32 %v11755_v61, %v4365_v48  ;;  %v4268_v1 = vand.u32 2147483647, %v4260_v58 }
 0x690   : > { %v4362_v24 = vmul.f32 %v4361_v63, %v11611_v17  ;;  %v4234_v0 = vmul.f32 0.5, %v4226_v25  ;;  %v4319_v9 = vmul.f32 %v11664_v57, %v11607_v20  ;;  %vm4368_vm15 = vweird.f32 %v11715_v37 }
 0x691   : > { %v4253_v43 = vmul.f32 2.0, %v4245_v8  ;;  %v4367_v23 = vadd.f32 %v11755_v61, %v4366_v6  ;;  %vm4373_vm6 = vcmp.eq.f32.partialorder %v4372_v27, 8.507059e+37  ;;  %vm4370_vm5 = vmor %vm4368_vm15, %vm4369_vm13  ;;  %v4375_v34 = vor.u32 1.1754944e-38, %v4374_v26 }
 0x692   : > { %v11799_v39 = vsel %vm4412_vm10, %v4268_v1, %v4362_v24  ;;  %v4242_v5 = vfloor.f32 %v4234_v0  ;;  %v4320_v44 = vsub.f32 1.0, %v4319_v9  ;;  %vm4324_vm7 = vweird.f32 %v11664_v57  ;;  %vm15167_vm10 = vmmov %vm15165_vm3 }
 0x693   : > { %7546 = vmatmul.msk.f32.gmra.mxu3 %vm15165_vm3, %v3536_v51  ;;  %4469 = vmatpush.msrb.mxu2 %v11799_v39  ;;  %v4261_v17 = vsub.f32 %v11645_v52, %v4253_v43  ;;  %v4371_v55 = vsel %vm4370_vm5, %v11755_v61, %v4367_v23  ;;  %v4329_v37 = vand.u32 2147483648, %v11607_v20  ;;  %v4327_v56 = vand.u32 2147483647, %v11607_v20  ;;  %v15168_v23 = vld [vmem:[#allocation22_spill] sm:$0xff] }
 0x694   : > { %v4376_v18 = vsel %vm4373_vm6, %v4375_v34, %v4371_v55  ;;  %v4250_v19 = vmul.f32 2.0, %v4242_v5  ;;  %v4321_v12 = vmul.f32 %v11664_v57, %v4320_v44  ;;  %v4227_v22 = vadd.f32 1.0, %v11592_v53  ;;  %v15169_v34 = vld [vmem:[#allocation32_spill] sm:$0xff] }
 0x695   : > { %v4269_v21 = vand.u32 2147483647, %v4261_v17  ;;  %v4377_v40 = vmul.f32 %v4376_v18, %v11645_v52  ;;  %v4334_v41 = vmul.f32 %v11672_v50, %v11609_v30  ;;  %vm4413_vm2 = vcmp.ge.f32.partialorder %v11645_v52, 0.0  ;;  %v15171_v17 = vld [vmem:[#allocation24_spill] sm:$0xff] }
 0x696   : > { %7543 = vmatmul.msk.f32.gmra.mxu2 %vm15166_vm4, %v3537_v59  ;;  %v4258_v61 = vsub.f32 %v11571_v3, %v4250_v19  ;;  %v4322_v49 = vadd.f32 %v11664_v57, %v4321_v12  ;;  %vm4323_vm8 = vweird.f32 %v11607_v20  ;;  %v4330_v51 = vor.u32 1.1754944e-38, %v4329_v37 }
 0x697   : > { %v11818_v29 = vsel %vm4413_vm2, %v4269_v21, %v4377_v40  ;;  %vm4325_vm12 = vmor %vm4323_vm8, %vm4324_vm7  ;;  %v4235_v10 = vmul.f32 0.5, %v4227_v22  ;;  %v4335_v28 = vsub.f32 1.0, %v4334_v41  ;;  %vm4328_vm1 = vcmp.eq.f32.partialorder %v4327_v56, 8.507059e+37 }
 0x698   : > { %4498 = vmatpush.msrb.mxu3 %v11818_v29  ;;  %v4326_v58 = vsel %vm4325_vm12, %v11664_v57, %v4322_v49  ;;  %vm4339_vm9 = vweird.f32 %v11672_v50  ;;  %v4344_v52 = vand.u32 2147483648, %v11609_v30  ;;  %v4342_v38 = vand.u32 2147483647, %v11609_v30 }
 0x699   : > { %v4331_v16 = vsel %vm4328_vm1, %v4330_v51, %v4326_v58  ;;  %v4243_v35 = vfloor.f32 %v4235_v10  ;;  %v4336_v20 = vmul.f32 %v11672_v50, %v4335_v28  ;;  %v4266_v48 = vand.u32 2147483647, %v4258_v61  ;;  %v15173_v58 = vld [vmem:[#allocation23_spill] sm:$0xff] }
 0x69a   : > { %v4332_v27 = vmul.f32 %v4331_v16, %v11571_v3  ;;  %vm4410_vm11 = vcmp.ge.f32.partialorder %v11571_v3, 0.0  ;;  %vm4338_vm13 = vweird.f32 %v11609_v30  ;;  %v4240_v26 = vfloor.f32 %v11770_v15 }
 0x69b   : > { %7547 = vmatmul.msk.f32.gmra.mxu3 %vm15167_vm10, %v3537_v59  ;;  %v4251_v54 = vmul.f32 2.0, %v4243_v35  ;;  %v4337_v57 = vadd.f32 %v11672_v50, %v4336_v20  ;;  %v4225_v25 = vadd.f32 1.0, %v11548_v11  ;;  %vm4340_vm15 = vmor %vm4338_vm13, %vm4339_vm9  ;;  %v4345_v8 = vor.u32 1.1754944e-38, %v4344_v52  ;;  %v15175_v52 = vld [vmem:[#allocation25_spill] sm:$0xff] }
 0x69c   : > { %v11835_v63 = vsel %vm4410_vm11, %v4266_v48, %v4332_v27  ;;  %v4289_v3 = vmul.f32 %v11600_v31, %v11546_v4  ;;  %vm4343_vm6 = vcmp.eq.f32.partialorder %v4342_v38, 8.507059e+37  ;;  %v4248_v30 = vmul.f32 2.0, %v4240_v26 }
 0x69d   : > { %4470 = vmatpush.msrb.mxu2 %v11835_v63  ;;  %v4259_v6 = vsub.f32 %v11592_v53, %v4251_v54  ;;  %v4341_v1 = vsel %vm4340_vm15, %v11672_v50, %v4337_v57  ;;  %vm4411_vm5 = vcmp.ge.f32.partialorder %v11592_v53, 0.0  ;;  %v4299_v43 = vand.u32 2147483648, %v11546_v4 }
 0x69e   : > { %v4346_v15 = vsel %vm4343_vm6, %v4345_v8, %v4341_v1  ;;  %v4290_v24 = vsub.f32 1.0, %v4289_v3  ;;  %vm15170_vm3 = vcmp.eq.s32.totalorder %v15169_v34, 0  ;;  %vm4294_vm7 = vweird.f32 %v11600_v31  ;;  %v4435_v1 = vld [vmem:[#allocation2 + $0x38] sm:$0xff] }
 0x69f   : > { %v4267_v0 = vand.u32 2147483647, %v4259_v6  ;;  %v4347_v9 = vmul.f32 %v4346_v15, %v11592_v53  ;;  %v3888_v5 = vsel %vm15170_vm3, %v15168_v23, 0.0  ;;  %v4297_v50 = vand.u32 2147483647, %v11546_v4  ;;  %vm15174_vm11 = vmmov %vm15170_vm3  ;;  %v4433_v6 = vld [vmem:[#allocation2 + $0x28] sm:$0xff] }
 0x6a0   : > { %v4291_v44 = vmul.f32 %v11600_v31, %v4290_v24  ;;  %vm15172_vm4 = vcmp.eq.s32.totalorder %v15169_v34, 1  ;;  %v4256_v53 = vsub.f32 %v11528_v7, %v4248_v30  ;;  %v4233_v37 = vmul.f32 0.5, %v4225_v25 }
 0x6a1   : > { %v11853_v59 = vsel %vm4411_vm5, %v4267_v0, %v4347_v9  ;;  %v3926_v55 = vsel %vm15172_vm4, %v15171_v17, 0.0  ;;  %vm4293_vm2 = vweird.f32 %v11546_v4  ;;  %v4304_v19 = vmul.f32 %v11656_v46, %v11582_v13  ;;  %vm15176_vm10 = vmmov %vm15172_vm4  ;;  %v3539_v0 = vld [vmem:[#allocation5 + $0x148] sm:$0xff] }
 0x6a2   : > { %4499 = vmatpush.msrb.mxu3 %v11853_v59  ;;  %v4292_v18 = vadd.f32 %v11600_v31, %v4291_v44  ;;  %vm4295_vm8 = vmor %vm4293_vm2, %vm4294_vm7  ;;  %v4300_v12 = vor.u32 1.1754944e-38, %v4299_v43  ;;  %v4241_v56 = vfloor.f32 %v4233_v37  ;;  %v3934_v21 = vadd.f32 %v3926_v55, %v3888_v5  ;;  %v3540_v44 = vld [vmem:[#allocation5 + $0x150] sm:$0xff] }
 0x6a3   : > { %vm4298_vm12 = vcmp.eq.f32.partialorder %v4297_v50, 8.507059e+37  ;;  %v4305_v22 = vsub.f32 1.0, %v4304_v19  ;;  %v4264_v41 = vand.u32 2147483647, %v4256_v53  ;;  %v4314_v51 = vand.u32 2147483648, %v11582_v13 }
 0x6a4   : > { %v4296_v40 = vsel %vm4295_vm8, %v11600_v31, %v4292_v18  ;;  %v4249_v49 = vmul.f32 2.0, %v4241_v56  ;;  %vm4309_vm1 = vweird.f32 %v11656_v46  ;;  %v4312_v28 = vand.u32 2147483647, %v11582_v13 }
 0x6a5   : > { %v4301_v61 = vsel %vm4298_vm12, %v4300_v12, %v4296_v40  ;;  %v4306_v4 = vmul.f32 %v11656_v46, %v4305_v22  ;;  %vm4408_vm9 = vcmp.ge.f32.partialorder %v11528_v7, 0.0  ;;  %v3889_v31 = vsel %vm15174_vm11, %v15173_v58, 0.0 }
 0x6a6   : > { %v4302_v10 = vmul.f32 %v4301_v61, %v11528_v7  ;;  %v3927_v16 = vsel %vm15176_vm10, %v15175_v52, 0.0  ;;  %v4257_v20 = vsub.f32 %v11548_v11, %v4249_v49  ;;  %vm4308_vm13 = vweird.f32 %v11582_v13  ;;  %v4432_v7 = vld [vmem:[#allocation2 + $0x20] sm:$0xff] }
 0x6a7   : > { %v4307_v38 = vadd.f32 %v11656_v46, %v4306_v4  ;;  %vm4310_vm15 = vmor %vm4308_vm13, %vm4309_vm1  ;;  %v4315_v27 = vor.u32 1.1754944e-38, %v4314_v51  ;;  %vm4313_vm6 = vcmp.eq.f32.partialorder %v4312_v28, 8.507059e+37  ;;  %v3935_v57 = vadd.f32 %v3927_v16, %v3889_v31  ;;  %v3541_v51 = vld [vmem:[#allocation5 + $0x158] sm:$0xff]  ;;  %v3542_v52 = vld [vmem:[#allocation5 + $0x160] sm:$0xff] }
 0x6a8   : > { %v4416_v35 = vsel %vm4408_vm9, %v4264_v41, %v4302_v10  ;;  %v4265_v25 = vand.u32 2147483647, %v4257_v20  ;;  %vm15178_vm5 = vcmask 261120   ;;  %vm4409_vm3 = vcmp.ge.f32.partialorder %v11548_v11, 0.0 }
 0x6a9   : > { %v11880_v48 = vadd.f32 %v4416_v35, %v3934_v21  ;;  %v4311_v54 = vsel %vm4310_vm15, %v11656_v46, %v4307_v38  ;;  %vm15180_vm7 = vmmov %vm15178_vm5  ;;  %v4434_v46 = vld [vmem:[#allocation2 + $0x30] sm:$0xff] }
 0x6aa   : > { %v4316_v26 = vsel %vm4313_vm6, %v4315_v27, %v4311_v54  ;;  %vm15181_vm4 = vmmov %vm15178_vm5 }
 0x6ab   : > { %15177 = vst [vmem:[#allocation39_spill] sm:$0xff] %v11880_v48  ;;  %4471 = vmatpush.msrb.mxu2 %v11880_v48  ;;  %v4317_v8 = vmul.f32 %v4316_v26, %v11548_v11  ;;  %vm15182_vm2 = vmmov %vm15181_vm4  ;;  %v3538_v11 = vld [vmem:[#allocation5 + $0x140] sm:$0xff] }
 0x6ac   : > { %7556 = vmatmul.msk.f32.vlgmr.msrb.gmra.mxu2 %vm15178_vm5, %v4432_v7  ;;  %vm15183_vm8 = vmmov %vm15182_vm2 }
 0x6ad   : > { %v4417_v13 = vsel %vm4409_vm3, %v4265_v25, %v4317_v8  ;;  %vm15184_vm12 = vmmov %vm15182_vm2 }
 0x6ae   : > { %v11887_v3 = vadd.f32 %v4417_v13, %v3935_v57  ;;  %vm15185_vm1 = vmmov %vm15182_vm2 }
 0x6af   : > { %vm15186_vm9 = vmmov %vm15185_vm1 }
 0x6b0   : > { %15179 = vst [vmem:[#allocation50_spill] sm:$0xff] %v11887_v3  ;;  %4500 = vmatpush.msrb.mxu3 %v11887_v3 }
 0x6b1   : > { %7560 = vmatmul.msk.f32.vlgmr.msrb.gmra.mxu3 %vm15180_vm7, %v4432_v7 }
 0x6b4   : > { %7557 = vmatmul.msk.f32.gmra.mxu2 %vm15181_vm4, %v4433_v6 }
 0x6b9   : > { %7561 = vmatmul.msk.f32.gmra.mxu3 %vm15182_vm2, %v4433_v6 }
 0x6bc   : > { %7558 = vmatmul.msk.f32.gmra.mxu2 %vm15183_vm8, %v4434_v46 }
 0x6c1   : > { %7562 = vmatmul.msk.f32.gmra.mxu3 %vm15184_vm12, %v4434_v46 }
 0x6c4   : > { %7559 = vmatmul.msk.f32.gmra.mxu2 %vm15185_vm1, %v4435_v1 }
 0x6c9   : > { %7563 = vmatmul.msk.f32.gmra.mxu3 %vm15186_vm9, %v4435_v1 }
 0x701   : > { %v3575_v30 = vpop.f32.mrf.mxu2 }
 0x702   : > { %v11897_v15 = vadd.f32 %v3575_v30, %v3538_v11 }
 0x704   : > { %v3664_v24 = vand.u32 2147483647, %v11897_v15  ;;  %v3616_v9 = vadd.f32 1.0, %v11897_v15  ;;  %vm3800_vm5 = vcmp.ge.f32.partialorder %v11897_v15, 0.0 }
 0x706   : > { %v3672_v43 = vadd.f32 1.0, %v3664_v24  ;;  %v3604_v23 = vpop.f32.mrf.mxu3  ;;  %v3624_v50 = vmul.f32 0.5, %v3616_v9 }
 0x707   : > { %v11901_v5 = vadd.f32 %v3604_v23, %v3539_v0 }
 0x708   : > { %7915 = vrcp.f32 %v3672_v43  ;;  %v3632_v21 = vfloor.f32 %v3624_v50  ;;  %v3689_v22 = vand.u32 2147483647, %v3672_v43  ;;  %v3691_v49 = vand.u32 2147483648, %v3672_v43 }
 0x709   : > { %v3617_v17 = vadd.f32 1.0, %v11901_v5  ;;  %v3665_v55 = vand.u32 2147483647, %v11901_v5  ;;  %v3578_v53 = vpop.f32.mrf.mxu2  ;;  %vm3685_vm11 = vweird.f32 %v3672_v43  ;;  %vm3801_vm1 = vcmp.ge.f32.partialorder %v11901_v5, 0.0 }
 0x70a   : > { %v11905_v37 = vadd.f32 %v3578_v53, %v3540_v44  ;;  %v3640_v58 = vmul.f32 2.0, %v3632_v21  ;;  %vm11915_vm10 = vcmp.eq.f32.partialorder %v3689_v22, 8.507059e+37  ;;  %v3692_v7 = vor.u32 1.1754944e-38, %v3691_v49 }
 0x70b   : > { %v11907_v18 = vadd.f32 1.0, %v3665_v55  ;;  %v3625_v19 = vmul.f32 0.5, %v3617_v17 }
 0x70c   : > { %v3618_v12 = vadd.f32 1.0, %v11905_v37  ;;  %v3666_v56 = vand.u32 2147483647, %v11905_v37  ;;  %v3648_v13 = vsub.f32 %v11897_v15, %v3640_v58  ;;  %vm3802_vm7 = vcmp.ge.f32.partialorder %v11905_v37, 0.0 }
 0x70d   : > { %7917 = vrcp.f32 %v11907_v18  ;;  %v3633_v4 = vfloor.f32 %v3625_v19  ;;  %vm3700_vm15 = vweird.f32 %v11907_v18  ;;  %v3704_v30 = vand.u32 2147483647, %v11907_v18 }
 0x70e   : > { %v7916_v40 = vpop.eup %7915  ;;  %v11912_v41 = vadd.f32 1.0, %v3666_v56  ;;  %v3607_v10 = vpop.f32.mrf.mxu3  ;;  %v3626_v28 = vmul.f32 0.5, %v3618_v12  ;;  %v3706_v24 = vand.u32 2147483648, %v11907_v18 }
 0x70f   : > { %v3681_v61 = vmul.f32 %v7916_v40, %v3672_v43  ;;  %v11919_v20 = vadd.f32 %v3607_v10, %v3541_v51  ;;  %vm3686_vm13 = vweird.f32 %v7916_v40  ;;  %v3641_v57 = vmul.f32 2.0, %v3633_v4  ;;  %v15196_v4 = vld [vmem:[#allocation62_spill] sm:$0xff] }
 0x710   : > { %7919 = vrcp.f32 %v11912_v41  ;;  %v3634_v25 = vfloor.f32 %v3626_v28  ;;  %vm3687_vm6 = vmor %vm3685_vm11, %vm3686_vm13  ;;  %v3719_v21 = vand.u32 2147483647, %v11912_v41  ;;  %v3656_v10 = vand.u32 2147483647, %v3648_v13 }
 0x711   : > { %v3682_v31 = vsub.f32 1.0, %v3681_v61  ;;  %v3581_v16 = vpop.f32.mrf.mxu2  ;;  %v3619_v8 = vadd.f32 1.0, %v11919_v20  ;;  %v3667_v46 = vand.u32 2147483647, %v11919_v20  ;;  %v3649_v43 = vsub.f32 %v11901_v5, %v3641_v57 }
 0x712   : > { %v11923_v54 = vadd.f32 %v3581_v16, %v3542_v52  ;;  %v3642_v53 = vmul.f32 2.0, %v3634_v25  ;;  %vm11959_vm8 = vcmp.eq.f32.partialorder %v3704_v30, 8.507059e+37  ;;  %v3707_v58 = vor.u32 1.1754944e-38, %v3706_v24  ;;  %v3543_v25 = vld [vmem:[#allocation5 + $0x168] sm:$0xff] }
 0x713   : > { %v11921_v38 = vpop.eup %7917  ;;  %v3683_v27 = vmul.f32 %v7916_v40, %v3682_v31  ;;  %v3627_v0 = vmul.f32 0.5, %v3619_v8  ;;  %v11936_v44 = vadd.f32 1.0, %v3667_v46  ;;  %vm3715_vm12 = vweird.f32 %v11912_v41 }
 0x714   : > { %v3696_v26 = vmul.f32 %v11921_v38, %v11907_v18  ;;  %v3668_v50 = vand.u32 2147483647, %v11923_v54  ;;  %vm3701_vm3 = vweird.f32 %v11921_v38  ;;  %v3620_v12 = vadd.f32 1.0, %v11923_v54 }
 0x715   : > { %v3684_v6 = vadd.f32 %v7916_v40, %v3683_v27  ;;  %7921 = vrcp.f32 %v11936_v44  ;;  %v3635_v22 = vfloor.f32 %v3627_v0  ;;  %vm11955_vm2 = vmor %vm3700_vm15, %vm3701_vm3  ;;  %v3650_v52 = vsub.f32 %v11905_v37, %v3642_v53 }
 0x716   : > { %v7920_v1 = vpop.eup %7919  ;;  %v3697_v11 = vsub.f32 1.0, %v3696_v26  ;;  %v11951_v51 = vadd.f32 1.0, %v3668_v50  ;;  %v3628_v35 = vmul.f32 0.5, %v3620_v12  ;;  %v3657_v18 = vand.u32 2147483647, %v3649_v43  ;;  %v3610_v8 = vpop.f32.mrf.mxu3 }
 0x717   : > { %v3688_v9 = vsel %vm3687_vm6, %v7916_v40, %v3684_v6  ;;  %v3711_v23 = vmul.f32 %v7920_v1, %v11912_v41  ;;  %v3721_v40 = vand.u32 2147483648, %v11912_v41  ;;  %vm3716_vm4 = vweird.f32 %v7920_v1 }
 0x718   : > { %v3693_v17 = vsel %vm11915_vm10, %v3692_v7, %v3688_v9  ;;  %v3698_v55 = vmul.f32 %v11921_v38, %v3697_v11  ;;  %vm3717_vm9 = vmor %vm3715_vm12, %vm3716_vm4  ;;  %v3643_v7 = vmul.f32 2.0, %v3635_v22  ;;  %7923 = vrcp.f32 %v11951_v51 }
 0x719   : > { %v3712_v19 = vsub.f32 1.0, %v3711_v23  ;;  %v3694_v61 = vmul.f32 %v3693_v17, %v11897_v15  ;;  %v3722_v27 = vor.u32 1.1754944e-38, %v3721_v40  ;;  %vm3720_vm11 = vcmp.eq.f32.partialorder %v3719_v21, 8.507059e+37  ;;  %v3584_v0 = vpop.f32.mrf.mxu2 }
 0x71a   : > { %v3699_v56 = vadd.f32 %v11921_v38, %v3698_v55  ;;  %v3736_v11 = vand.u32 2147483648, %v11936_v44  ;;  %v3658_v30 = vand.u32 2147483647, %v3650_v52  ;;  %vm3730_vm10 = vweird.f32 %v11936_v44 }
 0x71b   : > { %v3713_v49 = vmul.f32 %v7920_v1, %v3712_v19  ;;  %v7922_v57 = vpop.eup %7921  ;;  %v3808_v41 = vsel %vm3800_vm5, %v3656_v10, %v3694_v61  ;;  %v3636_v15 = vfloor.f32 %v3628_v35  ;;  %v3651_v23 = vsub.f32 %v11919_v20, %v3643_v7 }
 0x71c   : > { %v3703_v31 = vsel %vm11955_vm2, %v11921_v38, %v3699_v56  ;;  %v3734_v38 = vand.u32 2147483647, %v11936_v44  ;;  %v3726_v46 = vmul.f32 %v7922_v57, %v11936_v44  ;;  %v3816_v9 = vadd.f32 %v3808_v41, %v11377_v62 }
 0x71d   : > { %v3714_v16 = vadd.f32 %v7920_v1, %v3713_v49  ;;  %v3708_v13 = vsel %vm11959_vm8, %v3707_v58, %v3703_v31  ;;  %v11981_v17 = vadd.f32 %v3610_v8, %v3543_v25  ;;  %vm3803_vm15 = vcmp.ge.f32.partialorder %v11919_v20, 0.0  ;;  %v15195_v49 = vld [vmem:[#allocation61_spill] sm:$0xff] }
 0x71e   : > { %v3727_v50 = vsub.f32 1.0, %v3726_v46  ;;  %v3709_v43 = vmul.f32 %v3708_v13, %v11901_v5  ;;  %vm11986_vm13 = vcmp.eq.f32.partialorder %v3734_v38, 8.507059e+37  ;;  %v7924_v12 = vpop.eup %7923  ;;  %vm3731_vm6 = vweird.f32 %v7922_v57 }
 0x71f   : > { %v3718_v26 = vsel %vm3717_vm9, %v7920_v1, %v3714_v16  ;;  %v3544_v1 = vld [vmem:[#allocation5 + $0x170] sm:$0xff]  ;;  %v3737_v21 = vor.u32 1.1754944e-38, %v3736_v11  ;;  %v3644_v40 = vmul.f32 2.0, %v3636_v15  ;;  %v3741_v22 = vmul.f32 %v7924_v12, %v11951_v51  ;;  %vm3732_vm5 = vmor %vm3730_vm10, %vm3731_vm6 }
 0x720   : > { %v3723_v6 = vsel %vm3720_vm11, %v3722_v27, %v3718_v26  ;;  %v11991_v19 = vadd.f32 %v3584_v0, %v3544_v1  ;;  %v3728_v56 = vmul.f32 %v7922_v57, %v3727_v50  ;;  %v3669_v61 = vand.u32 2147483647, %v11981_v17  ;;  %v3545_v1 = vld [vmem:[#allocation5 + $0x178] sm:$0xff] }
 0x721   : > { %v3724_v24 = vmul.f32 %v3723_v6, %v11905_v37  ;;  %v3621_v37 = vadd.f32 1.0, %v11981_v17  ;;  %v3824_v10 = vmul.f32 %v3816_v9, %v15195_v49  ;;  %v3749_v31 = vand.u32 2147483647, %v11951_v51 }
 0x722   : > { %v3729_v58 = vadd.f32 %v7922_v57, %v3728_v56  ;;  %v3742_v52 = vsub.f32 1.0, %v3741_v22  ;;  %v3677_v16 = vadd.f32 1.0, %v3669_v61  ;;  %v3670_v35 = vand.u32 2147483647, %v11991_v19 }
 0x723   : > { %v3810_v55 = vsel %vm3802_vm7, %v3658_v30, %v3724_v24  ;;  %vm3746_vm3 = vweird.f32 %v7924_v12  ;;  %v3751_v41 = vand.u32 2147483648, %v11951_v51  ;;  %v3629_v25 = vmul.f32 0.5, %v3621_v37 }
 0x724   : > { %v3818_v62 = vadd.f32 %v3810_v55, %v11292_v60  ;;  %v3809_v60 = vsel %vm3801_vm1, %v3657_v18, %v3709_v43  ;;  %v3733_v7 = vsel %vm3732_vm5, %v7922_v57, %v3729_v58  ;;  %v3743_v38 = vmul.f32 %v7924_v12, %v3742_v52 }
 0x725   : > { %v3738_v26 = vsel %vm11986_vm13, %v3737_v21, %v3733_v7  ;;  %7925 = vrcp.f32 %v3677_v16  ;;  %v3659_v5 = vand.u32 2147483647, %v3651_v23  ;;  %v3652_v44 = vsub.f32 %v11923_v54, %v3644_v40 }
 0x726   : > { %v3826_v28 = vmul.f32 %v3818_v62, %v15196_v4  ;;  %v3739_v18 = vmul.f32 %v3738_v26, %v11919_v20  ;;  %v3622_v8 = vadd.f32 1.0, %v11991_v19  ;;  %v3817_v13 = vadd.f32 %v3809_v60, %v11425_v32  ;;  %v3613_v32 = vpop.f32.mrf.mxu3 }
 0x727   : > { %v3744_v6 = vadd.f32 %v7924_v12, %v3743_v38  ;;  %vm3745_vm7 = vweird.f32 %v11951_v51  ;;  %v12013_v57 = vadd.f32 1.0, %v3670_v35  ;;  %vm3750_vm2 = vcmp.eq.f32.partialorder %v3749_v31, 8.507059e+37 }
 0x728   : > { %v3832_v27 = vadd.f32 %v3826_v28, %v3824_v10  ;;  %v3811_v46 = vsel %vm3803_vm15, %v3659_v5, %v3739_v18  ;;  %vm3747_vm4 = vmor %vm3745_vm7, %vm3746_vm3  ;;  %v3752_v11 = vor.u32 1.1754944e-38, %v3751_v41  ;;  %v3637_v15 = vfloor.f32 %v3629_v25  ;;  %v15197_v28 = vld [vmem:[#allocation58_spill] sm:$0xff] }
 0x729   : > { %v3819_v30 = vadd.f32 %v3811_v46, %v11339_v33  ;;  %v3748_v24 = vsel %vm3747_vm4, %v7924_v12, %v3744_v6  ;;  %7927 = vrcp.f32 %v12013_v57  ;;  %v3630_v9 = vmul.f32 0.5, %v3622_v8 }
 0x72a   : > { %v3753_v0 = vsel %vm3750_vm2, %v3752_v11, %v3748_v24  ;;  %v3825_v23 = vmul.f32 %v3817_v13, %v15195_v49  ;;  %v3660_v50 = vand.u32 2147483647, %v3652_v44  ;;  %vm3804_vm8 = vcmp.ge.f32.partialorder %v11923_v54, 0.0 }
 0x72b   : > { %v7926_v51 = vpop.eup %7925  ;;  %v3827_v20 = vmul.f32 %v3819_v30, %v15196_v4  ;;  %v3754_v43 = vmul.f32 %v3753_v0, %v11923_v54  ;;  %v12024_v33 = vadd.f32 %v3613_v32, %v3545_v1  ;;  %v3645_v62 = vmul.f32 2.0, %v3637_v15 }
 0x72c   : > { %v3756_v55 = vmul.f32 %v7926_v51, %v3677_v16  ;;  %v3764_v56 = vand.u32 2147483647, %v3677_v16  ;;  %v3638_v22 = vfloor.f32 %v3630_v9  ;;  %vm3761_vm12 = vweird.f32 %v7926_v51 }
 0x72d   : > { %v3841_v53 = vadd.f32 %v3827_v20, %v3825_v23  ;;  %v3812_v12 = vsel %vm3804_vm8, %v3660_v50, %v3754_v43  ;;  %v3671_v37 = vand.u32 2147483647, %v12024_v33  ;;  %v3766_v10 = vand.u32 2147483648, %v3677_v16  ;;  %v4436_v20 = vld [vmem:[#allocation5 + $0x80] sm:$0xff] }
 0x72e   : > { %v3820_v21 = vadd.f32 %v3812_v12, %v11239_v14  ;;  %v3757_v40 = vsub.f32 1.0, %v3756_v55  ;;  %v3623_v60 = vadd.f32 1.0, %v12024_v33  ;;  %v3653_v52 = vsub.f32 %v11981_v17, %v3645_v62 }
 0x72f   : > { %v7928_v61 = vpop.eup %7927  ;;  %vm3760_vm1 = vweird.f32 %v3677_v16  ;;  %vm12032_vm9 = vcmp.eq.f32.partialorder %v3764_v56, 8.507059e+37  ;;  %v12036_v14 = vadd.f32 1.0, %v3671_v37  ;;  %v3646_v26 = vmul.f32 2.0, %v3638_v22 }
 0x730   : > { %v3828_v58 = vmul.f32 %v3820_v21, %v15197_v28  ;;  %v3758_v31 = vmul.f32 %v7926_v51, %v3757_v40  ;;  %v3771_v54 = vmul.f32 %v7928_v61, %v12013_v57  ;;  %vm3762_vm11 = vmor %vm3760_vm1, %vm3761_vm12  ;;  %v3767_v25 = vor.u32 1.1754944e-38, %v3766_v10 }
 0x731   : > { %v3779_v5 = vand.u32 2147483647, %v12013_v57  ;;  %v3781_v18 = vand.u32 2147483648, %v12013_v57  ;;  %7929 = vrcp.f32 %v12036_v14  ;;  %vm3776_vm10 = vweird.f32 %v7928_v61 }
 0x732   : > { %v3833_v7 = vadd.f32 %v3832_v27, %v3828_v58  ;;  %v3759_v41 = vadd.f32 %v7926_v51, %v3758_v31  ;;  %v3772_v38 = vsub.f32 1.0, %v3771_v54  ;;  %v3631_v8 = vmul.f32 0.5, %v3623_v60  ;;  %v4473_v27 = vpop.f32.mrf.mxu2  ;;  %v4437_v31 = vld [vmem:[#allocation5 + $0x88] sm:$0xff] }
 0x733   : > { %v3661_v13 = vand.u32 2147483647, %v3653_v52  ;;  %v3654_v30 = vsub.f32 %v11991_v19, %v3646_v26  ;;  %vm3775_vm13 = vweird.f32 %v12013_v57  ;;  %vm3805_vm15 = vcmp.ge.f32.partialorder %v11981_v17, 0.0 }
 0x734   : > { %v3763_v44 = vsel %vm3762_vm11, %v7926_v51, %v3759_v41  ;;  %v3773_v16 = vmul.f32 %v7928_v61, %v3772_v38  ;;  %v4502_v46 = vpop.f32.mrf.mxu3  ;;  %vm3777_vm6 = vmor %vm3775_vm13, %vm3776_vm10  ;;  %v3782_v15 = vor.u32 1.1754944e-38, %v3781_v18  ;;  %vm3780_vm5 = vcmp.eq.f32.partialorder %v3779_v5, 8.507059e+37  ;;  %v4439_v18 = vld [vmem:[#allocation5 + $0x98] sm:$0xff] }
 0x735   : > { %v3768_v6 = vsel %vm12032_vm9, %v3767_v25, %v3763_v44  ;;  %v3639_v0 = vfloor.f32 %v3631_v8  ;;  %v3662_v50 = vand.u32 2147483647, %v3654_v30  ;;  %vm3806_vm3 = vcmp.ge.f32.partialorder %v11991_v19, 0.0  ;;  %v4441_v8 = vld [vmem:[#allocation5 + $0xa8] sm:$0xff] }
 0x736   : > { %v3769_v11 = vmul.f32 %v3768_v6, %v11981_v17  ;;  %v3774_v24 = vadd.f32 %v7928_v61, %v3773_v16  ;;  %v4438_v17 = vld [vmem:[#allocation5 + $0x90] sm:$0xff]  ;;  %v12052_v21 = vadd.f32 %v4473_v27, %v4436_v20  ;;  %v3796_v22 = vand.u32 2147483648, %v12036_v14  ;;  %v4440_v16 = vld [vmem:[#allocation5 + $0xa0] sm:$0xff] }
 0x737   : > { %v7930_v9 = vpop.eup %7929  ;;  %v3647_v62 = vmul.f32 2.0, %v3639_v0  ;;  %v3794_v58 = vand.u32 2147483647, %v12036_v14  ;;  %vm3790_vm4 = vweird.f32 %v12036_v14  ;;  %v12065_v26 = vadd.f32 %v4502_v46, %v4437_v31 }
 0x738   : > { %v3813_v1 = vsel %vm3805_vm15, %v3661_v13, %v3769_v11  ;;  %v3778_v32 = vsel %vm3777_vm6, %v7928_v61, %v3774_v24  ;;  %v3786_v55 = vmul.f32 %v7930_v9, %v12036_v14  ;;  %vm3791_vm7 = vweird.f32 %v7930_v9 }
 0x739   : > { %v3821_v51 = vadd.f32 %v3813_v1, %v11284_v36  ;;  %v3783_v23 = vsel %vm3780_vm5, %v3782_v15, %v3778_v32  ;;  %v3655_v52 = vsub.f32 %v12024_v33, %v3647_v62  ;;  %vm3792_vm2 = vmor %vm3790_vm4, %vm3791_vm7  ;;  %v3797_v41 = vor.u32 1.1754944e-38, %v3796_v22  ;;  %v4442_v62 = vld [vmem:[#allocation5 + $0xb0] sm:$0xff] }
 0x73a   : > { %v3784_v43 = vmul.f32 %v3783_v23, %v11991_v19  ;;  %v3787_v56 = vsub.f32 1.0, %v3786_v55  ;;  %v4476_v37 = vpop.f32.mrf.mxu2  ;;  %v15200_v19 = vld [vmem:[#allocation56_spill] sm:$0xff]  ;;  %v4514_v38 = vadd.f32 1.0, %v12052_v21  ;;  %vm3795_vm8 = vcmp.eq.f32.partialorder %v3794_v58, 8.507059e+37 }
 0x73b   : > { %v3829_v57 = vmul.f32 %v3821_v51, %v15197_v28  ;;  %v12057_v54 = vadd.f32 %v4476_v37, %v4438_v17  ;;  %v3663_v13 = vand.u32 2147483647, %v3655_v52  ;;  %vm3807_vm12 = vcmp.ge.f32.partialorder %v12024_v33, 0.0 }
 0x73c   : > { %v3814_v12 = vsel %vm3806_vm3, %v3662_v50, %v3784_v43  ;;  %v4505_v61 = vpop.f32.mrf.mxu3  ;;  %v3788_v10 = vmul.f32 %v7930_v9, %v3787_v56  ;;  %v4522_v30 = vmul.f32 0.5, %v4514_v38  ;;  %v4443_v56 = vld [vmem:[#allocation5 + $0xb8] sm:$0xff] }
 0x73d   : > { %v3842_v40 = vadd.f32 %v3841_v53, %v3829_v57  ;;  %v3822_v36 = vadd.f32 %v3814_v12, %v11253_v42  ;;  %v4562_v42 = vand.u32 2147483647, %v12052_v21  ;;  %v4564_v5 = vand.u32 2147483647, %v12057_v54 }
 0x73e   : > { %v3789_v35 = vadd.f32 %v7930_v9, %v3788_v10  ;;  %v12074_v27 = vadd.f32 %v4505_v61, %v4439_v18  ;;  %v4530_v43 = vfloor.f32 %v4522_v30 }
 0x73f   : > { %v3830_v60 = vmul.f32 %v3822_v36, %v15200_v19  ;;  %v12070_v6 = vadd.f32 1.0, %v4562_v42  ;;  %v12076_v15 = vadd.f32 1.0, %v4564_v5 }
 0x740   : > { %v3793_v25 = vsel %vm3792_vm2, %v7930_v9, %v3789_v35  ;;  %v4516_v9 = vadd.f32 1.0, %v12057_v54  ;;  %v4565_v20 = vand.u32 2147483647, %v12074_v27  ;;  %v4517_v38 = vadd.f32 1.0, %v12074_v27 }
 0x741   : > { %v12063_v53 = vadd.f32 %v3833_v7, %v3830_v60  ;;  %v3798_v44 = vsel %vm3795_vm8, %v3797_v41, %v3793_v25  ;;  %v4563_v7 = vand.u32 2147483647, %v12065_v26  ;;  %7931 = vrcp.f32 %v12070_v6 }
 0x742   : > { %v3799_v14 = vmul.f32 %v3798_v44, %v12024_v33  ;;  %v4479_v46 = vpop.f32.mrf.mxu2  ;;  %7933 = vrcp.f32 %v12076_v15  ;;  %v4524_v22 = vmul.f32 0.5, %v4516_v9  ;;  %v12101_v37 = vadd.f32 1.0, %v4565_v20 }
 0x743   : > { %v12078_v1 = vadd.f32 %v4479_v46, %v4440_v16  ;;  %v12090_v55 = vadd.f32 1.0, %v4563_v7  ;;  %v12103_v60 = vmul.f32 2.0, %v4530_v43  ;;  %vm4613_vm0 = vweird.f32 %v12076_v15 }
 0x744   : > { %v4508_v11 = vpop.f32.mrf.mxu3  ;;  %v3815_v24 = vsel %vm3807_vm12, %v3663_v13, %v3799_v14  ;;  %v4532_v41 = vfloor.f32 %v4524_v22 }
 0x745   : > { %v12080_v32 = vadd.f32 %v4508_v11, %v4441_v8  ;;  %v3823_v0 = vadd.f32 %v3815_v24, %v11274_v2  ;;  %v4566_v33 = vand.u32 2147483647, %v12078_v1  ;;  %v4518_v50 = vadd.f32 1.0, %v12078_v1 }
 0x747   : > { %v4567_v51 = vand.u32 2147483647, %v12080_v32  ;;  %v3831_v23 = vmul.f32 %v3823_v0, %v15200_v19  ;;  %v12093_v2 = vadd.f32 1.0, %v4566_v33  ;;  %v4519_v57 = vadd.f32 1.0, %v12080_v32  ;;  %v12105_v52 = vpop.eup %7931 }
 0x748   : > { %v4526_v36 = vmul.f32 0.5, %v4518_v50  ;;  %v12114_v25 = vpop.eup %7933  ;;  %v12133_v33 = vmul.f32 2.0, %v4532_v41 }
 0x749   : > { %v12096_v17 = vadd.f32 %v3842_v40, %v3831_v23  ;;  %v12098_v12 = vadd.f32 1.0, %v4567_v51  ;;  %7935 = vrcp.f32 %v12093_v2  ;;  %v4527_v31 = vmul.f32 0.5, %v4519_v57 }
 0x74a   : > { %v4482_v61 = vpop.f32.mrf.mxu2  ;;  %v4534_v58 = vfloor.f32 %v4526_v36  ;;  %7937 = vrcp.f32 %v12090_v55  ;;  %v4647_v13 = vand.u32 2147483647, %v12093_v2  ;;  %v4649_v24 = vand.u32 2147483648, %v12093_v2 }
 0x74b   : > { %v12108_v40 = vadd.f32 %v4482_v61, %v4442_v62  ;;  %7939 = vrcp.f32 %v12098_v12  ;;  %v4535_v16 = vfloor.f32 %v4527_v31  ;;  %v12135_v51 = vmul.f32 0.5, %v4517_v38 }
 0x74c   : > { %v4511_v10 = vpop.f32.mrf.mxu3  ;;  %v4542_v42 = vmul.f32 2.0, %v4534_v58  ;;  %7941 = vrcp.f32 %v12101_v37  ;;  %vm4643_vm1 = vweird.f32 %v12093_v2  ;;  %vm12148_vm9 = vcmp.eq.f32.partialorder %v4647_v13, 8.507059e+37 }
 0x74d   : > { %v12110_v35 = vadd.f32 %v4511_v10, %v4443_v56  ;;  %v4568_v5 = vand.u32 2147483647, %v12108_v40  ;;  %v4520_v44 = vadd.f32 1.0, %v12108_v40  ;;  %v4543_v43 = vmul.f32 2.0, %v4535_v16 }
 0x74e   : > { %v4550_v50 = vsub.f32 %v12078_v1, %v4542_v42  ;;  %v4609_v56 = vmul.f32 %v12114_v25, %v12076_v15  ;;  %v4650_v10 = vor.u32 1.1754944e-38, %v4649_v24  ;;  %vm4658_vm11 = vweird.f32 %v12098_v12 }
 0x74f   : > { %v4569_v18 = vand.u32 2147483647, %v12110_v35  ;;  %v4521_v8 = vadd.f32 1.0, %v12110_v35  ;;  %v12124_v7 = vpop.eup %7935  ;;  %v12126_v46 = vadd.f32 1.0, %v4568_v5  ;;  %v4528_v30 = vmul.f32 0.5, %v4520_v44 }
 0x750   : > { %v4639_v9 = vmul.f32 %v12124_v7, %v12093_v2  ;;  %v12137_v23 = vpop.eup %7937  ;;  %v12159_v44 = vand.u32 2147483647, %v4550_v50  ;;  %v4551_v16 = vsub.f32 %v12080_v32, %v4543_v43  ;;  %vm4644_vm13 = vweird.f32 %v12124_v7 }
 0x751   : > { %v12128_v11 = vadd.f32 1.0, %v4569_v18  ;;  %v4529_v0 = vmul.f32 0.5, %v4521_v8  ;;  %7943 = vrcp.f32 %v12126_v46  ;;  %v4536_v20 = vfloor.f32 %v4528_v30  ;;  %v12141_v57 = vpop.eup %7939  ;;  %vm12185_vm3 = vmor %vm4643_vm1, %vm4644_vm13 }
 0x752   : > { %v4679_v22 = vand.u32 2147483648, %v12126_v46  ;;  %v12152_v58 = vpop.eup %7941  ;;  %v4677_v31 = vand.u32 2147483647, %v12126_v46  ;;  %v4640_v38 = vsub.f32 1.0, %v4639_v9  ;;  %vm4673_vm10 = vweird.f32 %v12126_v46 }
 0x753   : > { %7945 = vrcp.f32 %v12128_v11  ;;  %v4537_v62 = vfloor.f32 %v4529_v0  ;;  %v4544_v36 = vmul.f32 2.0, %v4536_v20  ;;  %v4694_v41 = vand.u32 2147483648, %v12128_v11 }
 0x754   : > { %v4692_v18 = vand.u32 2147483647, %v12128_v11  ;;  %v4641_v8 = vmul.f32 %v12124_v7, %v4640_v38  ;;  %v4654_v13 = vmul.f32 %v12141_v57, %v12098_v12  ;;  %v4680_v24 = vor.u32 1.1754944e-38, %v4679_v22 }
 0x755   : > { %v4545_v42 = vmul.f32 2.0, %v4537_v62  ;;  %v4552_v5 = vsub.f32 %v12108_v40, %v4544_v36  ;;  %vm4688_vm15 = vweird.f32 %v12128_v11  ;;  %v4695_v9 = vor.u32 1.1754944e-38, %v4694_v41 }
 0x756   : > { %vm12170_vm6 = vcmp.eq.f32.partialorder %v4677_v31, 8.507059e+37  ;;  %v4642_v36 = vadd.f32 %v12124_v7, %v4641_v8  ;;  %v4662_v38 = vand.u32 2147483647, %v12098_v12  ;;  %vm12177_vm5 = vcmp.eq.f32.partialorder %v4692_v18, 8.507059e+37 }
 0x757   : > { %v7944_v30 = vpop.eup %7943  ;;  %v4553_v0 = vsub.f32 %v12110_v35, %v4545_v42  ;;  %v4560_v50 = vand.u32 2147483647, %v4552_v5  ;;  %v12189_v31 = vand.u32 2147483647, %v4551_v16  ;;  %v4655_v41 = vsub.f32 1.0, %v4654_v13 }
 0x758   : > { %v4669_v43 = vmul.f32 %v7944_v30, %v12126_v46  ;;  %vm4659_vm7 = vweird.f32 %v12141_v57  ;;  %vm4674_vm4 = vweird.f32 %v7944_v30  ;;  %v4646_v18 = vsel %vm12185_vm3, %v12124_v7, %v4642_v36 }
 0x759   : > { %v7946_v20 = vpop.eup %7945  ;;  %v4664_v8 = vand.u32 2147483648, %v12098_v12  ;;  %vm4704_vm2 = vcmp.ge.f32.partialorder %v12108_v40, 0.0  ;;  %v4561_v2 = vand.u32 2147483647, %v4553_v0  ;;  %v4656_v28 = vmul.f32 %v12141_v57, %v4655_v41  ;;  %vm12211_vm3 = vmor %vm4658_vm11, %vm4659_vm7 }
 0x75a   : > { %v4684_v14 = vmul.f32 %v7946_v20, %v12128_v11  ;;  %v4670_v5 = vsub.f32 1.0, %v4669_v43  ;;  %v4610_v4 = vsub.f32 1.0, %v4609_v56  ;;  %vm4689_vm8 = vweird.f32 %v7946_v20 }
 0x75b   : > { %vm4705_vm12 = vcmp.ge.f32.partialorder %v12110_v35, 0.0  ;;  %v4651_v13 = vsel %vm12148_vm9, %v4650_v10, %v4646_v18  ;;  %vm12201_vm1 = vcmp.eq.f32.partialorder %v4662_v38, 8.507059e+37  ;;  %v4657_v0 = vadd.f32 %v12141_v57, %v4656_v28  ;;  %vm12219_vm9 = vmor %vm4673_vm10, %vm4674_vm4 }
 0x75c   : > { %v4685_v19 = vsub.f32 1.0, %v4684_v14  ;;  %v4671_v16 = vmul.f32 %v7944_v30, %v4670_v5  ;;  %v4665_v56 = vor.u32 1.1754944e-38, %v4664_v8  ;;  %v4611_v61 = vmul.f32 %v12114_v25, %v4610_v4  ;;  %vm12229_vm11 = vmor %vm4688_vm15, %vm4689_vm8 }
 0x75d   : > { %vm4614_vm13 = vweird.f32 %v12114_v25  ;;  %v4617_v28 = vand.u32 2147483647, %v12076_v15  ;;  %v4661_v46 = vsel %vm12211_vm3, %v12141_v57, %v4657_v0  ;;  %v4619_v38 = vand.u32 2147483648, %v12076_v15 }
 0x75e   : > { %v4686_v7 = vmul.f32 %v7946_v20, %v4685_v19  ;;  %v4672_v10 = vadd.f32 %v7944_v30, %v4671_v16  ;;  %v4612_v36 = vadd.f32 %v12114_v25, %v4611_v61  ;;  %vm4700_vm10 = vcmp.ge.f32.partialorder %v12057_v54, 0.0  ;;  %vm12245_vm15 = vmor %vm4613_vm0, %vm4614_vm13 }
 0x75f   : > { %v4666_v11 = vsel %vm12201_vm1, %v4665_v56, %v4661_v46  ;;  %v4548_v41 = vsub.f32 %v12057_v54, %v12133_v33  ;;  %v4533_v57 = vfloor.f32 %v12135_v51  ;;  %vm4628_vm7 = vweird.f32 %v12101_v37 }
 0x760   : > { %v4687_v12 = vadd.f32 %v7946_v20, %v4686_v7  ;;  %v4676_v42 = vsel %vm12219_vm9, %v7944_v30, %v4672_v10  ;;  %v4652_v30 = vmul.f32 %v4651_v13, %v12078_v1  ;;  %v4616_v8 = vsel %vm12245_vm15, %v12114_v25, %v4612_v36 }
 0x761   : > { %v4681_v15 = vsel %vm12170_vm6, %v4680_v24, %v4676_v42  ;;  %v4620_v51 = vor.u32 1.1754944e-38, %v4619_v38  ;;  %v4541_v43 = vmul.f32 2.0, %v4533_v57  ;;  %v4667_v62 = vmul.f32 %v4666_v11, %v12080_v32 }
 0x762   : > { %v4691_v18 = vsel %vm12229_vm11, %v7946_v20, %v4687_v12  ;;  %v4682_v33 = vmul.f32 %v4681_v15, %v12108_v40  ;;  %vm4618_vm0 = vcmp.eq.f32.partialorder %v4617_v28, 8.507059e+37  ;;  %v4624_v20 = vmul.f32 %v12152_v58, %v12101_v37 }
 0x763   : > { %v4696_v16 = vsel %vm12177_vm5, %v4695_v9, %v4691_v18  ;;  %v4621_v13 = vsel %vm4618_vm0, %v4620_v51, %v4616_v8  ;;  %v4549_v7 = vsub.f32 %v12074_v27, %v4541_v43  ;;  %v4632_v0 = vand.u32 2147483647, %v12101_v37 }
 0x764   : > { %v4697_v24 = vmul.f32 %v4696_v16, %v12110_v35  ;;  %v4712_v25 = vsel %vm4704_vm2, %v4560_v50, %v4682_v33  ;;  %v4622_v22 = vmul.f32 %v4621_v13, %v12057_v54  ;;  %v4625_v14 = vsub.f32 1.0, %v4624_v20 }
 0x765   : > { %4750 = vmatpush.msra.mxu0 %v4712_v25  ;;  %v4634_v56 = vand.u32 2147483648, %v12101_v37  ;;  %vm15219_vm6 = vcmp.ge.f32.partialorder %v12078_v1, 0.0  ;;  %vm4703_vm5 = vcmp.ge.f32.partialorder %v12080_v32, 0.0  ;;  %v4556_v50 = vand.u32 2147483647, %v4548_v41 }
 0x766   : > { %v4713_v9 = vsel %vm4705_vm12, %v4561_v2, %v4697_v24  ;;  %v4710_v40 = vsel %vm15219_vm6, %v12159_v44, %v4652_v30  ;;  %v4579_v61 = vmul.f32 %v12105_v52, %v12070_v6  ;;  %v4711_v35 = vsel %vm4703_vm5, %v12189_v31, %v4667_v62  ;;  %v4714_v62 = vld [vmem:[#allocation2 + $0x40] sm:$0xff] }
 0x767   : > { %4779 = vmatpush.msra.mxu1 %v4713_v9  ;;  %4751 = vmatpush.msra.mxu0 %v4710_v40  ;;  %v4557_v2 = vand.u32 2147483647, %v4549_v7  ;;  %v4626_v10 = vmul.f32 %v12152_v58, %v4625_v14  ;;  %vm4629_vm4 = vweird.f32 %v12152_v58  ;;  %v4708_v19 = vsel %vm4700_vm10, %v4556_v50, %v4622_v22  ;;  %v15231_v40 = vld [vmem:[#allocation12_spill] sm:$0xff] }
 0x768   : > { %vm12285_vm2 = vcmp.eq.f32.partialorder %v4632_v0, 8.507059e+37  ;;  %v4580_v32 = vsub.f32 1.0, %v4579_v61  ;;  %v4589_v44 = vand.u32 2147483648, %v12070_v6  ;;  %v4635_v31 = vor.u32 1.1754944e-38, %v4634_v56  ;;  %vm4630_vm8 = vmor %vm4628_vm7, %vm4629_vm4  ;;  %v4717_v0 = vld [vmem:[#allocation2 + $0x58] sm:$0xff] }
 0x769   : > { %4780 = vmatpush.msra.mxu1 %v4711_v35  ;;  %4752 = vmatpush.msra.mxu0 %v4708_v19  ;;  %v4627_v28 = vadd.f32 %v12152_v58, %v4626_v10  ;;  %v4515_v12 = vadd.f32 1.0, %v12065_v26  ;;  %v4594_v4 = vmul.f32 %v12137_v23, %v12090_v55  ;;  %vm4583_vm12 = vweird.f32 %v12070_v6  ;;  %v15232_v50 = vld [vmem:[#allocation28_spill] sm:$0xff] }
 0x76a   : > { %v4581_v54 = vmul.f32 %v12105_v52, %v4580_v32  ;;  %vm4584_vm1 = vweird.f32 %v12105_v52  ;;  %v4587_v46 = vand.u32 2147483647, %v12070_v6  ;;  %v4590_v38 = vor.u32 1.1754944e-38, %v4589_v44  ;;  %v15233_v32 = vld [vmem:[#allocation34_spill] sm:$0xff] }
 0x76b   : > { %v4631_v36 = vsel %vm4630_vm8, %v12152_v58, %v4627_v28  ;;  %v4523_v42 = vmul.f32 0.5, %v4515_v12  ;;  %v4595_v11 = vsub.f32 1.0, %v4594_v4  ;;  %vm4599_vm13 = vweird.f32 %v12137_v23  ;;  %vm4585_vm3 = vmor %vm4583_vm12, %vm4584_vm1  ;;  %v15234_v28 = vld [vmem:[#allocation29_spill] sm:$0xff]  ;;  %v15235_v4 = vld [vmem:[#allocation11_spill] sm:$0xff] }
 0x76c   : > { %v4636_v41 = vsel %vm12285_vm2, %v4635_v31, %v4631_v36  ;;  %v4582_v5 = vadd.f32 %v12105_v52, %v4581_v54  ;;  %v4604_v37 = vand.u32 2147483648, %v12090_v55  ;;  %v4602_v58 = vand.u32 2147483647, %v12090_v55  ;;  %v15236_v54 = vld [vmem:[#allocation30_spill] sm:$0xff] }
 0x76d   : > { %v4637_v57 = vmul.f32 %v4636_v41, %v12074_v27  ;;  %v4531_v15 = vfloor.f32 %v4523_v42  ;;  %v4596_v6 = vmul.f32 %v12137_v23, %v4595_v11  ;;  %vm4701_vm9 = vcmp.ge.f32.partialorder %v12074_v27, 0.0  ;;  %v15238_v42 = vld [vmem:[#allocation35_spill] sm:$0xff] }
 0x76e   : > { %v4586_v18 = vsel %vm4585_vm3, %v12105_v52, %v4582_v5  ;;  %vm4588_vm11 = vcmp.eq.f32.partialorder %v4587_v46, 8.507059e+37  ;;  %vm4598_vm10 = vweird.f32 %v12090_v55  ;;  %v15222_v51 = vsub.f32 %v12052_v21, %v12103_v60  ;;  %v5614_v46 = vld [vmem:[#allocation5 + $0x28] sm:$0xff] }
 0x76f   : > { %v4709_v30 = vsel %vm4701_vm9, %v4557_v2, %v4637_v57  ;;  %v4591_v8 = vsel %vm4588_vm11, %v4590_v38, %v4586_v18  ;;  %v4539_v33 = vmul.f32 2.0, %v4531_v15  ;;  %v4597_v16 = vadd.f32 %v12137_v23, %v4596_v6  ;;  %vm4600_vm15 = vmor %vm4598_vm10, %vm4599_vm13  ;;  %v5613_v2 = vld [vmem:[#allocation5 + $0x20] sm:$0xff]  ;;  %v15239_v57 = vld [vmem:[#allocation31_spill] sm:$0xff] }
 0x770   : > { %4781 = vmatpush.msra.mxu1 %v4709_v30  ;;  %v4554_v43 = vand.u32 2147483647, %v15222_v51  ;;  %v4592_v24 = vmul.f32 %v4591_v8, %v12052_v21  ;;  %v4605_v27 = vor.u32 1.1754944e-38, %v4604_v37  ;;  %vm4698_vm7 = vcmp.ge.f32.partialorder %v12052_v21, 0.0  ;;  %v4715_v21 = vld [vmem:[#allocation2 + $0x48] sm:$0xff] }
 0x771   : > { %v4547_v55 = vsub.f32 %v12065_v26, %v4539_v33  ;;  %v4601_v52 = vsel %vm4600_vm15, %v12137_v23, %v4597_v16  ;;  %vm4603_vm0 = vcmp.eq.f32.partialorder %v4602_v58, 8.507059e+37  ;;  %vm4699_vm6 = vcmp.ge.f32.partialorder %v12065_v26, 0.0  ;;  %v4716_v23 = vld [vmem:[#allocation2 + $0x50] sm:$0xff]  ;;  %v15240_v18 = vld [vmem:[#allocation14_spill] sm:$0xff] }
 0x772   : > { %v4706_v20 = vsel %vm4698_vm7, %v4554_v43, %v4592_v24  ;;  %v4606_v25 = vsel %vm4603_vm0, %v4605_v27, %v4601_v52  ;;  %vm15223_vm5 = vcmask 261120   ;;  %v3835_v9 = vrot.slane %v12063_v53, 4  ;;  %v5611_v16 = vld [vmem:[#allocation5 + $0x10] sm:$0xff] }
 0x773   : > { %4753 = vmatpush.msra.mxu0 %v4706_v20  ;;  %v4555_v13 = vand.u32 2147483647, %v4547_v55  ;;  %v4607_v60 = vmul.f32 %v4606_v25, %v12065_v26  ;;  %vm15224_vm4 = vmmov %vm15223_vm5  ;;  %v3844_v26 = vrot.slane %v12096_v17, 4  ;;  %v5628_v61 = vmul.f32 %v15232_v50, %v15231_v40  ;;  %v15243_v43 = vld [vmem:[#allocation15_spill] sm:$0xff] }
 0x774   : > { %7564 = vmatmul.msk.f32.vlgmr.msra.gmra.mxu0 %vm15223_vm5, %v4714_v62  ;;  %vm15225_vm2 = vmmov %vm15224_vm4  ;;  %v3836_v14 = vadd.f32 %v3835_v9, %v12063_v53  ;;  %v5748_v44 = vand.u32 2147483647, %v15233_v32  ;;  %v5629_v31 = vmul.f32 %v15234_v28, %v15231_v40  ;;  %v5749_v11 = vand.u32 2147483647, %v15238_v42  ;;  %v5612_v40 = vld [vmem:[#allocation5 + $0x18] sm:$0xff] }
 0x775   : > { %v4707_v7 = vsel %vm4699_vm6, %v4555_v13, %v4607_v60  ;;  %vm15226_vm8 = vmmov %vm15225_vm2  ;;  %v3845_v22 = vadd.f32 %v3844_v26, %v12096_v17  ;;  %v5636_v1 = vadd.f32 %v5628_v61, %v5613_v2  ;;  %v5666_v17 = vmul.f32 %v15236_v54, %v15235_v4 }
 0x776   : > { %4782 = vmatpush.msra.mxu1 %v4707_v7  ;;  %vm15227_vm12 = vmmov %vm15225_vm2  ;;  %v3837_v35 = vrot.slane %v3836_v14, 2  ;;  %v12345_v38 = vadd.f32 1.0, %v5748_v44  ;;  %v5637_v41 = vadd.f32 %v5629_v31, %v5614_v46  ;;  %v5667_v15 = vmul.f32 %v15239_v57, %v15235_v4  ;;  %v15247_v44 = vld [vmem:[#allocation16_spill] sm:$0xff] }
 0x777   : > { %7568 = vmatmul.msk.f32.vlgmr.msra.gmra.mxu1 %vm15224_vm4, %v4714_v62  ;;  %vm15228_vm1 = vmmov %vm15225_vm2  ;;  %v3846_v56 = vrot.slane %v3845_v22, 2  ;;  %v12343_v53 = vadd.f32 %v5666_v17, %v5636_v1  ;;  %v5626_v30 = vmul.f32 %v15232_v50, %v15240_v18  ;;  %v12354_v8 = vadd.f32 1.0, %v5749_v11 }
 0x778   : > { %vm15229_vm13 = vmmov %vm15228_vm1  ;;  %v3838_v19 = vadd.f32 %v3837_v35, %v3836_v14  ;;  %7947 = vrcp.f32 %v12345_v38  ;;  %v12356_v33 = vadd.f32 %v5667_v15, %v5637_v41  ;;  %vm15242_vm9 = vcmask 1040384   ;;  %v5609_v14 = vld [vmem:[#allocation5] sm:$0xff] }
 0x779   : > { %vm15230_vm3 = vmmov %vm15228_vm1  ;;  %v3847_v10 = vadd.f32 %v3846_v56, %v3845_v22  ;;  %15237 = vst [vmem:[#allocation51_spill] sm:$0xff] %v12343_v53  ;;  %v5746_v37 = vand.u32 2147483647, %v12343_v53  ;;  %v5664_v24 = vmul.f32 %v15236_v54, %v15243_v43  ;;  %v5700_v55 = vadd.f32 1.0, %v15233_v32 }
 0x77a   : > { %v3839_v36 = vrot.slane %v3838_v19, 1  ;;  %15241 = vst [vmem:[#allocation44_spill] sm:$0xff] %v12356_v33  ;;  %v5701_v62 = vadd.f32 1.0, %v15238_v42  ;;  %v5634_v20 = vadd.f32 %v5626_v30, %v5611_v16  ;;  %7949 = vrcp.f32 %v12354_v8 }
 0x77b   : > { %v3848_v12 = vrot.slane %v3847_v10, 1  ;;  %v12365_v52 = vadd.f32 1.0, %v5746_v37  ;;  %v5747_v25 = vand.u32 2147483647, %v12356_v33  ;;  %v5708_v7 = vmul.f32 0.5, %v5700_v55 }
 0x77c   : > { %7565 = vmatmul.msk.f32.gmra.mxu0 %vm15225_vm2, %v4715_v21  ;;  %v3840_v6 = vadd.f32 %v3839_v36, %v3838_v19  ;;  %v12372_v60 = vadd.f32 %v5664_v24, %v5634_v20  ;;  %v5627_v26 = vmul.f32 %v15234_v28, %v15240_v18  ;;  %v5698_v2 = vadd.f32 1.0, %v12343_v53 }
 0x77d   : > { %v3849_v5 = vadd.f32 %v3848_v12, %v3847_v10  ;;  %7951 = vrcp.f32 %v12365_v52  ;;  %v12381_v22 = vadd.f32 1.0, %v5747_v25  ;;  %v5716_v35 = vfloor.f32 %v5708_v7 }
 0x77e   : > { %v12370_v13 = vpop.eup %7947  ;;  %15245 = vst [vmem:[#allocation49_spill] sm:$0xff] %v12372_v60  ;;  %v5744_v56 = vand.u32 2147483647, %v12372_v60  ;;  %v5665_v10 = vmul.f32 %v15239_v57, %v15243_v43  ;;  %v5662_v31 = vmul.f32 %v15236_v54, %v15247_v44  ;;  %v5635_v17 = vadd.f32 %v5627_v26, %v5612_v40 }
 0x77f   : > { %7569 = vmatmul.msk.f32.gmra.mxu1 %vm15226_vm8, %v4715_v21  ;;  %v3852_v58 = vrot.slane %v3849_v5, 7  ;;  %v15246_v21 = vld [vmem:[#allocation13_spill] sm:$0xff]  ;;  %v5849_v9 = vmul.f32 %v12370_v13, %v12345_v38  ;;  %7953 = vrcp.f32 %v12381_v22  ;;  %v5857_v46 = vand.u32 2147483647, %v12345_v38 }
 0x780   : > { %v12384_v61 = vpop.eup %7949  ;;  %v12397_v11 = vadd.f32 1.0, %v5744_v56  ;;  %v5724_v41 = vmul.f32 2.0, %v5716_v35  ;;  %v5859_v5 = vand.u32 2147483648, %v12345_v38  ;;  %v5706_v37 = vmul.f32 0.5, %v5698_v2 }
 0x781   : > { %v3853_v51 = vsel %vm15242_vm9, %v3840_v6, %v3852_v58  ;;  %v5850_v4 = vsub.f32 1.0, %v5849_v9  ;;  %v5864_v36 = vmul.f32 %v12384_v61, %v12354_v8  ;;  %v12400_v15 = vadd.f32 %v5665_v10, %v5635_v17 }
 0x782   : > { %3855 = vst.msk [vmem:[%s11371_s11 + $0x2] sm:$0x3] %vm11364_vm14, %v3853_v51  ;;  %v5699_v18 = vadd.f32 1.0, %v12356_v33  ;;  %v5625_v16 = vmul.f32 %v15234_v28, %v15246_v21  ;;  %v5874_v43 = vand.u32 2147483648, %v12354_v8  ;;  %vm5853_vm11 = vweird.f32 %v12345_v38  ;;  %v4725_v28 = vld [vmem:[#allocation5 + $0xf8] sm:$0xff] }
 0x783   : > { %v12391_v12 = vpop.eup %7951  ;;  %15248 = vst [vmem:[#allocation27_spill] sm:$0xff] %v12400_v15  ;;  %v5851_v51 = vmul.f32 %v12370_v13, %v5850_v4  ;;  %v5865_v24 = vsub.f32 1.0, %v5864_v36  ;;  %v5872_v55 = vand.u32 2147483647, %v12354_v8  ;;  %7955 = vrcp.f32 %v12397_v11 }
 0x784   : > { %7566 = vmatmul.msk.f32.gmra.mxu0 %vm15227_vm12, %v4716_v23  ;;  %v5819_v58 = vmul.f32 %v12391_v12, %v12365_v52  ;;  %v5732_v20 = vsub.f32 %v15233_v32, %v5724_v41  ;;  %vm12417_vm10 = vcmp.eq.f32.partialorder %v5857_v46, 8.507059e+37  ;;  %v5860_v7 = vor.u32 1.1754944e-38, %v5859_v5 }
 0x785   : > { %vm5868_vm15 = vweird.f32 %v12354_v8  ;;  %v5852_v40 = vadd.f32 %v12370_v13, %v5851_v51  ;;  %vm5854_vm7 = vweird.f32 %v12370_v13  ;;  %v5875_v35 = vor.u32 1.1754944e-38, %v5874_v43 }
 0x786   : > { %v5820_v9 = vsub.f32 1.0, %v5819_v58  ;;  %v5696_v2 = vadd.f32 1.0, %v12372_v60  ;;  %v5866_v10 = vmul.f32 %v12384_v61, %v5865_v24  ;;  %v5740_v4 = vand.u32 2147483647, %v5732_v20  ;;  %vm12440_vm6 = vmor %vm5853_vm11, %vm5854_vm7 }
 0x787   : > { %7570 = vmatmul.msk.f32.gmra.mxu1 %vm15228_vm1, %v4716_v23  ;;  %v5624_v23 = vmul.f32 %v15232_v50, %v15246_v21  ;;  %v5714_v21 = vfloor.f32 %v5706_v37  ;;  %vm5823_vm0 = vweird.f32 %v12365_v52  ;;  %vm12446_vm5 = vcmp.eq.f32.partialorder %v5872_v55, 8.507059e+37 }
 0x788   : > { %v5827_v38 = vand.u32 2147483647, %v12365_v52  ;;  %v5704_v51 = vmul.f32 0.5, %v5696_v2  ;;  %vm5884_vm4 = vcmp.ge.f32.partialorder %v15233_v32, 0.0  ;;  %v5867_v24 = vadd.f32 %v12384_v61, %v5866_v10 }
 0x789   : > { %v5632_v1 = vadd.f32 %v5624_v23, %v5609_v14  ;;  %v5745_v23 = vand.u32 2147483647, %v12400_v15  ;;  %v5707_v14 = vmul.f32 0.5, %v5699_v18  ;;  %v5722_v17 = vmul.f32 2.0, %v5714_v21 }
 0x78a   : > { %v5856_v18 = vsel %vm12440_vm6, %v12370_v13, %v5852_v40  ;;  %vm5869_vm2 = vweird.f32 %v12384_v61  ;;  %vm5824_vm8 = vweird.f32 %v12391_v12  ;;  %vm12480_vm1 = vcmp.eq.f32.partialorder %v5827_v38, 8.507059e+37 }
 0x78b   : > { %v12405_v30 = vadd.f32 %v5662_v31, %v5632_v1  ;;  %v5663_v31 = vmul.f32 %v15239_v57, %v15247_v44  ;;  %v12434_v46 = vadd.f32 1.0, %v5745_v23  ;;  %v5821_v44 = vmul.f32 %v12391_v12, %v5820_v9  ;;  %vm12476_vm12 = vmor %vm5868_vm15, %vm5869_vm2 }
 0x78c   : > { %7567 = vmatmul.msk.f32.gmra.mxu0 %vm15229_vm13, %v4717_v0  ;;  %v5730_v21 = vsub.f32 %v12343_v53, %v5722_v17  ;;  %v5861_v23 = vsel %vm12417_vm10, %v5860_v7, %v5856_v18  ;;  %v5842_v25 = vand.u32 2147483647, %v12381_v22  ;;  %v5844_v7 = vand.u32 2147483648, %v12381_v22  ;;  %vm12499_vm13 = vmor %vm5823_vm0, %vm5824_vm8  ;;  %v4720_v17 = vld [vmem:[#allocation5 + $0xd0] sm:$0xff] }
 0x78d   : > { %15249 = vst [vmem:[#allocation45_spill] sm:$0xff] %v12405_v30  ;;  %v5742_v56 = vand.u32 2147483647, %v12405_v30  ;;  %7957 = vrcp.f32 %v12434_v46  ;;  %v5712_v40 = vfloor.f32 %v5704_v51  ;;  %v5871_v2 = vsel %vm12476_vm12, %v12384_v61, %v5867_v24 }
 0x78e   : > { %v5697_v8 = vadd.f32 1.0, %v12400_v15  ;;  %v5694_v18 = vadd.f32 1.0, %v12405_v30  ;;  %vm12514_vm9 = vcmp.eq.f32.partialorder %v5842_v25, 8.507059e+37  ;;  %v5797_v25 = vand.u32 2147483647, %v12397_v11 }
 0x78f   : > { %7571 = vmatmul.msk.f32.gmra.mxu1 %vm15230_vm3, %v4717_v0  ;;  %v5709_v0 = vmul.f32 0.5, %v5701_v62  ;;  %v12414_v62 = vpop.eup %7953  ;;  %v12451_v58 = vadd.f32 1.0, %v5742_v56  ;;  %vm5838_vm3 = vweird.f32 %v12381_v22  ;;  %v12518_v24 = vmul.f32 2.0, %v5712_v40 }
 0x790   : > { %v12436_v36 = vpop.eup %7955  ;;  %vm5839_vm11 = vweird.f32 %v12414_v62  ;;  %vm5793_vm15 = vweird.f32 %v12397_v11  ;;  %vm12564_vm0 = vcmp.eq.f32.partialorder %v5797_v25, 8.507059e+37 }
 0x791   : > { %v5717_v19 = vfloor.f32 %v5709_v0  ;;  %v5610_v0 = vld [vmem:[#allocation5 + $0x8] sm:$0xff]  ;;  %v5789_v13 = vmul.f32 %v12436_v36, %v12397_v11  ;;  %7959 = vrcp.f32 %v12451_v58  ;;  %15268 = vst [vmem:[#allocation47_spill] sm:$0xff] %v12518_v24  ;;  %vm12544_vm10 = vmor %vm5838_vm3, %vm5839_vm11  ;;  %vm5794_vm7 = vweird.f32 %v12436_v36 }
 0x792   : > { %v5633_v1 = vadd.f32 %v5625_v16, %v5610_v0  ;;  %v5829_v16 = vand.u32 2147483648, %v12365_v52  ;;  %v5822_v0 = vadd.f32 %v12391_v12, %v5821_v44  ;;  %v5876_v52 = vsel %vm12446_vm5, %v5875_v35, %v5871_v2  ;;  %vm12578_vm6 = vmor %vm5793_vm15, %vm5794_vm7 }
 0x793   : > { %v5725_v6 = vmul.f32 2.0, %v5717_v19  ;;  %v5834_v19 = vmul.f32 %v12414_v62, %v12381_v22  ;;  %v5790_v61 = vsub.f32 1.0, %v5789_v13  ;;  %v12510_v38 = vpop.eup %7957  ;;  %v12535_v40 = vmul.f32 %v5876_v52, %v15238_v42  ;;  %v4722_v52 = vld [vmem:[#allocation5 + $0xe0] sm:$0xff] }
 0x794   : > { %v12461_v20 = vadd.f32 %v5663_v31, %v5633_v1  ;;  %v5862_v1 = vmul.f32 %v5861_v23, %v15233_v32  ;;  %v12493_v31 = vand.u32 2147483647, %v5730_v21  ;;  %v5830_v41 = vor.u32 1.1754944e-38, %v5829_v16 }
 0x795   : > { %v5733_v26 = vsub.f32 %v15238_v42, %v5725_v6  ;;  %v5715_v6 = vfloor.f32 %v5707_v14  ;;  %v5835_v55 = vsub.f32 1.0, %v5834_v19  ;;  %v5826_v44 = vsel %vm12499_vm13, %v12391_v12, %v5822_v0  ;;  %15270 = vst [vmem:[#allocation55_spill] sm:$0xff] %v12535_v40 }
 0x796   : > { %15257 = vst [vmem:[#allocation38_spill] sm:$0xff] %v12461_v20  ;;  %v5743_v19 = vand.u32 2147483647, %v12461_v20  ;;  %v5845_v16 = vor.u32 1.1754944e-38, %v5844_v7  ;;  %v5705_v23 = vmul.f32 0.5, %v5697_v8  ;;  %v12528_v35 = vsel %vm5884_vm4, %v5740_v4, %v5862_v1  ;;  %v4719_v7 = vld [vmem:[#allocation5 + $0xc8] sm:$0xff] }
 0x797   : > { %v12444_v5 = vand.u32 2147483647, %v5733_v26  ;;  %v12471_v26 = vmul.f32 2.0, %v5715_v6  ;;  %v5836_v10 = vmul.f32 %v12414_v62, %v5835_v55  ;;  %15263 = vst [vmem:[#allocation54_spill] sm:$0xff] %v12493_v31  ;;  %v12520_v12 = vpop.eup %7959  ;;  %v4718_v55 = vld [vmem:[#allocation5 + $0xc0] sm:$0xff]  ;;  %v5831_v37 = vsel %vm12480_vm1, %v5830_v41, %v5826_v44 }
 0x798   : > { %v12524_v0 = vadd.f32 1.0, %v5743_v19  ;;  %15269 = vst [vmem:[#allocation53_spill] sm:$0xff] %v12528_v35  ;;  %v5791_v14 = vmul.f32 %v12436_v36, %v5790_v61  ;;  %v5799_v2 = vand.u32 2147483648, %v12397_v11  ;;  %v5702_v8 = vmul.f32 0.5, %v5694_v18 }
 0x799   : > { %15254 = vst [vmem:[#allocation52_spill] sm:$0xff] %v12444_v5  ;;  %v5837_v13 = vadd.f32 %v12414_v62, %v5836_v10  ;;  %v5804_v10 = vmul.f32 %v12510_v38, %v12434_v46  ;;  %v5759_v1 = vmul.f32 %v12520_v12, %v12451_v58  ;;  %v12554_v41 = vmul.f32 %v5831_v37, %v12343_v53 }
 0x79a   : > { %15258 = vst [vmem:[#allocation33_spill] sm:$0xff] %v12471_v26  ;;  %7961 = vrcp.f32 %v12524_v0  ;;  %v5792_v44 = vadd.f32 %v12436_v36, %v5791_v14  ;;  %v5710_v19 = vfloor.f32 %v5702_v8  ;;  %v5695_v56 = vadd.f32 1.0, %v12461_v20 }
 0x79b   : > { %15273 = vst [vmem:[#allocation43_spill] sm:$0xff] %v12554_v41  ;;  %v5841_v22 = vsel %vm12544_vm10, %v12414_v62, %v5837_v13  ;;  %v5805_v37 = vsub.f32 1.0, %v5804_v10  ;;  %v5760_v14 = vsub.f32 1.0, %v5759_v1  ;;  %v5769_v8 = vand.u32 2147483648, %v12451_v58  ;;  %v4723_v1 = vld [vmem:[#allocation5 + $0xe8] sm:$0xff] }
 0x79c   : > { %v5796_v11 = vsel %vm12578_vm6, %v12436_v36, %v5792_v44  ;;  %v12601_v10 = vmul.f32 0.5, %v5695_v56 }
 0x79d   : > { %v5806_v6 = vmul.f32 %v12510_v38, %v5805_v37  ;;  %v5761_v36 = vmul.f32 %v12520_v12, %v5760_v14 }
 0x79e   : > { %15282 = vst [vmem:[#allocation20_spill] sm:$0xff] %v12601_v10 }
 0x79f   : > { %v12629_v18 = vadd.f32 %v12510_v38, %v5806_v6 }
 0x7a1   : > { %15285 = vst [vmem:[#allocation36_spill] sm:$0xff] %v12629_v18 }
 0x7f1   : > { %v4755_v43 = vpop.f32.mrf.mxu0 }
 0x7f2   : > { %v12540_v32 = vadd.f32 %v4755_v43, %v4718_v55  ;;  %v5713_v43 = vfloor.f32 %v5705_v23  ;;  %v5800_v55 = vor.u32 1.1754944e-38, %v5799_v2  ;;  %v12574_v23 = vsel %vm12514_vm9, %v5845_v16, %v5841_v22  ;;  %v12594_v22 = vpop.eup %7961 }
 0x7f3   : > { %15277 = vst [vmem:[#allocation60_spill] sm:$0xff] %v12574_v23 }
 0x7f4   : > { %v4784_v9 = vpop.f32.mrf.mxu1  ;;  %v4844_v62 = vand.u32 2147483647, %v12540_v32  ;;  %v12582_v2 = vmul.f32 2.0, %v5713_v43 }
 0x7f5   : > { %v12560_v61 = vadd.f32 %v4784_v9, %v4719_v7  ;;  %v4721_v9 = vld [vmem:[#allocation5 + $0xd8] sm:$0xff] }
 0x7f6   : > { %15280 = vst [vmem:[#allocation40_spill] sm:$0xff] %v12582_v2  ;;  %v12603_v27 = vadd.f32 1.0, %v4844_v62  ;;  %v12623_v62 = vmul.f32 %v12594_v22, %v12524_v0 }
 0x7f7   : > { %15274 = vst [vmem:[#allocation46_spill] sm:$0xff] %v12560_v61  ;;  %v4845_v51 = vand.u32 2147483647, %v12560_v61  ;;  %v4797_v57 = vadd.f32 1.0, %v12560_v61 }
 0x7f8   : > { %7963 = vrcp.f32 %v12603_v27 }
 0x7f9   : > { %v4758_v21 = vpop.f32.mrf.mxu0  ;;  %v12617_v37 = vadd.f32 1.0, %v4845_v51 }
 0x7fa   : > { %v12570_v13 = vadd.f32 %v4758_v21, %v4720_v17  ;;  %v12599_v21 = vmul.f32 2.0, %v5710_v19  ;;  %v12615_v19 = vor.u32 1.1754944e-38, %v5769_v8  ;;  %v4796_v8 = vadd.f32 1.0, %v12540_v32 }
 0x7fc   : > { %v4787_v4 = vpop.f32.mrf.mxu1  ;;  %15281 = vst [vmem:[#allocation48_spill] sm:$0xff] %v12599_v21 }
 0x7fd   : > { %v12596_v43 = vadd.f32 %v4787_v4, %v4721_v9  ;;  %v12613_v4 = vsel %vm12564_vm0, %v5800_v55, %v5796_v11  ;;  %15284 = vst [vmem:[#allocation18_spill] sm:$0xff] %v12615_v19  ;;  %v12637_v11 = vadd.f32 %v12520_v12, %v5761_v36  ;;  %v12649_v36 = vadd.f32 1.0, %v12570_v13 }
 0x7fe   : > { %15283 = vst [vmem:[#allocation37_spill] sm:$0xff] %v12613_v4  ;;  %v12665_v40 = vpop.eup %7963 }
 0x7ff   : > { %v4847_v14 = vand.u32 2147483647, %v12596_v43  ;;  %15286 = vst [vmem:[#allocation26_spill] sm:$0xff] %v12637_v11  ;;  %v12652_v54 = vadd.f32 1.0, %v12596_v43 }
 0x801   : > { %v4761_v25 = vpop.f32.mrf.mxu0  ;;  %v12654_v34 = vadd.f32 1.0, %v4847_v14 }
 0x802   : > { %v12588_v16 = vadd.f32 %v4761_v25, %v4722_v52  ;;  %v4846_v52 = vand.u32 2147483647, %v12570_v13 }
 0x804   : > { %v4848_v25 = vand.u32 2147483647, %v12588_v16  ;;  %v4790_v7 = vpop.f32.mrf.mxu1  ;;  %v4800_v44 = vadd.f32 1.0, %v12588_v16  ;;  %v12634_v51 = vadd.f32 1.0, %v4846_v52  ;;  %vm4984_vm10 = vcmp.ge.f32.partialorder %v12588_v16, 0.0 }
 0x805   : > { %v12609_v17 = vadd.f32 %v4790_v7, %v4723_v1  ;;  %v4724_v7 = vld [vmem:[#allocation5 + $0xf0] sm:$0xff] }
 0x806   : > { %v12619_v56 = vadd.f32 1.0, %v4848_v25  ;;  %v4808_v6 = vmul.f32 0.5, %v4800_v44 }
 0x807   : > { %v4849_v1 = vand.u32 2147483647, %v12609_v17  ;;  %v4801_v25 = vadd.f32 1.0, %v12609_v17  ;;  %vm4985_vm6 = vcmp.ge.f32.partialorder %v12609_v17, 0.0 }
 0x808   : > { %7965 = vrcp.f32 %v12619_v56  ;;  %v4931_v20 = vand.u32 2147483648, %v12619_v56  ;;  %v4929_v31 = vand.u32 2147483647, %v12619_v56  ;;  %vm4925_vm5 = vweird.f32 %v12619_v56 }
 0x809   : > { %v12641_v9 = vadd.f32 1.0, %v4849_v1  ;;  %v4764_v49 = vpop.f32.mrf.mxu0  ;;  %7967 = vrcp.f32 %v12617_v37  ;;  %v4816_v1 = vfloor.f32 %v4808_v6  ;;  %v4809_v5 = vmul.f32 0.5, %v4801_v25 }
 0x80a   : > { %v12645_v55 = vadd.f32 %v4764_v49, %v4724_v7  ;;  %v12659_v7 = vmul.f32 0.5, %v4796_v8  ;;  %v4932_v2 = vor.u32 1.1754944e-38, %v4931_v20  ;;  %vm12689_vm4 = vcmp.eq.f32.partialorder %v4929_v31, 8.507059e+37 }
 0x80b   : > { %7969 = vrcp.f32 %v12641_v9  ;;  %v4824_v24 = vmul.f32 2.0, %v4816_v1  ;;  %v4817_v23 = vfloor.f32 %v4809_v5  ;;  %v4944_v30 = vand.u32 2147483647, %v12641_v9 }
 0x80c   : > { %v4802_v44 = vadd.f32 1.0, %v12645_v55  ;;  %v4850_v50 = vand.u32 2147483647, %v12645_v55  ;;  %v4793_v49 = vpop.f32.mrf.mxu1  ;;  %7971 = vrcp.f32 %v12634_v51  ;;  %vm4940_vm2 = vweird.f32 %v12641_v9 }
 0x80d   : > { %v12662_v52 = vadd.f32 %v4793_v49, %v4725_v28  ;;  %7973 = vrcp.f32 %v12654_v34  ;;  %v12675_v49 = vmul.f32 0.5, %v4797_v57  ;;  %v4832_v57 = vsub.f32 %v12588_v16, %v4824_v24 }
 0x80e   : > { %v4810_v14 = vmul.f32 0.5, %v4802_v44  ;;  %v12667_v6 = vadd.f32 1.0, %v4850_v50  ;;  %v12670_v41 = vpop.eup %7965  ;;  %v4946_v31 = vand.u32 2147483648, %v12641_v9  ;;  %vm4986_vm15 = vcmp.ge.f32.partialorder %v12645_v55, 0.0 }
 0x80f   : > { %v4803_v8 = vadd.f32 1.0, %v12662_v52  ;;  %v4851_v28 = vand.u32 2147483647, %v12662_v52  ;;  %v12677_v15 = vpop.eup %7967  ;;  %v4921_v35 = vmul.f32 %v12670_v41, %v12619_v56  ;;  %vm4926_vm12 = vweird.f32 %v12670_v41 }
 0x810   : > { %v4818_v25 = vfloor.f32 %v4810_v14  ;;  %7975 = vrcp.f32 %v12667_v6  ;;  %v4959_v5 = vand.u32 2147483647, %v12667_v6  ;;  %v4961_v20 = vand.u32 2147483648, %v12667_v6  ;;  %vm4927_vm11 = vmor %vm4925_vm5, %vm4926_vm12 }
 0x811   : > { %v4811_v1 = vmul.f32 0.5, %v4803_v8  ;;  %v12682_v44 = vadd.f32 1.0, %v4851_v28  ;;  %v12684_v26 = vpop.eup %7969  ;;  %vm4955_vm8 = vweird.f32 %v12667_v6  ;;  %vm12733_vm0 = vcmp.eq.f32.partialorder %v4944_v30, 8.507059e+37 }
 0x812   : > { %v4826_v33 = vmul.f32 2.0, %v4818_v25  ;;  %v12694_v50 = vpop.eup %7971  ;;  %v4922_v25 = vsub.f32 1.0, %v4921_v35  ;;  %v4936_v10 = vmul.f32 %v12684_v26, %v12641_v9  ;;  %vm12712_vm1 = vcmp.eq.f32.partialorder %v4959_v5, 8.507059e+37 }
 0x813   : > { %v4819_v8 = vfloor.f32 %v4811_v1  ;;  %7977 = vrcp.f32 %v12682_v44  ;;  %v4976_v28 = vand.u32 2147483648, %v12682_v44  ;;  %v12703_v21 = vpop.eup %7973  ;;  %v4825_v1 = vmul.f32 2.0, %v4817_v23 }
 0x814   : > { %v4834_v24 = vsub.f32 %v12645_v55, %v4826_v33  ;;  %v4974_v4 = vand.u32 2147483647, %v12682_v44  ;;  %v4840_v33 = vand.u32 2147483647, %v4832_v57  ;;  %v4923_v60 = vmul.f32 %v12670_v41, %v4922_v25 }
 0x815   : > { %v4827_v3 = vmul.f32 2.0, %v4819_v8  ;;  %v4962_v8 = vor.u32 1.1754944e-38, %v4961_v20  ;;  %vm4941_vm13 = vweird.f32 %v12684_v26  ;;  %vm4970_vm3 = vweird.f32 %v12682_v44 }
 0x816   : > { %v7976_v19 = vpop.eup %7975  ;;  %v4842_v35 = vand.u32 2147483647, %v4834_v24  ;;  %v4977_v11 = vor.u32 1.1754944e-38, %v4976_v28  ;;  %v4924_v57 = vadd.f32 %v12670_v41, %v4923_v60  ;;  %v4937_v25 = vsub.f32 1.0, %v4936_v10 }
 0x817   : > { %v4951_v18 = vmul.f32 %v7976_v19, %v12667_v6  ;;  %v4835_v23 = vsub.f32 %v12662_v52, %v4827_v3  ;;  %vm4956_vm9 = vweird.f32 %v7976_v19  ;;  %v4833_v5 = vsub.f32 %v12609_v17, %v4825_v1 }
 0x818   : > { %v4806_v20 = vmul.f32 0.5, %v12649_v36  ;;  %vm12727_vm7 = vcmp.eq.f32.partialorder %v4974_v4, 8.507059e+37  ;;  %v4928_v60 = vsel %vm4927_vm11, %v12670_v41, %v4924_v57  ;;  %v4938_v10 = vmul.f32 %v12684_v26, %v4937_v25  ;;  %vm4942_vm11 = vmor %vm4940_vm2, %vm4941_vm13 }
 0x819   : > { %v7978_v42 = vpop.eup %7977  ;;  %v4952_v53 = vsub.f32 1.0, %v4951_v18  ;;  %v4933_v36 = vsel %vm12689_vm4, %v4932_v2, %v4928_v60  ;;  %v4891_v4 = vmul.f32 %v12694_v50, %v12634_v51  ;;  %v4843_v1 = vand.u32 2147483647, %v4835_v23  ;;  %vm4957_vm4 = vmor %vm4955_vm8, %vm4956_vm9 }
 0x81a   : > { %v4966_v3 = vmul.f32 %v7978_v42, %v12682_v44  ;;  %v4814_v28 = vfloor.f32 %v4806_v20  ;;  %v4939_v41 = vadd.f32 %v12684_v26, %v4938_v10  ;;  %v4947_v57 = vor.u32 1.1754944e-38, %v4946_v31 }
 0x81b   : > { %v4953_v18 = vmul.f32 %v7976_v19, %v4952_v53  ;;  %vm4971_vm5 = vweird.f32 %v7978_v42  ;;  %vm4987_vm12 = vcmp.ge.f32.partialorder %v12662_v52, 0.0  ;;  %v4892_v30 = vsub.f32 1.0, %v4891_v4 }
 0x81c   : > { %v4967_v61 = vsub.f32 1.0, %v4966_v3  ;;  %v4822_v53 = vmul.f32 2.0, %v4814_v28  ;;  %v4934_v14 = vmul.f32 %v4933_v36, %v12588_v16  ;;  %v4943_v31 = vsel %vm4942_vm11, %v12684_v26, %v4939_v41  ;;  %vm4972_vm8 = vmor %vm4970_vm3, %vm4971_vm5 }
 0x81d   : > { %v4954_v25 = vadd.f32 %v7976_v19, %v4953_v18  ;;  %v4899_v23 = vand.u32 2147483647, %v12634_v51  ;;  %v4841_v3 = vand.u32 2147483647, %v4833_v5  ;;  %v4948_v60 = vsel %vm12733_vm0, %v4947_v57, %v4943_v31 }
 0x81e   : > { %v4968_v2 = vmul.f32 %v7978_v42, %v4967_v61  ;;  %vm4896_vm2 = vweird.f32 %v12694_v50  ;;  %v4949_v6 = vmul.f32 %v4948_v60, %v12609_v17  ;;  %v4893_v61 = vmul.f32 %v12694_v50, %v4892_v30 }
 0x81f   : > { %v4958_v20 = vsel %vm4957_vm4, %v7976_v19, %v4954_v25  ;;  %v4830_v26 = vsub.f32 %v12570_v13, %v4822_v53  ;;  %vm4895_vm13 = vweird.f32 %v12634_v51  ;;  %v4901_v19 = vand.u32 2147483648, %v12634_v51 }
 0x820   : > { %v4963_v9 = vsel %vm12712_vm1, %v4962_v8, %v4958_v20  ;;  %v4969_v10 = vadd.f32 %v7978_v42, %v4968_v2  ;;  %v4992_v48 = vsel %vm4984_vm10, %v4840_v33, %v4934_v14  ;;  %v4894_v8 = vadd.f32 %v12694_v50, %v4893_v61  ;;  %vm4897_vm3 = vmor %vm4895_vm13, %vm4896_vm2 }
 0x821   : > { %v4964_v18 = vmul.f32 %v4963_v9, %v12645_v55  ;;  %vm4900_vm1 = vcmp.eq.f32.partialorder %v4899_v23, 8.507059e+37  ;;  %v4993_v36 = vsel %vm4985_vm6, %v4841_v3, %v4949_v6  ;;  %v4902_v51 = vor.u32 1.1754944e-38, %v4901_v19 }
 0x822   : > { %v4973_v5 = vsel %vm4972_vm8, %v7978_v42, %v4969_v10  ;;  %v4898_v33 = vsel %vm4897_vm3, %v12694_v50, %v4894_v8  ;;  %v4807_v55 = vmul.f32 0.5, %v12652_v54  ;;  %v4906_v17 = vmul.f32 %v12703_v21, %v12654_v34 }
 0x823   : > { %v4994_v56 = vsel %vm4986_vm15, %v4842_v35, %v4964_v18  ;;  %v4978_v44 = vsel %vm12727_vm7, %v4977_v11, %v4973_v5  ;;  %v12786_v35 = vadd.f32 %v4992_v48, %v11799_v39  ;;  %v4838_v11 = vand.u32 2147483647, %v4830_v26 }
 0x824   : > { %v12780_v42 = vadd.f32 %v4994_v56, %v11763_v45  ;;  %v4979_v16 = vmul.f32 %v4978_v44, %v12662_v52  ;;  %v4903_v24 = vsel %vm4900_vm1, %v4902_v51, %v4898_v33  ;;  %v4815_v4 = vfloor.f32 %v4807_v55  ;;  %v15302_v33 = vld [vmem:[#allocation46_spill] sm:$0xff]  ;;  %v15333_v56 = vld [vmem:[#allocation43_spill] sm:$0xff] }
 0x825   : > { %v4904_v28 = vmul.f32 %v4903_v24, %v12570_v13  ;;  %v4914_v50 = vand.u32 2147483647, %v12654_v34  ;;  %v12799_v39 = vadd.f32 %v4993_v36, %v11818_v29  ;;  %vm4982_vm9 = vcmp.ge.f32.partialorder %v12570_v13, 0.0  ;;  %v15303_v24 = vld [vmem:[#allocation51_spill] sm:$0xff] }
 0x826   : > { %5040 = vmatpush.msra.mxu2 %v12780_v42  ;;  %v4995_v45 = vsel %vm4987_vm12, %v4843_v1, %v4979_v16  ;;  %v4907_v41 = vsub.f32 1.0, %v4906_v17  ;;  %v4823_v25 = vmul.f32 2.0, %v4815_v4  ;;  %v4916_v52 = vand.u32 2147483648, %v12654_v34 }
 0x827   : > { %v12796_v54 = vadd.f32 %v4995_v45, %v11781_v47  ;;  %v4990_v57 = vsel %vm4982_vm9, %v4838_v11, %v4904_v28  ;;  %v15295_v1 = vfloor.f32 %v12659_v7  ;;  %vm4911_vm10 = vweird.f32 %v12703_v21 }
 0x828   : > { %5041 = vmatpush.msra.mxu2 %v12786_v35  ;;  %v12808_v47 = vadd.f32 %v4990_v57, %v11835_v63  ;;  %v4908_v29 = vmul.f32 %v12703_v21, %v4907_v41  ;;  %v4861_v13 = vmul.f32 %v12665_v40, %v12603_v27  ;;  %vm5764_vm15 = vweird.f32 %v12520_v12 }
 0x829   : > { %v4820_v53 = vmul.f32 2.0, %v15295_v1  ;;  %5069 = vmatpush.msra.mxu3 %v12796_v54  ;;  %vm4910_vm7 = vweird.f32 %v12654_v34  ;;  %vm12816_vm0 = vcmp.eq.f32.partialorder %v4914_v50, 8.507059e+37  ;;  %vm4983_vm6 = vcmp.ge.f32.partialorder %v12596_v43, 0.0 }
 0x82a   : > { %vm5809_vm5 = vweird.f32 %v12510_v38  ;;  %v15298_v63 = vsub.f32 1.0, %v12623_v62  ;;  %5042 = vmatpush.msra.mxu2 %v12808_v47  ;;  %v4831_v2 = vsub.f32 %v12596_v43, %v4823_v25  ;;  %v4909_v34 = vadd.f32 %v12703_v21, %v4908_v29  ;;  %vm4912_vm11 = vmor %vm4910_vm7, %vm4911_vm10  ;;  %v15310_v25 = vld [vmem:[#allocation39_spill] sm:$0xff]  ;;  %v5004_v29 = vld [vmem:[#allocation2 + $0x60] sm:$0xff] }
 0x82b   : > { %5070 = vmatpush.msra.mxu3 %v12799_v39  ;;  %v4862_v14 = vsub.f32 1.0, %v4861_v13  ;;  %v4871_v31 = vand.u32 2147483648, %v12603_v27  ;;  %vm5763_vm12 = vweird.f32 %v12451_v58  ;;  %v4917_v23 = vor.u32 1.1754944e-38, %v4916_v52  ;;  %v15311_v13 = vld [vmem:[#allocation36_spill] sm:$0xff] }
 0x82c   : > { %v5776_v7 = vmul.f32 %v12594_v22, %v15298_v63  ;;  %v4828_v62 = vsub.f32 %v12540_v32, %v4820_v53  ;;  %v4813_v20 = vfloor.f32 %v12675_v49  ;;  %v4876_v3 = vmul.f32 %v12677_v15, %v12617_v37  ;;  %v15312_v63 = vld [vmem:[#allocation49_spill] sm:$0xff] }
 0x82d   : > { %vm5808_vm4 = vweird.f32 %v12434_v46  ;;  %v4913_v60 = vsel %vm4912_vm11, %v12703_v21, %v4909_v34  ;;  %v4863_v9 = vmul.f32 %v12665_v40, %v4862_v14  ;;  %vm4866_vm2 = vweird.f32 %v12665_v40 }
 0x82e   : > { %v4869_v10 = vand.u32 2147483647, %v12603_v27  ;;  %v4918_v6 = vsel %vm12816_vm0, %v4917_v23, %v4913_v60  ;;  %vm4865_vm8 = vweird.f32 %v12603_v27  ;;  %v4821_v61 = vmul.f32 2.0, %v4813_v20  ;;  %v15318_v23 = vld [vmem:[#allocation18_spill] sm:$0xff]  ;;  %v15319_v20 = vld [vmem:[#allocation20_spill] sm:$0xff] }
 0x82f   : > { %v4877_v49 = vsub.f32 1.0, %v4876_v3  ;;  %vm5778_vm13 = vweird.f32 %v12524_v0  ;;  %v4839_v18 = vand.u32 2147483647, %v4831_v2  ;;  %v4919_v26 = vmul.f32 %v4918_v6, %v12596_v43  ;;  %vm4867_vm1 = vmor %vm4865_vm8, %vm4866_vm2  ;;  %v15304_v43 = vld [vmem:[#allocation35_spill] sm:$0xff]  ;;  %v15321_v60 = vld [vmem:[#allocation50_spill] sm:$0xff] }
 0x830   : > { %v4864_v21 = vadd.f32 %v12665_v40, %v4863_v9  ;;  %v4872_v19 = vor.u32 1.1754944e-38, %v4871_v31  ;;  %vm4881_vm3 = vweird.f32 %v12677_v15  ;;  %v4884_v48 = vand.u32 2147483647, %v12617_v37  ;;  %v15323_v6 = vld [vmem:[#allocation48_spill] sm:$0xff] }
 0x831   : > { %v4878_v5 = vmul.f32 %v12677_v15, %v4877_v49  ;;  %v4886_v8 = vand.u32 2147483648, %v12617_v37  ;;  %v15299_v27 = vand.u32 2147483647, %v12434_v46  ;;  %v4991_v44 = vsel %vm4983_vm6, %v4839_v18, %v4919_v26  ;;  %v15325_v26 = vld [vmem:[#allocation53_spill] sm:$0xff] }
 0x832   : > { %v4868_v36 = vsel %vm4867_vm1, %v12665_v40, %v4864_v21  ;;  %vm4870_vm10 = vcmp.eq.f32.partialorder %v4869_v10, 8.507059e+37  ;;  %vm4880_vm7 = vweird.f32 %v12617_v37  ;;  %v12863_v51 = vadd.f32 %v4991_v44, %v11853_v59  ;;  %v15326_v21 = vld [vmem:[#allocation44_spill] sm:$0xff]  ;;  %v15331_v44 = vld [vmem:[#allocation27_spill] sm:$0xff] }
 0x833   : > { %vm12854_vm9 = vcmp.eq.f32.partialorder %v15299_v27, 8.507059e+37  ;;  %v4873_v16 = vsel %vm4870_vm10, %v4872_v19, %v4868_v36  ;;  %v4829_v55 = vsub.f32 %v15302_v33, %v4821_v61  ;;  %v4879_v11 = vadd.f32 %v12677_v15, %v4878_v5  ;;  %vm4882_vm6 = vmor %vm4880_vm7, %vm4881_vm3  ;;  %v15324_v61 = vld [vmem:[#allocation45_spill] sm:$0xff]  ;;  %v15330_v27 = vld [vmem:[#allocation40_spill] sm:$0xff] }
 0x834   : > { %vm5882_vm0 = vcmp.ge.f32.partialorder %v15303_v24, 0.0  ;;  %v4836_v17 = vand.u32 2147483647, %v4828_v62  ;;  %v4874_v45 = vmul.f32 %v4873_v16, %v12540_v32  ;;  %v4887_v40 = vor.u32 1.1754944e-38, %v4886_v8  ;;  %5071 = vmatpush.msra.mxu3 %v12863_v51  ;;  %vm12880_vm10 = vmor %vm5763_vm12, %vm5764_vm15  ;;  %v15327_v19 = vld [vmem:[#allocation33_spill] sm:$0xff]  ;;  %v15338_v37 = vld [vmem:[#allocation55_spill] sm:$0xff] }
 0x835   : > { %vm5885_vm11 = vcmp.ge.f32.partialorder %v15304_v43, 0.0  ;;  %vm5779_vm2 = vweird.f32 %v12594_v22  ;;  %vm4980_vm8 = vcmp.ge.f32.partialorder %v12540_v32, 0.0  ;;  %v4883_v59 = vsel %vm4882_vm6, %v12677_v15, %v4879_v11  ;;  %vm12889_vm3 = vmor %vm5808_vm4, %vm5809_vm5  ;;  %v15309_v15 = vld [vmem:[#allocation26_spill] sm:$0xff]  ;;  %v15335_v11 = vld [vmem:[#allocation47_spill] sm:$0xff] }
 0x836   : > { %vm4885_vm1 = vcmp.eq.f32.partialorder %v4884_v48, 8.507059e+37  ;;  %v5777_v28 = vadd.f32 %v12594_v22, %v5776_v7  ;;  %v4988_v4 = vsel %vm4980_vm8, %v4836_v17, %v4874_v45  ;;  %v5766_v41 = vsel %vm12880_vm10, %v12520_v12, %v15309_v15  ;;  %v15313_v7 = vld [vmem:[#allocation37_spill] sm:$0xff]  ;;  %vm12917_vm12 = vmor %vm5778_vm13, %vm5779_vm2 }
 0x837   : > { %v4888_v50 = vsel %vm4885_vm1, %v4887_v40, %v4883_v59  ;;  %v5784_v57 = vand.u32 2147483648, %v12524_v0  ;;  %v12899_v52 = vadd.f32 %v4988_v4, %v15310_v25  ;;  %v4837_v1 = vand.u32 2147483647, %v4829_v55  ;;  %v15340_v4 = vld [vmem:[#allocation38_spill] sm:$0xff] }
 0x838   : > { %v4889_v53 = vmul.f32 %v4888_v50, %v15302_v33  ;;  %v5811_v30 = vsel %vm12889_vm3, %v12510_v38, %v15311_v13  ;;  %vm4981_vm15 = vcmp.ge.f32.partialorder %v15302_v33, 0.0  ;;  %v5802_v2 = vmul.f32 %v15313_v7, %v15312_v63  ;;  %v15334_v33 = vld [vmem:[#allocation54_spill] sm:$0xff]  ;;  %v5894_v7 = vld [vmem:[#allocation2] sm:$0xff] }
 0x839   : > { %v15314_v12 = vand.u32 2147483648, %v12434_v46  ;;  %v15315_v14 = vand.u32 2147483647, %v12451_v58  ;;  %5043 = vmatpush.msra.mxu2 %v12899_v52  ;;  %v15320_v3 = vfloor.f32 %v15319_v20  ;;  %v5781_v58 = vsel %vm12917_vm12, %v12594_v22, %v5777_v28  ;;  %v15329_v22 = vld [vmem:[#allocation60_spill] sm:$0xff]  ;;  %v5005_v25 = vld [vmem:[#allocation2 + $0x68] sm:$0xff] }
 0x83a   : > { %v4989_v38 = vsel %vm4981_vm15, %v4837_v1, %v4889_v53  ;;  %vm15322_vm4 = vcmask 261120   ;;  %v5726_v49 = vsub.f32 %v15324_v61, %v15323_v6  ;;  %v5785_v18 = vor.u32 1.1754944e-38, %v5784_v57  ;;  %v15339_v28 = vld [vmem:[#allocation52_spill] sm:$0xff]  ;;  %v5009_v20 = vld [vmem:[#allocation5 + $0x108] sm:$0xff] }
 0x83b   : > { %v5815_v34 = vor.u32 1.1754944e-38, %v15314_v12  ;;  %vm5768_vm5 = vcmp.eq.f32.partialorder %v15315_v14, 8.507059e+37  ;;  %v5719_v46 = vmul.f32 2.0, %v15320_v3  ;;  %v12929_v9 = vadd.f32 %v4989_v38, %v15321_v60  ;;  %7572 = vmatmul.msk.f32.vlgmr.msra.gmra.mxu2 %vm15322_vm4, %v5004_v29  ;;  %vm15341_vm8 = vmmov %vm15322_vm4  ;;  %v5896_v12 = vld [vmem:[#allocation2 + $0x10] sm:$0xff]  ;;  %v5012_v3 = vld [vmem:[#allocation5 + $0x120] sm:$0xff] }
 0x83c   : > { %v5771_v62 = vsel %vm5768_vm5, %v15318_v23, %v5766_v41  ;;  %5930 = vmatpush.msrb.mxu2 %v15325_v26  ;;  %v15328_v5 = vsub.f32 %v15326_v21, %v15327_v19  ;;  %v5847_v8 = vmul.f32 %v15329_v22, %v15326_v21  ;;  %v5729_v36 = vsub.f32 %v15331_v44, %v15330_v27  ;;  %vm15342_vm1 = vmmov %vm15322_vm4  ;;  %v5011_v19 = vld [vmem:[#allocation5 + $0x118] sm:$0xff]  ;;  %v5014_v27 = vld [vmem:[#allocation5 + $0x130] sm:$0xff] }
 0x83d   : > { %v5816_v10 = vsel %vm12854_vm9, %v5815_v34, %v5811_v30  ;;  %v15332_v16 = vand.u32 2147483647, %v12524_v0  ;;  %5072 = vmatpush.msra.mxu3 %v12929_v9  ;;  %v5890_v55 = vsel %vm5882_vm0, %v15334_v33, %v15333_v56  ;;  %v15336_v17 = vsub.f32 %v15312_v63, %v15335_v11  ;;  %vm15337_vm9 = vmmov %vm15322_vm4  ;;  %v5006_v30 = vld [vmem:[#allocation2 + $0x70] sm:$0xff]  ;;  %v5897_v34 = vld [vmem:[#allocation2 + $0x18] sm:$0xff] }
 0x83e   : > { %v5739_v48 = vand.u32 2147483647, %v15328_v5  ;;  %v5772_v40 = vmul.f32 %v5771_v62, %v15324_v61  ;;  %7576 = vmatmul.msk.f32.vlgmr.msra.gmra.mxu3 %vm15337_vm9, %v5004_v29  ;;  %v5893_v0 = vsel %vm5885_vm11, %v15339_v28, %v15338_v37  ;;  %5931 = vmatpush.msrb.mxu2 %v5890_v55  ;;  %vm5880_vm7 = vcmp.ge.f32.partialorder %v15312_v63, 0.0  ;;  %vm15343_vm10 = vmmov %vm15342_vm1  ;;  %v5007_v63 = vld [vmem:[#allocation2 + $0x78] sm:$0xff]  ;;  %v5008_v62 = vld [vmem:[#allocation5 + $0x100] sm:$0xff] }
 0x83f   : > { %vm5783_vm13 = vcmp.eq.f32.partialorder %v15332_v16, 8.507059e+37  ;;  %v5736_v45 = vand.u32 2147483647, %v15336_v17  ;;  %v5817_v24 = vmul.f32 %v5816_v10, %v15331_v44  ;;  %v5727_v50 = vsub.f32 %v15340_v4, %v5719_v46  ;;  %5959 = vmatpush.msrb.mxu3 %v5893_v0  ;;  %vm15344_vm3 = vmmov %vm15342_vm1  ;;  %v5010_v46 = vld [vmem:[#allocation5 + $0x110] sm:$0xff]  ;;  %v5015_v11 = vld [vmem:[#allocation5 + $0x138] sm:$0xff] }
 0x840   : > { %v5786_v59 = vsel %vm5783_vm13, %v5785_v18, %v5781_v58  ;;  %vm5883_vm0 = vcmp.ge.f32.partialorder %v15326_v21, 0.0  ;;  %v5734_v15 = vand.u32 2147483647, %v5726_v49  ;;  %v5737_v57 = vand.u32 2147483647, %v5729_v36  ;;  %vm15345_vm15 = vmmov %vm15342_vm1  ;;  %v5013_v49 = vld [vmem:[#allocation5 + $0x128] sm:$0xff] }
 0x841   : > { %v5888_v32 = vsel %vm5880_vm7, %v5736_v45, %v5802_v2  ;;  %v5891_v41 = vsel %vm5883_vm0, %v5739_v48, %v5847_v8  ;;  %vm5878_vm6 = vcmp.ge.f32.partialorder %v15324_v61, 0.0  ;;  %v5787_v43 = vmul.f32 %v5786_v59, %v15340_v4  ;;  %vm15346_vm5 = vmmov %vm15342_vm1  ;;  %v5895_v2 = vld [vmem:[#allocation2 + $0x8] sm:$0xff] }
 0x842   : > { %5932 = vmatpush.msrb.mxu2 %v5888_v32  ;;  %5960 = vmatpush.msrb.mxu3 %v5891_v41  ;;  %vm5881_vm11 = vcmp.ge.f32.partialorder %v15331_v44, 0.0  ;;  %v5886_v1 = vsel %vm5878_vm6, %v5734_v15, %v5772_v40  ;;  %v5735_v29 = vand.u32 2147483647, %v5727_v50  ;;  %vm5879_vm2 = vcmp.ge.f32.partialorder %v15340_v4, 0.0  ;;  %vm15347_vm12 = vmmov %vm15342_vm1 }
 0x843   : > { %v5889_v53 = vsel %vm5881_vm11, %v5737_v57, %v5817_v24  ;;  %7573 = vmatmul.msk.f32.gmra.mxu2 %vm15341_vm8, %v5005_v25  ;;  %vm15348_vm4 = vmmov %vm15342_vm1  ;;  %v5898_v57 = vld [vmem:[#allocation5 + $0x40] sm:$0xff] }
 0x844   : > { %5933 = vmatpush.msrb.mxu2 %v5886_v1  ;;  %5961 = vmatpush.msrb.mxu3 %v5889_v53  ;;  %v5887_v13 = vsel %vm5879_vm2, %v5735_v29, %v5787_v43  ;;  %vm15349_vm13 = vmmov %vm15342_vm1 }
 0x845   : > { %vm15350_vm9 = vmmov %vm15342_vm1 }
 0x846   : > { %5962 = vmatpush.msrb.mxu3 %v5887_v13  ;;  %vm15351_vm7 = vmmov %vm15342_vm1 }
 0x847   : > { %7577 = vmatmul.msk.f32.gmra.mxu3 %vm15342_vm1, %v5005_v25  ;;  %vm15352_vm0 = vmmov %vm15342_vm1 }
 0x848   : > { %vm15353_vm6 = vmmov %vm15352_vm0 }
 0x849   : > { %vm15354_vm11 = vmmov %vm15352_vm0 }
 0x84b   : > { %7574 = vmatmul.msk.f32.gmra.mxu2 %vm15343_vm10, %v5006_v30 }
 0x84f   : > { %7578 = vmatmul.msk.f32.gmra.mxu3 %vm15344_vm3, %v5006_v30 }
 0x853   : > { %7575 = vmatmul.msk.f32.gmra.mxu2 %vm15345_vm15, %v5007_v63 }
 0x857   : > { %7579 = vmatmul.msk.f32.gmra.mxu3 %vm15346_vm5, %v5007_v63 }
 0x85b   : > { %7588 = vmatmul.msk.f32.vlgmr.msrb.gmra.mxu2 %vm15347_vm12, %v5894_v7 }
 0x85f   : > { %7592 = vmatmul.msk.f32.vlgmr.msrb.gmra.mxu3 %vm15348_vm4, %v5894_v7 }
 0x863   : > { %7589 = vmatmul.msk.f32.gmra.mxu2 %vm15349_vm13, %v5895_v2 }
 0x867   : > { %7593 = vmatmul.msk.f32.gmra.mxu3 %vm15350_vm9, %v5895_v2 }
 0x86b   : > { %7590 = vmatmul.msk.f32.gmra.mxu2 %vm15351_vm7, %v5896_v12 }
 0x86f   : > { %7594 = vmatmul.msk.f32.gmra.mxu3 %vm15352_vm0, %v5896_v12 }
 0x873   : > { %7591 = vmatmul.msk.f32.gmra.mxu2 %vm15353_vm6, %v5897_v34 }
 0x877   : > { %7595 = vmatmul.msk.f32.gmra.mxu3 %vm15354_vm11, %v5897_v34 }
 0x8be   : > { %v5045_v14 = vpop.f32.mrf.mxu2 }
 0x8bf   : > { %v12982_v58 = vadd.f32 %v5045_v14, %v5008_v62 }
 0x8c1   : > { %v5074_v31 = vpop.f32.mrf.mxu3  ;;  %v5134_v21 = vand.u32 2147483647, %v12982_v58 }
 0x8c2   : > { %v12984_v10 = vadd.f32 %v5074_v31, %v5009_v20 }
 0x8c3   : > { %v13000_v36 = vadd.f32 1.0, %v5134_v21 }
 0x8c4   : > { %v5135_v5 = vand.u32 2147483647, %v12984_v10 }
 0x8c6   : > { %v5048_v38 = vpop.f32.mrf.mxu2  ;;  %v13003_v56 = vadd.f32 1.0, %v5135_v5 }
 0x8c7   : > { %v12988_v61 = vadd.f32 %v5048_v38, %v5010_v46 }
 0x8c9   : > { %v5136_v8 = vand.u32 2147483647, %v12988_v61 }
 0x8ca   : > { %v5077_v23 = vpop.f32.mrf.mxu3 }
 0x8cb   : > { %v12998_v44 = vadd.f32 %v5077_v23, %v5011_v19  ;;  %v13008_v17 = vadd.f32 1.0, %v5136_v8 }
 0x8cd   : > { %v5137_v40 = vand.u32 2147483647, %v12998_v44 }
 0x8ce   : > { %v5051_v60 = vpop.f32.mrf.mxu2 }
 0x8cf   : > { %v12986_v6 = vadd.f32 %v5051_v60, %v5012_v3  ;;  %v13027_v25 = vadd.f32 1.0, %v5137_v40  ;;  %v5899_v60 = vld [vmem:[#allocation5 + $0x48] sm:$0xff] }
 0x8d1   : > { %v5138_v18 = vand.u32 2147483647, %v12986_v6  ;;  %v5090_v45 = vadd.f32 1.0, %v12986_v6  ;;  %vm5274_vm9 = vcmp.ge.f32.partialorder %v12986_v6, 0.0 }
 0x8d2   : > { %v5080_v26 = vpop.f32.mrf.mxu3 }
 0x8d3   : > { %v12993_v48 = vadd.f32 1.0, %v5138_v18  ;;  %v12995_v22 = vadd.f32 %v5080_v26, %v5013_v49  ;;  %v5098_v24 = vmul.f32 0.5, %v5090_v45 }
 0x8d5   : > { %7979 = vrcp.f32 %v12993_v48  ;;  %v5139_v33 = vand.u32 2147483647, %v12995_v22  ;;  %v5219_v53 = vand.u32 2147483647, %v12993_v48  ;;  %v5106_v63 = vfloor.f32 %v5098_v24 }
 0x8d6   : > { %v5054_v16 = vpop.f32.mrf.mxu2  ;;  %7981 = vrcp.f32 %v13000_v36  ;;  %v5221_v7 = vand.u32 2147483648, %v12993_v48  ;;  %vm5215_vm2 = vweird.f32 %v12993_v48  ;;  %v5091_v21 = vadd.f32 1.0, %v12995_v22 }
 0x8d7   : > { %v13006_v55 = vadd.f32 %v5054_v16, %v5014_v27  ;;  %7983 = vrcp.f32 %v13003_v56  ;;  %v13018_v4 = vadd.f32 1.0, %v5139_v33  ;;  %v5114_v49 = vmul.f32 2.0, %v5106_v63 }
 0x8d8   : > { %7985 = vrcp.f32 %v13008_v17  ;;  %vm13051_vm8 = vcmp.eq.f32.partialorder %v5219_v53, 8.507059e+37  ;;  %v5222_v26 = vor.u32 1.1754944e-38, %v5221_v7 }
 0x8d9   : > { %v5140_v59 = vand.u32 2147483647, %v13006_v55  ;;  %v5092_v28 = vadd.f32 1.0, %v13006_v55  ;;  %vm5276_vm12 = vcmp.ge.f32.partialorder %v13006_v55, 0.0  ;;  %v5236_v7 = vand.u32 2147483648, %v13018_v4 }
 0x8da   : > { %v5083_v37 = vpop.f32.mrf.mxu3 }
 0x8db   : > { %v13015_v0 = vadd.f32 %v5083_v37, %v5015_v11  ;;  %v13020_v50 = vadd.f32 1.0, %v5140_v59  ;;  %v5100_v32 = vmul.f32 0.5, %v5092_v28  ;;  %v13022_v15 = vpop.eup %7979  ;;  %v5900_v28 = vld [vmem:[#allocation5 + $0x50] sm:$0xff] }
 0x8dc   : > { %v5211_v34 = vmul.f32 %v13022_v15, %v12993_v48  ;;  %v13039_v14 = vpop.eup %7981  ;;  %vm5216_vm15 = vweird.f32 %v13022_v15 }
 0x8dd   : > { %v5141_v41 = vand.u32 2147483647, %v13015_v0  ;;  %v5093_v43 = vadd.f32 1.0, %v13015_v0  ;;  %7987 = vrcp.f32 %v13020_v50  ;;  %v5108_v1 = vfloor.f32 %v5100_v32  ;;  %v13044_v23 = vpop.eup %7983  ;;  %vm5217_vm13 = vmor %vm5215_vm2, %vm5216_vm15 }
 0x8de   : > { %v5935_v13 = vpop.f32.mrf.mxu2  ;;  %7989 = vrcp.f32 %v13018_v4  ;;  %v5249_v31 = vand.u32 2147483647, %v13020_v50  ;;  %v5251_v38 = vand.u32 2147483648, %v13020_v50  ;;  %v13049_v46 = vpop.eup %7985  ;;  %vm5245_vm1 = vweird.f32 %v13020_v50 }
 0x8df   : > { %v13031_v29 = vadd.f32 1.0, %v5141_v41  ;;  %v5101_v30 = vmul.f32 0.5, %v5093_v43  ;;  %v13035_v2 = vadd.f32 %v5935_v13, %v5898_v57  ;;  %v5116_v12 = vmul.f32 2.0, %v5108_v1 }
 0x8e0   : > { %v5212_v27 = vsub.f32 1.0, %v5211_v34  ;;  %vm13063_vm10 = vcmp.eq.f32.partialorder %v5249_v31, 8.507059e+37  ;;  %v5252_v45 = vor.u32 1.1754944e-38, %v5251_v38  ;;  %v5122_v1 = vsub.f32 %v12986_v6, %v5114_v49 }
 0x8e1   : > { %7991 = vrcp.f32 %v13031_v29  ;;  %v6024_v62 = vand.u32 2147483647, %v13035_v2  ;;  %v5109_v3 = vfloor.f32 %v5101_v30  ;;  %v5124_v5 = vsub.f32 %v13006_v55, %v5116_v12 }
 0x8e2   : > { %7993 = vrcp.f32 %v13027_v25  ;;  %v5964_v20 = vpop.f32.mrf.mxu3  ;;  %v5264_v8 = vand.u32 2147483647, %v13031_v29  ;;  %v13060_v16 = vadd.f32 1.0, %v13035_v2  ;;  %vm5260_vm3 = vweird.f32 %v13031_v29 }
 0x8e3   : > { %v7988_v19 = vpop.eup %7987  ;;  %v13069_v59 = vadd.f32 1.0, %v6024_v62  ;;  %v13071_v37 = vadd.f32 %v5964_v20, %v5899_v60  ;;  %v5117_v24 = vmul.f32 2.0, %v5109_v3  ;;  %v5266_v32 = vand.u32 2147483648, %v13031_v29 }
 0x8e4   : > { %v5241_v33 = vmul.f32 %v7988_v19, %v13020_v50  ;;  %v13067_v40 = vpop.eup %7989  ;;  %v5213_v53 = vmul.f32 %v13022_v15, %v5212_v27  ;;  %v5132_v30 = vand.u32 2147483647, %v5124_v5  ;;  %vm5246_vm5 = vweird.f32 %v7988_v19  ;;  %v5901_v27 = vld [vmem:[#allocation5 + $0x58] sm:$0xff] }
 0x8e5   : > { %vm13082_vm4 = vcmp.eq.f32.partialorder %v5264_v8, 8.507059e+37  ;;  %v5099_v38 = vmul.f32 0.5, %v5091_v21  ;;  %7995 = vrcp.f32 %v13069_v59  ;;  %v6025_v62 = vand.u32 2147483647, %v13071_v37  ;;  %vm5247_vm0 = vmor %vm5245_vm1, %vm5246_vm5 }
 0x8e6   : > { %v5938_v57 = vpop.f32.mrf.mxu2  ;;  %v5242_v43 = vsub.f32 1.0, %v5241_v33  ;;  %v5214_v31 = vadd.f32 %v13022_v15, %v5213_v53  ;;  %v5226_v60 = vmul.f32 %v13067_v40, %v13018_v4  ;;  %v5125_v5 = vsub.f32 %v13015_v0, %v5117_v24 }
 0x8e7   : > { %v7992_v41 = vpop.eup %7991  ;;  %v13086_v12 = vadd.f32 %v5938_v57, %v5900_v28  ;;  %vm5277_vm7 = vcmp.ge.f32.partialorder %v13015_v0, 0.0  ;;  %v5107_v8 = vfloor.f32 %v5099_v38  ;;  %v5267_v53 = vor.u32 1.1754944e-38, %v5266_v32 }
 0x8e8   : > { %v13078_v13 = vpop.eup %7993  ;;  %v5256_v63 = vmul.f32 %v7992_v41, %v13031_v29  ;;  %v5243_v34 = vmul.f32 %v7988_v19, %v5242_v43  ;;  %v5218_v21 = vsel %vm5217_vm13, %v13022_v15, %v5214_v31  ;;  %vm5261_vm6 = vweird.f32 %v7992_v41  ;;  %v5902_v43 = vld [vmem:[#allocation5 + $0x60] sm:$0xff] }
 0x8e9   : > { %v5223_v33 = vsel %vm13051_vm8, %v5222_v26, %v5218_v21  ;;  %v5227_v28 = vsub.f32 1.0, %v5226_v60  ;;  %v6026_v57 = vand.u32 2147483647, %v13086_v12  ;;  %v5115_v31 = vmul.f32 2.0, %v5107_v8  ;;  %vm5262_vm11 = vmor %vm5260_vm3, %vm5261_vm6  ;;  %v5903_v60 = vld [vmem:[#allocation5 + $0x68] sm:$0xff] }
 0x8ea   : > { %v5967_v20 = vpop.f32.mrf.mxu3  ;;  %v5257_v3 = vsub.f32 1.0, %v5256_v63  ;;  %v5244_v49 = vadd.f32 %v7988_v19, %v5243_v34  ;;  %v5130_v63 = vand.u32 2147483647, %v5122_v1  ;;  %v5133_v26 = vand.u32 2147483647, %v5125_v5 }
 0x8eb   : > { %v5228_v50 = vmul.f32 %v13067_v40, %v5227_v28  ;;  %v13110_v38 = vadd.f32 %v5967_v20, %v5901_v27  ;;  %v13117_v32 = vpop.eup %7995  ;;  %vm5231_vm2 = vweird.f32 %v13067_v40  ;;  %v13123_v20 = vadd.f32 1.0, %v6026_v57 }
 0x8ec   : > { %v5258_v48 = vmul.f32 %v7992_v41, %v5257_v3  ;;  %v5248_v24 = vsel %vm5247_vm0, %v7988_v19, %v5244_v49  ;;  %v5224_v19 = vmul.f32 %v5223_v33, %v12986_v6  ;;  %vm5230_vm8 = vweird.f32 %v13018_v4 }
 0x8ed   : > { %v5253_v15 = vsel %vm13063_vm10, %v5252_v45, %v5248_v24  ;;  %v5229_v1 = vadd.f32 %v13067_v40, %v5228_v50  ;;  %v5123_v8 = vsub.f32 %v12995_v22, %v5115_v31  ;;  %v5234_v27 = vand.u32 2147483647, %v13018_v4  ;;  %vm13137_vm1 = vmor %vm5230_vm8, %vm5231_vm2 }
 0x8ee   : > { %v5259_v34 = vadd.f32 %v7992_v41, %v5258_v48  ;;  %v5941_v3 = vpop.f32.mrf.mxu2  ;;  %v5254_v18 = vmul.f32 %v5253_v15, %v13006_v55  ;;  %v6027_v48 = vand.u32 2147483647, %v13110_v38  ;;  %v5282_v55 = vsel %vm5274_vm9, %v5130_v63, %v5224_v19 }
 0x8ef   : > { %v13119_v11 = vadd.f32 %v5941_v3, %v5902_v43  ;;  %v5088_v33 = vadd.f32 1.0, %v12988_v61  ;;  %v5233_v43 = vsel %vm13137_vm1, %v13067_v40, %v5229_v1  ;;  %v5181_v6 = vmul.f32 %v13049_v46, %v13008_v17 }
 0x8f0   : > { %v5263_v45 = vsel %vm5262_vm11, %v7992_v41, %v5259_v34  ;;  %v5284_v49 = vsel %vm5276_vm12, %v5132_v30, %v5254_v18  ;;  %7997 = vrcp.f32 %v13123_v20  ;;  %v5237_v4 = vor.u32 1.1754944e-38, %v5236_v7  ;;  %v5905_v30 = vld [vmem:[#allocation5 + $0x78] sm:$0xff] }
 0x8f1   : > { %v5268_v29 = vsel %vm13082_vm4, %v5267_v53, %v5263_v45  ;;  %v6028_v5 = vand.u32 2147483647, %v13119_v11  ;;  %5322 = vmatpush.msrb.mxu0 %v5284_v49  ;;  %v5096_v53 = vmul.f32 0.5, %v5088_v33  ;;  %v5131_v63 = vand.u32 2147483647, %v5123_v8 }
 0x8f2   : > { %v5970_v21 = vpop.f32.mrf.mxu3  ;;  %v5269_v41 = vmul.f32 %v5268_v29, %v13015_v0  ;;  %vm5235_vm10 = vcmp.eq.f32.partialorder %v5234_v27, 8.507059e+37  ;;  %v5182_v15 = vsub.f32 1.0, %v5181_v6  ;;  %v5189_v0 = vand.u32 2147483647, %v13008_v17 }
 0x8f3   : > { %v13143_v28 = vadd.f32 %v5970_v21, %v5903_v60  ;;  %5323 = vmatpush.msrb.mxu0 %v5282_v55  ;;  %v13153_v24 = vadd.f32 1.0, %v6028_v5  ;;  %v5238_v34 = vsel %vm5235_vm10, %v5237_v4, %v5233_v43  ;;  %vm5275_vm3 = vcmp.ge.f32.partialorder %v12995_v22, 0.0  ;;  %v5904_v21 = vld [vmem:[#allocation5 + $0x70] sm:$0xff] }
 0x8f4   : > { %v5285_v57 = vsel %vm5277_vm7, %v5133_v26, %v5269_v41  ;;  %v5104_v31 = vfloor.f32 %v5096_v53  ;;  %v5191_v40 = vand.u32 2147483648, %v13008_v17  ;;  %v5239_v3 = vmul.f32 %v5238_v34, %v12995_v22 }
 0x8f5   : > { %5351 = vmatpush.msrb.mxu1 %v5285_v57  ;;  %v6029_v50 = vand.u32 2147483647, %v13143_v28  ;;  %v5183_v18 = vmul.f32 %v13049_v46, %v5182_v15  ;;  %vm5186_vm15 = vweird.f32 %v13049_v46  ;;  %7999 = vrcp.f32 %v13153_v24 }
 0x8f6   : > { %v5112_v26 = vmul.f32 2.0, %v5104_v31  ;;  %vm5185_vm5 = vweird.f32 %v13008_v17  ;;  %v5089_v19 = vadd.f32 1.0, %v12998_v44  ;;  %v5283_v45 = vsel %vm5275_vm3, %v5131_v63, %v5239_v3  ;;  %v13172_v49 = vpop.eup %7997  ;;  %v5944_v41 = vpop.f32.mrf.mxu2 }
 0x8f7   : > { %v5184_v1 = vadd.f32 %v13049_v46, %v5183_v18  ;;  %vm13166_vm12 = vcmp.eq.f32.partialorder %v5189_v0, 8.507059e+37  ;;  %v5196_v22 = vmul.f32 %v13078_v13, %v13027_v25  ;;  %5352 = vmatpush.msrb.mxu1 %v5283_v45  ;;  %vm5187_vm4 = vmor %vm5185_vm5, %vm5186_vm15  ;;  %v5192_v5 = vor.u32 1.1754944e-38, %v5191_v40 }
 0x8f8   : > { %v5120_v29 = vsub.f32 %v12988_v61, %v5112_v26  ;;  %vm5272_vm13 = vcmp.ge.f32.partialorder %v12988_v61, 0.0  ;;  %v5097_v17 = vmul.f32 0.5, %v5089_v19  ;;  %vm5200_vm9 = vweird.f32 %v13027_v25 }
 0x8f9   : > { %v5188_v8 = vsel %vm5187_vm4, %v13049_v46, %v5184_v1  ;;  %v5197_v27 = vsub.f32 1.0, %v5196_v22  ;;  %v5206_v55 = vand.u32 2147483648, %v13027_v25  ;;  %vm5201_vm7 = vweird.f32 %v13078_v13 }
 0x8fa   : > { %v5973_v7 = vpop.f32.mrf.mxu3  ;;  %v5193_v33 = vsel %vm13166_vm12, %v5192_v5, %v5188_v8  ;;  %v5105_v57 = vfloor.f32 %v5097_v17  ;;  %v5204_v43 = vand.u32 2147483647, %v13027_v25  ;;  %v5128_v6 = vand.u32 2147483647, %v5120_v29  ;;  %vm5202_vm0 = vmor %vm5200_vm9, %vm5201_vm7 }
 0x8fb   : > { %v5194_v4 = vmul.f32 %v5193_v33, %v12988_v61  ;;  %v5198_v46 = vmul.f32 %v13078_v13, %v5197_v27  ;;  %v13185_v53 = vadd.f32 %v5944_v41, %v5904_v21  ;;  %v13187_v63 = vpop.eup %7999  ;;  %v13189_v0 = vadd.f32 %v5973_v7, %v5905_v30 }
 0x8fc   : > { %v5113_v15 = vmul.f32 2.0, %v5105_v57  ;;  %v5086_v34 = vadd.f32 1.0, %v12982_v58  ;;  %v5151_v31 = vmul.f32 %v13039_v14, %v13000_v36  ;;  %v5207_v18 = vor.u32 1.1754944e-38, %v5206_v55 }
 0x8fd   : > { %v5280_v40 = vsel %vm5272_vm13, %v5128_v6, %v5194_v4  ;;  %v5199_v3 = vadd.f32 %v13078_v13, %v5198_v46  ;;  %v6030_v26 = vand.u32 2147483647, %v13185_v53  ;;  %v6031_v45 = vand.u32 2147483647, %v13189_v0 }
 0x8fe   : > { %5324 = vmatpush.msrb.mxu0 %v5280_v40  ;;  %v5121_v19 = vsub.f32 %v12998_v44, %v5113_v15  ;;  %v5094_v1 = vmul.f32 0.5, %v5086_v34  ;;  %v5152_v60 = vsub.f32 1.0, %v5151_v31  ;;  %vm5205_vm6 = vcmp.eq.f32.partialorder %v5204_v43, 8.507059e+37 }
 0x8ff   : > { %v5203_v61 = vsel %vm5202_vm0, %v13078_v13, %v5199_v3  ;;  %v13205_v22 = vadd.f32 1.0, %v6030_v26  ;;  %vm5156_vm11 = vweird.f32 %v13039_v14  ;;  %v5159_v21 = vand.u32 2147483647, %v13000_v36 }
 0x900   : > { %v5129_v29 = vand.u32 2147483647, %v5121_v19  ;;  %v5208_v5 = vsel %vm5205_vm6, %v5207_v18, %v5203_v61  ;;  %v5102_v17 = vfloor.f32 %v5094_v1  ;;  %v13211_v25 = vadd.f32 1.0, %v6031_v45 }
 0x901   : > { %v5209_v41 = vmul.f32 %v5208_v5, %v12998_v44  ;;  %8001 = vrcp.f32 %v13205_v22  ;;  %v5153_v8 = vmul.f32 %v13039_v14, %v5152_v60  ;;  %vm5273_vm2 = vcmp.ge.f32.partialorder %v12998_v44, 0.0 }
 0x902   : > { %v5110_v13 = vmul.f32 2.0, %v5102_v17  ;;  %vm5155_vm8 = vweird.f32 %v13000_v36  ;;  %v5161_v27 = vand.u32 2147483648, %v13000_v36  ;;  %v5087_v7 = vadd.f32 1.0, %v12984_v10 }
 0x903   : > { %v5281_v55 = vsel %vm5273_vm2, %v5129_v29, %v5209_v41  ;;  %v5154_v30 = vadd.f32 %v13039_v14, %v5153_v8  ;;  %v5166_v33 = vmul.f32 %v13044_v23, %v13003_v56  ;;  %v13223_v57 = vadd.f32 1.0, %v6029_v50  ;;  %vm5157_vm1 = vmor %vm5155_vm8, %vm5156_vm11 }
 0x904   : > { %5353 = vmatpush.msrb.mxu1 %v5281_v55  ;;  %v5118_v44 = vsub.f32 %v12982_v58, %v5110_v13  ;;  %vm5160_vm10 = vcmp.eq.f32.partialorder %v5159_v21, 8.507059e+37  ;;  %v5162_v36 = vor.u32 1.1754944e-38, %v5161_v27  ;;  %8003 = vrcp.f32 %v13211_v25 }
 0x905   : > { %v5158_v43 = vsel %vm5157_vm1, %v13039_v14, %v5154_v30  ;;  %v5095_v6 = vmul.f32 0.5, %v5087_v7  ;;  %v5167_v4 = vsub.f32 1.0, %v5166_v33  ;;  %vm5171_vm3 = vweird.f32 %v13044_v23  ;;  %v5286_v14 = vld [vmem:[#allocation2 + $0x80] sm:$0xff] }
 0x906   : > { %v5163_v46 = vsel %vm5160_vm10, %v5162_v36, %v5158_v43  ;;  %v5174_v50 = vand.u32 2147483647, %v13003_v56  ;;  %v5176_v15 = vand.u32 2147483648, %v13003_v56  ;;  %v5126_v31 = vand.u32 2147483647, %v5118_v44 }
 0x907   : > { %v8002_v34 = vpop.eup %8001  ;;  %v5164_v40 = vmul.f32 %v5163_v46, %v12982_v58  ;;  %v5103_v3 = vfloor.f32 %v5095_v6  ;;  %v5168_v18 = vmul.f32 %v13044_v23, %v5167_v4  ;;  %v13237_v26 = vadd.f32 1.0, %v6027_v48  ;;  %v5287_v4 = vld [vmem:[#allocation2 + $0x88] sm:$0xff] }
 0x908   : > { %8005 = vrcp.f32 %v13223_v57  ;;  %vm5270_vm15 = vcmp.ge.f32.partialorder %v12982_v58, 0.0  ;;  %vm5170_vm5 = vweird.f32 %v13003_v56  ;;  %v5982_v60 = vadd.f32 1.0, %v13185_v53 }
 0x909   : > { %v5278_v19 = vsel %vm5270_vm15, %v5126_v31, %v5164_v40  ;;  %v5111_v45 = vmul.f32 2.0, %v5103_v3  ;;  %v5169_v1 = vadd.f32 %v13044_v23, %v5168_v18  ;;  %vm5172_vm12 = vmor %vm5170_vm5, %vm5171_vm3  ;;  %v5177_v61 = vor.u32 1.1754944e-38, %v5176_v15 }
 0x90a   : > { %5325 = vmatpush.msrb.mxu0 %v5278_v19  ;;  %vm5271_vm4 = vcmp.ge.f32.partialorder %v12984_v10, 0.0  ;;  %v6131_v48 = vmul.f32 %v8002_v34, %v13205_v22  ;;  %v6139_v58 = vand.u32 2147483647, %v13205_v22  ;;  %v8004_v29 = vpop.eup %8003  ;;  %vm5175_vm13 = vcmp.eq.f32.partialorder %v5174_v50, 8.507059e+37 }
 0x90b   : > { %v5119_v56 = vsub.f32 %v12984_v10, %v5111_v45  ;;  %v5173_v5 = vsel %vm5172_vm12, %v13044_v23, %v5169_v1  ;;  %vm15365_vm9 = vcmask 261120   ;;  %v5990_v17 = vmul.f32 0.5, %v5982_v60  ;;  %v5288_v23 = vld [vmem:[#allocation2 + $0x90] sm:$0xff] }
 0x90c   : > { %7580 = vmatmul.msk.f32.vlgmr.msrb.gmra.mxu0 %vm15365_vm9, %v5286_v14  ;;  %v5178_v21 = vsel %vm5175_vm13, %v5177_v61, %v5173_v5  ;;  %v6132_v41 = vsub.f32 1.0, %v6131_v48  ;;  %vm6135_vm7 = vweird.f32 %v13205_v22  ;;  %v6141_v8 = vand.u32 2147483648, %v13205_v22  ;;  %vm15368_vm2 = vmmov %vm15365_vm9 }
 0x90d   : > { %v5127_v13 = vand.u32 2147483647, %v5119_v56  ;;  %v5179_v27 = vmul.f32 %v5178_v21, %v12984_v10  ;;  %v5998_v55 = vfloor.f32 %v5990_v17  ;;  %vm6136_vm0 = vweird.f32 %v8002_v34  ;;  %vm15369_vm3 = vmmov %vm15368_vm2 }
 0x90e   : > { %v13255_v30 = vpop.eup %8005  ;;  %v6133_v7 = vmul.f32 %v8002_v34, %v6132_v41  ;;  %vm13257_vm6 = vcmp.eq.f32.partialorder %v6139_v58, 8.507059e+37  ;;  %v5983_v33 = vadd.f32 1.0, %v13189_v0  ;;  %v6146_v44 = vmul.f32 %v8004_v29, %v13211_v25  ;;  %vm6137_vm8 = vmor %vm6135_vm7, %vm6136_vm0 }
 0x90f   : > { %v5279_v36 = vsel %vm5271_vm4, %v5127_v13, %v5179_v27  ;;  %v6006_v43 = vmul.f32 2.0, %v5998_v55  ;;  %vm6166_vm11 = vcmp.ge.f32.partialorder %v13185_v53, 0.0  ;;  %v6154_v6 = vand.u32 2147483647, %v13211_v25  ;;  %vm15372_vm9 = vmmov %vm15368_vm2 }
 0x910   : > { %5354 = vmatpush.msrb.mxu1 %v5279_v36  ;;  %v6134_v46 = vadd.f32 %v8002_v34, %v6133_v7  ;;  %v6142_v50 = vor.u32 1.1754944e-38, %v6141_v8  ;;  %v5991_v15 = vmul.f32 0.5, %v5983_v33  ;;  %v6147_v31 = vsub.f32 1.0, %v6146_v44 }
 0x911   : > { %7584 = vmatmul.msk.f32.vlgmr.msrb.gmra.mxu1 %vm15368_vm2, %v5286_v14  ;;  %v6014_v40 = vsub.f32 %v13185_v53, %v6006_v43  ;;  %vm6150_vm1 = vweird.f32 %v13211_v25  ;;  %v6156_v10 = vand.u32 2147483648, %v13211_v25  ;;  %v5980_v3 = vadd.f32 1.0, %v13119_v11 }
 0x912   : > { %v6138_v18 = vsel %vm6137_vm8, %v8002_v34, %v6134_v46  ;;  %v5999_v19 = vfloor.f32 %v5991_v15  ;;  %v6148_v45 = vmul.f32 %v8004_v29, %v6147_v31  ;;  %vm6151_vm10 = vweird.f32 %v8004_v29 }
 0x913   : > { %v6143_v14 = vsel %vm13257_vm6, %v6142_v50, %v6138_v18  ;;  %vm13278_vm15 = vcmp.eq.f32.partialorder %v6154_v6, 8.507059e+37  ;;  %v5988_v22 = vmul.f32 0.5, %v5980_v3  ;;  %v6101_v60 = vmul.f32 %v13187_v63, %v13153_v24  ;;  %vm6152_vm5 = vmor %vm6150_vm1, %vm6151_vm10 }
 0x914   : > { %7581 = vmatmul.msk.f32.gmra.mxu0 %vm15369_vm3, %v5287_v4  ;;  %v6022_v61 = vand.u32 2147483647, %v6014_v40  ;;  %v6144_v48 = vmul.f32 %v6143_v14, %v13185_v53  ;;  %v6007_v34 = vmul.f32 2.0, %v5999_v19  ;;  %v6149_v58 = vadd.f32 %v8004_v29, %v6148_v45  ;;  %vm15373_vm6 = vmmov %vm15368_vm2 }
 0x915   : > { %v6157_v56 = vor.u32 1.1754944e-38, %v6156_v10  ;;  %v5996_v5 = vfloor.f32 %v5988_v22  ;;  %v6102_v17 = vsub.f32 1.0, %v6101_v60  ;;  %v6109_v21 = vand.u32 2147483647, %v13153_v24 }
 0x916   : > { %v13290_v41 = vsel %vm6166_vm11, %v6022_v61, %v6144_v48  ;;  %v6015_v8 = vsub.f32 %v13189_v0, %v6007_v34  ;;  %v6153_v13 = vsel %vm6152_vm5, %v8004_v29, %v6149_v58  ;;  %v6111_v27 = vand.u32 2147483648, %v13153_v24  ;;  %v5289_v48 = vld [vmem:[#allocation2 + $0x98] sm:$0xff]  ;;  %vm15374_vm5 = vmmov %vm15369_vm3 }
 0x917   : > { %6220 = vmatpush.msra.mxu0 %v13290_v41  ;;  %v6158_v25 = vsel %vm13278_vm15, %v6157_v56, %v6153_v13  ;;  %v6004_v55 = vmul.f32 2.0, %v5996_v5  ;;  %v6103_v7 = vmul.f32 %v13187_v63, %v6102_v17  ;;  %vm6106_vm12 = vweird.f32 %v13187_v63 }
 0x918   : > { %v6023_v33 = vand.u32 2147483647, %v6015_v8  ;;  %v6159_v53 = vmul.f32 %v6158_v25, %v13189_v0  ;;  %vm6167_vm4 = vcmp.ge.f32.partialorder %v13189_v0, 0.0  ;;  %vm6105_vm13 = vweird.f32 %v13153_v24 }
 0x919   : > { %7585 = vmatmul.msk.f32.gmra.mxu1 %vm15372_vm9, %v5287_v4  ;;  %v6012_v29 = vsub.f32 %v13119_v11, %v6004_v55  ;;  %v6104_v44 = vadd.f32 %v13187_v63, %v6103_v7  ;;  %v5981_v36 = vadd.f32 1.0, %v13143_v28  ;;  %v6116_v43 = vmul.f32 %v13255_v30, %v13223_v57  ;;  %vm6107_vm7 = vmor %vm6105_vm13, %vm6106_vm12 }
 0x91a   : > { %8007 = vrcp.f32 %v13237_v26  ;;  %v13309_v6 = vsel %vm6167_vm4, %v6023_v33, %v6159_v53  ;;  %vm6110_vm0 = vcmp.eq.f32.partialorder %v6109_v21, 8.507059e+37  ;;  %v6112_v0 = vor.u32 1.1754944e-38, %v6111_v27 }
 0x91b   : > { %6249 = vmatpush.msra.mxu1 %v13309_v6  ;;  %v6108_v24 = vsel %vm6107_vm7, %v13187_v63, %v6104_v44  ;;  %v5989_v4 = vmul.f32 0.5, %v5981_v36  ;;  %v6117_v46 = vsub.f32 1.0, %v6116_v43  ;;  %vm6121_vm11 = vweird.f32 %v13255_v30 }
 0x91c   : > { %7582 = vmatmul.msk.f32.gmra.mxu0 %vm15373_vm6, %v5288_v23  ;;  %v6020_v50 = vand.u32 2147483647, %v6012_v29  ;;  %v6113_v15 = vsel %vm6110_vm0, %v6112_v0, %v6108_v24  ;;  %v6124_v31 = vand.u32 2147483647, %v13223_v57  ;;  %v6126_v40 = vand.u32 2147483648, %v13223_v57  ;;  %vm15375_vm0 = vmmov %vm15369_vm3 }
 0x91d   : > { %v6114_v10 = vmul.f32 %v6113_v15, %v13119_v11  ;;  %v5997_v3 = vfloor.f32 %v5989_v4  ;;  %v6118_v18 = vmul.f32 %v13255_v30, %v6117_v46  ;;  %v5978_v19 = vadd.f32 1.0, %v13086_v12 }
 0x91e   : > { %v13322_v63 = vadd.f32 1.0, %v6025_v62  ;;  %vm6164_vm2 = vcmp.ge.f32.partialorder %v13119_v11, 0.0  ;;  %vm6120_vm8 = vweird.f32 %v13223_v57  ;;  %v6071_v45 = vmul.f32 %v13172_v49, %v13123_v20 }
 0x91f   : > { %v13328_v14 = vsel %vm6164_vm2, %v6020_v50, %v6114_v10  ;;  %v6005_v1 = vmul.f32 2.0, %v5997_v3  ;;  %v6119_v22 = vadd.f32 %v13255_v30, %v6118_v18  ;;  %v5986_v60 = vmul.f32 0.5, %v5978_v19  ;;  %vm6122_vm1 = vmor %vm6120_vm8, %vm6121_vm11 }
 0x920   : > { %v13331_v61 = vpop.eup %8007  ;;  %6221 = vmatpush.msra.mxu0 %v13328_v14  ;;  %vm6125_vm10 = vcmp.eq.f32.partialorder %v6124_v31, 8.507059e+37  ;;  %v6127_v62 = vor.u32 1.1754944e-38, %v6126_v40  ;;  %v6072_v11 = vsub.f32 1.0, %v6071_v45  ;;  %v6081_v57 = vand.u32 2147483648, %v13123_v20 }
 0x921   : > { %7586 = vmatmul.msk.f32.gmra.mxu1 %vm15369_vm3, %v5288_v23  ;;  %v6013_v34 = vsub.f32 %v13143_v28, %v6005_v1  ;;  %v6123_v58 = vsel %vm6122_vm1, %v13255_v30, %v6119_v22  ;;  %v5994_v56 = vfloor.f32 %v5986_v60  ;;  %v5979_v5 = vadd.f32 1.0, %v13110_v38 }
 0x922   : > { %v6128_v17 = vsel %vm6125_vm10, %v6127_v62, %v6123_v58  ;;  %v6073_v21 = vmul.f32 %v13172_v49, %v6072_v11  ;;  %vm6076_vm15 = vweird.f32 %v13172_v49  ;;  %v6079_v8 = vand.u32 2147483647, %v13123_v20  ;;  %v15376_v11 = vld [vmem:[#allocation28_spill] sm:$0xff]  ;;  %v15379_v58 = vld [vmem:[#allocation30_spill] sm:$0xff] }
 0x923   : > { %v6021_v13 = vand.u32 2147483647, %v6013_v34  ;;  %v6129_v27 = vmul.f32 %v6128_v17, %v13143_v28  ;;  %v6002_v25 = vmul.f32 2.0, %v5994_v56  ;;  %v5987_v55 = vmul.f32 0.5, %v5979_v5 }
 0x924   : > { %7583 = vmatmul.msk.f32.gmra.mxu0 %vm15374_vm5, %v5289_v48  ;;  %vm6165_vm12 = vcmp.ge.f32.partialorder %v13143_v28, 0.0  ;;  %v6074_v30 = vadd.f32 %v13172_v49, %v6073_v21  ;;  %vm6075_vm4 = vweird.f32 %v13123_v20  ;;  %v6086_v7 = vmul.f32 %v13331_v61, %v13237_v26 }
 0x925   : > { %v13351_v23 = vsel %vm6165_vm12, %v6021_v13, %v6129_v27  ;;  %v6010_v33 = vsub.f32 %v13086_v12, %v6002_v25  ;;  %vm6077_vm13 = vmor %vm6075_vm4, %vm6076_vm15  ;;  %v6082_v53 = vor.u32 1.1754944e-38, %v6081_v57  ;;  %v5995_v29 = vfloor.f32 %v5987_v55  ;;  %v15377_v57 = vld [vmem:[#allocation32_spill] sm:$0xff] }
 0x926   : > { %8009 = vrcp.f32 %v13322_v63  ;;  %6250 = vmatpush.msra.mxu1 %v13351_v23  ;;  %v6078_v28 = vsel %vm6077_vm13, %v13172_v49, %v6074_v30  ;;  %vm6080_vm9 = vcmp.eq.f32.partialorder %v6079_v8, 8.507059e+37  ;;  %v6087_v44 = vsub.f32 1.0, %v6086_v7 }
 0x927   : > { %v6083_v36 = vsel %vm6080_vm9, %v6082_v53, %v6078_v28  ;;  %v6003_v20 = vmul.f32 2.0, %v5995_v29  ;;  %vm6091_vm7 = vweird.f32 %v13331_v61  ;;  %v6096_v43 = vand.u32 2147483648, %v13237_v26 }
 0x928   : > { %v6018_v0 = vand.u32 2147483647, %v6010_v33  ;;  %v6084_v24 = vmul.f32 %v6083_v36, %v13086_v12  ;;  %v6088_v4 = vmul.f32 %v13331_v61, %v6087_v44  ;;  %v6094_v46 = vand.u32 2147483647, %v13237_v26  ;;  %v15381_v36 = vld [vmem:[#allocation29_spill] sm:$0xff] }
 0x929   : > { %v5977_v50 = vadd.f32 1.0, %v13071_v37  ;;  %7587 = vmatmul.msk.f32.gmra.mxu1 %vm15375_vm0, %v5289_v48  ;;  %vm6162_vm6 = vcmp.ge.f32.partialorder %v13086_v12, 0.0  ;;  %v5984_v49 = vmul.f32 0.5, %v13060_v16  ;;  %v6041_v15 = vmul.f32 %v13117_v32, %v13069_v59 }
 0x92a   : > { %v13368_v31 = vsel %vm6162_vm6, %v6018_v0, %v6084_v24  ;;  %v6011_v40 = vsub.f32 %v13110_v38, %v6003_v20  ;;  %v6089_v10 = vadd.f32 %v13331_v61, %v6088_v4  ;;  %vm6090_vm11 = vweird.f32 %v13237_v26  ;;  %v15383_v20 = vld [vmem:[#allocation31_spill] sm:$0xff] }
 0x92b   : > { %6222 = vmatpush.msra.mxu0 %v13368_v31  ;;  %vm6092_vm2 = vmor %vm6090_vm11, %vm6091_vm7  ;;  %v6097_v3 = vor.u32 1.1754944e-38, %v6096_v43  ;;  %vm6163_vm8 = vcmp.ge.f32.partialorder %v13110_v38, 0.0  ;;  %v5992_v16 = vfloor.f32 %v5984_v49  ;;  %v6042_v12 = vsub.f32 1.0, %v6041_v15 }
 0x92c   : > { %v8010_v18 = vpop.eup %8009  ;;  %v6093_v19 = vsel %vm6092_vm2, %v13331_v61, %v6089_v10  ;;  %vm6095_vm1 = vcmp.eq.f32.partialorder %v6094_v46, 8.507059e+37  ;;  %vm6046_vm10 = vweird.f32 %v13117_v32  ;;  %v6051_v45 = vand.u32 2147483648, %v13069_v59 }
 0x92d   : > { %v6098_v1 = vsel %vm6095_vm1, %v6097_v3, %v6093_v19  ;;  %v6000_v26 = vmul.f32 2.0, %v5992_v16  ;;  %v6043_v22 = vmul.f32 %v13117_v32, %v6042_v12  ;;  %v6049_v60 = vand.u32 2147483647, %v13069_v59  ;;  %v6186_v12 = vld [vmem:[#allocation2 + $0x30] sm:$0xff] }
 0x92e   : > { %v6019_v48 = vand.u32 2147483647, %v6011_v40  ;;  %v6099_v62 = vmul.f32 %v6098_v1, %v13110_v38  ;;  %vm15378_vm3 = vcmp.eq.s32.totalorder %v15377_v57, 0  ;;  %vm15380_vm15 = vcmp.eq.s32.totalorder %v15377_v57, 1 }
 0x92f   : > { %v5640_v34 = vsel %vm15378_vm3, %v15376_v11, 0.0  ;;  %v5678_v61 = vsel %vm15380_vm15, %v15379_v58, 0.0  ;;  %v6008_v56 = vsub.f32 %v13035_v2, %v6000_v26  ;;  %v6044_v5 = vadd.f32 %v13117_v32, %v6043_v22  ;;  %vm15382_vm7 = vmmov %vm15378_vm3  ;;  %v5292_v11 = vld [vmem:[#allocation5 + $0x150] sm:$0xff] }
 0x930   : > { %vm6045_vm5 = vweird.f32 %v13069_v59  ;;  %v5985_v17 = vmul.f32 0.5, %v5977_v50  ;;  %v13394_v21 = vsel %vm6163_vm8, %v6019_v48, %v6099_v62  ;;  %v6052_v8 = vor.u32 1.1754944e-38, %v6051_v45  ;;  %vm15384_vm0 = vmmov %vm15380_vm15 }
 0x931   : > { %vm6047_vm12 = vmor %vm6045_vm5, %vm6046_vm10  ;;  %v6056_v13 = vmul.f32 %v8010_v18, %v13322_v63  ;;  %6251 = vmatpush.msra.mxu1 %v13394_v21  ;;  %vm6050_vm4 = vcmp.eq.f32.partialorder %v6049_v60, 8.507059e+37  ;;  %v5686_v55 = vadd.f32 %v5678_v61, %v5640_v34  ;;  %v6016_v7 = vand.u32 2147483647, %v6008_v56  ;;  %v5291_v60 = vld [vmem:[#allocation5 + $0x148] sm:$0xff] }
 0x932   : > { %v6048_v27 = vsel %vm6047_vm12, %v13117_v32, %v6044_v5  ;;  %v5993_v25 = vfloor.f32 %v5985_v17  ;;  %v6066_v53 = vand.u32 2147483648, %v13322_v63  ;;  %vm6160_vm13 = vcmp.ge.f32.partialorder %v13035_v2, 0.0 }
 0x933   : > { %v6053_v30 = vsel %vm6050_vm4, %v6052_v8, %v6048_v27  ;;  %v6057_v59 = vsub.f32 1.0, %v6056_v13  ;;  %vm6061_vm9 = vweird.f32 %v8010_v18  ;;  %v6064_v28 = vand.u32 2147483647, %v13322_v63 }
 0x934   : > { %v6054_v38 = vmul.f32 %v6053_v30, %v13035_v2  ;;  %v6001_v33 = vmul.f32 2.0, %v5993_v25  ;;  %v5641_v32 = vsel %vm15382_vm7, %v15381_v36, 0.0  ;;  %v5679_v43 = vsel %vm15384_vm0, %v15383_v20, 0.0  ;;  %v6184_v2 = vld [vmem:[#allocation2 + $0x20] sm:$0xff] }
 0x935   : > { %v6058_v29 = vmul.f32 %v8010_v18, %v6057_v59  ;;  %vm6060_vm6 = vweird.f32 %v13322_v63  ;;  %v6067_v46 = vor.u32 1.1754944e-38, %v6066_v53  ;;  %vm6065_vm2 = vcmp.eq.f32.partialorder %v6064_v28, 8.507059e+37  ;;  %v6185_v63 = vld [vmem:[#allocation2 + $0x28] sm:$0xff]  ;;  %v5293_v59 = vld [vmem:[#allocation5 + $0x158] sm:$0xff]  ;;  %v5294_v20 = vld [vmem:[#allocation5 + $0x160] sm:$0xff] }
 0x936   : > { %v6168_v44 = vsel %vm6160_vm13, %v6016_v7, %v6054_v38  ;;  %v6009_v24 = vsub.f32 %v13071_v37, %v6001_v33  ;;  %vm6062_vm11 = vmor %vm6060_vm6, %vm6061_vm9  ;;  %v5687_v49 = vadd.f32 %v5679_v43, %v5641_v32  ;;  %vm15385_vm8 = vcmask 261120  }
 0x937   : > { %v13411_v0 = vadd.f32 %v6168_v44, %v5686_v55  ;;  %v6059_v4 = vadd.f32 %v8010_v18, %v6058_v29  ;;  %vm6161_vm1 = vcmp.ge.f32.partialorder %v13071_v37, 0.0  ;;  %vm15386_vm10 = vmmov %vm15385_vm8 }
 0x938   : > { %v6017_v40 = vand.u32 2147483647, %v6009_v24  ;;  %vm15387_vm3 = vmmov %vm15385_vm8 }
 0x939   : > { %6223 = vmatpush.msra.mxu0 %v13411_v0  ;;  %v6063_v50 = vsel %vm6062_vm11, %v8010_v18, %v6059_v4  ;;  %vm15388_vm15 = vmmov %vm15387_vm3  ;;  %v6187_v18 = vld [vmem:[#allocation2 + $0x38] sm:$0xff] }
 0x93a   : > { %v6068_v15 = vsel %vm6065_vm2, %v6067_v46, %v6063_v50  ;;  %7596 = vmatmul.msk.f32.vlgmr.msra.gmra.mxu0 %vm15385_vm8, %v6184_v2  ;;  %vm15389_vm5 = vmmov %vm15387_vm3 }
 0x93b   : > { %v6069_v10 = vmul.f32 %v6068_v15, %v13071_v37  ;;  %vm15390_vm12 = vmmov %vm15387_vm3  ;;  %v5290_v37 = vld [vmem:[#allocation5 + $0x140] sm:$0xff] }
 0x93c   : > { %vm15391_vm4 = vmmov %vm15387_vm3 }
 0x93d   : > { %v6169_v3 = vsel %vm6161_vm1, %v6017_v40, %v6069_v10  ;;  %vm15392_vm13 = vmmov %vm15387_vm3 }
 0x93e   : > { %v13419_v16 = vadd.f32 %v6169_v3, %v5687_v49 }
 0x940   : > { %6252 = vmatpush.msra.mxu1 %v13419_v16 }
 0x941   : > { %7600 = vmatmul.msk.f32.vlgmr.msra.gmra.mxu1 %vm15386_vm10, %v6184_v2 }
 0x942   : > { %7597 = vmatmul.msk.f32.gmra.mxu0 %vm15387_vm3, %v6185_v63 }
 0x949   : > { %7601 = vmatmul.msk.f32.gmra.mxu1 %vm15388_vm15, %v6185_v63 }
 0x94a   : > { %7598 = vmatmul.msk.f32.gmra.mxu0 %vm15389_vm5, %v6186_v12 }
 0x951   : > { %7602 = vmatmul.msk.f32.gmra.mxu1 %vm15390_vm12, %v6186_v12 }
 0x952   : > { %7599 = vmatmul.msk.f32.gmra.mxu0 %vm15391_vm4, %v6187_v18 }
 0x959   : > { %7603 = vmatmul.msk.f32.gmra.mxu1 %vm15392_vm13, %v6187_v18 }
 0x989   : > { %v5327_v19 = vpop.f32.mrf.mxu0 }
 0x98a   : > { %v13429_v45 = vadd.f32 %v5327_v19, %v5290_v37 }
 0x98c   : > { %v5368_v1 = vadd.f32 1.0, %v13429_v45  ;;  %v5416_v26 = vand.u32 2147483647, %v13429_v45  ;;  %vm5552_vm0 = vcmp.ge.f32.partialorder %v13429_v45, 0.0 }
 0x98e   : > { %v5424_v22 = vadd.f32 1.0, %v5416_v26  ;;  %v5376_v48 = vmul.f32 0.5, %v5368_v1  ;;  %v5356_v62 = vpop.f32.mrf.mxu1 }
 0x98f   : > { %v13433_v57 = vadd.f32 %v5356_v62, %v5291_v60 }
 0x990   : > { %8011 = vrcp.f32 %v5424_v22  ;;  %v5384_v61 = vfloor.f32 %v5376_v48  ;;  %v5441_v29 = vand.u32 2147483647, %v5424_v22  ;;  %v5443_v28 = vand.u32 2147483648, %v5424_v22 }
 0x991   : > { %v5330_v34 = vpop.f32.mrf.mxu0  ;;  %v5417_v56 = vand.u32 2147483647, %v13433_v57  ;;  %v5369_v17 = vadd.f32 1.0, %v13433_v57  ;;  %vm5437_vm7 = vweird.f32 %v5424_v22  ;;  %vm5553_vm13 = vcmp.ge.f32.partialorder %v13433_v57, 0.0 }
 0x992   : > { %v13435_v58 = vadd.f32 %v5330_v34, %v5292_v11  ;;  %v5392_v55 = vmul.f32 2.0, %v5384_v61  ;;  %v5444_v49 = vor.u32 1.1754944e-38, %v5443_v28  ;;  %vm5442_vm11 = vcmp.eq.f32.partialorder %v5441_v29, 8.507059e+37 }
 0x993   : > { %v13440_v8 = vadd.f32 1.0, %v5417_v56  ;;  %v5377_v33 = vmul.f32 0.5, %v5369_v17 }
 0x994   : > { %v5418_v5 = vand.u32 2147483647, %v13435_v58  ;;  %v5370_v13 = vadd.f32 1.0, %v13435_v58  ;;  %v5400_v44 = vsub.f32 %v13429_v45, %v5392_v55  ;;  %vm5554_vm12 = vcmp.ge.f32.partialorder %v13435_v58, 0.0 }
 0x995   : > { %8013 = vrcp.f32 %v13440_v8  ;;  %v5385_v2 = vfloor.f32 %v5377_v33  ;;  %vm5452_vm2 = vweird.f32 %v13440_v8  ;;  %v5456_v19 = vand.u32 2147483647, %v13440_v8 }
 0x996   : > { %v8012_v27 = vpop.eup %8011  ;;  %v13443_v25 = vadd.f32 1.0, %v5418_v5  ;;  %v5359_v7 = vpop.f32.mrf.mxu1  ;;  %v5378_v53 = vmul.f32 0.5, %v5370_v13  ;;  %v5408_v63 = vand.u32 2147483647, %v5400_v44  ;;  %v5458_v55 = vand.u32 2147483648, %v13440_v8 }
 0x997   : > { %v5433_v30 = vmul.f32 %v8012_v27, %v5424_v22  ;;  %vm5438_vm9 = vweird.f32 %v8012_v27  ;;  %v13448_v32 = vadd.f32 %v5359_v7, %v5293_v59  ;;  %v5393_v26 = vmul.f32 2.0, %v5385_v2 }
 0x998   : > { %8015 = vrcp.f32 %v13443_v25  ;;  %v5386_v46 = vfloor.f32 %v5378_v53  ;;  %vm5439_vm6 = vmor %vm5437_vm7, %vm5438_vm9  ;;  %v5473_v56 = vand.u32 2147483648, %v13443_v25  ;;  %vm5467_vm10 = vweird.f32 %v13443_v25 }
 0x999   : > { %v5434_v38 = vsub.f32 1.0, %v5433_v30  ;;  %v5333_v43 = vpop.f32.mrf.mxu0  ;;  %v5371_v50 = vadd.f32 1.0, %v13448_v32  ;;  %v5419_v40 = vand.u32 2147483647, %v13448_v32  ;;  %vm13487_vm15 = vcmp.eq.f32.partialorder %v5456_v19, 8.507059e+37 }
 0x99a   : > { %v13457_v10 = vadd.f32 %v5333_v43, %v5294_v20  ;;  %v5394_v22 = vmul.f32 2.0, %v5386_v46  ;;  %v5459_v43 = vor.u32 1.1754944e-38, %v5458_v55  ;;  %v5295_v46 = vld [vmem:[#allocation5 + $0x168] sm:$0xff] }
 0x99b   : > { %v5435_v36 = vmul.f32 %v8012_v27, %v5434_v38  ;;  %v13450_v24 = vpop.eup %8013  ;;  %v5379_v60 = vmul.f32 0.5, %v5371_v50  ;;  %v13462_v48 = vadd.f32 1.0, %v5419_v40  ;;  %v5401_v38 = vsub.f32 %v13433_v57, %v5393_v26 }
 0x99c   : > { %v5448_v15 = vmul.f32 %v13450_v24, %v13440_v8  ;;  %v5420_v61 = vand.u32 2147483647, %v13457_v10  ;;  %vm5453_vm8 = vweird.f32 %v13450_v24  ;;  %v5372_v5 = vadd.f32 1.0, %v13457_v10 }
 0x99d   : > { %v5436_v4 = vadd.f32 %v8012_v27, %v5435_v36  ;;  %8017 = vrcp.f32 %v13462_v48  ;;  %v5387_v30 = vfloor.f32 %v5379_v60  ;;  %vm13482_vm3 = vmor %vm5452_vm2, %vm5453_vm8  ;;  %v5402_v53 = vsub.f32 %v13435_v58, %v5394_v22  ;;  %v15397_v22 = vld [vmem:[#allocation61_spill] sm:$0xff] }
 0x99e   : > { %v8016_v3 = vpop.eup %8015  ;;  %v5449_v37 = vsub.f32 1.0, %v5448_v15  ;;  %v13475_v59 = vadd.f32 1.0, %v5420_v61  ;;  %v5362_v50 = vpop.f32.mrf.mxu1  ;;  %vm5482_vm9 = vweird.f32 %v13462_v48  ;;  %vm5555_vm2 = vcmp.ge.f32.partialorder %v13448_v32, 0.0 }
 0x99f   : > { %v5440_v12 = vsel %vm5439_vm6, %v8012_v27, %v5436_v4  ;;  %v5463_v1 = vmul.f32 %v8016_v3, %v13443_v25  ;;  %vm5468_vm1 = vweird.f32 %v8016_v3  ;;  %v5471_v27 = vand.u32 2147483647, %v13443_v25 }
 0x9a0   : > { %v5445_v18 = vsel %vm5442_vm11, %v5444_v49, %v5440_v12  ;;  %v5450_v11 = vmul.f32 %v13450_v24, %v5449_v37  ;;  %vm5469_vm5 = vmor %vm5467_vm10, %vm5468_vm1  ;;  %v5474_v25 = vor.u32 1.1754944e-38, %v5473_v56  ;;  %8019 = vrcp.f32 %v13475_v59 }
 0x9a1   : > { %v5446_v62 = vmul.f32 %v5445_v18, %v13429_v45  ;;  %v5464_v34 = vsub.f32 1.0, %v5463_v1  ;;  %v5380_v45 = vmul.f32 0.5, %v5372_v5  ;;  %vm5472_vm4 = vcmp.eq.f32.partialorder %v5471_v27, 8.507059e+37 }
 0x9a2   : > { %v5451_v17 = vadd.f32 %v13450_v24, %v5450_v11  ;;  %v5395_v2 = vmul.f32 2.0, %v5387_v30  ;;  %v5409_v49 = vand.u32 2147483647, %v5401_v38  ;;  %v5410_v15 = vand.u32 2147483647, %v5402_v53 }
 0x9a3   : > { %v5465_v13 = vmul.f32 %v8016_v3, %v5464_v34  ;;  %v5560_v7 = vsel %vm5552_vm0, %v5408_v63, %v5446_v62  ;;  %v8018_v36 = vpop.eup %8017  ;;  %v5336_v63 = vpop.f32.mrf.mxu0  ;;  %v5388_v18 = vfloor.f32 %v5380_v45  ;;  %v13506_v1 = vadd.f32 %v5362_v50, %v5295_v46 }
 0x9a4   : > { %v5455_v8 = vsel %vm13482_vm3, %v13450_v24, %v5451_v17  ;;  %v5568_v20 = vadd.f32 %v5560_v7, %v12899_v52  ;;  %v5478_v24 = vmul.f32 %v8018_v36, %v13462_v48  ;;  %v5486_v52 = vand.u32 2147483647, %v13462_v48  ;;  %v15398_v17 = vld [vmem:[#allocation62_spill] sm:$0xff] }
 0x9a5   : > { %v5466_v29 = vadd.f32 %v8016_v3, %v5465_v13  ;;  %v5460_v12 = vsel %vm13487_vm15, %v5459_v43, %v5455_v8  ;;  %v5403_v11 = vsub.f32 %v13448_v32, %v5395_v2  ;;  %v5488_v34 = vand.u32 2147483648, %v13462_v48 }
 0x9a6   : > { %v5479_v19 = vsub.f32 1.0, %v5478_v24  ;;  %v5576_v60 = vmul.f32 %v5568_v20, %v15397_v22  ;;  %v8020_v61 = vpop.eup %8019  ;;  %v5461_v56 = vmul.f32 %v5460_v12, %v13433_v57  ;;  %vm5483_vm7 = vweird.f32 %v8018_v36  ;;  %v5365_v12 = vpop.f32.mrf.mxu1 }
 0x9a7   : > { %v5470_v44 = vsel %vm5469_vm5, %v8016_v3, %v5466_v29  ;;  %v5296_v3 = vld [vmem:[#allocation5 + $0x170] sm:$0xff]  ;;  %vm13517_vm0 = vcmp.eq.f32.partialorder %v5486_v52, 8.507059e+37  ;;  %v5493_v55 = vmul.f32 %v8020_v61, %v13475_v59  ;;  %v5396_v7 = vmul.f32 2.0, %v5388_v18  ;;  %vm5484_vm6 = vmor %vm5482_vm9, %vm5483_vm7 }
 0x9a8   : > { %v5475_v4 = vsel %vm5472_vm4, %v5474_v25, %v5470_v44  ;;  %v13508_v26 = vadd.f32 %v5336_v63, %v5296_v3  ;;  %v5480_v5 = vmul.f32 %v8018_v36, %v5479_v19  ;;  %v5489_v29 = vor.u32 1.1754944e-38, %v5488_v34  ;;  %v5297_v63 = vld [vmem:[#allocation5 + $0x178] sm:$0xff] }
 0x9a9   : > { %v5476_v40 = vmul.f32 %v5475_v4, %v13435_v58  ;;  %v5421_v58 = vand.u32 2147483647, %v13506_v1  ;;  %v5494_v28 = vsub.f32 1.0, %v5493_v55  ;;  %v5501_v25 = vand.u32 2147483647, %v13475_v59  ;;  %v15401_v55 = vld [vmem:[#allocation58_spill] sm:$0xff] }
 0x9aa   : > { %v5481_v30 = vadd.f32 %v8018_v36, %v5480_v5  ;;  %v5422_v33 = vand.u32 2147483647, %v13508_v26  ;;  %v5561_v45 = vsel %vm5553_vm13, %v5409_v49, %v5461_v56  ;;  %v5503_v44 = vand.u32 2147483648, %v13475_v59 }
 0x9ab   : > { %v5562_v37 = vsel %vm5554_vm12, %v5410_v15, %v5476_v40  ;;  %v13523_v38 = vadd.f32 1.0, %v5421_v58  ;;  %v5495_v43 = vmul.f32 %v8020_v61, %v5494_v28  ;;  %vm5498_vm11 = vweird.f32 %v8020_v61 }
 0x9ac   : > { %v5570_v62 = vadd.f32 %v5562_v37, %v12808_v47  ;;  %v5373_v47 = vadd.f32 1.0, %v13506_v1  ;;  %v5485_v8 = vsel %vm5484_vm6, %v8018_v36, %v5481_v30  ;;  %v5411_v48 = vand.u32 2147483647, %v5403_v11 }
 0x9ad   : > { %8021 = vrcp.f32 %v13523_v38  ;;  %v5490_v20 = vsel %vm13517_vm0, %v5489_v29, %v5485_v8  ;;  %v5404_v46 = vsub.f32 %v13457_v10, %v5396_v7  ;;  %v13537_v50 = vadd.f32 1.0, %v5422_v33 }
 0x9ae   : > { %v5578_v13 = vmul.f32 %v5570_v62, %v15398_v17  ;;  %v5381_v4 = vmul.f32 0.5, %v5373_v47  ;;  %v5491_v2 = vmul.f32 %v5490_v20, %v13448_v32  ;;  %v5569_v57 = vadd.f32 %v5561_v45, %v12929_v9 }
 0x9af   : > { %v5496_v36 = vadd.f32 %v8020_v61, %v5495_v43  ;;  %vm5497_vm8 = vweird.f32 %v13475_v59  ;;  %vm5502_vm10 = vcmp.eq.f32.partialorder %v5501_v25, 8.507059e+37  ;;  %v5504_v15 = vor.u32 1.1754944e-38, %v5503_v44 }
 0x9b0   : > { %v5584_v53 = vadd.f32 %v5578_v13, %v5576_v60  ;;  %v5563_v49 = vsel %vm5555_vm2, %v5411_v48, %v5491_v2  ;;  %vm5499_vm1 = vmor %vm5497_vm8, %vm5498_vm11  ;;  %v5389_v3 = vfloor.f32 %v5381_v4  ;;  %8023 = vrcp.f32 %v13537_v50 }
 0x9b1   : > { %v5571_v40 = vadd.f32 %v5563_v49, %v12863_v51  ;;  %v5500_v24 = vsel %vm5499_vm1, %v8020_v61, %v5496_v36  ;;  %v5412_v18 = vand.u32 2147483647, %v5404_v46  ;;  %v5577_v32 = vmul.f32 %v5569_v57, %v15397_v22  ;;  %v6188_v36 = vld [vmem:[#allocation5 + $0x80] sm:$0xff] }
 0x9b2   : > { %v5505_v9 = vsel %vm5502_vm10, %v5504_v15, %v5500_v24  ;;  %vm5556_vm3 = vcmp.ge.f32.partialorder %v13457_v10, 0.0  ;;  %v13549_v51 = vadd.f32 %v5365_v12, %v5297_v63  ;;  %v5397_v11 = vmul.f32 2.0, %v5389_v3 }
 0x9b3   : > { %v8022_v52 = vpop.eup %8021  ;;  %v5579_v37 = vmul.f32 %v5571_v40, %v15398_v17  ;;  %v5506_v59 = vmul.f32 %v5505_v9, %v13457_v10  ;;  %v5518_v56 = vand.u32 2147483648, %v13523_v38  ;;  %v5516_v27 = vand.u32 2147483647, %v13523_v38 }
 0x9b4   : > { %v5508_v19 = vmul.f32 %v8022_v52, %v13523_v38  ;;  %v5423_v5 = vand.u32 2147483647, %v13549_v51  ;;  %vm5513_vm15 = vweird.f32 %v8022_v52  ;;  %v5405_v30 = vsub.f32 %v13506_v1, %v5397_v11 }
 0x9b5   : > { %v5593_v60 = vadd.f32 %v5579_v37, %v5577_v32  ;;  %v5564_v62 = vsel %vm5556_vm3, %v5412_v18, %v5506_v59  ;;  %vm5512_vm5 = vweird.f32 %v13523_v38  ;;  %v5519_v33 = vor.u32 1.1754944e-38, %v5518_v56  ;;  %v6191_v59 = vld [vmem:[#allocation5 + $0x98] sm:$0xff] }
 0x9b6   : > { %v5509_v34 = vsub.f32 1.0, %v5508_v19  ;;  %v5572_v61 = vadd.f32 %v5564_v62, %v12786_v35  ;;  %v13554_v58 = vpop.eup %8023  ;;  %v13558_v47 = vadd.f32 1.0, %v5423_v5  ;;  %vm5514_vm12 = vmor %vm5512_vm5, %vm5513_vm15  ;;  %vm5517_vm4 = vcmp.eq.f32.partialorder %v5516_v27, 8.507059e+37 }
 0x9b7   : > { %v5523_v29 = vmul.f32 %v13554_v58, %v13537_v50  ;;  %v6225_v45 = vpop.f32.mrf.mxu0  ;;  %v5413_v44 = vand.u32 2147483647, %v5405_v30  ;;  %v5374_v43 = vadd.f32 1.0, %v13508_v26  ;;  %vm5557_vm13 = vcmp.ge.f32.partialorder %v13506_v1, 0.0  ;;  %v6192_v30 = vld [vmem:[#allocation5 + $0xa0] sm:$0xff] }
 0x9b8   : > { %v5510_v13 = vmul.f32 %v8022_v52, %v5509_v34  ;;  %v5580_v10 = vmul.f32 %v5572_v61, %v15401_v55  ;;  %8025 = vrcp.f32 %v13558_v47  ;;  %v5375_v4 = vadd.f32 1.0, %v13549_v51 }
 0x9b9   : > { %v5524_v38 = vsub.f32 1.0, %v5523_v29  ;;  %v5382_v46 = vmul.f32 0.5, %v5374_v43  ;;  %v13580_v63 = vadd.f32 %v6225_v45, %v6188_v36  ;;  %vm5528_vm9 = vweird.f32 %v13554_v58 }
 0x9ba   : > { %v5511_v7 = vadd.f32 %v8022_v52, %v5510_v13  ;;  %v13562_v35 = vadd.f32 %v5584_v53, %v5580_v10  ;;  %v5383_v40 = vmul.f32 0.5, %v5375_v4  ;;  %v5533_v19 = vand.u32 2147483648, %v13537_v50 }
 0x9bb   : > { %v5525_v15 = vmul.f32 %v13554_v58, %v5524_v38  ;;  %v5390_v18 = vfloor.f32 %v5382_v46  ;;  %vm5527_vm7 = vweird.f32 %v13537_v50  ;;  %v6314_v11 = vand.u32 2147483647, %v13580_v63 }
 0x9bc   : > { %v5515_v28 = vsel %vm5514_vm12, %v8022_v52, %v5511_v7  ;;  %v5391_v62 = vfloor.f32 %v5383_v40  ;;  %vm13593_vm0 = vmor %vm5527_vm7, %vm5528_vm9  ;;  %v5546_v5 = vand.u32 2147483647, %v13558_v47  ;;  %v6193_v7 = vld [vmem:[#allocation5 + $0xa8] sm:$0xff]  ;;  %vm5542_vm2 = vweird.f32 %v13558_v47 }
 0x9bd   : > { %v5520_v25 = vsel %vm5517_vm4, %v5519_v33, %v5515_v28  ;;  %v5526_v9 = vadd.f32 %v13554_v58, %v5525_v15  ;;  %v5398_v61 = vmul.f32 2.0, %v5390_v18  ;;  %v5534_v33 = vor.u32 1.1754944e-38, %v5533_v19 }
 0x9be   : > { %v6254_v8 = vpop.f32.mrf.mxu1  ;;  %v5521_v20 = vmul.f32 %v5520_v25, %v13506_v1  ;;  %v13571_v48 = vpop.eup %8025  ;;  %v6190_v1 = vld [vmem:[#allocation5 + $0x90] sm:$0xff]  ;;  %v5399_v29 = vmul.f32 2.0, %v5391_v62  ;;  %v5548_v28 = vand.u32 2147483648, %v13558_v47  ;;  %v13608_v25 = vadd.f32 1.0, %v6314_v11 }
 0x9bf   : > { %v5538_v57 = vmul.f32 %v13571_v48, %v13558_v47  ;;  %v6228_v12 = vpop.f32.mrf.mxu0  ;;  %v5530_v27 = vsel %vm13593_vm0, %v13554_v58, %v5526_v9  ;;  %vm5543_vm6 = vweird.f32 %v13571_v48  ;;  %v5406_v4 = vsub.f32 %v13508_v26, %v5398_v61  ;;  %v6195_v9 = vld [vmem:[#allocation5 + $0xb8] sm:$0xff] }
 0x9c0   : > { %v5565_v53 = vsel %vm5557_vm13, %v5413_v44, %v5521_v20  ;;  %v13585_v37 = vadd.f32 %v6228_v12, %v6190_v1  ;;  %vm13611_vm8 = vmor %vm5542_vm2, %vm5543_vm6  ;;  %vm5547_vm1 = vcmp.eq.f32.partialorder %v5546_v5, 8.507059e+37  ;;  %v5407_v46 = vsub.f32 %v13549_v51, %v5399_v29 }
 0x9c1   : > { %v5573_v2 = vadd.f32 %v5565_v53, %v12799_v39  ;;  %v5539_v24 = vsub.f32 1.0, %v5538_v57  ;;  %v6189_v39 = vld [vmem:[#allocation5 + $0x88] sm:$0xff]  ;;  %v5549_v57 = vor.u32 1.1754944e-38, %v5548_v28  ;;  %8027 = vrcp.f32 %v13608_v25 }
 0x9c2   : > { %v13591_v34 = vadd.f32 %v6254_v8, %v6189_v39  ;;  %v6194_v39 = vld [vmem:[#allocation5 + $0xb0] sm:$0xff]  ;;  %v5414_v19 = vand.u32 2147483647, %v5406_v4  ;;  %vm5558_vm10 = vcmp.ge.f32.partialorder %v13508_v26, 0.0  ;;  %vm5559_vm3 = vcmp.ge.f32.partialorder %v13549_v51, 0.0 }
 0x9c3   : > { %v5581_v49 = vmul.f32 %v5573_v2, %v15401_v55  ;;  %v5540_v32 = vmul.f32 %v13571_v48, %v5539_v24 }
 0x9c4   : > { %v6315_v45 = vand.u32 2147483647, %v13591_v34 }
 0x9c5   : > { %v13578_v3 = vadd.f32 %v5593_v60, %v5581_v49  ;;  %v5531_v60 = vand.u32 2147483647, %v13537_v50  ;;  %v5541_v10 = vadd.f32 %v13571_v48, %v5540_v32  ;;  %v6316_v50 = vand.u32 2147483647, %v13585_v37 }
 0x9c6   : > { %v6257_v52 = vpop.f32.mrf.mxu1  ;;  %v13631_v40 = vadd.f32 1.0, %v6315_v45 }
 0x9c7   : > { %v13598_v13 = vadd.f32 %v6257_v52, %v6191_v59  ;;  %vm5532_vm11 = vcmp.eq.f32.partialorder %v5531_v60, 8.507059e+37  ;;  %v6231_v58 = vpop.f32.mrf.mxu0  ;;  %v5545_v47 = vsel %vm13611_vm8, %v13571_v48, %v5541_v10  ;;  %v13624_v2 = vadd.f32 1.0, %v6316_v50  ;;  %v13653_v10 = vpop.eup %8027 }
 0x9c8   : > { %v5535_v44 = vsel %vm5532_vm11, %v5534_v33, %v5530_v27  ;;  %v13616_v38 = vadd.f32 %v6231_v58, %v6192_v30  ;;  %v5550_v1 = vsel %vm5547_vm1, %v5549_v57, %v5545_v47  ;;  %v6266_v59 = vadd.f32 1.0, %v13580_v63 }
 0x9c9   : > { %v6317_v43 = vand.u32 2147483647, %v13598_v13  ;;  %v5536_v15 = vmul.f32 %v5535_v44, %v13508_v26  ;;  %8029 = vrcp.f32 %v13624_v2  ;;  %v5551_v62 = vmul.f32 %v5550_v1, %v13549_v51 }
 0x9ca   : > { %v6318_v36 = vand.u32 2147483647, %v13616_v38  ;;  %v6270_v24 = vadd.f32 1.0, %v13616_v38  ;;  %v5415_v50 = vand.u32 2147483647, %v5407_v46  ;;  %v13658_v30 = vmul.f32 0.5, %v6266_v59 }
 0x9cb   : > { %v13634_v48 = vadd.f32 1.0, %v6317_v43  ;;  %v13655_v26 = vsel %vm5558_vm10, %v5414_v19, %v5536_v15  ;;  %v6268_v15 = vadd.f32 1.0, %v13585_v37  ;;  %vm6454_vm8 = vcmp.ge.f32.partialorder %v13616_v38, 0.0 }
 0x9cc   : > { %v13636_v12 = vadd.f32 1.0, %v6318_v36  ;;  %v6278_v32 = vmul.f32 0.5, %v6270_v24  ;;  %v13667_v58 = vsel %vm5559_vm3, %v5415_v50, %v5551_v62  ;;  %vm6365_vm1 = vweird.f32 %v13624_v2 }
 0x9cd   : > { %v6276_v55 = vmul.f32 0.5, %v6268_v15 }
 0x9ce   : > { %v6260_v8 = vpop.f32.mrf.mxu1  ;;  %8031 = vrcp.f32 %v13636_v12  ;;  %v6286_v61 = vfloor.f32 %v6278_v32  ;;  %v6399_v44 = vand.u32 2147483647, %v13636_v12  ;;  %v6401_v20 = vand.u32 2147483648, %v13636_v12 }
 0x9cf   : > { %v13618_v53 = vadd.f32 %v6260_v8, %v6193_v7  ;;  %8033 = vrcp.f32 %v13631_v40  ;;  %v6234_v60 = vpop.f32.mrf.mxu0  ;;  %v13663_v45 = vpop.eup %8029  ;;  %vm6395_vm15 = vweird.f32 %v13636_v12 }
 0x9d0   : > { %8035 = vrcp.f32 %v13634_v48  ;;  %v13649_v56 = vadd.f32 %v6234_v60, %v6194_v39  ;;  %v6294_v28 = vmul.f32 2.0, %v6286_v61  ;;  %vm13694_vm5 = vcmp.eq.f32.partialorder %v6399_v44, 8.507059e+37 }
 0x9d1   : > { %v6319_v49 = vand.u32 2147483647, %v13618_v53  ;;  %v6271_v52 = vadd.f32 1.0, %v13618_v53 }
 0x9d2   : > { %v6320_v7 = vand.u32 2147483647, %v13649_v56  ;;  %v6272_v29 = vadd.f32 1.0, %v13649_v56  ;;  %v6302_v39 = vsub.f32 %v13616_v38, %v6294_v28 }
 0x9d3   : > { %v13640_v18 = vadd.f32 1.0, %v6319_v49  ;;  %v6279_v27 = vmul.f32 0.5, %v6271_v52 }
 0x9d4   : > { %v13672_v43 = vpop.eup %8031  ;;  %v13674_v4 = vadd.f32 1.0, %v6320_v7  ;;  %v6280_v46 = vmul.f32 0.5, %v6272_v29 }
 0x9d5   : > { %8037 = vrcp.f32 %v13640_v18  ;;  %v6287_v57 = vfloor.f32 %v6279_v27  ;;  %v13678_v36 = vpop.eup %8033  ;;  %v6391_v51 = vmul.f32 %v13672_v43, %v13636_v12  ;;  %vm6410_vm12 = vweird.f32 %v13640_v18 }
 0x9d6   : > { %v6263_v11 = vpop.f32.mrf.mxu1  ;;  %v13684_v1 = vpop.eup %8035  ;;  %8039 = vrcp.f32 %v13674_v4  ;;  %v6288_v52 = vfloor.f32 %v6280_v46  ;;  %v6431_v60 = vand.u32 2147483648, %v13674_v4  ;;  %v6429_v27 = vand.u32 2147483647, %v13674_v4 }
 0x9d7   : > { %v13651_v5 = vadd.f32 %v6263_v11, %v6195_v9  ;;  %v6361_v9 = vmul.f32 %v13663_v45, %v13624_v2  ;;  %v6402_v11 = vor.u32 1.1754944e-38, %v6401_v20  ;;  %v13699_v61 = vmul.f32 2.0, %v6287_v57 }
 0x9d8   : > { %v6296_v62 = vmul.f32 2.0, %v6288_v52  ;;  %vm6425_vm4 = vweird.f32 %v13674_v4  ;;  %vm6396_vm13 = vweird.f32 %v13672_v43  ;;  %v6432_v57 = vor.u32 1.1754944e-38, %v6431_v60 }
 0x9d9   : > { %v6321_v33 = vand.u32 2147483647, %v13651_v5  ;;  %v6273_v8 = vadd.f32 1.0, %v13651_v5  ;;  %v6303_v52 = vsub.f32 %v13618_v53, %v13699_v61  ;;  %vm13721_vm7 = vcmp.eq.f32.partialorder %v6429_v27, 8.507059e+37  ;;  %vm6397_vm11 = vmor %vm6395_vm15, %vm6396_vm13 }
 0x9da   : > { %v6304_v29 = vsub.f32 %v13649_v56, %v6296_v62  ;;  %v6414_v60 = vand.u32 2147483647, %v13640_v18  ;;  %v6362_v22 = vsub.f32 1.0, %v6361_v9  ;;  %vm6455_vm13 = vcmp.ge.f32.partialorder %v13618_v53, 0.0 }
 0x9db   : > { %v13676_v47 = vadd.f32 1.0, %v6321_v33  ;;  %v6281_v49 = vmul.f32 0.5, %v6273_v8  ;;  %v13690_v32 = vpop.eup %8037  ;;  %v6392_v33 = vsub.f32 1.0, %v6391_v51  ;;  %v13707_v8 = vand.u32 2147483647, %v6302_v39 }
 0x9dc   : > { %v6406_v20 = vmul.f32 %v13690_v32, %v13640_v18  ;;  %v8040_v46 = vpop.eup %8039  ;;  %vm6411_vm2 = vweird.f32 %v13690_v32  ;;  %vm13745_vm15 = vcmp.eq.f32.partialorder %v6414_v60, 8.507059e+37  ;;  %v6363_v19 = vmul.f32 %v13663_v45, %v6362_v22 }
 0x9dd   : > { %8041 = vrcp.f32 %v13676_v47  ;;  %v6289_v59 = vfloor.f32 %v6281_v49  ;;  %v6446_v7 = vand.u32 2147483648, %v13676_v47  ;;  %v6444_v28 = vand.u32 2147483647, %v13676_v47 }
 0x9de   : > { %v6393_v44 = vmul.f32 %v13672_v43, %v6392_v33  ;;  %vm6440_vm9 = vweird.f32 %v13676_v47  ;;  %v6421_v62 = vmul.f32 %v8040_v46, %v13674_v4  ;;  %vm6426_vm0 = vweird.f32 %v8040_v46 }
 0x9df   : > { %v13702_v50 = vmul.f32 2.0, %v6289_v59  ;;  %v6447_v51 = vor.u32 1.1754944e-38, %v6446_v7  ;;  %v6312_v59 = vand.u32 2147483647, %v6304_v29  ;;  %vm13728_vm6 = vcmp.eq.f32.partialorder %v6444_v28, 8.507059e+37  ;;  %vm6427_vm3 = vmor %vm6425_vm4, %vm6426_vm0 }
 0x9e0   : > { %v6394_v24 = vadd.f32 %v13672_v43, %v6393_v44  ;;  %v6407_v61 = vsub.f32 1.0, %v6406_v20  ;;  %v6422_v27 = vsub.f32 1.0, %v6421_v62  ;;  %v6416_v44 = vand.u32 2147483648, %v13640_v18 }
 0x9e1   : > { %v6305_v49 = vsub.f32 %v13651_v5, %v13702_v50  ;;  %v6364_v22 = vadd.f32 %v13663_v45, %v6363_v19  ;;  %v6371_v4 = vand.u32 2147483648, %v13624_v2  ;;  %vm15417_vm0 = vcmp.ge.f32.partialorder %v13651_v5, 0.0 }
 0x9e2   : > { %v6398_v29 = vsel %vm6397_vm11, %v13672_v43, %v6394_v24  ;;  %v6408_v12 = vmul.f32 %v13690_v32, %v6407_v61  ;;  %v6423_v20 = vmul.f32 %v8040_v46, %v6422_v27  ;;  %v6284_v24 = vfloor.f32 %v6276_v55 }
 0x9e3   : > { %v8042_v39 = vpop.eup %8041  ;;  %v6403_v17 = vsel %vm13694_vm5, %v6402_v11, %v6398_v29  ;;  %vm6412_vm5 = vmor %vm6410_vm12, %vm6411_vm2  ;;  %v6417_v9 = vor.u32 1.1754944e-38, %v6416_v44  ;;  %vm6366_vm11 = vweird.f32 %v13663_v45  ;;  %v6369_v27 = vand.u32 2147483647, %v13624_v2 }
 0x9e4   : > { %v6436_v50 = vmul.f32 %v8042_v39, %v13676_v47  ;;  %vm6441_vm10 = vweird.f32 %v8042_v39  ;;  %v6404_v15 = vmul.f32 %v6403_v17, %v13616_v38  ;;  %v6424_v11 = vadd.f32 %v8040_v46, %v6423_v20  ;;  %vm13776_vm4 = vmor %vm6365_vm1, %vm6366_vm11 }
 0x9e5   : > { %v6292_v60 = vmul.f32 2.0, %v6284_v24  ;;  %vm6442_vm12 = vmor %vm6440_vm9, %vm6441_vm10  ;;  %v6311_v44 = vand.u32 2147483647, %v6303_v52  ;;  %v6368_v2 = vsel %vm13776_vm4, %v13663_v45, %v6364_v22  ;;  %v6372_v33 = vor.u32 1.1754944e-38, %v6371_v4 }
 0x9e6   : > { %v6437_v28 = vsub.f32 1.0, %v6436_v50  ;;  %v6409_v50 = vadd.f32 %v13690_v32, %v6408_v12  ;;  %v6428_v61 = vsel %vm6427_vm3, %v8040_v46, %v6424_v11  ;;  %v6313_v12 = vand.u32 2147483647, %v6305_v49 }
 0x9e7   : > { %v6433_v29 = vsel %vm13721_vm7, %v6432_v57, %v6428_v61  ;;  %v6462_v52 = vsel %vm6454_vm8, %v13707_v8, %v6404_v15  ;;  %vm15416_vm9 = vcmp.ge.f32.partialorder %v13649_v56, 0.0  ;;  %vm6370_vm7 = vcmp.eq.f32.partialorder %v6369_v27, 8.507059e+37 }
 0x9e8   : > { %v6438_v62 = vmul.f32 %v8042_v39, %v6437_v28  ;;  %v6413_v55 = vsel %vm6412_vm5, %v13690_v32, %v6409_v50  ;;  %v6300_v28 = vsub.f32 %v13585_v37, %v6292_v60  ;;  %v6434_v47 = vmul.f32 %v6433_v29, %v13649_v56 }
 0x9e9   : > { %v6418_v18 = vsel %vm13745_vm15, %v6417_v9, %v6413_v55  ;;  %v6269_v49 = vadd.f32 1.0, %v13598_v13  ;;  %v6373_v24 = vsel %vm6370_vm7, %v6372_v33, %v6368_v2  ;;  %v6384_v38 = vand.u32 2147483647, %v13634_v48 }
 0x9ea   : > { %v6439_v17 = vadd.f32 %v8042_v39, %v6438_v62  ;;  %v6464_v43 = vsel %vm15416_vm9, %v6312_v59, %v6434_v47  ;;  %v6308_v7 = vand.u32 2147483647, %v6300_v28  ;;  %v6374_v8 = vmul.f32 %v6373_v24, %v13585_v37 }
 0x9eb   : > { %6502 = vmatpush.msra.mxu2 %v6464_v43  ;;  %v6277_v62 = vmul.f32 0.5, %v6269_v49  ;;  %v6386_v59 = vand.u32 2147483648, %v13634_v48  ;;  %v6331_v19 = vmul.f32 %v13653_v10, %v13608_v25  ;;  %vm6381_vm2 = vweird.f32 %v13684_v1 }
 0x9ec   : > { %v6443_v32 = vsel %vm6442_vm12, %v8042_v39, %v6439_v17  ;;  %v6419_v39 = vmul.f32 %v6418_v18, %v13618_v53  ;;  %vm6380_vm8 = vweird.f32 %v13634_v48  ;;  %vm13811_vm1 = vcmp.eq.f32.partialorder %v6384_v38, 8.507059e+37 }
 0x9ed   : > { %v6448_v20 = vsel %vm13728_vm6, %v6447_v51, %v6443_v32  ;;  %v6376_v51 = vmul.f32 %v13684_v1, %v13634_v48  ;;  %6503 = vmatpush.msra.mxu2 %v6462_v52  ;;  %vm6452_vm6 = vcmp.ge.f32.partialorder %v13585_v37, 0.0  ;;  %v6285_v9 = vfloor.f32 %v6277_v62  ;;  %vm6382_vm10 = vmor %vm6380_vm8, %vm6381_vm2 }
 0x9ee   : > { %v6449_v57 = vmul.f32 %v6448_v20, %v13651_v5  ;;  %v6463_v15 = vsel %vm6455_vm13, %v6311_v44, %v6419_v39  ;;  %v15418_v5 = vfloor.f32 %v13658_v30  ;;  %v6460_v11 = vsel %vm6452_vm6, %v6308_v7, %v6374_v8 }
 0x9ef   : > { %v6377_v56 = vsub.f32 1.0, %v6376_v51  ;;  %6504 = vmatpush.msra.mxu2 %v6460_v11  ;;  %v6387_v37 = vor.u32 1.1754944e-38, %v6386_v59  ;;  %v6332_v30 = vsub.f32 1.0, %v6331_v19  ;;  %v6293_v17 = vmul.f32 2.0, %v6285_v9  ;;  %v6468_v9 = vld [vmem:[#allocation2 + $0x50] sm:$0xff] }
 0x9f0   : > { %v6465_v45 = vsel %vm15417_vm0, %v6313_v12, %v6449_v57  ;;  %v6290_v50 = vmul.f32 2.0, %v15418_v5  ;;  %v6341_v61 = vand.u32 2147483648, %v13608_v25  ;;  %vm6336_vm3 = vweird.f32 %v13653_v10  ;;  %v6467_v5 = vld [vmem:[#allocation2 + $0x48] sm:$0xff] }
 0x9f1   : > { %6531 = vmatpush.msra.mxu3 %v6465_v45  ;;  %v6378_v60 = vmul.f32 %v13684_v1, %v6377_v56  ;;  %v6333_v18 = vmul.f32 %v13653_v10, %v6332_v30  ;;  %v6339_v48 = vand.u32 2147483647, %v13608_v25  ;;  %v6267_v27 = vadd.f32 1.0, %v13591_v34  ;;  %v6466_v45 = vld [vmem:[#allocation2 + $0x40] sm:$0xff] }
 0x9f2   : > { %v6298_v22 = vsub.f32 %v13580_v63, %v6290_v50  ;;  %v6301_v4 = vsub.f32 %v13598_v13, %v6293_v17  ;;  %vm6453_vm15 = vcmp.ge.f32.partialorder %v13598_v13, 0.0  ;;  %vm6335_vm5 = vweird.f32 %v13608_v25 }
 0x9f3   : > { %6532 = vmatpush.msra.mxu3 %v6463_v15  ;;  %v6379_v55 = vadd.f32 %v13684_v1, %v6378_v60  ;;  %v6334_v44 = vadd.f32 %v13653_v10, %v6333_v18  ;;  %v6275_v28 = vmul.f32 0.5, %v6267_v27  ;;  %v6346_v46 = vmul.f32 %v13678_v36, %v13631_v40  ;;  %vm6337_vm13 = vmor %vm6335_vm5, %vm6336_vm3 }
 0x9f4   : > { %v6309_v47 = vand.u32 2147483647, %v6301_v4  ;;  %v6306_v20 = vand.u32 2147483647, %v6298_v22  ;;  %v6342_v2 = vor.u32 1.1754944e-38, %v6341_v61  ;;  %vm6340_vm11 = vcmp.eq.f32.partialorder %v6339_v48, 8.507059e+37 }
 0x9f5   : > { %v6383_v29 = vsel %vm6382_vm10, %v13684_v1, %v6379_v55  ;;  %v6338_v1 = vsel %vm6337_vm13, %v13653_v10, %v6334_v44  ;;  %v6283_v57 = vfloor.f32 %v6275_v28  ;;  %v6347_v25 = vsub.f32 1.0, %v6346_v46  ;;  %v6471_v44 = vld [vmem:[#allocation5 + $0xc8] sm:$0xff]  ;;  %v6472_v28 = vld [vmem:[#allocation5 + $0xd0] sm:$0xff] }
 0x9f6   : > { %v6388_v32 = vsel %vm13811_vm1, %v6387_v37, %v6383_v29  ;;  %v6343_v39 = vsel %vm6340_vm11, %v6342_v2, %v6338_v1  ;;  %vm6351_vm12 = vweird.f32 %v13678_v36  ;;  %v6356_v33 = vand.u32 2147483648, %v13631_v40  ;;  %v6469_v37 = vld [vmem:[#allocation2 + $0x58] sm:$0xff] }
 0x9f7   : > { %v6389_v12 = vmul.f32 %v6388_v32, %v13598_v13  ;;  %v6344_v43 = vmul.f32 %v6343_v39, %v13580_v63  ;;  %v6291_v49 = vmul.f32 2.0, %v6283_v57  ;;  %v6348_v13 = vmul.f32 %v13678_v36, %v6347_v25  ;;  %v6470_v32 = vld [vmem:[#allocation5 + $0xc0] sm:$0xff]  ;;  %v6473_v2 = vld [vmem:[#allocation5 + $0xd8] sm:$0xff] }
 0x9f8   : > { %v6354_v51 = vand.u32 2147483647, %v13631_v40  ;;  %v5575_v10 = vadd.f32 %v13667_v58, %v12796_v54  ;;  %vm6450_vm4 = vcmp.ge.f32.partialorder %v13580_v63, 0.0  ;;  %vm6350_vm9 = vweird.f32 %v13631_v40  ;;  %v15422_v63 = vld [vmem:[#allocation56_spill] sm:$0xff] }
 0x9f9   : > { %v6461_v52 = vsel %vm6453_vm15, %v6309_v47, %v6389_v12  ;;  %v6458_v7 = vsel %vm6450_vm4, %v6306_v20, %v6344_v43  ;;  %v6299_v24 = vsub.f32 %v13591_v34, %v6291_v49  ;;  %v6349_v38 = vadd.f32 %v13678_v36, %v6348_v13  ;;  %vm6352_vm7 = vmor %vm6350_vm9, %vm6351_vm12  ;;  %v6474_v12 = vld [vmem:[#allocation5 + $0xe0] sm:$0xff]  ;;  %v6475_v13 = vld [vmem:[#allocation5 + $0xe8] sm:$0xff] }
 0x9fa   : > { %6533 = vmatpush.msra.mxu3 %v6461_v52  ;;  %v5574_v8 = vadd.f32 %v13655_v26, %v12780_v42  ;;  %6505 = vmatpush.msra.mxu2 %v6458_v7  ;;  %v6357_v62 = vor.u32 1.1754944e-38, %v6356_v33  ;;  %vm6355_vm0 = vcmp.eq.f32.partialorder %v6354_v51, 8.507059e+37  ;;  %vm15421_vm6 = vcmask 261120  }
 0x9fb   : > { %v6353_v54 = vsel %vm6352_vm7, %v13678_v36, %v6349_v38  ;;  %7604 = vmatmul.msk.f32.vlgmr.msra.gmra.mxu2 %vm15421_vm6, %v6466_v45  ;;  %v5583_v58 = vmul.f32 %v5575_v10, %v15422_v63  ;;  %v6307_v59 = vand.u32 2147483647, %v6299_v24  ;;  %vm6451_vm2 = vcmp.ge.f32.partialorder %v13591_v34, 0.0  ;;  %vm15423_vm8 = vmmov %vm15421_vm6  ;;  %v6476_v24 = vld [vmem:[#allocation5 + $0xf0] sm:$0xff] }
 0x9fc   : > { %v6358_v56 = vsel %vm6355_vm0, %v6357_v62, %v6353_v54  ;;  %v5582_v40 = vmul.f32 %v5574_v8, %v15422_v63  ;;  %vm15424_vm1 = vmmov %vm15421_vm6  ;;  %vm15430_vm11 = vcmask 1040384  }
 0x9fd   : > { %v6359_v15 = vmul.f32 %v6358_v56, %v13591_v34  ;;  %v5595_v26 = vadd.f32 %v13578_v3, %v5583_v58  ;;  %vm15425_vm10 = vmmov %vm15424_vm1 }
 0x9fe   : > { %v5586_v36 = vadd.f32 %v13562_v35, %v5582_v40  ;;  %vm15426_vm3 = vmmov %vm15424_vm1 }
 0x9ff   : > { %v6459_v42 = vsel %vm6451_vm2, %v6307_v59, %v6359_v15  ;;  %v5596_v50 = vrot.slane %v5595_v26, 4  ;;  %vm15427_vm15 = vmmov %vm15424_vm1 }
 0xa00   : > { %6534 = vmatpush.msra.mxu3 %v6459_v42  ;;  %v5587_v19 = vrot.slane %v5586_v36, 4  ;;  %vm15428_vm5 = vmmov %vm15424_vm1 }
 0xa01   : > { %7608 = vmatmul.msk.f32.vlgmr.msra.gmra.mxu3 %vm15423_vm8, %v6466_v45  ;;  %v5597_v11 = vadd.f32 %v5596_v50, %v5595_v26  ;;  %vm15429_vm13 = vmmov %vm15424_vm1  ;;  %v6477_v50 = vld [vmem:[#allocation5 + $0xf8] sm:$0xff] }
 0xa02   : > { %v5588_v60 = vadd.f32 %v5587_v19, %v5586_v36 }
 0xa03   : > { %7605 = vmatmul.msk.f32.gmra.mxu2 %vm15424_vm1, %v6467_v5  ;;  %v5598_v34 = vrot.slane %v5597_v11, 2 }
 0xa04   : > { %v5589_v3 = vrot.slane %v5588_v60, 2 }
 0xa05   : > { %v5599_v53 = vadd.f32 %v5598_v34, %v5597_v11 }
 0xa06   : > { %v5590_v30 = vadd.f32 %v5589_v3, %v5588_v60 }
 0xa07   : > { %v5600_v35 = vrot.slane %v5599_v53, 1 }
 0xa08   : > { %v5591_v17 = vrot.slane %v5590_v30, 1 }
 0xa09   : > { %7609 = vmatmul.msk.f32.gmra.mxu3 %vm15425_vm10, %v6467_v5  ;;  %v5601_v55 = vadd.f32 %v5600_v35, %v5599_v53 }
 0xa0a   : > { %v5592_v22 = vadd.f32 %v5591_v17, %v5590_v30 }
 0xa0b   : > { %7606 = vmatmul.msk.f32.gmra.mxu2 %vm15426_vm3, %v6468_v9  ;;  %v5604_v61 = vrot.slane %v5601_v55, 7 }
 0xa0d   : > { %v5605_v18 = vsel %vm15430_vm11, %v5592_v22, %v5604_v61 }
 0xa0e   : > { %5607 = vst.msk [vmem:[%s11371_s11 + $0x4] sm:$0x3] %vm11364_vm14, %v5605_v18 }
 0xa11   : > { %7610 = vmatmul.msk.f32.gmra.mxu3 %vm15427_vm15, %v6468_v9 }
 0xa13   : > { %7607 = vmatmul.msk.f32.gmra.mxu2 %vm15428_vm5, %v6469_v37 }
 0xa19   : > { %7611 = vmatmul.msk.f32.gmra.mxu3 %vm15429_vm13, %v6469_v37 }
 0xa7e   : > { %v6507_v27 = vpop.f32.mrf.mxu2 }
 0xa7f   : > { %v13867_v46 = vadd.f32 %v6507_v27, %v6470_v32 }
 0xa81   : > { %v6596_v52 = vand.u32 2147483647, %v13867_v46  ;;  %v6548_v62 = vadd.f32 1.0, %v13867_v46 }
 0xa83   : > { %v13883_v10 = vadd.f32 1.0, %v6596_v52  ;;  %v13908_v11 = vmul.f32 0.5, %v6548_v62 }
 0xa84   : > { %v6536_v4 = vpop.f32.mrf.mxu3 }
 0xa85   : > { %v13869_v20 = vadd.f32 %v6536_v4, %v6471_v44  ;;  %v6564_v4 = vfloor.f32 %v13908_v11 }
 0xa86   : > { %v6510_v29 = vpop.f32.mrf.mxu2 }
 0xa87   : > { %v13871_v1 = vadd.f32 %v6510_v29, %v6472_v28  ;;  %v6597_v33 = vand.u32 2147483647, %v13869_v20  ;;  %v6549_v36 = vadd.f32 1.0, %v13869_v20 }
 0xa89   : > { %v6598_v49 = vand.u32 2147483647, %v13871_v1  ;;  %v13886_v38 = vadd.f32 1.0, %v6597_v33  ;;  %v13911_v60 = vadd.f32 1.0, %v13871_v1  ;;  %v13929_v29 = vmul.f32 0.5, %v6549_v36 }
 0xa8b   : > { %v13892_v54 = vadd.f32 1.0, %v6598_v49 }
 0xa8c   : > { %v6539_v47 = vpop.f32.mrf.mxu3 }
 0xa8d   : > { %v13876_v39 = vadd.f32 %v6539_v47, %v6473_v2 }
 0xa8e   : > { %v6513_v57 = vpop.f32.mrf.mxu2 }
 0xa8f   : > { %v13873_v25 = vadd.f32 %v6513_v57, %v6474_v12  ;;  %v6599_v45 = vand.u32 2147483647, %v13876_v39  ;;  %v13917_v53 = vadd.f32 1.0, %v13876_v39 }
 0xa91   : > { %v6600_v43 = vand.u32 2147483647, %v13873_v25  ;;  %v6552_v58 = vadd.f32 1.0, %v13873_v25  ;;  %v13899_v40 = vadd.f32 1.0, %v6599_v45  ;;  %vm6736_vm0 = vcmp.ge.f32.partialorder %v13873_v25, 0.0 }
 0xa93   : > { %v13881_v51 = vadd.f32 1.0, %v6600_v43  ;;  %v6560_v19 = vmul.f32 0.5, %v6552_v58 }
 0xa94   : > { %v6542_v7 = vpop.f32.mrf.mxu3 }
 0xa95   : > { %8043 = vrcp.f32 %v13881_v51  ;;  %v13889_v8 = vadd.f32 %v6542_v7, %v6475_v13  ;;  %v6568_v30 = vfloor.f32 %v6560_v19  ;;  %v6681_v22 = vand.u32 2147483647, %v13881_v51 }
 0xa96   : > { %v6516_v56 = vpop.f32.mrf.mxu2  ;;  %8045 = vrcp.f32 %v13883_v10  ;;  %vm6677_vm12 = vweird.f32 %v13881_v51  ;;  %v6683_v33 = vand.u32 2147483648, %v13881_v51  ;;  %v6651_v19 = vand.u32 2147483647, %v13892_v54 }
 0xa97   : > { %v6601_v59 = vand.u32 2147483647, %v13889_v8  ;;  %v13896_v15 = vadd.f32 %v6516_v56, %v6476_v24  ;;  %8047 = vrcp.f32 %v13886_v38  ;;  %v6553_v18 = vadd.f32 1.0, %v13889_v8 }
 0xa98   : > { %8049 = vrcp.f32 %v13892_v54  ;;  %v6576_v47 = vmul.f32 2.0, %v6568_v30  ;;  %vm13944_vm9 = vcmp.eq.f32.partialorder %v6681_v22, 8.507059e+37 }
 0xa99   : > { %v13902_v42 = vadd.f32 1.0, %v6601_v59  ;;  %v6554_v26 = vadd.f32 1.0, %v13896_v15  ;;  %v6602_v5 = vand.u32 2147483647, %v13896_v15  ;;  %v6561_v62 = vmul.f32 0.5, %v6553_v18 }
 0xa9a   : > { %vm6738_vm1 = vcmp.ge.f32.partialorder %v13896_v15, 0.0 }
 0xa9b   : > { %v8044_v9 = vpop.eup %8043  ;;  %8051 = vrcp.f32 %v13902_v42  ;;  %v6562_v34 = vmul.f32 0.5, %v6554_v26  ;;  %v13914_v3 = vadd.f32 1.0, %v6602_v5  ;;  %v6584_v5 = vsub.f32 %v13873_v25, %v6576_v47 }
 0xa9c   : > { %8053 = vrcp.f32 %v13899_v40  ;;  %v6545_v37 = vpop.f32.mrf.mxu3  ;;  %v6673_v35 = vmul.f32 %v8044_v9, %v13881_v51  ;;  %v13925_v61 = vpop.eup %8045  ;;  %vm6678_vm4 = vweird.f32 %v8044_v9  ;;  %vm6692_vm13 = vweird.f32 %v13902_v42 }
 0xa9d   : > { %v6570_v17 = vfloor.f32 %v6562_v34  ;;  %8055 = vrcp.f32 %v13914_v3  ;;  %v13922_v55 = vadd.f32 %v6545_v37, %v6477_v50  ;;  %v13931_v32 = vpop.eup %8047  ;;  %v6711_v57 = vand.u32 2147483647, %v13914_v3  ;;  %vm6679_vm2 = vmor %vm6677_vm12, %vm6678_vm4 }
 0xa9e   : > { %v6674_v27 = vsub.f32 1.0, %v6673_v35  ;;  %v13936_v12 = vpop.eup %8049  ;;  %vm6707_vm7 = vweird.f32 %v13914_v3  ;;  %v6713_v26 = vand.u32 2147483648, %v13914_v3  ;;  %v6684_v37 = vor.u32 1.1754944e-38, %v6683_v33 }
 0xa9f   : > { %v6555_v44 = vadd.f32 1.0, %v13922_v55  ;;  %v6603_v28 = vand.u32 2147483647, %v13922_v55  ;;  %v6578_v2 = vmul.f32 2.0, %v6570_v17  ;;  %vm13959_vm6 = vcmp.eq.f32.partialorder %v6711_v57, 8.507059e+37 }
 0xaa0   : > { %v6675_v52 = vmul.f32 %v8044_v9, %v6674_v27  ;;  %v6569_v17 = vfloor.f32 %v6561_v62  ;;  %vm6739_vm4 = vcmp.ge.f32.partialorder %v13922_v55, 0.0 }
 0xaa1   : > { %v13940_v43 = vpop.eup %8051  ;;  %v6563_v49 = vmul.f32 0.5, %v6555_v44  ;;  %v13942_v13 = vadd.f32 1.0, %v6603_v28  ;;  %v6586_v36 = vsub.f32 %v13896_v15, %v6578_v2 }
 0xaa2   : > { %v13948_v7 = vpop.eup %8053  ;;  %v6676_v24 = vadd.f32 %v8044_v9, %v6675_v52  ;;  %v6688_v58 = vmul.f32 %v13940_v43, %v13902_v42  ;;  %v6577_v51 = vmul.f32 2.0, %v6569_v17  ;;  %v6592_v52 = vand.u32 2147483647, %v6584_v5 }
 0xaa3   : > { %v8056_v56 = vpop.eup %8055  ;;  %v6571_v59 = vfloor.f32 %v6563_v49  ;;  %8057 = vrcp.f32 %v13942_v13  ;;  %v6728_v34 = vand.u32 2147483648, %v13942_v13  ;;  %v6726_v27 = vand.u32 2147483647, %v13942_v13 }
 0xaa4   : > { %v6703_v50 = vmul.f32 %v8056_v56, %v13914_v3  ;;  %v6680_v35 = vsel %vm6679_vm2, %v8044_v9, %v6676_v24  ;;  %v6689_v22 = vsub.f32 1.0, %v6688_v58  ;;  %vm6708_vm8 = vweird.f32 %v8056_v56 }
 0xaa5   : > { %v6579_v30 = vmul.f32 2.0, %v6571_v59  ;;  %v6685_v44 = vsel %vm13944_vm9, %v6684_v37, %v6680_v35  ;;  %v6714_v9 = vor.u32 1.1754944e-38, %v6713_v26  ;;  %vm6693_vm10 = vweird.f32 %v13940_v43  ;;  %vm6709_vm15 = vmor %vm6707_vm7, %vm6708_vm8 }
 0xaa6   : > { %v6704_v18 = vsub.f32 1.0, %v6703_v50  ;;  %v6686_v47 = vmul.f32 %v6685_v44, %v13873_v25  ;;  %v6690_v2 = vmul.f32 %v13940_v43, %v6689_v22  ;;  %v6594_v49 = vand.u32 2147483647, %v6586_v36  ;;  %vm13992_vm11 = vmor %vm6692_vm13, %vm6693_vm10 }
 0xaa7   : > { %v6587_v28 = vsub.f32 %v13922_v55, %v6579_v30  ;;  %vm6722_vm3 = vweird.f32 %v13942_v13  ;;  %v6729_v45 = vor.u32 1.1754944e-38, %v6728_v34  ;;  %vm13981_vm5 = vcmp.eq.f32.partialorder %v6726_v27, 8.507059e+37 }
 0xaa8   : > { %v6705_v57 = vmul.f32 %v8056_v56, %v6704_v18  ;;  %v6691_v24 = vadd.f32 %v13940_v43, %v6690_v2  ;;  %v6696_v26 = vand.u32 2147483647, %v13902_v42  ;;  %v6744_v36 = vsel %vm6736_vm0, %v6592_v52, %v6686_v47 }
 0xaa9   : > { %v8058_v33 = vpop.eup %8057  ;;  %v6595_v5 = vand.u32 2147483647, %v6587_v28  ;;  %v6585_v50 = vsub.f32 %v13889_v8, %v6577_v51  ;;  %v6698_v34 = vand.u32 2147483648, %v13902_v42  ;;  %v6558_v17 = vmul.f32 0.5, %v13911_v60 }
 0xaaa   : > { %v6706_v62 = vadd.f32 %v8056_v56, %v6705_v57  ;;  %v6718_v58 = vmul.f32 %v8058_v33, %v13942_v13  ;;  %v6695_v35 = vsel %vm13992_vm11, %v13940_v43, %v6691_v24  ;;  %vm6723_vm12 = vweird.f32 %v8058_v33 }
 0xaab   : > { %v6699_v22 = vor.u32 1.1754944e-38, %v6698_v34  ;;  %v6643_v18 = vmul.f32 %v13936_v12, %v13892_v54  ;;  %vm6697_vm9 = vcmp.eq.f32.partialorder %v6696_v26, 8.507059e+37  ;;  %v6566_v27 = vfloor.f32 %v6558_v17  ;;  %vm6724_vm7 = vmor %vm6722_vm3, %vm6723_vm12 }
 0xaac   : > { %v6710_v37 = vsel %vm6709_vm15, %v8056_v56, %v6706_v62  ;;  %v6719_v30 = vsub.f32 1.0, %v6718_v58  ;;  %v14008_v44 = vadd.f32 %v6744_v36, %v13328_v14  ;;  %v6653_v2 = vand.u32 2147483648, %v13892_v54 }
 0xaad   : > { %v6715_v25 = vsel %vm13959_vm6, %v6714_v9, %v6710_v37  ;;  %v6700_v43 = vsel %vm6697_vm9, %v6699_v22, %v6695_v35  ;;  %v6644_v60 = vsub.f32 1.0, %v6643_v18  ;;  %v6574_v51 = vmul.f32 2.0, %v6566_v27 }
 0xaae   : > { %v6716_v42 = vmul.f32 %v6715_v25, %v13896_v15  ;;  %v6720_v56 = vmul.f32 %v8058_v33, %v6719_v30  ;;  %v6701_v14 = vmul.f32 %v6700_v43, %v13889_v8  ;;  %vm6648_vm0 = vweird.f32 %v13936_v12 }
 0xaaf   : > { %v6645_v9 = vmul.f32 %v13936_v12, %v6644_v60  ;;  %v6593_v15 = vand.u32 2147483647, %v6585_v50  ;;  %vm6737_vm6 = vcmp.ge.f32.partialorder %v13889_v8, 0.0  ;;  %vm6647_vm2 = vweird.f32 %v13892_v54 }
 0xab0   : > { %v6746_v28 = vsel %vm6738_vm1, %v6594_v49, %v6716_v42  ;;  %v6721_v47 = vadd.f32 %v8058_v33, %v6720_v56  ;;  %v6582_v13 = vsub.f32 %v13871_v1, %v6574_v51  ;;  %v6559_v24 = vmul.f32 0.5, %v13917_v53  ;;  %vm6649_vm8 = vmor %vm6647_vm2, %vm6648_vm0 }
 0xab1   : > { %v14015_v57 = vadd.f32 %v6746_v28, %v13290_v41  ;;  %v6646_v49 = vadd.f32 %v13936_v12, %v6645_v9  ;;  %vm6652_vm1 = vcmp.eq.f32.partialorder %v6651_v19, 8.507059e+37  ;;  %v6658_v8 = vmul.f32 %v13948_v7, %v13899_v40 }
 0xab2   : > { %v6725_v52 = vsel %vm6724_vm7, %v8058_v33, %v6721_v47  ;;  %v6654_v33 = vor.u32 1.1754944e-38, %v6653_v2  ;;  %v6745_v54 = vsel %vm6737_vm6, %v6593_v15, %v6701_v14  ;;  %v6666_v59 = vand.u32 2147483647, %v13899_v40 }
 0xab3   : > { %6792 = vmatpush.msrb.mxu0 %v14015_v57  ;;  %v6730_v41 = vsel %vm13981_vm5, %v6729_v45, %v6725_v52  ;;  %v6650_v58 = vsel %vm6649_vm8, %v13936_v12, %v6646_v49  ;;  %v6567_v45 = vfloor.f32 %v6559_v24  ;;  %v6659_v36 = vsub.f32 1.0, %v6658_v8 }
 0xab4   : > { %v6731_v62 = vmul.f32 %v6730_v41, %v13922_v55  ;;  %v6655_v53 = vsel %vm6652_vm1, %v6654_v33, %v6650_v58  ;;  %v6668_v50 = vand.u32 2147483648, %v13899_v40  ;;  %v6590_v34 = vand.u32 2147483647, %v6582_v13 }
 0xab5   : > { %6793 = vmatpush.msrb.mxu0 %v14008_v44  ;;  %v6656_v37 = vmul.f32 %v6655_v53, %v13871_v1  ;;  %v6575_v30 = vmul.f32 2.0, %v6567_v45  ;;  %v14045_v35 = vadd.f32 %v6745_v54, %v13351_v23  ;;  %vm6734_vm10 = vcmp.ge.f32.partialorder %v13871_v1, 0.0  ;;  %v6756_v54 = vld [vmem:[#allocation2 + $0x60] sm:$0xff]  ;;  %v6761_v53 = vld [vmem:[#allocation5 + $0x108] sm:$0xff] }
 0xab6   : > { %v6747_v26 = vsel %vm6739_vm4, %v6595_v5, %v6731_v62  ;;  %v6660_v12 = vmul.f32 %v13948_v7, %v6659_v36  ;;  %vm6663_vm3 = vweird.f32 %v13948_v7  ;;  %vm6662_vm15 = vweird.f32 %v13899_v40 }
 0xab7   : > { %v14041_v3 = vadd.f32 %v6747_v26, %v13309_v6  ;;  %v6742_v55 = vsel %vm6734_vm10, %v6590_v34, %v6656_v37  ;;  %vm14052_vm5 = vcmp.eq.f32.partialorder %v6666_v59, 8.507059e+37  ;;  %v6613_v5 = vmul.f32 %v13925_v61, %v13883_v10  ;;  %vm6664_vm13 = vmor %vm6662_vm15, %vm6663_vm3  ;;  %v6760_v26 = vld [vmem:[#allocation5 + $0x100] sm:$0xff] }
 0xab8   : > { %v14059_v23 = vadd.f32 %v6742_v55, %v13368_v31  ;;  %v6583_v1 = vsub.f32 %v13876_v39, %v6575_v30  ;;  %v6661_v17 = vadd.f32 %v13948_v7, %v6660_v12  ;;  %v6669_v25 = vor.u32 1.1754944e-38, %v6668_v50  ;;  %v6762_v50 = vld [vmem:[#allocation5 + $0x110] sm:$0xff]  ;;  %v6763_v30 = vld [vmem:[#allocation5 + $0x118] sm:$0xff]  ;;  %v6764_v12 = vld [vmem:[#allocation5 + $0x120] sm:$0xff] }
 0xab9   : > { %6821 = vmatpush.msrb.mxu1 %v14041_v3  ;;  %vm6735_vm11 = vcmp.ge.f32.partialorder %v13876_v39, 0.0  ;;  %v6572_v40 = vmul.f32 2.0, %v6564_v4  ;;  %v6614_v22 = vsub.f32 1.0, %v6613_v5  ;;  %v6623_v18 = vand.u32 2147483648, %v13883_v10 }
 0xaba   : > { %6794 = vmatpush.msrb.mxu0 %v14059_v23  ;;  %v6665_v31 = vsel %vm6664_vm13, %v13948_v7, %v6661_v17  ;;  %vm6617_vm12 = vweird.f32 %v13883_v10  ;;  %v6565_v42 = vfloor.f32 %v13929_v29  ;;  %v6628_v56 = vmul.f32 %v13931_v32, %v13886_v38 }
 0xabb   : > { %6822 = vmatpush.msrb.mxu1 %v14045_v35  ;;  %v6670_v27 = vsel %vm14052_vm5, %v6669_v25, %v6665_v31  ;;  %v6615_v11 = vmul.f32 %v13925_v61, %v6614_v22  ;;  %vm6618_vm4 = vweird.f32 %v13925_v61  ;;  %v6621_v4 = vand.u32 2147483647, %v13883_v10  ;;  %v6765_v25 = vld [vmem:[#allocation5 + $0x128] sm:$0xff] }
 0xabc   : > { %v6591_v43 = vand.u32 2147483647, %v6583_v1  ;;  %v6671_v60 = vmul.f32 %v6670_v27, %v13876_v39  ;;  %v6573_v7 = vmul.f32 2.0, %v6565_v42  ;;  %v6629_v19 = vsub.f32 1.0, %v6628_v56  ;;  %vm6619_vm9 = vmor %vm6617_vm12, %vm6618_vm4 }
 0xabd   : > { %v6580_v28 = vsub.f32 %v13867_v46, %v6572_v40  ;;  %v6616_v29 = vadd.f32 %v13925_v61, %v6615_v11  ;;  %v6624_v47 = vor.u32 1.1754944e-38, %v6623_v18  ;;  %v6638_v51 = vand.u32 2147483648, %v13886_v38 }
 0xabe   : > { %v6743_v2 = vsel %vm6735_vm11, %v6591_v43, %v6671_v60  ;;  %v6630_v14 = vmul.f32 %v13931_v32, %v6629_v19  ;;  %vm6633_vm7 = vweird.f32 %v13931_v32  ;;  %v6636_v9 = vand.u32 2147483647, %v13886_v38  ;;  %v6766_v60 = vld [vmem:[#allocation5 + $0x130] sm:$0xff] }
 0xabf   : > { %v14091_v52 = vadd.f32 %v6743_v2, %v13394_v21  ;;  %v6620_v15 = vsel %vm6619_vm9, %v13925_v61, %v6616_v29  ;;  %vm6622_vm0 = vcmp.eq.f32.partialorder %v6621_v4, 8.507059e+37  ;;  %v6581_v13 = vsub.f32 %v13869_v20, %v6573_v7 }
 0xac0   : > { %v6625_v41 = vsel %vm6622_vm0, %v6624_v47, %v6620_v15  ;;  %v6631_v39 = vadd.f32 %v13931_v32, %v6630_v14  ;;  %vm6632_vm6 = vweird.f32 %v13886_v38  ;;  %v6588_v10 = vand.u32 2147483647, %v6580_v28  ;;  %v6767_v15 = vld [vmem:[#allocation5 + $0x138] sm:$0xff] }
 0xac1   : > { %6823 = vmatpush.msrb.mxu1 %v14091_v52  ;;  %v6626_v49 = vmul.f32 %v6625_v41, %v13867_v46  ;;  %vm6634_vm2 = vmor %vm6632_vm6, %vm6633_vm7  ;;  %v6639_v24 = vor.u32 1.1754944e-38, %v6638_v51  ;;  %vm6732_vm8 = vcmp.ge.f32.partialorder %v13867_v46, 0.0  ;;  %vm6637_vm1 = vcmp.eq.f32.partialorder %v6636_v9, 8.507059e+37  ;;  %v6758_v46 = vld [vmem:[#allocation2 + $0x70] sm:$0xff] }
 0xac2   : > { %v6635_v21 = vsel %vm6634_vm2, %v13931_v32, %v6631_v39  ;;  %v6589_v8 = vand.u32 2147483647, %v6581_v13  ;;  %vm6733_vm10 = vcmp.ge.f32.partialorder %v13869_v20, 0.0  ;;  %vm15442_vm3 = vcmask 261120  }
 0xac3   : > { %v6740_v61 = vsel %vm6732_vm8, %v6588_v10, %v6626_v49  ;;  %v6640_v62 = vsel %vm6637_vm1, %v6639_v24, %v6635_v21  ;;  %vm15443_vm15 = vmmov %vm15442_vm3 }
 0xac4   : > { %v14102_v33 = vadd.f32 %v6740_v61, %v13411_v0  ;;  %v6641_v38 = vmul.f32 %v6640_v62, %v13869_v20  ;;  %v6757_v0 = vld [vmem:[#allocation2 + $0x68] sm:$0xff]  ;;  %vm15444_vm5 = vmmov %vm15442_vm3  ;;  %v6759_v20 = vld [vmem:[#allocation2 + $0x78] sm:$0xff] }
 0xac5   : > { %vm15445_vm13 = vmmov %vm15442_vm3 }
 0xac6   : > { %6795 = vmatpush.msrb.mxu0 %v14102_v33  ;;  %v6741_v58 = vsel %vm6733_vm10, %v6589_v8, %v6641_v38  ;;  %vm15446_vm11 = vmmov %vm15442_vm3 }
 0xac7   : > { %v14108_v45 = vadd.f32 %v6741_v58, %v13419_v16  ;;  %7612 = vmatmul.msk.f32.vlgmr.msrb.gmra.mxu0 %vm15442_vm3, %v6756_v54  ;;  %vm15447_vm12 = vmmov %vm15442_vm3 }
 0xac8   : > { %vm15448_vm4 = vmmov %vm15442_vm3 }
 0xac9   : > { %6824 = vmatpush.msrb.mxu1 %v14108_v45  ;;  %vm15449_vm9 = vmmov %vm15442_vm3 }
 0xaca   : > { %7616 = vmatmul.msk.f32.vlgmr.msrb.gmra.mxu1 %vm15443_vm15, %v6756_v54 }
 0xacf   : > { %7613 = vmatmul.msk.f32.gmra.mxu0 %vm15444_vm5, %v6757_v0 }
 0xad2   : > { %7617 = vmatmul.msk.f32.gmra.mxu1 %vm15445_vm13, %v6757_v0 }
 0xad7   : > { %7614 = vmatmul.msk.f32.gmra.mxu0 %vm15446_vm11, %v6758_v46 }
 0xada   : > { %7618 = vmatmul.msk.f32.gmra.mxu1 %vm15447_vm12, %v6758_v46 }
 0xadf   : > { %7615 = vmatmul.msk.f32.gmra.mxu0 %vm15448_vm4, %v6759_v20 }
 0xae2   : > { %7619 = vmatmul.msk.f32.gmra.mxu1 %vm15449_vm9, %v6759_v20 }
 0xb44   : > { %v6797_v16 = vpop.f32.mrf.mxu0 }
 0xb45   : > { %v14119_v34 = vadd.f32 %v6797_v16, %v6760_v26 }
 0xb47   : > { %v6826_v32 = vpop.f32.mrf.mxu1  ;;  %v6886_v5 = vand.u32 2147483647, %v14119_v34  ;;  %v6838_v13 = vadd.f32 1.0, %v14119_v34 }
 0xb48   : > { %v14121_v37 = vadd.f32 %v6826_v32, %v6761_v53 }
 0xb49   : > { %v14135_v56 = vadd.f32 1.0, %v6886_v5  ;;  %v14173_v16 = vmul.f32 0.5, %v6838_v13 }
 0xb4a   : > { %v6887_v40 = vand.u32 2147483647, %v14121_v37  ;;  %v6839_v39 = vadd.f32 1.0, %v14121_v37 }
 0xb4c   : > { %v6800_v59 = vpop.f32.mrf.mxu0  ;;  %v14140_v4 = vadd.f32 1.0, %v6887_v40  ;;  %v14175_v32 = vmul.f32 0.5, %v6839_v39 }
 0xb4d   : > { %v14123_v55 = vadd.f32 %v6800_v59, %v6762_v50 }
 0xb4f   : > { %v6829_v36 = vpop.f32.mrf.mxu1  ;;  %v6888_v22 = vand.u32 2147483647, %v14123_v55 }
 0xb50   : > { %v14126_v1 = vadd.f32 %v6829_v36, %v6763_v30  ;;  %v6840_v36 = vadd.f32 1.0, %v14123_v55 }
 0xb51   : > { %v14145_v28 = vadd.f32 1.0, %v6888_v22 }
 0xb52   : > { %v6889_v27 = vand.u32 2147483647, %v14126_v1 }
 0xb54   : > { %v6803_v6 = vpop.f32.mrf.mxu0  ;;  %v14151_v14 = vadd.f32 1.0, %v6889_v27 }
 0xb55   : > { %v14128_v17 = vadd.f32 %v6803_v6, %v6764_v12 }
 0xb57   : > { %v6890_v18 = vand.u32 2147483647, %v14128_v17  ;;  %v6832_v31 = vpop.f32.mrf.mxu1  ;;  %v6842_v7 = vadd.f32 1.0, %v14128_v17  ;;  %vm7026_vm3 = vcmp.ge.f32.partialorder %v14128_v17, 0.0 }
 0xb58   : > { %v14133_v42 = vadd.f32 %v6832_v31, %v6765_v25 }
 0xb59   : > { %v14138_v11 = vadd.f32 1.0, %v6890_v18  ;;  %v6850_v51 = vmul.f32 0.5, %v6842_v7 }
 0xb5a   : > { %v6891_v43 = vand.u32 2147483647, %v14133_v42  ;;  %v6843_v19 = vadd.f32 1.0, %v14133_v42  ;;  %vm7027_vm9 = vcmp.ge.f32.partialorder %v14133_v42, 0.0 }
 0xb5b   : > { %8059 = vrcp.f32 %v14138_v11  ;;  %v6858_v41 = vfloor.f32 %v6850_v51  ;;  %v6973_v21 = vand.u32 2147483648, %v14138_v11  ;;  %v6971_v58 = vand.u32 2147483647, %v14138_v11 }
 0xb5c   : > { %v14148_v29 = vadd.f32 1.0, %v6891_v43  ;;  %v6806_v47 = vpop.f32.mrf.mxu0  ;;  %v6851_v2 = vmul.f32 0.5, %v6843_v19  ;;  %8061 = vrcp.f32 %v14135_v56  ;;  %vm6967_vm7 = vweird.f32 %v14138_v11 }
 0xb5d   : > { %v14153_v9 = vadd.f32 %v6806_v47, %v6766_v60  ;;  %8063 = vrcp.f32 %v14140_v4  ;;  %v6866_v62 = vmul.f32 2.0, %v6858_v41  ;;  %v6974_v53 = vor.u32 1.1754944e-38, %v6973_v21 }
 0xb5e   : > { %8065 = vrcp.f32 %v14148_v29  ;;  %v6859_v8 = vfloor.f32 %v6851_v2  ;;  %vm14192_vm0 = vcmp.eq.f32.partialorder %v6971_v58, 8.507059e+37  ;;  %v6986_v27 = vand.u32 2147483647, %v14148_v29 }
 0xb5f   : > { %v6892_v10 = vand.u32 2147483647, %v14153_v9  ;;  %v6835_v49 = vpop.f32.mrf.mxu1  ;;  %v6844_v24 = vadd.f32 1.0, %v14153_v9  ;;  %8067 = vrcp.f32 %v14145_v28  ;;  %v6874_v6 = vsub.f32 %v14128_v17, %v6866_v62 }
 0xb60   : > { %v14163_v61 = vadd.f32 %v6835_v49, %v6767_v15  ;;  %8069 = vrcp.f32 %v14151_v14  ;;  %v6867_v5 = vmul.f32 2.0, %v6859_v8  ;;  %v6988_v19 = vand.u32 2147483648, %v14148_v29 }
 0xb61   : > { %v14166_v38 = vadd.f32 1.0, %v6892_v10  ;;  %v6852_v54 = vmul.f32 0.5, %v6844_v24  ;;  %v14169_v0 = vpop.eup %8059  ;;  %vm6982_vm6 = vweird.f32 %v14148_v29  ;;  %v6848_v41 = vmul.f32 0.5, %v6840_v36 }
 0xb62   : > { %v6893_v46 = vand.u32 2147483647, %v14163_v61  ;;  %v6845_v20 = vadd.f32 1.0, %v14163_v61  ;;  %v14177_v59 = vpop.eup %8061  ;;  %v6963_v18 = vmul.f32 %v14169_v0, %v14138_v11  ;;  %v6882_v39 = vand.u32 2147483647, %v6874_v6 }
 0xb63   : > { %8071 = vrcp.f32 %v14166_v38  ;;  %v6860_v26 = vfloor.f32 %v6852_v54  ;;  %v14182_v50 = vpop.eup %8063  ;;  %v7003_v22 = vand.u32 2147483648, %v14166_v38  ;;  %v7001_v60 = vand.u32 2147483647, %v14166_v38 }
 0xb64   : > { %v14184_v30 = vadd.f32 1.0, %v6893_v46  ;;  %v6853_v12 = vmul.f32 0.5, %v6845_v20  ;;  %v14187_v25 = vpop.eup %8065  ;;  %v6964_v15 = vsub.f32 1.0, %v6963_v18  ;;  %vm6997_vm2 = vweird.f32 %v14166_v38 }
 0xb65   : > { %v6868_v40 = vmul.f32 2.0, %v6860_v26  ;;  %v14197_v43 = vpop.eup %8067  ;;  %v6875_v10 = vsub.f32 %v14133_v42, %v6867_v5  ;;  %v6978_v49 = vmul.f32 %v14187_v25, %v14148_v29  ;;  %v7004_v21 = vor.u32 1.1754944e-38, %v7003_v22 }
 0xb66   : > { %8073 = vrcp.f32 %v14184_v30  ;;  %v6861_v7 = vfloor.f32 %v6853_v12  ;;  %v14202_v47 = vpop.eup %8069  ;;  %v7018_v2 = vand.u32 2147483648, %v14184_v30  ;;  %v7016_v62 = vand.u32 2147483647, %v14184_v30 }
 0xb67   : > { %v6876_v51 = vsub.f32 %v14153_v9, %v6868_v40  ;;  %v6965_v8 = vmul.f32 %v14169_v0, %v6964_v15  ;;  %vm6968_vm8 = vweird.f32 %v14169_v0  ;;  %vm14214_vm1 = vcmp.eq.f32.partialorder %v6986_v27, 8.507059e+37 }
 0xb68   : > { %v6869_v13 = vmul.f32 2.0, %v6861_v7  ;;  %vm14219_vm10 = vcmp.eq.f32.partialorder %v7001_v60, 8.507059e+37  ;;  %v7019_v26 = vor.u32 1.1754944e-38, %v7018_v2  ;;  %vm6983_vm15 = vweird.f32 %v14187_v25  ;;  %vm6969_vm11 = vmor %vm6967_vm7, %vm6968_vm8 }
 0xb69   : > { %v8072_v24 = vpop.eup %8071  ;;  %v6884_v58 = vand.u32 2147483647, %v6876_v51  ;;  %v6966_v36 = vadd.f32 %v14169_v0, %v6965_v8  ;;  %v6979_v12 = vsub.f32 1.0, %v6978_v49  ;;  %v6856_v6 = vfloor.f32 %v6848_v41 }
 0xb6a   : > { %v6993_v46 = vmul.f32 %v8072_v24, %v14166_v38  ;;  %vm6998_vm5 = vweird.f32 %v8072_v24  ;;  %v6877_v22 = vsub.f32 %v14163_v61, %v6869_v13  ;;  %v6883_v18 = vand.u32 2147483647, %v6875_v10 }
 0xb6b   : > { %v6933_v27 = vmul.f32 %v14197_v43, %v14145_v28  ;;  %vm14236_vm4 = vcmp.eq.f32.partialorder %v7016_v62, 8.507059e+37  ;;  %v6970_v51 = vsel %vm6969_vm11, %v14169_v0, %v6966_v36  ;;  %v6980_v2 = vmul.f32 %v14187_v25, %v6979_v12  ;;  %vm6999_vm13 = vmor %vm6997_vm2, %vm6998_vm5 }
 0xb6c   : > { %v8074_v5 = vpop.eup %8073  ;;  %v6994_v40 = vsub.f32 1.0, %v6993_v46  ;;  %v6989_v15 = vor.u32 1.1754944e-38, %v6988_v19  ;;  %v6975_v11 = vsel %vm14192_vm0, %v6974_v53, %v6970_v51  ;;  %v6864_v13 = vmul.f32 2.0, %v6856_v6  ;;  %vm6984_vm0 = vmor %vm6982_vm6, %vm6983_vm15 }
 0xb6d   : > { %v7008_v60 = vmul.f32 %v8074_v5, %v14184_v30  ;;  %v6934_v10 = vsub.f32 1.0, %v6933_v27  ;;  %v6976_v8 = vmul.f32 %v6975_v11, %v14128_v17  ;;  %v6981_v46 = vadd.f32 %v14187_v25, %v6980_v2 }
 0xb6e   : > { %v6995_v41 = vmul.f32 %v8072_v24, %v6994_v40  ;;  %vm6937_vm7 = vweird.f32 %v14145_v28  ;;  %vm7013_vm8 = vweird.f32 %v8074_v5  ;;  %vm7029_vm11 = vcmp.ge.f32.partialorder %v14163_v61, 0.0 }
 0xb6f   : > { %v7009_v49 = vsub.f32 1.0, %v7008_v60  ;;  %v6935_v0 = vmul.f32 %v14197_v43, %v6934_v10  ;;  %vm6938_vm12 = vweird.f32 %v14197_v43  ;;  %v6985_v31 = vsel %vm6984_vm0, %v14187_v25, %v6981_v46 }
 0xb70   : > { %v6996_v62 = vadd.f32 %v8072_v24, %v6995_v41  ;;  %v6941_v19 = vand.u32 2147483647, %v14145_v28  ;;  %v6943_v36 = vand.u32 2147483648, %v14145_v28  ;;  %v6990_v29 = vsel %vm14214_vm1, %v6989_v15, %v6985_v31  ;;  %vm6939_vm6 = vmor %vm6937_vm7, %vm6938_vm12 }
 0xb71   : > { %v7010_v53 = vmul.f32 %v8074_v5, %v7009_v49  ;;  %v6872_v6 = vsub.f32 %v14123_v55, %v6864_v13  ;;  %v6936_v40 = vadd.f32 %v14197_v43, %v6935_v0  ;;  %v6885_v38 = vand.u32 2147483647, %v6877_v22 }
 0xb72   : > { %v7000_v12 = vsel %vm6999_vm13, %v8072_v24, %v6996_v62  ;;  %v7034_v25 = vsel %vm7026_vm3, %v6882_v39, %v6976_v8  ;;  %vm15458_vm2 = vweird.f32 %v14184_v30  ;;  %v6991_v54 = vmul.f32 %v6990_v29, %v14133_v42 }
 0xb73   : > { %v7005_v27 = vsel %vm14219_vm10, %v7004_v21, %v7000_v12  ;;  %v7011_v60 = vadd.f32 %v8074_v5, %v7010_v53  ;;  %vm7014_vm1 = vmor %vm15458_vm2, %vm7013_vm8  ;;  %v6940_v51 = vsel %vm6939_vm6, %v14197_v43, %v6936_v40  ;;  %v6944_v20 = vor.u32 1.1754944e-38, %v6943_v36 }
 0xb74   : > { %v7006_v24 = vmul.f32 %v7005_v27, %v14153_v9  ;;  %vm6942_vm10 = vcmp.eq.f32.partialorder %v6941_v19, 8.507059e+37  ;;  %v6841_v22 = vadd.f32 1.0, %v14126_v1  ;;  %v6948_v17 = vmul.f32 %v14202_v47, %v14151_v14 }
 0xb75   : > { %v7015_v21 = vsel %vm7014_vm1, %v8074_v5, %v7011_v60  ;;  %vm15459_vm3 = vcmp.ge.f32.partialorder %v14153_v9, 0.0  ;;  %v6880_v30 = vand.u32 2147483647, %v6872_v6  ;;  %v6945_v2 = vsel %vm6942_vm10, %v6944_v20, %v6940_v51 }
 0xb76   : > { %v7036_v28 = vsel %vm15459_vm3, %v6884_v58, %v7006_v24  ;;  %v7020_v39 = vsel %vm14236_vm4, %v7019_v26, %v7015_v21  ;;  %v6946_v43 = vmul.f32 %v6945_v2, %v14123_v55  ;;  %v6849_v5 = vmul.f32 0.5, %v6841_v22  ;;  %v7038_v22 = vld [vmem:[#allocation2 + $0x80] sm:$0xff] }
 0xb77   : > { %7074 = vmatpush.msrb.mxu2 %v7036_v28  ;;  %v7021_v15 = vmul.f32 %v7020_v39, %v14163_v61  ;;  %v6949_v41 = vsub.f32 1.0, %v6948_v17  ;;  %v7035_v11 = vsel %vm7027_vm9, %v6883_v18, %v6991_v54  ;;  %vm7024_vm15 = vcmp.ge.f32.partialorder %v14123_v55, 0.0 }
 0xb78   : > { %v6956_v9 = vand.u32 2147483647, %v14151_v14  ;;  %v6958_v58 = vand.u32 2147483648, %v14151_v14  ;;  %v6857_v7 = vfloor.f32 %v6849_v5  ;;  %vm6953_vm5 = vweird.f32 %v14202_v47 }
 0xb79   : > { %v7037_v26 = vsel %vm7029_vm11, %v6885_v38, %v7021_v15  ;;  %7075 = vmatpush.msrb.mxu2 %v7034_v25  ;;  %v6950_v13 = vmul.f32 %v14202_v47, %v6949_v41  ;;  %v7032_v10 = vsel %vm7024_vm15, %v6880_v30, %v6946_v43  ;;  %vm6952_vm13 = vweird.f32 %v14151_v14 }
 0xb7a   : > { %7103 = vmatpush.msrb.mxu3 %v7037_v26  ;;  %v6854_v42 = vfloor.f32 %v14173_v16  ;;  %v6903_v55 = vmul.f32 %v14177_v59, %v14135_v56  ;;  %v6865_v18 = vmul.f32 2.0, %v6857_v7  ;;  %vm6957_vm12 = vcmp.eq.f32.partialorder %v6956_v9, 8.507059e+37  ;;  %vm6954_vm4 = vmor %vm6952_vm13, %vm6953_vm5  ;;  %v7044_v7 = vld [vmem:[#allocation5 + $0x150] sm:$0xff] }
 0xb7b   : > { %7076 = vmatpush.msrb.mxu2 %v7032_v10  ;;  %v6951_v61 = vadd.f32 %v14202_v47, %v6950_v13  ;;  %v6959_v49 = vor.u32 1.1754944e-38, %v6958_v58  ;;  %v6911_v62 = vand.u32 2147483647, %v14135_v56  ;;  %v6913_v0 = vand.u32 2147483648, %v14135_v56 }
 0xb7c   : > { %7104 = vmatpush.msrb.mxu3 %v7035_v11  ;;  %v6862_v8 = vmul.f32 2.0, %v6854_v42  ;;  %v6904_v46 = vsub.f32 1.0, %v6903_v55  ;;  %v6873_v14 = vsub.f32 %v14126_v1, %v6865_v18  ;;  %v6855_v53 = vfloor.f32 %v14175_v32  ;;  %v7043_v11 = vld [vmem:[#allocation5 + $0x148] sm:$0xff] }
 0xb7d   : > { %v6955_v16 = vsel %vm6954_vm4, %v14202_v47, %v6951_v61  ;;  %v6918_v31 = vmul.f32 %v14182_v50, %v14140_v4  ;;  %vm6908_vm9 = vweird.f32 %v14177_v59  ;;  %vm7025_vm7 = vcmp.ge.f32.partialorder %v14126_v1, 0.0 }
 0xb7e   : > { %v6960_v19 = vsel %vm6957_vm12, %v6959_v49, %v6955_v16  ;;  %v6905_v36 = vmul.f32 %v14177_v59, %v6904_v46  ;;  %v6881_v12 = vand.u32 2147483647, %v6873_v14  ;;  %v6870_v6 = vsub.f32 %v14119_v34, %v6862_v8 }
 0xb7f   : > { %v6961_v29 = vmul.f32 %v6960_v19, %v14126_v1  ;;  %vm6907_vm8 = vweird.f32 %v14135_v56  ;;  %v6863_v32 = vmul.f32 2.0, %v6855_v53  ;;  %v6919_v47 = vsub.f32 1.0, %v6918_v31  ;;  %v7046_v53 = vld [vmem:[#allocation5 + $0x160] sm:$0xff] }
 0xb80   : > { %v6906_v40 = vadd.f32 %v14177_v59, %v6905_v36  ;;  %vm6909_vm11 = vmor %vm6907_vm8, %vm6908_vm9  ;;  %vm6912_vm0 = vcmp.eq.f32.partialorder %v6911_v62, 8.507059e+37  ;;  %v6914_v38 = vor.u32 1.1754944e-38, %v6913_v0  ;;  %vm6923_vm6 = vweird.f32 %v14182_v50  ;;  %v7045_v62 = vld [vmem:[#allocation5 + $0x158] sm:$0xff] }
 0xb81   : > { %v7033_v27 = vsel %vm7025_vm7, %v6881_v12, %v6961_v29  ;;  %v6920_v25 = vmul.f32 %v14182_v50, %v6919_v47  ;;  %v6926_v1 = vand.u32 2147483647, %v14140_v4  ;;  %v6928_v24 = vand.u32 2147483648, %v14140_v4 }
 0xb82   : > { %7105 = vmatpush.msrb.mxu3 %v7033_v27  ;;  %v6910_v60 = vsel %vm6909_vm11, %v14177_v59, %v6906_v40  ;;  %v6878_v54 = vand.u32 2147483647, %v6870_v6  ;;  %v6871_v20 = vsub.f32 %v14121_v37, %v6863_v32  ;;  %vm6922_vm2 = vweird.f32 %v14140_v4  ;;  %v7040_v4 = vld [vmem:[#allocation2 + $0x90] sm:$0xff] }
 0xb83   : > { %v6915_v51 = vsel %vm6912_vm0, %v6914_v38, %v6910_v60  ;;  %v6921_v21 = vadd.f32 %v14182_v50, %v6920_v25  ;;  %vm7022_vm1 = vcmp.ge.f32.partialorder %v14119_v34, 0.0  ;;  %vm6924_vm10 = vmor %vm6922_vm2, %vm6923_vm6  ;;  %v6929_v59 = vor.u32 1.1754944e-38, %v6928_v24 }
 0xb84   : > { %v6916_v56 = vmul.f32 %v6915_v51, %v14119_v34  ;;  %vm6927_vm3 = vcmp.eq.f32.partialorder %v6926_v1, 8.507059e+37  ;;  %v6879_v30 = vand.u32 2147483647, %v6871_v20  ;;  %vm15460_vm15 = vcmask 261120   ;;  %v7039_v34 = vld [vmem:[#allocation2 + $0x88] sm:$0xff] }
 0xb85   : > { %v6925_v28 = vsel %vm6924_vm10, %v14182_v50, %v6921_v21  ;;  %vm7023_vm5 = vcmp.ge.f32.partialorder %v14121_v37, 0.0  ;;  %vm15461_vm13 = vmmov %vm15460_vm15  ;;  %v7041_v50 = vld [vmem:[#allocation2 + $0x98] sm:$0xff] }
 0xb86   : > { %v7030_v17 = vsel %vm7022_vm1, %v6878_v54, %v6916_v56  ;;  %v6930_v39 = vsel %vm6927_vm3, %v6929_v59, %v6925_v28  ;;  %vm15462_vm12 = vmmov %vm15461_vm13 }
 0xb87   : > { %7077 = vmatpush.msrb.mxu2 %v7030_v17  ;;  %v6931_v2 = vmul.f32 %v6930_v39, %v14121_v37  ;;  %vm15463_vm4 = vmmov %vm15462_vm12  ;;  %v7042_v37 = vld [vmem:[#allocation5 + $0x140] sm:$0xff] }
 0xb88   : > { %7620 = vmatmul.msk.f32.vlgmr.msrb.gmra.mxu2 %vm15460_vm15, %v7038_v22  ;;  %vm15464_vm9 = vmmov %vm15463_vm4 }
 0xb89   : > { %v7031_v15 = vsel %vm7023_vm5, %v6879_v30, %v6931_v2  ;;  %vm15465_vm7 = vmmov %vm15463_vm4 }
 0xb8a   : > { %7106 = vmatpush.msrb.mxu3 %v7031_v15  ;;  %vm15466_vm8 = vmmov %vm15463_vm4 }
 0xb8b   : > { %7624 = vmatmul.msk.f32.vlgmr.msrb.gmra.mxu3 %vm15461_vm13, %v7038_v22  ;;  %vm15467_vm11 = vmmov %vm15463_vm4 }
 0xb90   : > { %7621 = vmatmul.msk.f32.gmra.mxu2 %vm15462_vm12, %v7039_v34 }
 0xb93   : > { %7625 = vmatmul.msk.f32.gmra.mxu3 %vm15463_vm4, %v7039_v34 }
 0xb98   : > { %7622 = vmatmul.msk.f32.gmra.mxu2 %vm15464_vm9, %v7040_v4 }
 0xb9b   : > { %7626 = vmatmul.msk.f32.gmra.mxu3 %vm15465_vm7, %v7040_v4 }
 0xba0   : > { %7623 = vmatmul.msk.f32.gmra.mxu2 %vm15466_vm8, %v7041_v50 }
 0xba3   : > { %7627 = vmatmul.msk.f32.gmra.mxu3 %vm15467_vm11, %v7041_v50 }
 0xc0b   : > { %v7079_v43 = vpop.f32.mrf.mxu2 }
 0xc0c   : > { %v14335_v5 = vadd.f32 %v7079_v43, %v7042_v37 }
 0xc0e   : > { %v7168_v41 = vand.u32 2147483647, %v14335_v5  ;;  %v7108_v9 = vpop.f32.mrf.mxu3  ;;  %v7120_v18 = vadd.f32 1.0, %v14335_v5  ;;  %vm7304_vm15 = vcmp.ge.f32.partialorder %v14335_v5, 0.0 }
 0xc0f   : > { %v14338_v26 = vadd.f32 %v7108_v9, %v7043_v11 }
 0xc10   : > { %v7176_v58 = vadd.f32 1.0, %v7168_v41  ;;  %v7128_v16 = vmul.f32 0.5, %v7120_v18 }
 0xc11   : > { %v7169_v42 = vand.u32 2147483647, %v14338_v26  ;;  %v7121_v8 = vadd.f32 1.0, %v14338_v26 }
 0xc12   : > { %8075 = vrcp.f32 %v7176_v58  ;;  %v7136_v6 = vfloor.f32 %v7128_v16  ;;  %v7193_v51 = vand.u32 2147483647, %v7176_v58  ;;  %v7195_v20 = vand.u32 2147483648, %v7176_v58 }
 0xc13   : > { %v7082_v13 = vpop.f32.mrf.mxu2  ;;  %v14350_v46 = vadd.f32 1.0, %v7169_v42  ;;  %v7129_v36 = vmul.f32 0.5, %v7121_v8  ;;  %vm7189_vm6 = vweird.f32 %v7176_v58 }
 0xc14   : > { %v14340_v10 = vadd.f32 %v7082_v13, %v7044_v7  ;;  %v7144_v54 = vmul.f32 2.0, %v7136_v6  ;;  %vm14379_vm2 = vcmp.eq.f32.partialorder %v7193_v51, 8.507059e+37  ;;  %v7196_v43 = vor.u32 1.1754944e-38, %v7195_v20 }
 0xc15   : > { %v7137_v27 = vfloor.f32 %v7129_v36  ;;  %v7210_v2 = vand.u32 2147483648, %v14350_v46  ;;  %v7208_v11 = vand.u32 2147483647, %v14350_v46  ;;  %vm7204_vm3 = vweird.f32 %v14350_v46 }
 0xc16   : > { %v7170_v55 = vand.u32 2147483647, %v14340_v10  ;;  %v7111_v0 = vpop.f32.mrf.mxu3  ;;  %v7122_v47 = vadd.f32 1.0, %v14340_v10  ;;  %v7152_v39 = vsub.f32 %v14335_v5, %v7144_v54  ;;  %vm7306_vm11 = vcmp.ge.f32.partialorder %v14340_v10, 0.0 }
 0xc17   : > { %v14354_v19 = vadd.f32 %v7111_v0, %v7045_v62  ;;  %v7145_v21 = vmul.f32 2.0, %v7137_v27  ;;  %v14402_v62 = vor.u32 1.1754944e-38, %v7210_v2  ;;  %vm14442_vm7 = vcmp.eq.f32.partialorder %v7208_v11, 8.507059e+37 }
 0xc18   : > { %v14345_v61 = vpop.eup %8075  ;;  %v14347_v49 = vadd.f32 1.0, %v7170_v55  ;;  %v7130_v56 = vmul.f32 0.5, %v7122_v47  ;;  %v7160_v8 = vand.u32 2147483647, %v7152_v39 }
 0xc19   : > { %v7185_v14 = vmul.f32 %v14345_v61, %v7176_v58  ;;  %v7171_v40 = vand.u32 2147483647, %v14354_v19  ;;  %vm7190_vm0 = vweird.f32 %v14345_v61  ;;  %v7123_v34 = vadd.f32 1.0, %v14354_v19  ;;  %v7047_v58 = vld [vmem:[#allocation5 + $0x168] sm:$0xff] }
 0xc1a   : > { %8077 = vrcp.f32 %v14347_v49  ;;  %v7138_v15 = vfloor.f32 %v7130_v56  ;;  %vm14389_vm1 = vmor %vm7189_vm6, %vm7190_vm0  ;;  %v7153_v41 = vsub.f32 %v14338_v26, %v7145_v21  ;;  %v7223_v9 = vand.u32 2147483647, %v14347_v49 }
 0xc1b   : > { %v7085_v31 = vpop.f32.mrf.mxu2  ;;  %8079 = vrcp.f32 %v14350_v46  ;;  %v7186_v29 = vsub.f32 1.0, %v7185_v14  ;;  %v14363_v38 = vadd.f32 1.0, %v7171_v40  ;;  %vm7219_vm10 = vweird.f32 %v14347_v49  ;;  %v7048_v14 = vld [vmem:[#allocation5 + $0x170] sm:$0xff] }
 0xc1c   : > { %v14357_v12 = vadd.f32 %v7085_v31, %v7046_v53  ;;  %v7225_v0 = vand.u32 2147483648, %v14347_v49  ;;  %v7146_v53 = vmul.f32 2.0, %v7138_v15  ;;  %v14407_v31 = vmul.f32 0.5, %v7123_v34 }
 0xc1d   : > { %v7187_v25 = vmul.f32 %v14345_v61, %v7186_v29  ;;  %8081 = vrcp.f32 %v14363_v38  ;;  %v14414_v6 = vand.u32 2147483647, %v7153_v41  ;;  %vm14416_vm5 = vcmp.eq.f32.partialorder %v7223_v9, 8.507059e+37 }
 0xc1e   : > { %v7172_v60 = vand.u32 2147483647, %v14357_v12  ;;  %v7124_v4 = vadd.f32 1.0, %v14357_v12  ;;  %v7114_v7 = vpop.f32.mrf.mxu3  ;;  %v7226_v54 = vor.u32 1.1754944e-38, %v7225_v0  ;;  %v7154_v21 = vsub.f32 %v14340_v10, %v7146_v53 }
 0xc1f   : > { %v7188_v22 = vadd.f32 %v14345_v61, %v7187_v25  ;;  %v14409_v36 = vadd.f32 %v7114_v7, %v7047_v58  ;;  %vm7234_vm9 = vweird.f32 %v14363_v38  ;;  %v7238_v37 = vand.u32 2147483647, %v14363_v38 }
 0xc20   : > { %v14360_v32 = vpop.eup %8077  ;;  %v14372_v59 = vadd.f32 1.0, %v7172_v60  ;;  %v7240_v11 = vand.u32 2147483648, %v14363_v38 }
 0xc21   : > { %v7215_v1 = vmul.f32 %v14360_v32, %v14347_v49  ;;  %v14369_v24 = vpop.eup %8079  ;;  %v7192_v13 = vsel %vm14389_vm1, %v14345_v61, %v7188_v22  ;;  %v7132_v61 = vmul.f32 0.5, %v7124_v4  ;;  %vm7220_vm13 = vweird.f32 %v14360_v32 }
 0xc22   : > { %v7200_v17 = vmul.f32 %v14369_v24, %v14350_v46  ;;  %8083 = vrcp.f32 %v14372_v59  ;;  %v7197_v29 = vsel %vm14379_vm2, %v7196_v43, %v7192_v13  ;;  %vm7205_vm12 = vweird.f32 %v14369_v24  ;;  %vm14433_vm4 = vmor %vm7219_vm10, %vm7220_vm13 }
 0xc23   : > { %v7216_v28 = vsub.f32 1.0, %v7215_v1  ;;  %v14387_v50 = vpop.eup %8081  ;;  %v7088_v16 = vpop.f32.mrf.mxu2  ;;  %v7173_v56 = vand.u32 2147483647, %v14409_v36  ;;  %v7198_v20 = vmul.f32 %v7197_v29, %v14335_v5  ;;  %v7139_v22 = vfloor.f32 %v14407_v31  ;;  %vm14461_vm0 = vmor %vm7204_vm3, %vm7205_vm12 }
 0xc24   : > { %v7201_v42 = vsub.f32 1.0, %v7200_v17  ;;  %v7230_v18 = vmul.f32 %v14387_v50, %v14363_v38  ;;  %v14420_v47 = vadd.f32 %v7088_v16, %v7048_v14  ;;  %v7140_v17 = vfloor.f32 %v7132_v61 }
 0xc25   : > { %v7217_v55 = vmul.f32 %v14360_v32, %v7216_v28  ;;  %v14438_v30 = vadd.f32 1.0, %v7173_v56  ;;  %v7125_v41 = vadd.f32 1.0, %v14409_v36  ;;  %v7255_v58 = vand.u32 2147483648, %v14372_v59 }
 0xc26   : > { %v7202_v60 = vmul.f32 %v14369_v24, %v7201_v42  ;;  %v7231_v1 = vsub.f32 1.0, %v7230_v18  ;;  %v7174_v2 = vand.u32 2147483647, %v14420_v47  ;;  %v7148_v9 = vmul.f32 2.0, %v7140_v17  ;;  %v7049_v18 = vld [vmem:[#allocation5 + $0x178] sm:$0xff]  ;;  %v7117_v0 = vpop.f32.mrf.mxu3 }
 0xc27   : > { %v7218_v25 = vadd.f32 %v14360_v32, %v7217_v55  ;;  %8085 = vrcp.f32 %v14438_v30  ;;  %v7126_v7 = vadd.f32 1.0, %v14420_v47  ;;  %vm7249_vm6 = vweird.f32 %v14372_v59 }
 0xc28   : > { %v8084_v27 = vpop.eup %8083  ;;  %v7203_v15 = vadd.f32 %v14369_v24, %v7202_v60  ;;  %v7232_v4 = vmul.f32 %v14387_v50, %v7231_v1  ;;  %v7253_v42 = vand.u32 2147483647, %v14372_v59  ;;  %v14467_v55 = vadd.f32 1.0, %v7174_v2 }
 0xc29   : > { %v7245_v51 = vmul.f32 %v8084_v27, %v14372_v59  ;;  %v7222_v49 = vsel %vm14433_vm4, %v14360_v32, %v7218_v25  ;;  %vm7250_vm8 = vweird.f32 %v8084_v27  ;;  %v7312_v14 = vsel %vm7304_vm15, %v7160_v8, %v7198_v20 }
 0xc2a   : > { %v7227_v16 = vsel %vm14416_vm5, %v7226_v54, %v7222_v49  ;;  %v7233_v46 = vadd.f32 %v14387_v50, %v7232_v4  ;;  %vm7235_vm2 = vweird.f32 %v14387_v50  ;;  %vm14476_vm1 = vmor %vm7249_vm6, %vm7250_vm8  ;;  %v7207_v59 = vsel %vm14461_vm0, %v14369_v24, %v7203_v15  ;;  %v15487_v24 = vld [vmem:[#allocation62_spill] sm:$0xff] }
 0xc2b   : > { %v7246_v39 = vsub.f32 1.0, %v7245_v51  ;;  %v7133_v8 = vmul.f32 0.5, %v7125_v41  ;;  %8087 = vrcp.f32 %v14467_v55  ;;  %v7156_v31 = vsub.f32 %v14357_v12, %v7148_v9  ;;  %vm14494_vm10 = vmor %vm7234_vm9, %vm7235_vm2 }
 0xc2c   : > { %v7256_v61 = vor.u32 1.1754944e-38, %v7255_v58  ;;  %v7134_v29 = vmul.f32 0.5, %v7126_v7  ;;  %v14487_v40 = vadd.f32 %v7117_v0, %v7049_v18  ;;  %v7162_v25 = vand.u32 2147483647, %v7154_v21 }
 0xc2d   : > { %v7247_v43 = vmul.f32 %v8084_v27, %v7246_v39  ;;  %v8086_v60 = vpop.eup %8085  ;;  %v7228_v1 = vmul.f32 %v7227_v16, %v14340_v10  ;;  %v14490_v54 = vmul.f32 2.0, %v7139_v22  ;;  %vm7254_vm3 = vcmp.eq.f32.partialorder %v7253_v42, 8.507059e+37 }
 0xc2e   : > { %v7237_v51 = vsel %vm14494_vm10, %v14387_v50, %v7233_v46  ;;  %v7260_v20 = vmul.f32 %v8086_v60, %v14438_v30  ;;  %v7212_v21 = vsel %vm14442_vm7, %v14402_v62, %v7207_v59  ;;  %vm7239_vm15 = vcmp.eq.f32.partialorder %v7238_v37, 8.507059e+37 }
 0xc2f   : > { %v7248_v13 = vadd.f32 %v8084_v27, %v7247_v43  ;;  %v7241_v38 = vor.u32 1.1754944e-38, %v7240_v11  ;;  %v7141_v22 = vfloor.f32 %v7133_v8  ;;  %v7164_v17 = vand.u32 2147483647, %v7156_v31 }
 0xc30   : > { %v7261_v28 = vsub.f32 1.0, %v7260_v20  ;;  %v7142_v39 = vfloor.f32 %v7134_v29  ;;  %v7175_v2 = vand.u32 2147483647, %v14487_v40  ;;  %v7314_v15 = vsel %vm7306_vm11, %v7162_v25, %v7228_v1  ;;  %v15486_v1 = vld [vmem:[#allocation61_spill] sm:$0xff] }
 0xc31   : > { %v7252_v5 = vsel %vm14476_vm1, %v8084_v27, %v7248_v13  ;;  %v7320_v27 = vadd.f32 %v7312_v14, %v14102_v33  ;;  %v8088_v33 = vpop.eup %8087  ;;  %v7242_v50 = vsel %vm7239_vm15, %v7241_v38, %v7237_v51  ;;  %vm7308_vm5 = vcmp.ge.f32.partialorder %v14357_v12, 0.0 }
 0xc32   : > { %v7257_v56 = vsel %vm7254_vm3, %v7256_v61, %v7252_v5  ;;  %v7262_v4 = vmul.f32 %v8086_v60, %v7261_v28  ;;  %vm7265_vm13 = vweird.f32 %v8086_v60  ;;  %v7275_v62 = vmul.f32 %v8088_v33, %v14467_v55  ;;  %v15488_v28 = vld [vmem:[#allocation58_spill] sm:$0xff] }
 0xc33   : > { %v7258_v49 = vmul.f32 %v7257_v56, %v14357_v12  ;;  %v7127_v34 = vadd.f32 1.0, %v14487_v40  ;;  %v7149_v37 = vmul.f32 2.0, %v7141_v22  ;;  %vm7264_vm12 = vweird.f32 %v14438_v30 }
 0xc34   : > { %v7270_v43 = vand.u32 2147483648, %v14438_v30  ;;  %v14515_v41 = vadd.f32 1.0, %v7175_v2  ;;  %vm7305_vm4 = vcmp.ge.f32.partialorder %v14338_v26, 0.0  ;;  %vm7307_vm9 = vcmp.ge.f32.partialorder %v14354_v19, 0.0  ;;  %vm14520_vm7 = vmor %vm7264_vm12, %vm7265_vm13 }
 0xc35   : > { %v7263_v10 = vadd.f32 %v8086_v60, %v7262_v4  ;;  %v7268_v12 = vand.u32 2147483647, %v14438_v30  ;;  %v7150_v11 = vmul.f32 2.0, %v7142_v39  ;;  %v7276_v9 = vsub.f32 1.0, %v7275_v62 }
 0xc36   : > { %v7316_v58 = vsel %vm7308_vm5, %v7164_v17, %v7258_v49  ;;  %v7283_v32 = vand.u32 2147483647, %v14467_v55  ;;  %v7285_v13 = vand.u32 2147483648, %v14467_v55  ;;  %8089 = vrcp.f32 %v14515_v41 }
 0xc37   : > { %v7267_v42 = vsel %vm14520_vm7, %v8086_v60, %v7263_v10  ;;  %v7277_v18 = vmul.f32 %v8088_v33, %v7276_v9  ;;  %vm7280_vm8 = vweird.f32 %v8088_v33  ;;  %v7135_v0 = vmul.f32 0.5, %v7127_v34 }
 0xc38   : > { %v7213_v30 = vmul.f32 %v7212_v21, %v14338_v26  ;;  %v7322_v14 = vadd.f32 %v7314_v15, %v14059_v23  ;;  %v7155_v16 = vsub.f32 %v14354_v19, %v14490_v54  ;;  %v7271_v46 = vor.u32 1.1754944e-38, %v7270_v43 }
 0xc39   : > { %vm7269_vm11 = vcmp.eq.f32.partialorder %v7268_v12, 8.507059e+37  ;;  %v7158_v53 = vsub.f32 %v14420_v47, %v7150_v11  ;;  %v7278_v59 = vadd.f32 %v8088_v33, %v7277_v18  ;;  %vm7279_vm0 = vweird.f32 %v14467_v55 }
 0xc3a   : > { %v7243_v5 = vmul.f32 %v7242_v50, %v14354_v19  ;;  %v7324_v8 = vadd.f32 %v7316_v58, %v14008_v44  ;;  %v7272_v31 = vsel %vm7269_vm11, %v7271_v46, %v7267_v42  ;;  %vm7281_vm6 = vmor %vm7279_vm0, %vm7280_vm8  ;;  %v7286_v61 = vor.u32 1.1754944e-38, %v7285_v13 }
 0xc3b   : > { %v7157_v29 = vsub.f32 %v14409_v36, %v7149_v37  ;;  %v7282_v23 = vsel %vm7281_vm6, %v8088_v33, %v7278_v59  ;;  %vm7284_vm2 = vcmp.eq.f32.partialorder %v7283_v32, 8.507059e+37  ;;  %v7143_v60 = vfloor.f32 %v7135_v0 }
 0xc3c   : > { %v8090_v25 = vpop.eup %8089  ;;  %v7328_v54 = vmul.f32 %v7320_v27, %v15486_v1  ;;  %v7330_v51 = vmul.f32 %v7322_v14, %v15487_v24  ;;  %v7163_v56 = vand.u32 2147483647, %v7155_v16  ;;  %v7287_v20 = vsel %vm7284_vm2, %v7286_v61, %v7282_v23 }
 0xc3d   : > { %v7273_v55 = vmul.f32 %v7272_v31, %v14409_v36  ;;  %v7166_v21 = vand.u32 2147483647, %v7158_v53  ;;  %v7288_v44 = vmul.f32 %v7287_v20, %v14420_v47  ;;  %v7290_v38 = vmul.f32 %v8090_v25, %v14515_v41 }
 0xc3e   : > { %v7313_v22 = vsel %vm7305_vm4, %v14414_v6, %v7213_v30  ;;  %v7315_v17 = vsel %vm7307_vm9, %v7163_v56, %v7243_v5  ;;  %v7332_v27 = vmul.f32 %v7324_v8, %v15488_v28  ;;  %vm7310_vm1 = vcmp.ge.f32.partialorder %v14420_v47, 0.0 }
 0xc3f   : > { %v7165_v39 = vand.u32 2147483647, %v7157_v29  ;;  %v7318_v2 = vsel %vm7310_vm1, %v7166_v21, %v7288_v44  ;;  %v7151_v33 = vmul.f32 2.0, %v7143_v60  ;;  %v7291_v15 = vsub.f32 1.0, %v7290_v38 }
 0xc40   : > { %v7336_v50 = vadd.f32 %v7330_v51, %v7328_v54  ;;  %vm7309_vm10 = vcmp.ge.f32.partialorder %v14409_v36, 0.0  ;;  %v7326_v49 = vadd.f32 %v7318_v2, %v14015_v57  ;;  %v7300_v4 = vand.u32 2147483648, %v14515_v41 }
 0xc41   : > { %v7317_v26 = vsel %vm7309_vm10, %v7165_v39, %v7273_v55  ;;  %v7292_v6 = vmul.f32 %v8090_v25, %v7291_v15  ;;  %vm7295_vm3 = vweird.f32 %v8090_v25  ;;  %v7298_v19 = vand.u32 2147483647, %v14515_v41 }
 0xc42   : > { %v7323_v62 = vadd.f32 %v7315_v17, %v14091_v52  ;;  %v7337_v34 = vadd.f32 %v7336_v50, %v7332_v27  ;;  %v7334_v47 = vmul.f32 %v7326_v49, %v15422_v63  ;;  %v7159_v37 = vsub.f32 %v14487_v40, %v7151_v33 }
 0xc43   : > { %v7293_v43 = vadd.f32 %v8090_v25, %v7292_v6  ;;  %vm7294_vm15 = vweird.f32 %v14515_v41  ;;  %v7321_v36 = vadd.f32 %v7313_v22, %v14108_v45  ;;  %v7325_v57 = vadd.f32 %v7317_v26, %v14045_v35 }
 0xc44   : > { %v7338_v10 = vadd.f32 %v7337_v34, %v7334_v47  ;;  %vm7296_vm5 = vmor %vm7294_vm15, %vm7295_vm3  ;;  %v7301_v12 = vor.u32 1.1754944e-38, %v7300_v4  ;;  %vm7299_vm13 = vcmp.eq.f32.partialorder %v7298_v19, 8.507059e+37  ;;  %v7331_v9 = vmul.f32 %v7323_v62, %v15487_v24 }
 0xc45   : > { %v7297_v11 = vsel %vm7296_vm5, %v8090_v25, %v7293_v43  ;;  %v7167_v58 = vand.u32 2147483647, %v7159_v37  ;;  %v7329_v32 = vmul.f32 %v7321_v36, %v15486_v1  ;;  %v7333_v13 = vmul.f32 %v7325_v57, %v15488_v28 }
 0xc46   : > { %v7302_v52 = vsel %vm7299_vm13, %v7301_v12, %v7297_v11  ;;  %v7339_v41 = vrot.slane %v7338_v10, 4  ;;  %vm7311_vm12 = vcmp.ge.f32.partialorder %v14487_v40, 0.0  ;;  %vm15489_vm4 = vcmask 1040384  }
 0xc47   : > { %v7303_v7 = vmul.f32 %v7302_v52, %v14487_v40  ;;  %v7345_v45 = vadd.f32 %v7331_v9, %v7329_v32 }
 0xc48   : > { %v7340_v0 = vadd.f32 %v7339_v41, %v7338_v10 }
 0xc49   : > { %v7319_v35 = vsel %vm7311_vm12, %v7167_v58, %v7303_v7  ;;  %v7346_v18 = vadd.f32 %v7345_v45, %v7333_v13 }
 0xc4a   : > { %v7327_v42 = vadd.f32 %v7319_v35, %v14041_v3  ;;  %v7341_v16 = vrot.slane %v7340_v0, 2 }
 0xc4c   : > { %v7335_v30 = vmul.f32 %v7327_v42, %v15422_v63  ;;  %v7342_v59 = vadd.f32 %v7341_v16, %v7340_v0 }
 0xc4e   : > { %v7347_v14 = vadd.f32 %v7346_v18, %v7335_v30  ;;  %v7343_v3 = vrot.slane %v7342_v59, 1 }
 0xc50   : > { %v7348_v46 = vrot.slane %v7347_v14, 4  ;;  %v7344_v63 = vadd.f32 %v7343_v3, %v7342_v59 }
 0xc52   : > { %v7349_v53 = vadd.f32 %v7348_v46, %v7347_v14 }
 0xc54   : > { %v7350_v5 = vrot.slane %v7349_v53, 2 }
 0xc56   : > { %v7351_v8 = vadd.f32 %v7350_v5, %v7349_v53 }
 0xc58   : > { %v7352_v40 = vrot.slane %v7351_v8, 1 }
 0xc5a   : > { %v7353_v31 = vadd.f32 %v7352_v40, %v7351_v8 }
 0xc5c   : > { %v7356_v61 = vrot.slane %v7353_v31, 7 }
 0xc5e   : > { %v7357_v29 = vsel %vm15489_vm4, %v7344_v63, %v7356_v61 }
 0xc5f   : > { %7359 = vst.msk [vmem:[%s11371_s11 + $0x6] sm:$0x3] %vm11364_vm14, %v7357_v29 }
 0xc60   : > { %8178 = shalt.err (!%p8175_p8)
}
 0xc61   : > { %7640 = dma.vmem_to_hbm [thread:$0]  (%p8299_p5), %s7374_s15, 128, %s7376_s17, %s7361_s23  }
 0xc62 PF: > { %p7657_p9 = scmp.ge.s32.totalorder %s8221_s21, 2  ;;  %s7387_s8 = sand.u32 1, %s8209_s18  }
 0xc63   : > { %s7388_s9 = scalar_lea.sflag [#allocation4], %s7387_s8 }
 0xc64   : > { %p7650_p10 = pnand %p7657_p9, %p8303_p6 }
 0xc66   : > { %p7651_p11 = pneg %p7650_p10 }
 0xc68   : > { %8204 = dma.done.wait (%p7651_p11), %s7388_s9, 128  }
 0xc69   : > { %8206 = vsyncadd (%p7651_p11), %s7388_s9, 4294967168  ;;  %p17_p12 = scmp.ge.s32.totalorder %s8286_s24, 4   ;;  %s15490_s18 = smov %s8213_s19 }
 0xc6a   : > { %s15491_s19 = smov %s8217_s20  ;;  %s15492_s20 = smov %s8297_s27 }
 0xc6b   : > { %s15493_s21 = smov %s8286_s24  ;;  %19 = sbr.rel (!%p17_p12) target bundleno = 5 (0x5), region = 93 }
 0xc70   :  { %7394 = vsyncpa [#allocation3], 1 }
 0xc71   :  { %7396 = vsyncpa [#allocation3 + $0x1], 1 }
 0xc72   :  { %7397 = vsyncpa [#allocation6], 1 }
 0xc73   :  { %7398 = vsyncpa [#allocation4], 1 }
 0xc74   :  { %7400 = vsyncpa [#allocation4 + $0x1], 1 }

</bundles_post_ra>
